<compile_context>
chip_gen: v7x
topology: tpu7x:2x2x1
jax: 0.10.0
libtpu: 0.0.40
codegen_flags: <defaults>
</compile_context>

<pallas_src>
import math

import jax
import jax.numpy as jnp
from jax.experimental import pallas as pl
from jax.experimental.pallas import tpu as pltpu

# ----- hyper-parameters fixed by the PyTorch module definition -----
MODEL_SCALE = 1.0
EXPAND_FACTOR = 2
QK_DIM_DIV = 8
NUM_BLOCKS = round(8 * math.log2(1.0 + MODEL_SCALE))                  # 8
RESIDUAL_DEPTH = round(384 * math.log2(1.0 + MODEL_SCALE) / 64) * 64  # 384
N_TOKS = 100
QK_DIM = RESIDUAL_DEPTH // QK_DIM_DIV                                 # 48
V_DIM = RESIDUAL_DEPTH                                                # 384
EXPAND_DIM = RESIDUAL_DEPTH * EXPAND_FACTOR                           # 768
LOCAL_DIM = EXPAND_DIM - V_DIM                                        # 384
LN_EPS = 1e-5
NEG_INF = -1e30

# ----- lane-aligned packed widths (weights repacked once in pack_params) -----
QK_PAD = 128                                                          # 48 -> 128 zero-pad
EXP_PACK = 2 * EXPAND_DIM + 2 * QK_PAD                                # 1792 = [lin|pre|q|k]
WQ_PACK = 2 * LOCAL_DIM + QK_PAD                                      # 896  = [lin_loc|pre_loc|q]
WKV_PACK = 2 * V_DIM + QK_PAD                                         # 896  = [lin_val|pre_val|k]
N_PAD = 128                                                           # vocab 100 -> 128 lanes


# ----------------------------- in-kernel math ------------------------------
def _erf(x):
    # Abramowitz & Stegun 7.1.26 polynomial (|err| < 1.5e-7) — matches torch's exact
    # erf-GELU within f32 noise, uses only VPU/EUP-friendly ops (exp, mul, add, where).
    a1, a2, a3, a4, a5 = 0.254829592, -0.284496736, 1.421413741, -1.453152027, 1.061405429
    p = 0.3275911
    sgn = jnp.where(x >= 0.0, 1.0, -1.0)
    ax = jnp.abs(x)
    t = 1.0 / (1.0 + p * ax)
    poly = ((((a5 * t + a4) * t + a3) * t + a2) * t + a1) * t
    return sgn * (1.0 - poly * jnp.exp(-ax * ax))


def _gelu(x):
    return 0.5 * x * (1.0 + _erf(x * (1.0 / math.sqrt(2.0))))


def _layernorm(x, w, b):
    mu = jnp.mean(x, axis=-1, keepdims=True)
    xc = x - mu
    var = jnp.mean(xc * xc, axis=-1, keepdims=True)
    return xc * jax.lax.rsqrt(var + LN_EPS) * w + b


def _softmax(x):
    m = jnp.max(x, axis=-1, keepdims=True)
    e = jnp.exp(x - m)
    return e / jnp.sum(e, axis=-1, keepdims=True)


def _dot(x, w):
    # weights are pre-transposed to (in_dim, out_dim) at pack time -> plain NN matmul
    return jnp.dot(x, w, preferred_element_type=jnp.float32)


# --------------------------- fused forward kernel --------------------------
def _fused_forward_kernel(q_emb_ref, kv_ref, nw_ref, nb_ref, outw_ref,
                          llnw_ref, llnb_ref, lexp_ref, lprj_ref, lbias_ref,
                          clnw_ref, clnb_ref, cwq_ref, cwkv_ref, cprj_ref,
                          logits_ref, res_ref):
    layer = pl.program_id(0)
    B, S, D = q_emb_ref.shape
    T = kv_ref.shape[1]
    scale = 1.0 / math.sqrt(QK_DIM)        # SDPA scale uses the true qk_dim (=48), not the pad

    # ---- layer 0: token embeddings -> LayerNorm -> residual scratch ----
    @pl.when(layer == 0)
    def _():
        x0 = q_emb_ref[...].reshape(B * S, D)
        res_ref[...] = _layernorm(x0, nw_ref[...], nb_ref[...])

    resid = res_ref[...]                                                 # (B*S, D)

    # ---------------- LatentAttentionBlock (causal self-attention) ------------
    xn = _layernorm(resid, llnw_ref[0], llnb_ref[0])
    xe = _dot(xn, lexp_ref[0])                                           # (B*S, EXP_PACK)
    geglu = xe[:, :EXPAND_DIM] * _gelu(xe[:, EXPAND_DIM:2 * EXPAND_DIM])  # (B*S, 768)
    q = xe[:, 2 * EXPAND_DIM:2 * EXPAND_DIM + QK_PAD].reshape(B, S, QK_PAD)
    k = xe[:, 2 * EXPAND_DIM + QK_PAD:].reshape(B, S, QK_PAD)
    gv = geglu[:, LOCAL_DIM:].reshape(B, S, V_DIM)

    scores = jnp.einsum("bqd,bkd->bqk", q, k,
                        preferred_element_type=jnp.float32) * scale      # (B, S, S)
    # causal position-bias mask built in-kernel.
    # TODO(synk): `position_bias_base` / `negative_infinity_matrix_base` are undefined in
    # the reference source; using the hlb-gpt convention: softplus(mult)*(j-i) on allowed
    # (j <= i) positions, -inf on future positions.
    ii = jax.lax.broadcasted_iota(jnp.int32, (S, S), 0)
    jj = jax.lax.broadcasted_iota(jnp.int32, (S, S), 1)
    sp = jnp.log(1.0 + jnp.exp(lbias_ref[0]))                            # softplus, (1,1)
    bias = jnp.where(jj <= ii, sp * (jj - ii).astype(jnp.float32), NEG_INF)
    probs = _softmax(scores + bias[None, :, :])
    attn = jnp.einsum("bqk,bkd->bqd", probs, gv,
                      preferred_element_type=jnp.float32).reshape(B * S, V_DIM)
    cat = jnp.concatenate([geglu[:, :LOCAL_DIM], attn], axis=-1)          # (B*S, 768)
    resid = resid + _dot(cat, lprj_ref[0])                                # (B*S, D)

    # ---------------- LatentCrossAttentionBlock --------------------------------
    qn = _layernorm(resid, clnw_ref[0], clnb_ref[0])
    qx = _dot(qn, cwq_ref[0])                                             # (B*S, WQ_PACK)
    gl = qx[:, :LOCAL_DIM] * _gelu(qx[:, LOCAL_DIM:2 * LOCAL_DIM])
    q2 = qx[:, 2 * LOCAL_DIM:].reshape(B, S, QK_PAD)

    kvf = kv_ref[...].reshape(B * T, D)    # kv stream is NOT layer-normed, per reference
    kx = _dot(kvf, cwkv_ref[0])                                           # (B*T, WKV_PACK)
    gv2 = (kx[:, :V_DIM] * _gelu(kx[:, V_DIM:2 * V_DIM])).reshape(B, T, V_DIM)
    k2 = kx[:, 2 * V_DIM:].reshape(B, T, QK_PAD)

    s2 = jnp.einsum("bqd,bkd->bqk", q2, k2,
                    preferred_element_type=jnp.float32) * scale           # (B, S, T)
    p2 = _softmax(s2)
    a2 = jnp.einsum("bqk,bkd->bqd", p2, gv2,
                    preferred_element_type=jnp.float32).reshape(B * S, V_DIM)
    cat2 = jnp.concatenate([gl, a2], axis=-1)
    resid = resid + _dot(cat2, cprj_ref[0])

    res_ref[...] = resid

    # ---------------- final LayerNorm + vocab projection (last layer only) -----
    @pl.when(layer == pl.num_programs(0) - 1)
    def _():
        xf = _layernorm(resid, nw_ref[...], nb_ref[...])
        logits_ref[...] = _dot(xf, outw_ref[...]).reshape(B, S, N_PAD).astype(logits_ref.dtype)


# -------------------------- parameters & packing ---------------------------
def init_params(key):
    # Mirrors the PyTorch module's parameter shapes / init scales.
    kit = iter(jax.random.split(key, 64))
    nk = lambda: next(kit)
    D = RESIDUAL_DEPTH
    scale_e = 0.5 / math.sqrt(D) / EXPAND_FACTOR
    scale_p = 1.0 / math.sqrt(D) / EXPAND_FACTOR / NUM_BLOCKS
    bound = 1.0 / math.sqrt(D)
    params = {
        "emb": jax.random.normal(nk(), (N_TOKS, D), jnp.float32),
        "pt_emb": jax.random.normal(nk(), (N_TOKS, D // 2), jnp.float32),
        "norm_w": jnp.ones((D,), jnp.float32),
        "norm_b": jnp.zeros((D,), jnp.float32),
        "out_w": jax.random.uniform(nk(), (N_TOKS, D), jnp.float32, -bound, bound),
        "blocks": [],
        "blocks2": [],
    }
    for _ in range(NUM_BLOCKS):
        params["blocks"].append(dict(
            ln_w=jnp.ones((D,), jnp.float32), ln_b=jnp.zeros((D,), jnp.float32),
            expand=scale_e * jax.random.normal(nk(), (2 * QK_DIM + 2 * EXPAND_DIM, D), jnp.float32),
            project=scale_p * jax.random.normal(nk(), (D, EXPAND_DIM), jnp.float32),
            bias_mult=jnp.float32(1.0)))
        params["blocks2"].append(dict(
            ln_w=jnp.ones((D,), jnp.float32), ln_b=jnp.zeros((D,), jnp.float32),
            Wq=scale_e * jax.random.normal(nk(), (QK_DIM + 2 * LOCAL_DIM, D), jnp.float32),
            Wkv=scale_e * jax.random.normal(nk(), (QK_DIM + 2 * V_DIM, D), jnp.float32),
            project=scale_p * jax.random.normal(nk(), (D, EXPAND_DIM), jnp.float32)))
    return params


def pack_params(params):
    """One-time re-layout of PyTorch-style params into the kernel's matmul-native,
    lane-aligned, layer-stacked layout.  Called once, outside the forward pass."""
    D = RESIDUAL_DEPTH

    def pad_rows(w, n):
        return jnp.concatenate([w, jnp.zeros((n - w.shape[0], w.shape[1]), w.dtype)], axis=0)

    lat_lnw, lat_lnb, lat_exp, lat_prj, lat_bias = [], [], [], [], []
    for blk in params["blocks"]:
        e = blk["expand"]                                   # (2*QK + 2*E, D) rows: [q, k, lin, pre]
        q_w = e[0:QK_DIM]
        k_w = e[QK_DIM:2 * QK_DIM]
        lin_w = e[2 * QK_DIM:2 * QK_DIM + EXPAND_DIM]
        pre_w = e[2 * QK_DIM + EXPAND_DIM:]
        packed = jnp.concatenate(
            [lin_w, pre_w, pad_rows(q_w, QK_PAD), pad_rows(k_w, QK_PAD)], axis=0)
        lat_exp.append(packed.T)                            # (D, EXP_PACK)
        lat_prj.append(blk["project"].T)                    # (EXPAND_DIM, D)
        lat_lnw.append(blk["ln_w"].reshape(1, D))
        lat_lnb.append(blk["ln_b"].reshape(1, D))
        lat_bias.append(jnp.reshape(blk["bias_mult"], (1, 1)))

    crs_lnw, crs_lnb, crs_wq, crs_wkv, crs_prj = [], [], [], [], []
    for blk in params["blocks2"]:
        wq = blk["Wq"]                                      # rows: [q, lin_local, pre_local]
        q_w = wq[0:QK_DIM]
        ll_w = wq[QK_DIM:QK_DIM + LOCAL_DIM]
        plc_w = wq[QK_DIM + LOCAL_DIM:]
        crs_wq.append(jnp.concatenate([ll_w, plc_w, pad_rows(q_w, QK_PAD)], axis=0).T)
        wkv = blk["Wkv"]                                    # rows: [k, lin_value, pre_value]
        k_w = wkv[0:QK_DIM]
        lv_w = wkv[QK_DIM:QK_DIM + V_DIM]
        pv_w = wkv[QK_DIM + V_DIM:]
        crs_wkv.append(jnp.concatenate([lv_w, pv_w, pad_rows(k_w, QK_PAD)], axis=0).T)
        crs_prj.append(blk["project"].T)
        crs_lnw.append(blk["ln_w"].reshape(1, D))
        crs_lnb.append(blk["ln_b"].reshape(1, D))

    out_w_pad = pad_rows(params["out_w"], N_PAD)            # (N_PAD, D)

    return {
        "emb": params["emb"],
        "pt_emb": params["pt_emb"],
        "norm_w": params["norm_w"].reshape(1, D),
        "norm_b": params["norm_b"].reshape(1, D),
        "out_w_t": out_w_pad.T,                             # (D, N_PAD)
        "lat_ln_w": jnp.stack(lat_lnw),                     # (L, 1, D)
        "lat_ln_b": jnp.stack(lat_lnb),
        "lat_expand_t": jnp.stack(lat_exp),                 # (L, D, EXP_PACK)
        "lat_project_t": jnp.stack(lat_prj),                # (L, EXPAND_DIM, D)
        "lat_bias": jnp.stack(lat_bias),                    # (L, 1, 1)
        "crs_ln_w": jnp.stack(crs_lnw),
        "crs_ln_b": jnp.stack(crs_lnb),
        "crs_wq_t": jnp.stack(crs_wq),                      # (L, D, WQ_PACK)
        "crs_wkv_t": jnp.stack(crs_wkv),                    # (L, D, WKV_PACK)
        "crs_project_t": jnp.stack(crs_prj),                # (L, EXPAND_DIM, D)
    }


# ------------------------------- forward pass ------------------------------
@jax.jit
def model_forward(packed, q_tok, pts):
    D = RESIDUAL_DEPTH
    q_emb = packed["emb"][q_tok]                                        # (B, S, D)   gather (glue)
    kv = packed["pt_emb"][pts].reshape(pts.shape[0], -1, D)             # (B, T, D)
    B, S, _ = q_emb.shape
    T = kv.shape[1]

    logits_pad = pl.pallas_call(
        _fused_forward_kernel,
        out_shape=jax.ShapeDtypeStruct((B, S, N_PAD), jnp.float32),
        grid=(NUM_BLOCKS,),
        in_specs=[
            pl.BlockSpec((B, S, D), lambda i: (0, 0, 0)),               # q_emb (const, DMA'd once)
            pl.BlockSpec((B, T, D), lambda i: (0, 0, 0)),               # kv    (const, DMA'd once)
            pl.BlockSpec((1, D), lambda i: (0, 0)),                     # norm_w
            pl.BlockSpec((1, D), lambda i: (0, 0)),                     # norm_b
            pl.BlockSpec((D, N_PAD), lambda i: (0, 0)),                 # out_w_t
            pl.BlockSpec((1, 1, D), lambda i: (i, 0, 0)),               # lat ln_w   (per layer, streamed)
            pl.BlockSpec((1, 1, D), lambda i: (i, 0, 0)),               # lat ln_b
            pl.BlockSpec((1, D, EXP_PACK), lambda i: (i, 0, 0)),        # lat expand_t
            pl.BlockSpec((1, EXPAND_DIM, D), lambda i: (i, 0, 0)),      # lat project_t
            pl.BlockSpec((1, 1, 1), lambda i: (i, 0, 0)),               # lat bias_mult
            pl.BlockSpec((1, 1, D), lambda i: (i, 0, 0)),               # crs ln_w
            pl.BlockSpec((1, 1, D), lambda i: (i, 0, 0)),               # crs ln_b
            pl.BlockSpec((1, D, WQ_PACK), lambda i: (i, 0, 0)),         # crs Wq_t
            pl.BlockSpec((1, D, WKV_PACK), lambda i: (i, 0, 0)),        # crs Wkv_t
            pl.BlockSpec((1, EXPAND_DIM, D), lambda i: (i, 0, 0)),      # crs project_t
        ],
        out_specs=pl.BlockSpec((B, S, N_PAD), lambda i: (0, 0, 0)),
        scratch_shapes=[pltpu.VMEM((B * S, D), jnp.float32)],           # residual, persists across layers
        compiler_params=pltpu.CompilerParams(
            dimension_semantics=("arbitrary",),                          # layers are sequential
            vmem_limit_bytes=40 * 1024 * 1024,                           # > v5e 16 MiB default, < v7x 64 MiB
        ),
    )(q_emb, kv, packed["norm_w"], packed["norm_b"], packed["out_w_t"],
      packed["lat_ln_w"], packed["lat_ln_b"], packed["lat_expand_t"],
      packed["lat_project_t"], packed["lat_bias"],
      packed["crs_ln_w"], packed["crs_ln_b"], packed["crs_wq_t"],
      packed["crs_wkv_t"], packed["crs_project_t"])

    return logits_pad[:, :, :N_TOKS]                                    # drop vocab lane padding


# --------------------------- pure-JAX reference ----------------------------
@jax.jit
def _ref_forward(params, q_tok, pts):
    """Straight transcription of the PyTorch forward (HIGHEST-precision matmuls)."""
    D = RESIDUAL_DEPTH
    P = jax.lax.Precision.HIGHEST
    scale = 1.0 / math.sqrt(QK_DIM)

    def ln(x, w, b):
        mu = jnp.mean(x, -1, keepdims=True)
        var = jnp.mean((x - mu) ** 2, -1, keepdims=True)
        return (x - mu) * jax.lax.rsqrt(var + LN_EPS) * w + b

    x = params["emb"][q_tok]
    kv = params["pt_emb"][pts].reshape(pts.shape[0], -1, D)
    x = ln(x, params["norm_w"], params["norm_b"])
    S = x.shape[1]
    ii = jnp.arange(S)[:, None]
    jj = jnp.arange(S)[None, :]

    for blk, blk2 in zip(params["blocks"], params["blocks2"]):
        # --- LatentAttentionBlock ---
        resid = x
        xn = ln(x, blk["ln_w"], blk["ln_b"])
        pr = jnp.einsum("bsd,ed->bse", xn, blk["expand"], precision=P)
        q = pr[..., :QK_DIM]
        k = pr[..., QK_DIM:2 * QK_DIM]
        lin = pr[..., 2 * QK_DIM:2 * QK_DIM + EXPAND_DIM]
        pre = pr[..., 2 * QK_DIM + EXPAND_DIM:]
        geglu = lin * jax.nn.gelu(pre, approximate=False)
        g_loc, g_val = geglu[..., :LOCAL_DIM], geglu[..., LOCAL_DIM:]
        sp = jax.nn.softplus(blk["bias_mult"])
        bias = jnp.where(jj <= ii, sp * (jj - ii).astype(jnp.float32), NEG_INF)
        s = jnp.einsum("bqd,bkd->bqk", q, k, precision=P) * scale + bias
        p = jax.nn.softmax(s, axis=-1)
        attn = jnp.einsum("bqk,bkd->bqd", p, g_val, precision=P)
        out = jnp.einsum("bse,de->bsd", jnp.concatenate([g_loc, attn], -1),
                         blk["project"], precision=P)
        x = resid + out
        # --- LatentCrossAttentionBlock ---
        resid = x
        qn = ln(x, blk2["ln_w"], blk2["ln_b"])
        qp = jnp.einsum("bsd,ed->bse", qn, blk2["Wq"], precision=P)
        q2 = qp[..., :QK_DIM]
        gl = qp[..., QK_DIM:QK_DIM + LOCAL_DIM] * jax.nn.gelu(
            qp[..., QK_DIM + LOCAL_DIM:], approximate=False)
        kp = jnp.einsum("btd,ed->bte", kv, blk2["Wkv"], precision=P)
        k2 = kp[..., :QK_DIM]
        gv = kp[..., QK_DIM:QK_DIM + V_DIM] * jax.nn.gelu(
            kp[..., QK_DIM + V_DIM:], approximate=False)
        s2 = jnp.einsum("bqd,bkd->bqk", q2, k2, precision=P) * scale
        p2 = jax.nn.softmax(s2, axis=-1)
        a2 = jnp.einsum("bqk,bkd->bqd", p2, gv, precision=P)
        out2 = jnp.einsum("bse,de->bsd", jnp.concatenate([gl, a2], -1),
                          blk2["project"], precision=P)
        x = resid + out2

    x = ln(x, params["norm_w"], params["norm_b"])
    return jnp.einsum("bsd,nd->bsn", x, params["out_w"], precision=P)


if __name__ == "__main__":
    key = jax.random.PRNGKey(0)
    kp, kq, kpts = jax.random.split(key, 3)
    params = init_params(kp)
    packed = pack_params(params)          # one-time weight re-layout (outside the forward pass)

    B, S, P = 2, 8, 8                     # P must be even (pt_emb pairs -> D)
    q_tok = jax.random.randint(kq, (B, S), 0, N_TOKS, dtype=jnp.int32)
    pts = jax.random.randint(kpts, (B, P), 0, N_TOKS, dtype=jnp.int32)

    logits = model_forward(packed, q_tok, pts)
    logits = jax.block_until_ready(logits)
    assert logits.shape == (B, S, N_TOKS), logits.shape
    assert bool(jnp.all(jnp.isfinite(logits))), "non-finite output"

    # correctness check vs. pure-JAX reference forward
    ref = jax.block_until_ready(_ref_forward(params, q_tok, pts))
    max_err = float(jnp.max(jnp.abs(logits - ref)))
    assert bool(jnp.allclose(logits, ref, rtol=2e-3, atol=2e-3)), f"max abs err {max_err}"

    print("KERNEL_OK")
</pallas_src>

<mosaic_0001>
module attributes {stable_mosaic.version = 11 : i64} {
  func.func @_fused_forward_kernel(%arg0: i32, %arg1: memref<2x8x384xf32, #tpu.memory_space<vmem>>, %arg2: memref<2x4x384xf32, #tpu.memory_space<vmem>>, %arg3: memref<1x384xf32, #tpu.memory_space<vmem>>, %arg4: memref<1x384xf32, #tpu.memory_space<vmem>>, %arg5: memref<384x128xf32, #tpu.memory_space<vmem>>, %arg6: memref<1x1x384xf32, #tpu.memory_space<vmem>>, %arg7: memref<1x1x384xf32, #tpu.memory_space<vmem>>, %arg8: memref<1x384x1792xf32, #tpu.memory_space<vmem>>, %arg9: memref<1x768x384xf32, #tpu.memory_space<vmem>>, %arg10: memref<1x1x1xf32, #tpu.memory_space<vmem>>, %arg11: memref<1x1x384xf32, #tpu.memory_space<vmem>>, %arg12: memref<1x1x384xf32, #tpu.memory_space<vmem>>, %arg13: memref<1x384x896xf32, #tpu.memory_space<vmem>>, %arg14: memref<1x384x896xf32, #tpu.memory_space<vmem>>, %arg15: memref<1x768x384xf32, #tpu.memory_space<vmem>>, %arg16: memref<2x8x128xf32, #tpu.memory_space<vmem>>, %arg17: memref<16x384xf32, #tpu.memory_space<vmem>>) attributes {dimension_semantics = [#tpu.dimension_semantics<arbitrary>], iteration_bounds = array<i64: 8>, scalar_prefetch = 0 : i64, scratch_operands = 1 : i64, tpu.core_type = #tpu.core_type<tc>, window_params = [{pipeline_mode = #tpu.pipeline_mode<synchronous>, transform_indices = @transform_0, window_bounds = array<i64: 2, 8, 384>}, {pipeline_mode = #tpu.pipeline_mode<synchronous>, transform_indices = @transform_1, window_bounds = array<i64: 2, 4, 384>}, {pipeline_mode = #tpu.pipeline_mode<synchronous>, transform_indices = @transform_2, window_bounds = array<i64: 1, 384>}, {pipeline_mode = #tpu.pipeline_mode<synchronous>, transform_indices = @transform_3, window_bounds = array<i64: 1, 384>}, {pipeline_mode = #tpu.pipeline_mode<synchronous>, transform_indices = @transform_4, window_bounds = array<i64: 384, 128>}, {transform_indices = @transform_5, window_bounds = array<i64: 1, 1, 384>}, {transform_indices = @transform_6, window_bounds = array<i64: 1, 1, 384>}, {transform_indices = @transform_7, window_bounds = array<i64: 1, 384, 1792>}, {transform_indices = @transform_8, window_bounds = array<i64: 1, 768, 384>}, {transform_indices = @transform_9, window_bounds = array<i64: 1, 1, 1>}, {transform_indices = @transform_10, window_bounds = array<i64: 1, 1, 384>}, {transform_indices = @transform_11, window_bounds = array<i64: 1, 1, 384>}, {transform_indices = @transform_12, window_bounds = array<i64: 1, 384, 896>}, {transform_indices = @transform_13, window_bounds = array<i64: 1, 384, 896>}, {transform_indices = @transform_14, window_bounds = array<i64: 1, 768, 384>}, {pipeline_mode = #tpu.pipeline_mode<synchronous>, transform_indices = @transform_15, window_bounds = array<i64: 2, 8, 128>}]} {
    %c0_i32 = arith.constant 0 : i32
    %0 = arith.cmpi eq, %arg0, %c0_i32 : i32
    %1 = arith.extui %0 : i1 to i32
    %c0_i32_0 = arith.constant 0 : i32
    %2 = arith.cmpi ne, %1, %c0_i32_0 : i32
    scf.if %2 {
      %c0_112 = arith.constant 0 : index
      %c0_113 = arith.constant 0 : index
      %c0_114 = arith.constant 0 : index
      %267 = vector.load %arg1[%c0_112, %c0_113, %c0_114] : memref<2x8x384xf32, #tpu.memory_space<vmem>>, vector<2x8x384xf32>
      %268 = vector.shape_cast %267 : vector<2x8x384xf32> to vector<16x384xf32>
      %c0_115 = arith.constant 0 : index
      %c0_116 = arith.constant 0 : index
      %269 = vector.load %arg3[%c0_115, %c0_116] : memref<1x384xf32, #tpu.memory_space<vmem>>, vector<1x384xf32>
      %c0_117 = arith.constant 0 : index
      %c0_118 = arith.constant 0 : index
      %270 = vector.load %arg4[%c0_117, %c0_118] : memref<1x384xf32, #tpu.memory_space<vmem>>, vector<1x384xf32>
      %cst_119 = arith.constant dense<0.000000e+00> : vector<16xf32>
      %271 = vector.multi_reduction <add>, %268, %cst_119 [1] : vector<16x384xf32> to vector<16xf32>
      %272 = vector.shape_cast %271 : vector<16xf32> to vector<16x1xf32>
      %cst_120 = arith.constant 3.840000e+02 : f32
      %273 = vector.broadcast %cst_120 : f32 to vector<16x1xf32>
      %274 = arith.divf %272, %273 : vector<16x1xf32>
      %275 = vector.broadcast %274 : vector<16x1xf32> to vector<16x384xf32>
      %276 = arith.subf %268, %275 : vector<16x384xf32>
      %277 = arith.mulf %276, %276 : vector<16x384xf32>
      %cst_121 = arith.constant dense<0.000000e+00> : vector<16xf32>
      %278 = vector.multi_reduction <add>, %277, %cst_121 [1] : vector<16x384xf32> to vector<16xf32>
      %279 = vector.shape_cast %278 : vector<16xf32> to vector<16x1xf32>
      %cst_122 = arith.constant 3.840000e+02 : f32
      %280 = vector.broadcast %cst_122 : f32 to vector<16x1xf32>
      %281 = arith.divf %279, %280 : vector<16x1xf32>
      %cst_123 = arith.constant 9.99999974E-6 : f32
      %282 = vector.broadcast %cst_123 : f32 to vector<16x1xf32>
      %283 = arith.addf %281, %282 : vector<16x1xf32>
      %284 = math.rsqrt %283 : vector<16x1xf32>
      %285 = vector.broadcast %284 : vector<16x1xf32> to vector<16x384xf32>
      %286 = arith.mulf %276, %285 : vector<16x384xf32>
      %287 = vector.broadcast %269 : vector<1x384xf32> to vector<16x384xf32>
      %288 = arith.mulf %286, %287 : vector<16x384xf32>
      %289 = vector.broadcast %270 : vector<1x384xf32> to vector<16x384xf32>
      %290 = arith.addf %288, %289 : vector<16x384xf32>
      %c0_124 = arith.constant 0 : index
      %c0_125 = arith.constant 0 : index
      %291 = vector.load %arg17[%c0_124, %c0_125] : memref<16x384xf32, #tpu.memory_space<vmem>>, vector<16x384xf32>
      tpu.vector_store %arg17[%c0_124, %c0_125], %290 {strides = array<i32>} : memref<16x384xf32, #tpu.memory_space<vmem>>, vector<16x384xf32>,
    } else {
    }
    %c0 = arith.constant 0 : index
    %c0_1 = arith.constant 0 : index
    %3 = vector.load %arg17[%c0, %c0_1] : memref<16x384xf32, #tpu.memory_space<vmem>>, vector<16x384xf32>
    %c0_2 = arith.constant 0 : index
    %c0_3 = arith.constant 0 : index
    %c0_4 = arith.constant 0 : index
    %4 = vector.load %arg6[%c0_2, %c0_3, %c0_4] : memref<1x1x384xf32, #tpu.memory_space<vmem>>, vector<1x1x384xf32>
    %5 = vector.shape_cast %4 : vector<1x1x384xf32> to vector<1x384xf32>
    %c0_5 = arith.constant 0 : index
    %c0_6 = arith.constant 0 : index
    %c0_7 = arith.constant 0 : index
    %6 = vector.load %arg7[%c0_5, %c0_6, %c0_7] : memref<1x1x384xf32, #tpu.memory_space<vmem>>, vector<1x1x384xf32>
    %7 = vector.shape_cast %6 : vector<1x1x384xf32> to vector<1x384xf32>
    %cst = arith.constant dense<0.000000e+00> : vector<16xf32>
    %8 = vector.multi_reduction <add>, %3, %cst [1] : vector<16x384xf32> to vector<16xf32>
    %9 = vector.shape_cast %8 : vector<16xf32> to vector<16x1xf32>
    %cst_8 = arith.constant 3.840000e+02 : f32
    %10 = vector.broadcast %cst_8 : f32 to vector<16x1xf32>
    %11 = arith.divf %9, %10 : vector<16x1xf32>
    %12 = vector.broadcast %11 : vector<16x1xf32> to vector<16x384xf32>
    %13 = arith.subf %3, %12 : vector<16x384xf32>
    %14 = arith.mulf %13, %13 : vector<16x384xf32>
    %cst_9 = arith.constant dense<0.000000e+00> : vector<16xf32>
    %15 = vector.multi_reduction <add>, %14, %cst_9 [1] : vector<16x384xf32> to vector<16xf32>
    %16 = vector.shape_cast %15 : vector<16xf32> to vector<16x1xf32>
    %cst_10 = arith.constant 3.840000e+02 : f32
    %17 = vector.broadcast %cst_10 : f32 to vector<16x1xf32>
    %18 = arith.divf %16, %17 : vector<16x1xf32>
    %cst_11 = arith.constant 9.99999974E-6 : f32
    %19 = vector.broadcast %cst_11 : f32 to vector<16x1xf32>
    %20 = arith.addf %18, %19 : vector<16x1xf32>
    %21 = math.rsqrt %20 : vector<16x1xf32>
    %22 = vector.broadcast %21 : vector<16x1xf32> to vector<16x384xf32>
    %23 = arith.mulf %13, %22 : vector<16x384xf32>
    %24 = vector.broadcast %5 : vector<1x384xf32> to vector<16x384xf32>
    %25 = arith.mulf %23, %24 : vector<16x384xf32>
    %26 = vector.broadcast %7 : vector<1x384xf32> to vector<16x384xf32>
    %27 = arith.addf %25, %26 : vector<16x384xf32>
    %c0_12 = arith.constant 0 : index
    %c0_13 = arith.constant 0 : index
    %c0_14 = arith.constant 0 : index
    %28 = vector.load %arg8[%c0_12, %c0_13, %c0_14] : memref<1x384x1792xf32, #tpu.memory_space<vmem>>, vector<1x384x1792xf32>
    %29 = vector.shape_cast %28 : vector<1x384x1792xf32> to vector<384x1792xf32>
    %cst_15 = arith.constant dense<0.000000e+00> : vector<16x1792xf32>
    %30 = tpu.matmul %27, %29, %cst_15 {dimension_numbers = #tpu.dot_dimension_numbers<[1], [0], [0], [1], [0, 0, 1, 1], [], []>} : vector<16x384xf32>, vector<384x1792xf32>, vector<16x1792xf32> -> vector<16x1792xf32>
    %31 = vector.extract_strided_slice %30 {offsets = [0, 0], sizes = [16, 768], strides = [1, 1]} : vector<16x1792xf32> to vector<16x768xf32>
    %32 = vector.extract_strided_slice %30 {offsets = [0, 768], sizes = [16, 768], strides = [1, 1]} : vector<16x1792xf32> to vector<16x768xf32>
    %cst_16 = arith.constant 5.000000e-01 : f32
    %33 = vector.broadcast %cst_16 : f32 to vector<16x768xf32>
    %34 = arith.mulf %33, %32 : vector<16x768xf32>
    %cst_17 = arith.constant 0.707106769 : f32
    %35 = vector.broadcast %cst_17 : f32 to vector<16x768xf32>
    %36 = arith.mulf %32, %35 : vector<16x768xf32>
    %cst_18 = arith.constant 0.000000e+00 : f32
    %37 = vector.broadcast %cst_18 : f32 to vector<16x768xf32>
    %38 = arith.cmpf oge, %36, %37 : vector<16x768xf32>
    %cst_19 = arith.constant 1.000000e+00 : f32
    %cst_20 = arith.constant -1.000000e+00 : f32
    %39 = vector.broadcast %cst_19 : f32 to vector<16x768xf32>
    %40 = vector.broadcast %cst_20 : f32 to vector<16x768xf32>
    %41 = arith.select %38, %39, %40 : vector<16x768xi1>, vector<16x768xf32>
    %42 = math.absf %36 : vector<16x768xf32>
    %cst_21 = arith.constant 0.327591091 : f32
    %43 = vector.broadcast %cst_21 : f32 to vector<16x768xf32>
    %44 = arith.mulf %43, %42 : vector<16x768xf32>
    %cst_22 = arith.constant 1.000000e+00 : f32
    %45 = vector.broadcast %cst_22 : f32 to vector<16x768xf32>
    %46 = arith.addf %45, %44 : vector<16x768xf32>
    %cst_23 = arith.constant 1.000000e+00 : f32
    %47 = vector.broadcast %cst_23 : f32 to vector<16x768xf32>
    %48 = arith.divf %47, %46 : vector<16x768xf32>
    %cst_24 = arith.constant 1.06140542 : f32
    %49 = vector.broadcast %cst_24 : f32 to vector<16x768xf32>
    %50 = arith.mulf %49, %48 : vector<16x768xf32>
    %cst_25 = arith.constant -1.45315206 : f32
    %51 = vector.broadcast %cst_25 : f32 to vector<16x768xf32>
    %52 = arith.addf %50, %51 : vector<16x768xf32>
    %53 = arith.mulf %52, %48 : vector<16x768xf32>
    %cst_26 = arith.constant 1.42141378 : f32
    %54 = vector.broadcast %cst_26 : f32 to vector<16x768xf32>
    %55 = arith.addf %53, %54 : vector<16x768xf32>
    %56 = arith.mulf %55, %48 : vector<16x768xf32>
    %cst_27 = arith.constant -0.284496725 : f32
    %57 = vector.broadcast %cst_27 : f32 to vector<16x768xf32>
    %58 = arith.addf %56, %57 : vector<16x768xf32>
    %59 = arith.mulf %58, %48 : vector<16x768xf32>
    %cst_28 = arith.constant 0.254829586 : f32
    %60 = vector.broadcast %cst_28 : f32 to vector<16x768xf32>
    %61 = arith.addf %59, %60 : vector<16x768xf32>
    %62 = arith.mulf %61, %48 : vector<16x768xf32>
    %cst_29 = arith.constant 0.000000e+00 : f32
    %63 = vector.broadcast %cst_29 : f32 to vector<16x768xf32>
    %64 = arith.subf %63, %42 : vector<16x768xf32>
    %65 = arith.mulf %64, %42 : vector<16x768xf32>
    %66 = math.exp %65 : vector<16x768xf32>
    %67 = arith.mulf %62, %66 : vector<16x768xf32>
    %cst_30 = arith.constant 1.000000e+00 : f32
    %68 = vector.broadcast %cst_30 : f32 to vector<16x768xf32>
    %69 = arith.subf %68, %67 : vector<16x768xf32>
    %70 = arith.mulf %41, %69 : vector<16x768xf32>
    %cst_31 = arith.constant 1.000000e+00 : f32
    %71 = vector.broadcast %cst_31 : f32 to vector<16x768xf32>
    %72 = arith.addf %71, %70 : vector<16x768xf32>
    %73 = arith.mulf %34, %72 : vector<16x768xf32>
    %74 = arith.mulf %31, %73 : vector<16x768xf32>
    %75 = vector.extract_strided_slice %30 {offsets = [0, 1536], sizes = [16, 128], strides = [1, 1]} : vector<16x1792xf32> to vector<16x128xf32>
    %76 = vector.shape_cast %75 : vector<16x128xf32> to vector<2x8x128xf32>
    %77 = vector.extract_strided_slice %30 {offsets = [0, 1664], sizes = [16, 128], strides = [1, 1]} : vector<16x1792xf32> to vector<16x128xf32>
    %78 = vector.shape_cast %77 : vector<16x128xf32> to vector<2x8x128xf32>
    %79 = vector.extract_strided_slice %74 {offsets = [0, 384], sizes = [16, 384], strides = [1, 1]} : vector<16x768xf32> to vector<16x384xf32>
    %80 = vector.shape_cast %79 : vector<16x384xf32> to vector<2x8x384xf32>
    "tpu.trace_start"() <{level = 10 : i32, message = "bqd,bkd->bqk"}> : () -> ()
    %cst_32 = arith.constant dense<0.000000e+00> : vector<2x8x8xf32>
    %81 = tpu.matmul %76, %78, %cst_32 {dimension_numbers = #tpu.dot_dimension_numbers<[2], [2], [1], [1], [0, 0, 0, 1, 1, 1], [0], [0]>} : vector<2x8x128xf32>, vector<2x8x128xf32>, vector<2x8x8xf32> -> vector<2x8x8xf32>
    "tpu.trace_stop"() : () -> ()
    %cst_33 = arith.constant 0.144337565 : f32
    %82 = vector.broadcast %cst_33 : f32 to vector<2x8x8xf32>
    %83 = arith.mulf %81, %82 : vector<2x8x8xf32>
    %84 = tpu.iota {dimensions = array<i32: 0>} : vector<8x8xi32>
    %85 = tpu.iota {dimensions = array<i32: 1>} : vector<8x8xi32>
    %c0_34 = arith.constant 0 : index
    %c0_35 = arith.constant 0 : index
    %c0_36 = arith.constant 0 : index
    %86 = vector.load %arg10[%c0_34, %c0_35, %c0_36] : memref<1x1x1xf32, #tpu.memory_space<vmem>>, vector<1x1x1xf32>
    %87 = vector.shape_cast %86 : vector<1x1x1xf32> to vector<1x1xf32>
    %88 = math.exp %87 : vector<1x1xf32>
    %cst_37 = arith.constant 1.000000e+00 : f32
    %89 = vector.broadcast %cst_37 : f32 to vector<1x1xf32>
    %90 = arith.addf %89, %88 : vector<1x1xf32>
    %91 = math.log %90 : vector<1x1xf32>
    %92 = arith.cmpi sle, %85, %84 : vector<8x8xi32>
    %93 = arith.subi %85, %84 : vector<8x8xi32>
    %94 = arith.sitofp %93 : vector<8x8xi32> to vector<8x8xf32>
    %95 = vector.broadcast %91 : vector<1x1xf32> to vector<8x8xf32>
    %96 = arith.mulf %95, %94 : vector<8x8xf32>
    %cst_38 = arith.constant -1.000000e+30 : f32
    %97 = vector.broadcast %cst_38 : f32 to vector<8x8xf32>
    %98 = arith.select %92, %96, %97 : vector<8x8xi1>, vector<8x8xf32>
    %99 = vector.shape_cast %98 : vector<8x8xf32> to vector<1x8x8xf32>
    %100 = vector.broadcast %99 : vector<1x8x8xf32> to vector<2x8x8xf32>
    %101 = arith.addf %83, %100 : vector<2x8x8xf32>
    %cst_39 = arith.constant dense<0xFF800000> : vector<2x8xf32>
    %102 = vector.multi_reduction <maximumf>, %101, %cst_39 [2] : vector<2x8x8xf32> to vector<2x8xf32>
    %103 = vector.shape_cast %102 : vector<2x8xf32> to vector<2x8x1xf32>
    %104 = vector.broadcast %103 : vector<2x8x1xf32> to vector<2x8x8xf32>
    %105 = arith.subf %101, %104 : vector<2x8x8xf32>
    %106 = math.exp %105 : vector<2x8x8xf32>
    %cst_40 = arith.constant dense<0.000000e+00> : vector<2x8xf32>
    %107 = vector.multi_reduction <add>, %106, %cst_40 [2] : vector<2x8x8xf32> to vector<2x8xf32>
    %108 = vector.shape_cast %107 : vector<2x8xf32> to vector<2x8x1xf32>
    %109 = vector.broadcast %108 : vector<2x8x1xf32> to vector<2x8x8xf32>
    %110 = arith.divf %106, %109 : vector<2x8x8xf32>
    "tpu.trace_start"() <{level = 10 : i32, message = "bqk,bkd->bqd"}> : () -> ()
    %cst_41 = arith.constant dense<0.000000e+00> : vector<2x8x384xf32>
    %111 = tpu.matmul %110, %80, %cst_41 {dimension_numbers = #tpu.dot_dimension_numbers<[2], [1], [1], [2], [0, 0, 0, 1, 1, 2], [0], [0]>} : vector<2x8x8xf32>, vector<2x8x384xf32>, vector<2x8x384xf32> -> vector<2x8x384xf32>
    "tpu.trace_stop"() : () -> ()
    %112 = vector.shape_cast %111 : vector<2x8x384xf32> to vector<16x384xf32>
    %113 = vector.extract_strided_slice %74 {offsets = [0, 0], sizes = [16, 384], strides = [1, 1]} : vector<16x768xf32> to vector<16x384xf32>
    %114 = tpu.concatenate %113, %112 in 1 : vector<16x384xf32>, vector<16x384xf32> -> vector<16x768xf32>
    %c0_42 = arith.constant 0 : index
    %c0_43 = arith.constant 0 : index
    %c0_44 = arith.constant 0 : index
    %115 = vector.load %arg9[%c0_42, %c0_43, %c0_44] : memref<1x768x384xf32, #tpu.memory_space<vmem>>, vector<1x768x384xf32>
    %116 = vector.shape_cast %115 : vector<1x768x384xf32> to vector<768x384xf32>
    %cst_45 = arith.constant dense<0.000000e+00> : vector<16x384xf32>
    %117 = tpu.matmul %114, %116, %cst_45 {dimension_numbers = #tpu.dot_dimension_numbers<[1], [0], [0], [1], [0, 0, 1, 1], [], []>} : vector<16x768xf32>, vector<768x384xf32>, vector<16x384xf32> -> vector<16x384xf32>
    %118 = arith.addf %3, %117 : vector<16x384xf32>
    %c0_46 = arith.constant 0 : index
    %c0_47 = arith.constant 0 : index
    %c0_48 = arith.constant 0 : index
    %119 = vector.load %arg11[%c0_46, %c0_47, %c0_48] : memref<1x1x384xf32, #tpu.memory_space<vmem>>, vector<1x1x384xf32>
    %120 = vector.shape_cast %119 : vector<1x1x384xf32> to vector<1x384xf32>
    %c0_49 = arith.constant 0 : index
    %c0_50 = arith.constant 0 : index
    %c0_51 = arith.constant 0 : index
    %121 = vector.load %arg12[%c0_49, %c0_50, %c0_51] : memref<1x1x384xf32, #tpu.memory_space<vmem>>, vector<1x1x384xf32>
    %122 = vector.shape_cast %121 : vector<1x1x384xf32> to vector<1x384xf32>
    %cst_52 = arith.constant dense<0.000000e+00> : vector<16xf32>
    %123 = vector.multi_reduction <add>, %118, %cst_52 [1] : vector<16x384xf32> to vector<16xf32>
    %124 = vector.shape_cast %123 : vector<16xf32> to vector<16x1xf32>
    %cst_53 = arith.constant 3.840000e+02 : f32
    %125 = vector.broadcast %cst_53 : f32 to vector<16x1xf32>
    %126 = arith.divf %124, %125 : vector<16x1xf32>
    %127 = vector.broadcast %126 : vector<16x1xf32> to vector<16x384xf32>
    %128 = arith.subf %118, %127 : vector<16x384xf32>
    %129 = arith.mulf %128, %128 : vector<16x384xf32>
    %cst_54 = arith.constant dense<0.000000e+00> : vector<16xf32>
    %130 = vector.multi_reduction <add>, %129, %cst_54 [1] : vector<16x384xf32> to vector<16xf32>
    %131 = vector.shape_cast %130 : vector<16xf32> to vector<16x1xf32>
    %cst_55 = arith.constant 3.840000e+02 : f32
    %132 = vector.broadcast %cst_55 : f32 to vector<16x1xf32>
    %133 = arith.divf %131, %132 : vector<16x1xf32>
    %cst_56 = arith.constant 9.99999974E-6 : f32
    %134 = vector.broadcast %cst_56 : f32 to vector<16x1xf32>
    %135 = arith.addf %133, %134 : vector<16x1xf32>
    %136 = math.rsqrt %135 : vector<16x1xf32>
    %137 = vector.broadcast %136 : vector<16x1xf32> to vector<16x384xf32>
    %138 = arith.mulf %128, %137 : vector<16x384xf32>
    %139 = vector.broadcast %120 : vector<1x384xf32> to vector<16x384xf32>
    %140 = arith.mulf %138, %139 : vector<16x384xf32>
    %141 = vector.broadcast %122 : vector<1x384xf32> to vector<16x384xf32>
    %142 = arith.addf %140, %141 : vector<16x384xf32>
    %c0_57 = arith.constant 0 : index
    %c0_58 = arith.constant 0 : index
    %c0_59 = arith.constant 0 : index
    %143 = vector.load %arg13[%c0_57, %c0_58, %c0_59] : memref<1x384x896xf32, #tpu.memory_space<vmem>>, vector<1x384x896xf32>
    %144 = vector.shape_cast %143 : vector<1x384x896xf32> to vector<384x896xf32>
    %cst_60 = arith.constant dense<0.000000e+00> : vector<16x896xf32>
    %145 = tpu.matmul %142, %144, %cst_60 {dimension_numbers = #tpu.dot_dimension_numbers<[1], [0], [0], [1], [0, 0, 1, 1], [], []>} : vector<16x384xf32>, vector<384x896xf32>, vector<16x896xf32> -> vector<16x896xf32>
    %146 = vector.extract_strided_slice %145 {offsets = [0, 0], sizes = [16, 384], strides = [1, 1]} : vector<16x896xf32> to vector<16x384xf32>
    %147 = vector.extract_strided_slice %145 {offsets = [0, 384], sizes = [16, 384], strides = [1, 1]} : vector<16x896xf32> to vector<16x384xf32>
    %cst_61 = arith.constant 5.000000e-01 : f32
    %148 = vector.broadcast %cst_61 : f32 to vector<16x384xf32>
    %149 = arith.mulf %148, %147 : vector<16x384xf32>
    %cst_62 = arith.constant 0.707106769 : f32
    %150 = vector.broadcast %cst_62 : f32 to vector<16x384xf32>
    %151 = arith.mulf %147, %150 : vector<16x384xf32>
    %cst_63 = arith.constant 0.000000e+00 : f32
    %152 = vector.broadcast %cst_63 : f32 to vector<16x384xf32>
    %153 = arith.cmpf oge, %151, %152 : vector<16x384xf32>
    %cst_64 = arith.constant 1.000000e+00 : f32
    %cst_65 = arith.constant -1.000000e+00 : f32
    %154 = vector.broadcast %cst_64 : f32 to vector<16x384xf32>
    %155 = vector.broadcast %cst_65 : f32 to vector<16x384xf32>
    %156 = arith.select %153, %154, %155 : vector<16x384xi1>, vector<16x384xf32>
    %157 = math.absf %151 : vector<16x384xf32>
    %cst_66 = arith.constant 0.327591091 : f32
    %158 = vector.broadcast %cst_66 : f32 to vector<16x384xf32>
    %159 = arith.mulf %158, %157 : vector<16x384xf32>
    %cst_67 = arith.constant 1.000000e+00 : f32
    %160 = vector.broadcast %cst_67 : f32 to vector<16x384xf32>
    %161 = arith.addf %160, %159 : vector<16x384xf32>
    %cst_68 = arith.constant 1.000000e+00 : f32
    %162 = vector.broadcast %cst_68 : f32 to vector<16x384xf32>
    %163 = arith.divf %162, %161 : vector<16x384xf32>
    %cst_69 = arith.constant 1.06140542 : f32
    %164 = vector.broadcast %cst_69 : f32 to vector<16x384xf32>
    %165 = arith.mulf %164, %163 : vector<16x384xf32>
    %cst_70 = arith.constant -1.45315206 : f32
    %166 = vector.broadcast %cst_70 : f32 to vector<16x384xf32>
    %167 = arith.addf %165, %166 : vector<16x384xf32>
    %168 = arith.mulf %167, %163 : vector<16x384xf32>
    %cst_71 = arith.constant 1.42141378 : f32
    %169 = vector.broadcast %cst_71 : f32 to vector<16x384xf32>
    %170 = arith.addf %168, %169 : vector<16x384xf32>
    %171 = arith.mulf %170, %163 : vector<16x384xf32>
    %cst_72 = arith.constant -0.284496725 : f32
    %172 = vector.broadcast %cst_72 : f32 to vector<16x384xf32>
    %173 = arith.addf %171, %172 : vector<16x384xf32>
    %174 = arith.mulf %173, %163 : vector<16x384xf32>
    %cst_73 = arith.constant 0.254829586 : f32
    %175 = vector.broadcast %cst_73 : f32 to vector<16x384xf32>
    %176 = arith.addf %174, %175 : vector<16x384xf32>
    %177 = arith.mulf %176, %163 : vector<16x384xf32>
    %cst_74 = arith.constant 0.000000e+00 : f32
    %178 = vector.broadcast %cst_74 : f32 to vector<16x384xf32>
    %179 = arith.subf %178, %157 : vector<16x384xf32>
    %180 = arith.mulf %179, %157 : vector<16x384xf32>
    %181 = math.exp %180 : vector<16x384xf32>
    %182 = arith.mulf %177, %181 : vector<16x384xf32>
    %cst_75 = arith.constant 1.000000e+00 : f32
    %183 = vector.broadcast %cst_75 : f32 to vector<16x384xf32>
    %184 = arith.subf %183, %182 : vector<16x384xf32>
    %185 = arith.mulf %156, %184 : vector<16x384xf32>
    %cst_76 = arith.constant 1.000000e+00 : f32
    %186 = vector.broadcast %cst_76 : f32 to vector<16x384xf32>
    %187 = arith.addf %186, %185 : vector<16x384xf32>
    %188 = arith.mulf %149, %187 : vector<16x384xf32>
    %189 = arith.mulf %146, %188 : vector<16x384xf32>
    %190 = vector.extract_strided_slice %145 {offsets = [0, 768], sizes = [16, 128], strides = [1, 1]} : vector<16x896xf32> to vector<16x128xf32>
    %191 = vector.shape_cast %190 : vector<16x128xf32> to vector<2x8x128xf32>
    %c0_77 = arith.constant 0 : index
    %c0_78 = arith.constant 0 : index
    %c0_79 = arith.constant 0 : index
    %192 = vector.load %arg2[%c0_77, %c0_78, %c0_79] : memref<2x4x384xf32, #tpu.memory_space<vmem>>, vector<2x4x384xf32>
    %193 = vector.shape_cast %192 : vector<2x4x384xf32> to vector<8x384xf32>
    %c0_80 = arith.constant 0 : index
    %c0_81 = arith.constant 0 : index
    %c0_82 = arith.constant 0 : index
    %194 = vector.load %arg14[%c0_80, %c0_81, %c0_82] : memref<1x384x896xf32, #tpu.memory_space<vmem>>, vector<1x384x896xf32>
    %195 = vector.shape_cast %194 : vector<1x384x896xf32> to vector<384x896xf32>
    %cst_83 = arith.constant dense<0.000000e+00> : vector<8x896xf32>
    %196 = tpu.matmul %193, %195, %cst_83 {dimension_numbers = #tpu.dot_dimension_numbers<[1], [0], [0], [1], [0, 0, 1, 1], [], []>} : vector<8x384xf32>, vector<384x896xf32>, vector<8x896xf32> -> vector<8x896xf32>
    %197 = vector.extract_strided_slice %196 {offsets = [0, 0], sizes = [8, 384], strides = [1, 1]} : vector<8x896xf32> to vector<8x384xf32>
    %198 = vector.extract_strided_slice %196 {offsets = [0, 384], sizes = [8, 384], strides = [1, 1]} : vector<8x896xf32> to vector<8x384xf32>
    %cst_84 = arith.constant 5.000000e-01 : f32
    %199 = vector.broadcast %cst_84 : f32 to vector<8x384xf32>
    %200 = arith.mulf %199, %198 : vector<8x384xf32>
    %cst_85 = arith.constant 0.707106769 : f32
    %201 = vector.broadcast %cst_85 : f32 to vector<8x384xf32>
    %202 = arith.mulf %198, %201 : vector<8x384xf32>
    %cst_86 = arith.constant 0.000000e+00 : f32
    %203 = vector.broadcast %cst_86 : f32 to vector<8x384xf32>
    %204 = arith.cmpf oge, %202, %203 : vector<8x384xf32>
    %cst_87 = arith.constant 1.000000e+00 : f32
    %cst_88 = arith.constant -1.000000e+00 : f32
    %205 = vector.broadcast %cst_87 : f32 to vector<8x384xf32>
    %206 = vector.broadcast %cst_88 : f32 to vector<8x384xf32>
    %207 = arith.select %204, %205, %206 : vector<8x384xi1>, vector<8x384xf32>
    %208 = math.absf %202 : vector<8x384xf32>
    %cst_89 = arith.constant 0.327591091 : f32
    %209 = vector.broadcast %cst_89 : f32 to vector<8x384xf32>
    %210 = arith.mulf %209, %208 : vector<8x384xf32>
    %cst_90 = arith.constant 1.000000e+00 : f32
    %211 = vector.broadcast %cst_90 : f32 to vector<8x384xf32>
    %212 = arith.addf %211, %210 : vector<8x384xf32>
    %cst_91 = arith.constant 1.000000e+00 : f32
    %213 = vector.broadcast %cst_91 : f32 to vector<8x384xf32>
    %214 = arith.divf %213, %212 : vector<8x384xf32>
    %cst_92 = arith.constant 1.06140542 : f32
    %215 = vector.broadcast %cst_92 : f32 to vector<8x384xf32>
    %216 = arith.mulf %215, %214 : vector<8x384xf32>
    %cst_93 = arith.constant -1.45315206 : f32
    %217 = vector.broadcast %cst_93 : f32 to vector<8x384xf32>
    %218 = arith.addf %216, %217 : vector<8x384xf32>
    %219 = arith.mulf %218, %214 : vector<8x384xf32>
    %cst_94 = arith.constant 1.42141378 : f32
    %220 = vector.broadcast %cst_94 : f32 to vector<8x384xf32>
    %221 = arith.addf %219, %220 : vector<8x384xf32>
    %222 = arith.mulf %221, %214 : vector<8x384xf32>
    %cst_95 = arith.constant -0.284496725 : f32
    %223 = vector.broadcast %cst_95 : f32 to vector<8x384xf32>
    %224 = arith.addf %222, %223 : vector<8x384xf32>
    %225 = arith.mulf %224, %214 : vector<8x384xf32>
    %cst_96 = arith.constant 0.254829586 : f32
    %226 = vector.broadcast %cst_96 : f32 to vector<8x384xf32>
    %227 = arith.addf %225, %226 : vector<8x384xf32>
    %228 = arith.mulf %227, %214 : vector<8x384xf32>
    %cst_97 = arith.constant 0.000000e+00 : f32
    %229 = vector.broadcast %cst_97 : f32 to vector<8x384xf32>
    %230 = arith.subf %229, %208 : vector<8x384xf32>
    %231 = arith.mulf %230, %208 : vector<8x384xf32>
    %232 = math.exp %231 : vector<8x384xf32>
    %233 = arith.mulf %228, %232 : vector<8x384xf32>
    %cst_98 = arith.constant 1.000000e+00 : f32
    %234 = vector.broadcast %cst_98 : f32 to vector<8x384xf32>
    %235 = arith.subf %234, %233 : vector<8x384xf32>
    %236 = arith.mulf %207, %235 : vector<8x384xf32>
    %cst_99 = arith.constant 1.000000e+00 : f32
    %237 = vector.broadcast %cst_99 : f32 to vector<8x384xf32>
    %238 = arith.addf %237, %236 : vector<8x384xf32>
    %239 = arith.mulf %200, %238 : vector<8x384xf32>
    %240 = arith.mulf %197, %239 : vector<8x384xf32>
    %241 = vector.shape_cast %240 : vector<8x384xf32> to vector<2x4x384xf32>
    %242 = vector.extract_strided_slice %196 {offsets = [0, 768], sizes = [8, 128], strides = [1, 1]} : vector<8x896xf32> to vector<8x128xf32>
    %243 = vector.shape_cast %242 : vector<8x128xf32> to vector<2x4x128xf32>
    "tpu.trace_start"() <{level = 10 : i32, message = "bqd,bkd->bqk"}> : () -> ()
    %cst_100 = arith.constant dense<0.000000e+00> : vector<2x8x4xf32>
    %244 = tpu.matmul %191, %243, %cst_100 {dimension_numbers = #tpu.dot_dimension_numbers<[2], [2], [1], [1], [0, 0, 0, 1, 1, 1], [0], [0]>} : vector<2x8x128xf32>, vector<2x4x128xf32>, vector<2x8x4xf32> -> vector<2x8x4xf32>
    "tpu.trace_stop"() : () -> ()
    %cst_101 = arith.constant 0.144337565 : f32
    %245 = vector.broadcast %cst_101 : f32 to vector<2x8x4xf32>
    %246 = arith.mulf %244, %245 : vector<2x8x4xf32>
    %cst_102 = arith.constant dense<0xFF800000> : vector<2x8xf32>
    %247 = vector.multi_reduction <maximumf>, %246, %cst_102 [2] : vector<2x8x4xf32> to vector<2x8xf32>
    %248 = vector.shape_cast %247 : vector<2x8xf32> to vector<2x8x1xf32>
    %249 = vector.broadcast %248 : vector<2x8x1xf32> to vector<2x8x4xf32>
    %250 = arith.subf %246, %249 : vector<2x8x4xf32>
    %251 = math.exp %250 : vector<2x8x4xf32>
    %cst_103 = arith.constant dense<0.000000e+00> : vector<2x8xf32>
    %252 = vector.multi_reduction <add>, %251, %cst_103 [2] : vector<2x8x4xf32> to vector<2x8xf32>
    %253 = vector.shape_cast %252 : vector<2x8xf32> to vector<2x8x1xf32>
    %254 = vector.broadcast %253 : vector<2x8x1xf32> to vector<2x8x4xf32>
    %255 = arith.divf %251, %254 : vector<2x8x4xf32>
    "tpu.trace_start"() <{level = 10 : i32, message = "bqk,bkd->bqd"}> : () -> ()
    %cst_104 = arith.constant dense<0.000000e+00> : vector<2x8x384xf32>
    %256 = tpu.matmul %255, %241, %cst_104 {dimension_numbers = #tpu.dot_dimension_numbers<[2], [1], [1], [2], [0, 0, 0, 1, 1, 2], [0], [0]>} : vector<2x8x4xf32>, vector<2x4x384xf32>, vector<2x8x384xf32> -> vector<2x8x384xf32>
    "tpu.trace_stop"() : () -> ()
    %257 = vector.shape_cast %256 : vector<2x8x384xf32> to vector<16x384xf32>
    %258 = tpu.concatenate %189, %257 in 1 : vector<16x384xf32>, vector<16x384xf32> -> vector<16x768xf32>
    %c0_105 = arith.constant 0 : index
    %c0_106 = arith.constant 0 : index
    %c0_107 = arith.constant 0 : index
    %259 = vector.load %arg15[%c0_105, %c0_106, %c0_107] : memref<1x768x384xf32, #tpu.memory_space<vmem>>, vector<1x768x384xf32>
    %260 = vector.shape_cast %259 : vector<1x768x384xf32> to vector<768x384xf32>
    %cst_108 = arith.constant dense<0.000000e+00> : vector<16x384xf32>
    %261 = tpu.matmul %258, %260, %cst_108 {dimension_numbers = #tpu.dot_dimension_numbers<[1], [0], [0], [1], [0, 0, 1, 1], [], []>} : vector<16x768xf32>, vector<768x384xf32>, vector<16x384xf32> -> vector<16x384xf32>
    %262 = arith.addf %118, %261 : vector<16x384xf32>
    %c0_109 = arith.constant 0 : index
    %c0_110 = arith.constant 0 : index
    %263 = vector.load %arg17[%c0_109, %c0_110] : memref<16x384xf32, #tpu.memory_space<vmem>>, vector<16x384xf32>
    tpu.vector_store %arg17[%c0_109, %c0_110], %262 {strides = array<i32>} : memref<16x384xf32, #tpu.memory_space<vmem>>, vector<16x384xf32>,
    %c7_i32 = arith.constant 7 : i32
    %264 = arith.cmpi eq, %arg0, %c7_i32 : i32
    %265 = arith.extui %264 : i1 to i32
    %c0_i32_111 = arith.constant 0 : i32
    %266 = arith.cmpi ne, %265, %c0_i32_111 : i32
    scf.if %266 {
      %c0_112 = arith.constant 0 : index
      %c0_113 = arith.constant 0 : index
      %267 = vector.load %arg3[%c0_112, %c0_113] : memref<1x384xf32, #tpu.memory_space<vmem>>, vector<1x384xf32>
      %c0_114 = arith.constant 0 : index
      %c0_115 = arith.constant 0 : index
      %268 = vector.load %arg4[%c0_114, %c0_115] : memref<1x384xf32, #tpu.memory_space<vmem>>, vector<1x384xf32>
      %cst_116 = arith.constant dense<0.000000e+00> : vector<16xf32>
      %269 = vector.multi_reduction <add>, %262, %cst_116 [1] : vector<16x384xf32> to vector<16xf32>
      %270 = vector.shape_cast %269 : vector<16xf32> to vector<16x1xf32>
      %cst_117 = arith.constant 3.840000e+02 : f32
      %271 = vector.broadcast %cst_117 : f32 to vector<16x1xf32>
      %272 = arith.divf %270, %271 : vector<16x1xf32>
      %273 = vector.broadcast %272 : vector<16x1xf32> to vector<16x384xf32>
      %274 = arith.subf %262, %273 : vector<16x384xf32>
      %275 = arith.mulf %274, %274 : vector<16x384xf32>
      %cst_118 = arith.constant dense<0.000000e+00> : vector<16xf32>
      %276 = vector.multi_reduction <add>, %275, %cst_118 [1] : vector<16x384xf32> to vector<16xf32>
      %277 = vector.shape_cast %276 : vector<16xf32> to vector<16x1xf32>
      %cst_119 = arith.constant 3.840000e+02 : f32
      %278 = vector.broadcast %cst_119 : f32 to vector<16x1xf32>
      %279 = arith.divf %277, %278 : vector<16x1xf32>
      %cst_120 = arith.constant 9.99999974E-6 : f32
      %280 = vector.broadcast %cst_120 : f32 to vector<16x1xf32>
      %281 = arith.addf %279, %280 : vector<16x1xf32>
      %282 = math.rsqrt %281 : vector<16x1xf32>
      %283 = vector.broadcast %282 : vector<16x1xf32> to vector<16x384xf32>
      %284 = arith.mulf %274, %283 : vector<16x384xf32>
      %285 = vector.broadcast %267 : vector<1x384xf32> to vector<16x384xf32>
      %286 = arith.mulf %284, %285 : vector<16x384xf32>
      %287 = vector.broadcast %268 : vector<1x384xf32> to vector<16x384xf32>
      %288 = arith.addf %286, %287 : vector<16x384xf32>
      %c0_121 = arith.constant 0 : index
      %c0_122 = arith.constant 0 : index
      %289 = vector.load %arg5[%c0_121, %c0_122] : memref<384x128xf32, #tpu.memory_space<vmem>>, vector<384x128xf32>
      %cst_123 = arith.constant dense<0.000000e+00> : vector<16x128xf32>
      %290 = tpu.matmul %288, %289, %cst_123 {dimension_numbers = #tpu.dot_dimension_numbers<[1], [0], [0], [1], [0, 0, 1, 1], [], []>} : vector<16x384xf32>, vector<384x128xf32>, vector<16x128xf32> -> vector<16x128xf32>
      %291 = vector.shape_cast %290 : vector<16x128xf32> to vector<2x8x128xf32>
      %c0_124 = arith.constant 0 : index
      %c0_125 = arith.constant 0 : index
      %c0_126 = arith.constant 0 : index
      %292 = vector.load %arg16[%c0_124, %c0_125, %c0_126] : memref<2x8x128xf32, #tpu.memory_space<vmem>>, vector<2x8x128xf32>
      tpu.vector_store %arg16[%c0_124, %c0_125, %c0_126], %291 {strides = array<i32>} : memref<2x8x128xf32, #tpu.memory_space<vmem>>, vector<2x8x128xf32>,
    } else {
    }
    return
  }
  func.func @transform_0(%arg0: i32) -> (i32, i32, i32) {
    %c0_i32 = arith.constant 0 : i32
    %c0_i32_0 = arith.constant 0 : i32
    %c0_i32_1 = arith.constant 0 : i32
    %c0_i32_2 = arith.constant 0 : i32
    return %c0_i32, %c0_i32_0, %c0_i32_1 : i32, i32, i32
  }
  func.func @transform_1(%arg0: i32) -> (i32, i32, i32) {
    %c0_i32 = arith.constant 0 : i32
    %c0_i32_0 = arith.constant 0 : i32
    %c0_i32_1 = arith.constant 0 : i32
    %c0_i32_2 = arith.constant 0 : i32
    return %c0_i32, %c0_i32_0, %c0_i32_1 : i32, i32, i32
  }
  func.func @transform_2(%arg0: i32) -> (i32, i32) {
    %c0_i32 = arith.constant 0 : i32
    %c0_i32_0 = arith.constant 0 : i32
    %c0_i32_1 = arith.constant 0 : i32
    return %c0_i32, %c0_i32_0 : i32, i32
  }
  func.func @transform_3(%arg0: i32) -> (i32, i32) {
    %c0_i32 = arith.constant 0 : i32
    %c0_i32_0 = arith.constant 0 : i32
    %c0_i32_1 = arith.constant 0 : i32
    return %c0_i32, %c0_i32_0 : i32, i32
  }
  func.func @transform_4(%arg0: i32) -> (i32, i32) {
    %c0_i32 = arith.constant 0 : i32
    %c0_i32_0 = arith.constant 0 : i32
    %c0_i32_1 = arith.constant 0 : i32
    return %c0_i32, %c0_i32_0 : i32, i32
  }
  func.func @transform_5(%arg0: i32) -> (i32, i32, i32) {
    %c0_i32 = arith.constant 0 : i32
    %c0_i32_0 = arith.constant 0 : i32
    %c0_i32_1 = arith.constant 0 : i32
    return %arg0, %c0_i32, %c0_i32_0 : i32, i32, i32
  }
  func.func @transform_6(%arg0: i32) -> (i32, i32, i32) {
    %c0_i32 = arith.constant 0 : i32
    %c0_i32_0 = arith.constant 0 : i32
    %c0_i32_1 = arith.constant 0 : i32
    return %arg0, %c0_i32, %c0_i32_0 : i32, i32, i32
  }
  func.func @transform_7(%arg0: i32) -> (i32, i32, i32) {
    %c0_i32 = arith.constant 0 : i32
    %c0_i32_0 = arith.constant 0 : i32
    %c0_i32_1 = arith.constant 0 : i32
    return %arg0, %c0_i32, %c0_i32_0 : i32, i32, i32
  }
  func.func @transform_8(%arg0: i32) -> (i32, i32, i32) {
    %c0_i32 = arith.constant 0 : i32
    %c0_i32_0 = arith.constant 0 : i32
    %c0_i32_1 = arith.constant 0 : i32
    return %arg0, %c0_i32, %c0_i32_0 : i32, i32, i32
  }
  func.func @transform_9(%arg0: i32) -> (i32, i32, i32) {
    %c0_i32 = arith.constant 0 : i32
    %c0_i32_0 = arith.constant 0 : i32
    %c0_i32_1 = arith.constant 0 : i32
    return %arg0, %c0_i32, %c0_i32_0 : i32, i32, i32
  }
  func.func @transform_10(%arg0: i32) -> (i32, i32, i32) {
    %c0_i32 = arith.constant 0 : i32
    %c0_i32_0 = arith.constant 0 : i32
    %c0_i32_1 = arith.constant 0 : i32
    return %arg0, %c0_i32, %c0_i32_0 : i32, i32, i32
  }
  func.func @transform_11(%arg0: i32) -> (i32, i32, i32) {
    %c0_i32 = arith.constant 0 : i32
    %c0_i32_0 = arith.constant 0 : i32
    %c0_i32_1 = arith.constant 0 : i32
    return %arg0, %c0_i32, %c0_i32_0 : i32, i32, i32
  }
  func.func @transform_12(%arg0: i32) -> (i32, i32, i32) {
    %c0_i32 = arith.constant 0 : i32
    %c0_i32_0 = arith.constant 0 : i32
    %c0_i32_1 = arith.constant 0 : i32
    return %arg0, %c0_i32, %c0_i32_0 : i32, i32, i32
  }
  func.func @transform_13(%arg0: i32) -> (i32, i32, i32) {
    %c0_i32 = arith.constant 0 : i32
    %c0_i32_0 = arith.constant 0 : i32
    %c0_i32_1 = arith.constant 0 : i32
    return %arg0, %c0_i32, %c0_i32_0 : i32, i32, i32
  }
  func.func @transform_14(%arg0: i32) -> (i32, i32, i32) {
    %c0_i32 = arith.constant 0 : i32
    %c0_i32_0 = arith.constant 0 : i32
    %c0_i32_1 = arith.constant 0 : i32
    return %arg0, %c0_i32, %c0_i32_0 : i32, i32, i32
  }
  func.func @transform_15(%arg0: i32) -> (i32, i32, i32) {
    %c0_i32 = arith.constant 0 : i32
    %c0_i32_0 = arith.constant 0 : i32
    %c0_i32_1 = arith.constant 0 : i32
    %c0_i32_2 = arith.constant 0 : i32
    return %c0_i32, %c0_i32_0, %c0_i32_1 : i32, i32, i32
  }
}

</mosaic_0001>

<bundles_post_ra>
// kernel: model_forward.1
= control target key start
LH: loop header
LB: loop body
LE: loop exit
PB: predicated region body
PF: predicated region fallthrough
CT: control target
= control target key end

     0   :  { %s15193_s0 = inlined_call_operand.vmem [shape: f32[2,8,384], index: 0, kind: input, shape index: {}]   ;;  %s15194_s1 = inlined_call_operand.vmem [shape: f32[2,4,384], index: 1, kind: input, shape index: {}]   ;;  %s15195_s2 = inlined_call_operand.hbm [shape: f32[1,384], index: 2, kind: input, shape index: {}]   ;;  %s15196_s3 = inlined_call_operand.hbm [shape: f32[1,384], index: 3, kind: input, shape index: {}]   ;;  %s15197_s4 = inlined_call_operand.hbm [shape: f32[384,128], index: 4, kind: input, shape index: {}]   ;;  %s15198_s5 = inlined_call_operand.hbm [shape: f32[8,1,384], index: 5, kind: input, shape index: {}]   ;;  %s15199_s6 = inlined_call_operand.hbm [shape: f32[8,1,384], index: 6, kind: input, shape index: {}]   ;;  %s15200_s7 = inlined_call_operand.hbm [shape: f32[8,384,1792], index: 7, kind: input, shape index: {}]   ;;  %s15201_s8 = inlined_call_operand.hbm [shape: f32[8,768,384], index: 8, kind: input, shape index: {}]   ;;  %s15202_s9 = inlined_call_operand.vmem [shape: f32[8,1,1], index: 9, kind: input, shape index: {}]   ;;  %s15203_s10 = inlined_call_operand.hbm [shape: f32[8,1,384], index: 10, kind: input, shape index: {}]   ;;  %s15204_s11 = inlined_call_operand.hbm [shape: f32[8,1,384], index: 11, kind: input, shape index: {}]   ;;  %s15205_s12 = inlined_call_operand.hbm [shape: f32[8,384,896], index: 12, kind: input, shape index: {}]   ;;  %s15206_s13 = inlined_call_operand.hbm [shape: f32[8,384,896], index: 13, kind: input, shape index: {}]   ;;  %s15207_s14 = inlined_call_operand.hbm [shape: f32[8,768,384], index: 14, kind: input, shape index: {}]   ;;  %s15208_s15 = inlined_call_operand.hbm [shape: f32[2,8,128], index: 15, kind: output, shape index: {}]  }
   0x1   :  { %15245 = sst [smem:[#allocation39_spill]] %s15193_s0 }
   0x2   :  { %15246 = sst [smem:[#allocation40_spill]] %s15194_s1 }
   0x3   :  { %15247 = sst [smem:[#allocation41_spill]] %s15196_s3 }
   0x4   :  { %15248 = sst [smem:[#allocation42_spill]] %s15198_s5 }
   0x5   :  { %15249 = sst [smem:[#allocation43_spill]] %s15200_s7 }
   0x6   :  { %15250 = sst [smem:[#allocation44_spill]] %s15202_s9 }
   0x7   :  { %15251 = sst [smem:[#allocation45_spill]] %s15203_s10 }
   0x8   :  { %15252 = sst [smem:[#allocation46_spill]] %s15205_s12 }
   0x9   :  { %15253 = sst [smem:[#allocation47_spill]] %s15207_s14 }
   0xa   :  { %15254 = sst [smem:[#allocation48_spill]] %s15208_s15 }
   0xb   :  { %20 = vsyncpa [#allocation4], 0 }
   0xc   :  { %21 = vsyncpa [#allocation7], 0 }
   0xd   :  { %22 = vsyncpa [#allocation10], 0 }
   0xe   :  { %24 = vsyncpa [#allocation10 + $0x1], 0 }
   0xf   :  { %25 = vsyncpa [#allocation13], 0 }
  0x10   :  { %27 = vsyncpa [#allocation13 + $0x1], 0 }
  0x11   :  { %28 = vsyncpa [#allocation16], 0 }
  0x12   :  { %30 = vsyncpa [#allocation16 + $0x1], 0 }
  0x13   :  { %31 = vsyncpa [#allocation19], 0 }
  0x14   :  { %33 = vsyncpa [#allocation19 + $0x1], 0 }
  0x15   :  { %34 = vsyncpa [#allocation22], 0 }
  0x16   :  { %36 = vsyncpa [#allocation22 + $0x1], 0 }
  0x17   :  { %37 = vsyncpa [#allocation5], 0  ;;  %s11872_s18 = smov 0   ;;  %s11874_s19 = smov 0  }
  0x18   :  { %s11876_s20 = smov 0   ;;  %s11878_s21 = smov 0  }
  0x19 LB: > { %15255 = sst [smem:[#allocation32_spill]] %s11754_s19  ;;  %s11891_s22 = sadd.s32 4294967295, %s11762_s21   ;;  %s11762_s21 = sphi %s11878_s21, %s15309_s21   ;;  %s11758_s20 = sphi %s11876_s20, %s15312_s20   ;;  %s11754_s19 = sphi %s11874_s19, %s15311_s19   ;;  %s11750_s18 = sphi %s11872_s18, %s15310_s18  }
  0x1a   : > { %15256 = sst [smem:[#allocation33_spill]] %s11758_s20  ;;  %s11894_s23 = sadd.s32 1, %s11762_s21  }
  0x1b   : > { %15257 = sst [smem:[#allocation34_spill]] %s11891_s22  ;;  %s152_s24 = ssub.s32 %s11762_s21, %s11894_s23 }
  0x1c   : > { %15258 = sst [smem:[#allocation35_spill]] %s11894_s23  ;;  %s155_s25 = sadd.s32 1, %s11758_s20 }
  0x1d   : > { %p153_p0 = scmp.eq.s32.totalorder %s152_s24, 0  ;;  %p162_p1 = scmp.ne.s32.totalorder %s11758_s20, %s11754_s19 }
  0x1e   : > { %p163_p2 = scmp.eq.s32.totalorder %s11762_s21, 0  ;;  %p168_p3 = scmp.ne.s32.totalorder %s11754_s19, %s11750_s18 }
  0x1f   : > { %s11904_s26 = scalar_select %p153_p0, %s11758_s20, %s155_s25  }
  0x20   : > { %p11906_p4 = por %p163_p2, %p162_p1  ;;  %p15215_p5 = scmp.eq.s32.totalorder %s11891_s22, 0 }
  0x21   : > { %15259 = sst [smem:[#allocation36_spill]] %s11904_s26  ;;  %p8371_p6 = scmp.ge.s32.totalorder %s11762_s21, 1 }
  0x22   : > { %p434_p7 = scmp.lt.s32.totalorder %s11762_s21, 9  ;;  %p11915_p8 = por %p15215_p5, %p168_p3 }
  0x23   : > { %s11764_s30 = smov [#allocation6]   ;;  %p11131_p12 = scmp.lt.s32.totalorder %s11762_s21, 8 }
  0x24   : > { %s15261_s28 = scalar_select %p11915_p8, 1, 0 }
  0x25   : > { %p11920_p10 = pnand %p8371_p6, %p434_p7  ;;  %s464_s16 = sshll.u32 %s11764_s30, 4  ;;  %s465_s16 = int_to_ptr.vmem [resolvable:$true] %s464_s16 }
  0x26   : > { %15262 = sst [smem:[#allocation37_spill]] %s15261_s28  ;;  %s11928_s17 = sand.u32 1, %s11762_s21  }
  0x27   : > { %s15263_s29 = scalar_select %p11920_p10, 1, 0 }
  0x28   : > { %p11090_p11 = pneg %p11920_p10  ;;  %p11938_p0 = pnand %p11131_p12, %p11906_p4 }
  0x29   : > { %15264 = sst [smem:[#allocation38_spill]] %s15263_s29  ;;  %s11943_s25 = sand.u32 1, %s11758_s20  }
  0x2a   : > { %p11932_p13 = pnand %p11090_p11, %p15215_p5  ;;  %s11946_s30 = smul.u32 3, %s11943_s25 }
  0x2b   : > { %s15266_s24 = scalar_select %p11938_p0, 1, 0 }
  0x2c   : > { %s15265_s18 = scalar_select %p11932_p13, 1, 0 }
  0x2d   : > { %s15267_s3 = sld [smem:[#allocation41_spill]]  ;;  %p11956_p2 = pneg %p11932_p13 }
  0x2f   : > { %s15268_s27 = scalar_select %p11956_p2, 1, 0 }
  0x33   : > { %s11320_s15 = scalar_lea.hbm %s15267_s3, 48 }
  0x34   : > { %p11321_p1 = scmp.ne.s32.totalorder %s15267_s3, %s11320_s15  ;;  %p11327_p6 = scmp.lt.u32.totalorder %s11320_s15, %s15267_s3 }
  0x36   : > { %p11323_p3 = pnand %p11956_p2, %p11321_p1 }
  0x38   : > { %p11324_p4 = pneg %p11323_p3 }
  0x3a   : > { %p11329_p7 = pnand %p11327_p6, %p11324_p4 }
  0x3c   : > { %11332 = shalt.err (!%p11329_p7)
}
  0x3d   : > { %s11333_s23 = scalar_lea.vmem %s465_s16, 48  ;;  %s11340_s0 = scalar_lea.vmem %s465_s16, 64 }
  0x3e   : > { %p11334_p11 = scmp.ne.s32.totalorder %s465_s16, %s11333_s23  ;;  %p11341_p5 = scmp.lt.s32.totalorder %s465_s16, %s465_s16 }
  0x3f   : > { %p11342_p8 = scmp.lt.s32.totalorder %s11340_s0, %s11333_s23 }
  0x40   : > { %p11336_p12 = pnand %p11334_p11, %p11956_p2 }
  0x41   : > { %p11343_p10 = por %p11342_p8, %p11341_p5 }
  0x42   : > { %p11337_p9 = pneg %p11336_p12 }
  0x44   : > { %p11344_p0 = pnand %p11343_p10, %p11337_p9 }
  0x46   : > { %11347 = shalt.err (!%p11344_p0)
}
  0x47   : > { %11096 = dma.hbm_to_vmem [thread:$0]  (!%p11932_p13), %s15267_s3, 48, %s465_s16, [#allocation7]  }
  0x48   : > { %s11973_s9 = smul.u32 48, %s11762_s21  ;;  %s492_s15 = scalar_lea.vmem [#allocation9], %s11946_s30 }
  0x49   : > { %s500_s20 = sshll.u32 %s492_s15, 4  ;;  %s15269_s5 = sld [smem:[#allocation42_spill]]  ;;  %s11976_s20 = int_to_ptr.vmem [resolvable:$true] %s500_s20 }
  0x4a   : > { %s15230_s26 = scalar_lea.sflag [#allocation10], %s11928_s17  ;;  %p15270_p8 = scmp.ne.s32.totalorder %s15266_s24, 0 }
  0x4c   : > { %p11990_p9 = pneg %p15270_p8 }
  0x4e   : > { %s15271_s16 = scalar_select %p11990_p9, 1, 0 }
  0x4f   : > { %s11982_s28 = scalar_lea.hbm %s15269_s5, %s11973_s9  ;;  %s11353_s0 = scalar_lea.hbm %s15269_s5, 384 }
  0x50   : > { %s11348_s19 = scalar_lea.hbm %s11982_s28, 48  ;;  %p11354_p1 = scmp.lt.u32.totalorder %s11982_s28, %s15269_s5 }
  0x51   : > { %p11349_p5 = scmp.ne.s32.totalorder %s11982_s28, %s11348_s19  ;;  %p11355_p3 = scmp.lt.u32.totalorder %s11353_s0, %s11348_s19 }
  0x52   : > { %p11357_p6 = scmp.lt.u32.totalorder %s11348_s19, %s11982_s28 }
  0x53   : > { %p11351_p10 = pnand %p11990_p9, %p11349_p5  ;;  %p11356_p4 = por %p11355_p3, %p11354_p1 }
  0x55   : > { %p11352_p0 = pneg %p11351_p10  ;;  %p11358_p7 = por %p11357_p6, %p11356_p4 }
  0x57   : > { %p11359_p11 = pnand %p11358_p7, %p11352_p0 }
  0x59   : > { %11362 = shalt.err (!%p11359_p11)
}
  0x5a   : > { %s11363_s1 = scalar_lea.vmem %s11976_s20, 48  ;;  %s11765_s15 = smov [#allocation9]  }
  0x5b   : > { %p11364_p12 = scmp.ne.s32.totalorder %s11976_s20, %s11363_s1  ;;  %s11368_s23 = sshll.u32 %s11765_s15, 4  ;;  %s11369_s23 = int_to_ptr.vmem [resolvable:$false] %s11368_s23 }
  0x5c   : > { %s11370_s3 = scalar_lea.vmem %s11369_s23, 96  ;;  %p11371_p13 = scmp.lt.s32.totalorder %s11976_s20, %s11369_s23 }
  0x5d   : > { %p11366_p5 = pnand %p11364_p12, %p11990_p9  ;;  %p11372_p2 = scmp.lt.s32.totalorder %s11370_s3, %s11363_s1 }
  0x5f   : > { %p11367_p10 = pneg %p11366_p5  ;;  %p11373_p1 = por %p11372_p2, %p11371_p13 }
  0x61   : > { %p11374_p3 = pnand %p11373_p1, %p11367_p10 }
  0x63   : > { %11377 = shalt.err (!%p11374_p3)
}
  0x64   : > { %11103 = dma.hbm_to_vmem [thread:$0]  (!%p15270_p8), %s11982_s28, 48, %s11976_s20, %s15230_s26  }
  0x65   : > { %s11039_s19 = smul.u32 86016, %s11762_s21  ;;  %s15273_s7 = sld [smem:[#allocation43_spill]] }
  0x66   : > { %s15272_s22 = smul.u32 5376, %s11943_s25  ;;  %s15234_s5 = scalar_lea.sflag [#allocation13], %s11928_s17 }
  0x68   : > { %s530_s0 = scalar_lea.vmem [#allocation12], %s15272_s22 }
  0x69   : > { %s537_s15 = sshll.u32 %s530_s0, 4  ;;  %s12023_s15 = int_to_ptr.vmem [resolvable:$true] %s537_s15 }
  0x6b   : > { %s12021_s3 = scalar_lea.hbm %s15273_s7, %s11039_s19  ;;  %s11383_s22 = scalar_lea.hbm %s15273_s7, 688128 }
  0x6c   : > { %s11378_s29 = scalar_lea.hbm %s12021_s3, 86016  ;;  %p11384_p4 = scmp.lt.u32.totalorder %s12021_s3, %s15273_s7 }
  0x6d   : > { %p11379_p13 = scmp.ne.s32.totalorder %s12021_s3, %s11378_s29  ;;  %p11385_p6 = scmp.lt.u32.totalorder %s11383_s22, %s11378_s29 }
  0x6e   : > { %p11387_p11 = scmp.lt.u32.totalorder %s11378_s29, %s12021_s3 }
  0x6f   : > { %p11381_p2 = pnand %p11379_p13, %p11990_p9  ;;  %p11386_p7 = por %p11385_p6, %p11384_p4 }
  0x71   : > { %p11382_p0 = pneg %p11381_p2  ;;  %p11388_p12 = por %p11387_p11, %p11386_p7 }
  0x73   : > { %p11389_p5 = pnand %p11388_p12, %p11382_p0 }
  0x75   : > { %11392 = shalt.err (!%p11389_p5)
}
  0x76   : > { %s11393_s19 = scalar_lea.vmem %s12023_s15, 86016  ;;  %s11766_s1 = smov [#allocation12]  }
  0x77   : > { %p11394_p10 = scmp.ne.s32.totalorder %s12023_s15, %s11393_s19  ;;  %s11398_s28 = sshll.u32 %s11766_s1, 4  ;;  %s11399_s28 = int_to_ptr.vmem [resolvable:$false] %s11398_s28 }
  0x78   : > { %s11400_s20 = scalar_lea.vmem %s11399_s28, 172032  ;;  %p11401_p13 = scmp.lt.s32.totalorder %s12023_s15, %s11399_s28 }
  0x79   : > { %p11396_p1 = pnand %p11394_p10, %p11990_p9  ;;  %p11402_p2 = scmp.lt.s32.totalorder %s11400_s20, %s11393_s19 }
  0x7b   : > { %p11397_p3 = pneg %p11396_p1  ;;  %p11403_p4 = por %p11402_p2, %p11401_p13 }
  0x7d   : > { %p11404_p6 = pnand %p11403_p4, %p11397_p3 }
  0x7f   : > { %11407 = shalt.err (!%p11404_p6)
}
  0x80   : > { %s11767_s29 = smov 1792   ;;  %s11768_s22 = smov 112  }
  0x81   : > { %11109 = dma.hbm_to_vmem [thread:$0]  (!%p15270_p8), %s12021_s3, 86016, %s12023_s15, %s15234_s5, %s11767_s29, %s11767_s29, %s11768_s22  }
  0x82   : > { %s15274_s10 = sld [smem:[#allocation45_spill]]  ;;  %s578_s1 = scalar_lea.vmem [#allocation15], %s11946_s30 }
  0x83   : > { %s586_s28 = sshll.u32 %s578_s1, 4  ;;  %s15231_s20 = smul.u32 2688, %s11943_s25  ;;  %s12056_s28 = int_to_ptr.vmem [resolvable:$true] %s586_s28 }
  0x84   : > { %s15233_s26 = scalar_lea.sflag [#allocation16], %s11928_s17 }
  0x88   : > { %s12053_s19 = scalar_lea.hbm %s15274_s10, %s11973_s9  ;;  %s11413_s29 = scalar_lea.hbm %s15274_s10, 384 }
  0x89   : > { %s11408_s7 = scalar_lea.hbm %s12053_s19, 48  ;;  %p11414_p12 = scmp.lt.u32.totalorder %s12053_s19, %s15274_s10 }
  0x8a   : > { %p11409_p0 = scmp.ne.s32.totalorder %s12053_s19, %s11408_s7  ;;  %p11415_p5 = scmp.lt.u32.totalorder %s11413_s29, %s11408_s7 }
  0x8b   : > { %p11417_p1 = scmp.lt.u32.totalorder %s11408_s7, %s12053_s19 }
  0x8c   : > { %p11411_p7 = pnand %p11409_p0, %p11990_p9  ;;  %p11416_p10 = por %p11415_p5, %p11414_p12 }
  0x8e   : > { %p11412_p11 = pneg %p11411_p7  ;;  %p11418_p3 = por %p11417_p1, %p11416_p10 }
  0x90   : > { %p11419_p13 = pnand %p11418_p3, %p11412_p11 }
  0x92   : > { %11422 = shalt.err (!%p11419_p13)
}
  0x93   : > { %s11423_s23 = scalar_lea.vmem %s12056_s28, 48  ;;  %s11769_s1 = smov [#allocation15]  }
  0x94   : > { %p11424_p2 = scmp.ne.s32.totalorder %s12056_s28, %s11423_s23  ;;  %s11428_s15 = sshll.u32 %s11769_s1, 4  ;;  %s11429_s15 = int_to_ptr.vmem [resolvable:$false] %s11428_s15 }
  0x95   : > { %s11430_s3 = scalar_lea.vmem %s11429_s15, 96  ;;  %p11431_p0 = scmp.lt.s32.totalorder %s12056_s28, %s11429_s15 }
  0x96   : > { %p11426_p4 = pnand %p11424_p2, %p11990_p9  ;;  %p11432_p7 = scmp.lt.s32.totalorder %s11430_s3, %s11423_s23 }
  0x98   : > { %p11427_p6 = pneg %p11426_p4  ;;  %p11433_p12 = por %p11432_p7, %p11431_p0 }
  0x9a   : > { %p11434_p5 = pnand %p11433_p12, %p11427_p6 }
  0x9c   : > { %11437 = shalt.err (!%p11434_p5)
}
  0x9d   : > { %11115 = dma.hbm_to_vmem [thread:$0]  (!%p15270_p8), %s12053_s19, 48, %s12056_s28, %s15233_s26  }
  0x9e   : > { %s15232_s7 = smul.u32 43008, %s11762_s21  ;;  %s616_s29 = scalar_lea.vmem [#allocation18], %s15231_s20 }
  0x9f   : > { %s623_s22 = sshll.u32 %s616_s29, 4  ;;  %s15275_s12 = sld [smem:[#allocation46_spill]]  ;;  %s12093_s22 = int_to_ptr.vmem [resolvable:$true] %s623_s22 }
  0xa0   : > { %s613_s15 = scalar_lea.sflag [#allocation19], %s11928_s17 }
  0xa5   : > { %s12091_s1 = scalar_lea.hbm %s15275_s12, %s15232_s7  ;;  %s11443_s29 = scalar_lea.hbm %s15275_s12, 344064 }
  0xa6   : > { %s11438_s3 = scalar_lea.hbm %s12091_s1, 43008  ;;  %p11444_p3 = scmp.lt.u32.totalorder %s12091_s1, %s15275_s12 }
  0xa7   : > { %p11439_p11 = scmp.ne.s32.totalorder %s12091_s1, %s11438_s3  ;;  %p11445_p13 = scmp.lt.u32.totalorder %s11443_s29, %s11438_s3 }
  0xa8   : > { %p11447_p4 = scmp.lt.u32.totalorder %s11438_s3, %s12091_s1 }
  0xa9   : > { %p11441_p10 = pnand %p11439_p11, %p11990_p9  ;;  %p11446_p2 = por %p11445_p13, %p11444_p3 }
  0xab   : > { %p11442_p1 = pneg %p11441_p10  ;;  %p11448_p6 = por %p11447_p4, %p11446_p2 }
  0xad   : > { %p11449_p0 = pnand %p11448_p6, %p11442_p1 }
  0xaf   : > { %11452 = shalt.err (!%p11449_p0)
}
  0xb0   : > { %s11453_s23 = scalar_lea.vmem %s12093_s22, 43008  ;;  %s11770_s19 = smov [#allocation18]  }
  0xb1   : > { %p11454_p7 = scmp.ne.s32.totalorder %s12093_s22, %s11453_s23  ;;  %s11458_s28 = sshll.u32 %s11770_s19, 4  ;;  %s11459_s28 = int_to_ptr.vmem [resolvable:$false] %s11458_s28 }
  0xb2   : > { %s11460_s20 = scalar_lea.vmem %s11459_s28, 86016  ;;  %p11461_p11 = scmp.lt.s32.totalorder %s12093_s22, %s11459_s28 }
  0xb3   : > { %p11456_p12 = pnand %p11454_p7, %p11990_p9  ;;  %p11462_p10 = scmp.lt.s32.totalorder %s11460_s20, %s11453_s23 }
  0xb5   : > { %p11457_p5 = pneg %p11456_p12  ;;  %p11463_p3 = por %p11462_p10, %p11461_p11 }
  0xb7   : > { %p11464_p13 = pnand %p11463_p3, %p11457_p5 }
  0xb9   : > { %11467 = shalt.err (!%p11464_p13)
}
  0xba   : > { %s11771_s3 = smov 896   ;;  %s11772_s29 = smov 56  }
  0xbb   : > { %11121 = dma.hbm_to_vmem [thread:$0]  (!%p15270_p8), %s12091_s1, 43008, %s12093_s22, %s613_s15, %s11771_s3, %s11771_s3, %s11772_s29  }
  0xbc   : > { %s11773_s0 = smov [#allocation3]   ;;  %s11774_s23 = smov [#allocation8]  }
  0xbd   : > { %s453_s19 = sshll.u32 %s11773_s0, 4  ;;  %s474_s28 = sshll.u32 %s11774_s23, 4  ;;  %s454_s19 = int_to_ptr.vmem [resolvable:$true] %s453_s19  ;;  %s475_s28 = int_to_ptr.vmem [resolvable:$true] %s474_s28 }
  0xbe   : > { %s11468_s26 = scalar_lea.hbm %s15195_s2, 48  ;;  %p15276_p2 = scmp.ne.s32.totalorder %s15268_s27, 0 }
  0xbf   : > { %p11469_p1 = scmp.ne.s32.totalorder %s15195_s2, %s11468_s26  ;;  %p11475_p0 = scmp.lt.u32.totalorder %s11468_s26, %s15195_s2 }
  0xc1   : > { %p11471_p4 = pnand %p11469_p1, %p15276_p2 }
  0xc3   : > { %p11472_p6 = pneg %p11471_p4 }
  0xc5   : > { %p11477_p7 = pnand %p11475_p0, %p11472_p6 }
  0xc7   : > { %11480 = shalt.err (!%p11477_p7)
}
  0xc8   : > { %s11481_s22 = scalar_lea.vmem %s454_s19, 48  ;;  %s11488_s7 = scalar_lea.vmem %s454_s19, 64 }
  0xc9   : > { %p11482_p12 = scmp.ne.s32.totalorder %s454_s19, %s11481_s22  ;;  %p11489_p10 = scmp.lt.s32.totalorder %s454_s19, %s454_s19 }
  0xca   : > { %p11490_p3 = scmp.lt.s32.totalorder %s11488_s7, %s11481_s22 }
  0xcb   : > { %p11484_p5 = pnand %p11482_p12, %p15276_p2 }
  0xcc   : > { %p11491_p13 = por %p11490_p3, %p11489_p10 }
  0xcd   : > { %p11485_p11 = pneg %p11484_p5 }
  0xcf   : > { %p11492_p8 = pnand %p11491_p13, %p11485_p11 }
  0xd1   : > { %11495 = shalt.err (!%p11492_p8)
}
  0xd2   : > { %p15277_p1 = scmp.ne.s32.totalorder %s15265_s18, 0  ;;  %s11496_s26 = scalar_lea.hbm %s15197_s4, 6144 }
  0xd3   : > { %p11497_p4 = scmp.ne.s32.totalorder %s15197_s4, %s11496_s26  ;;  %p11503_p8 = scmp.lt.u32.totalorder %s11496_s26, %s15197_s4 }
  0xd4   : > { %11093 = dma.hbm_to_vmem [thread:$0]  (!%p15277_p1), %s15195_s2, 48, %s454_s19, [#allocation4]  }
  0xd5   : > { %p11499_p6 = pnand %p11497_p4, %p15276_p2 }
  0xd7   : > { %p11500_p0 = pneg %p11499_p6 }
  0xd9   : > { %p11505_p7 = pnand %p11503_p8, %p11500_p0 }
  0xdb   : > { %11508 = shalt.err (!%p11505_p7)
}
  0xdc   : > { %s11509_s22 = scalar_lea.vmem %s475_s28, 6144  ;;  %p11517_p10 = scmp.lt.s32.totalorder %s475_s28, %s475_s28 }
  0xdd   : > { %p11510_p12 = scmp.ne.s32.totalorder %s475_s28, %s11509_s22  ;;  %p11518_p3 = scmp.lt.s32.totalorder %s11509_s22, %s11509_s22 }
  0xdf   : > { %p11512_p5 = pnand %p11510_p12, %p15276_p2  ;;  %p11519_p13 = por %p11518_p3, %p11517_p10 }
  0xe1   : > { %p11513_p11 = pneg %p11512_p5 }
  0xe3   : > { %p11520_p9 = pnand %p11519_p13, %p11513_p11 }
  0xe5   : > { %11523 = shalt.err (!%p11520_p9)
}
  0xe6   : > { %s11775_s19 = smov 128   ;;  %s11776_s7 = smov 8  }
  0xe7   : > { %11099 = dma.hbm_to_vmem [thread:$0]  (!%p15277_p1), %s15197_s4, 6144, %s475_s28, [#allocation7], %s11775_s19, %s11775_s19, %s11776_s7  }
  0xe8   : > { %s12162_s14 = scalar_lea.hbm %s15199_s6, %s11973_s9  ;;  %s511_s26 = scalar_lea.vmem [#allocation11], %s11946_s30 }
  0xe9   : > { %s519_s1 = sshll.u32 %s511_s26, 4  ;;  %s11040_s0 = smul.u32 2304, %s11943_s25  ;;  %s520_s1 = int_to_ptr.vmem [resolvable:$true] %s519_s1 }
  0xea   : > { %s11524_s23 = scalar_lea.hbm %s12162_s14, 48  ;;  %p15278_p2 = scmp.ne.s32.totalorder %s15271_s16, 0 }
  0xeb   : > { %p11525_p9 = scmp.ne.s32.totalorder %s12162_s14, %s11524_s23  ;;  %s11529_s20 = scalar_lea.hbm %s15199_s6, 384 }
  0xec   : > { %p11530_p1 = scmp.lt.u32.totalorder %s12162_s14, %s15199_s6  ;;  %p11531_p0 = scmp.lt.u32.totalorder %s11529_s20, %s11524_s23 }
  0xed   : > { %p11527_p4 = pnand %p11525_p9, %p15278_p2  ;;  %p11533_p7 = scmp.lt.u32.totalorder %s11524_s23, %s12162_s14 }
  0xee   : > { %p11532_p8 = por %p11531_p0, %p11530_p1 }
  0xef   : > { %p11528_p6 = pneg %p11527_p4 }
  0xf0   : > { %p11534_p12 = por %p11533_p7, %p11532_p8 }
  0xf2   : > { %p11535_p5 = pnand %p11534_p12, %p11528_p6 }
  0xf4   : > { %11538 = shalt.err (!%p11535_p5)
}
  0xf5   : > { %s11539_s7 = scalar_lea.vmem %s520_s1, 48  ;;  %s11777_s5 = smov [#allocation11]  }
  0xf6   : > { %p11540_p11 = scmp.ne.s32.totalorder %s520_s1, %s11539_s7  ;;  %s11544_s10 = sshll.u32 %s11777_s5, 4  ;;  %s11545_s10 = int_to_ptr.vmem [resolvable:$false] %s11544_s10 }
  0xf7   : > { %s11546_s27 = scalar_lea.vmem %s11545_s10, 96  ;;  %p11547_p13 = scmp.lt.s32.totalorder %s520_s1, %s11545_s10 }
  0xf8   : > { %p11542_p10 = pnand %p11540_p11, %p15278_p2  ;;  %p11548_p9 = scmp.lt.s32.totalorder %s11546_s27, %s11539_s7 }
  0xfa   : > { %p11543_p3 = pneg %p11542_p10  ;;  %p11549_p4 = por %p11548_p9, %p11547_p13 }
  0xfc   : > { %p11550_p0 = pnand %p11549_p4, %p11543_p3 }
  0xfe   : > { %11553 = shalt.err (!%p11550_p0)
}
  0xff   : > { %p15279_p1 = scmp.ne.s32.totalorder %s15266_s24, 0  ;;  %s15280_s12 = scalar_lea.sflag [#allocation10], %s11928_s17 }
 0x100   : > { %s11041_s26 = smul.u32 36864, %s11762_s21  ;;  %s551_s23 = scalar_lea.vmem [#allocation14], %s11040_s0 }
 0x101   : > { %11106 = dma.hbm_to_vmem [thread:$0]  (!%p15279_p1), %s12162_s14, 48, %s520_s1, %s15280_s12  }
 0x102   : > { %s558_s18 = sshll.u32 %s551_s23, 4  ;;  %s12193_s22 = scalar_lea.hbm %s15201_s8, %s11041_s26  ;;  %s12195_s18 = int_to_ptr.vmem [resolvable:$true] %s558_s18 }
 0x103   : > { %s11554_s19 = scalar_lea.hbm %s12193_s22, 36864  ;;  %s11559_s7 = scalar_lea.hbm %s15201_s8, 294912 }
 0x104   : > { %p11555_p6 = scmp.ne.s32.totalorder %s12193_s22, %s11554_s19  ;;  %p11560_p12 = scmp.lt.u32.totalorder %s12193_s22, %s15201_s8 }
 0x105   : > { %p11561_p5 = scmp.lt.u32.totalorder %s11559_s7, %s11554_s19  ;;  %p11563_p10 = scmp.lt.u32.totalorder %s11554_s19, %s12193_s22 }
 0x106   : > { %p11557_p8 = pnand %p11555_p6, %p15278_p2 }
 0x107   : > { %p11562_p11 = por %p11561_p5, %p11560_p12 }
 0x108   : > { %p11558_p7 = pneg %p11557_p8 }
 0x109   : > { %p11564_p3 = por %p11563_p10, %p11562_p11 }
 0x10b   : > { %p11565_p13 = pnand %p11564_p3, %p11558_p7 }
 0x10d   : > { %11568 = shalt.err (!%p11565_p13)
}
 0x10e   : > { %s11569_s27 = scalar_lea.vmem %s12195_s18, 36864  ;;  %s11778_s12 = smov [#allocation14]  }
 0x10f   : > { %p11570_p9 = scmp.ne.s32.totalorder %s12195_s18, %s11569_s27  ;;  %s11574_s23 = sshll.u32 %s11778_s12, 4  ;;  %s11575_s23 = int_to_ptr.vmem [resolvable:$false] %s11574_s23 }
 0x110   : > { %s11576_s28 = scalar_lea.vmem %s11575_s23, 73728  ;;  %p11577_p6 = scmp.lt.s32.totalorder %s12195_s18, %s11575_s23 }
 0x111   : > { %p11572_p4 = pnand %p11570_p9, %p15278_p2  ;;  %p11578_p8 = scmp.lt.s32.totalorder %s11576_s28, %s11569_s27 }
 0x113   : > { %p11573_p0 = pneg %p11572_p4  ;;  %p11579_p12 = por %p11578_p8, %p11577_p6 }
 0x115   : > { %p11580_p5 = pnand %p11579_p12, %p11573_p0 }
 0x117   : > { %11583 = shalt.err (!%p11580_p5)
}
 0x118   : > { %s11779_s20 = smov 384   ;;  %s11780_s19 = smov 24  }
 0x119   : > { %s15281_s14 = scalar_lea.sflag [#allocation13], %s11928_s17  ;;  %s12227_s5 = scalar_lea.hbm %s15204_s11, %s11973_s9 }
 0x11a   : > { %11112 = dma.hbm_to_vmem [thread:$0]  (!%p15279_p1), %s12193_s22, 36864, %s12195_s18, %s15281_s14, %s11779_s20, %s11779_s20, %s11780_s19  }
 0x11b   : > { %s597_s10 = scalar_lea.vmem [#allocation17], %s11946_s30  ;;  %s11584_s12 = scalar_lea.hbm %s12227_s5, 48 }
 0x11c   : > { %s605_s27 = sshll.u32 %s597_s10, 4  ;;  %p11585_p7 = scmp.ne.s32.totalorder %s12227_s5, %s11584_s12  ;;  %s606_s27 = int_to_ptr.vmem [resolvable:$true] %s605_s27 }
 0x11d   : > { %s11589_s18 = scalar_lea.hbm %s15204_s11, 384  ;;  %p11590_p3 = scmp.lt.u32.totalorder %s12227_s5, %s15204_s11 }
 0x11e   : > { %p11587_p11 = pnand %p11585_p7, %p15278_p2  ;;  %p11591_p13 = scmp.lt.u32.totalorder %s11589_s18, %s11584_s12 }
 0x11f   : > { %p11593_p4 = scmp.lt.u32.totalorder %s11584_s12, %s12227_s5 }
 0x120   : > { %p11588_p10 = pneg %p11587_p11  ;;  %p11592_p9 = por %p11591_p13, %p11590_p3 }
 0x122   : > { %p11594_p0 = por %p11593_p4, %p11592_p9 }
 0x124   : > { %p11595_p6 = pnand %p11594_p0, %p11588_p10 }
 0x126   : > { %11598 = shalt.err (!%p11595_p6)
}
 0x127   : > { %s11599_s30 = scalar_lea.vmem %s606_s27, 48  ;;  %s11781_s9 = smov [#allocation17]  }
 0x128   : > { %p11600_p8 = scmp.ne.s32.totalorder %s606_s27, %s11599_s30  ;;  %s11604_s1 = sshll.u32 %s11781_s9, 4  ;;  %s11605_s1 = int_to_ptr.vmem [resolvable:$false] %s11604_s1 }
 0x129   : > { %s11606_s7 = scalar_lea.vmem %s11605_s1, 96  ;;  %p11607_p7 = scmp.lt.s32.totalorder %s606_s27, %s11605_s1 }
 0x12a   : > { %p11602_p12 = pnand %p11600_p8, %p15278_p2  ;;  %p11608_p11 = scmp.lt.s32.totalorder %s11606_s7, %s11599_s30 }
 0x12c   : > { %p11603_p5 = pneg %p11602_p12  ;;  %p11609_p1 = por %p11608_p11, %p11607_p7 }
 0x12e   : > { %p11610_p3 = pnand %p11609_p1, %p11603_p5 }
 0x130   : > { %11613 = shalt.err (!%p11610_p3)
}
 0x131   : > { %p15282_p13 = scmp.ne.s32.totalorder %s15266_s24, 0  ;;  %s15283_s10 = scalar_lea.sflag [#allocation16], %s11928_s17 }
 0x132   : > { %s15284_s12 = smul.u32 43008, %s11762_s21  ;;  %s11619_s1 = scalar_lea.hbm %s15206_s13, 344064 }
 0x133   : > { %11118 = dma.hbm_to_vmem [thread:$0]  (!%p15282_p13), %s12227_s5, 48, %s606_s27, %s15283_s10  }
 0x134   : > { %s12254_s18 = scalar_lea.hbm %s15206_s13, %s15284_s12  ;;  %s15285_s22 = smul.u32 2688, %s11943_s25 }
 0x135   : > { %s11614_s9 = scalar_lea.hbm %s12254_s18, 43008  ;;  %p11620_p4 = scmp.lt.u32.totalorder %s12254_s18, %s15206_s13 }
 0x136   : > { %s637_s14 = scalar_lea.vmem [#allocation20], %s15285_s22  ;;  %p11615_p1 = scmp.ne.s32.totalorder %s12254_s18, %s11614_s9 }
 0x137   : > { %s644_s30 = sshll.u32 %s637_s14, 4  ;;  %p11621_p0 = scmp.lt.u32.totalorder %s11619_s1, %s11614_s9  ;;  %s12258_s30 = int_to_ptr.vmem [resolvable:$true] %s644_s30 }
 0x138   : > { %p11617_p10 = pnand %p11615_p1, %p15278_p2  ;;  %p11623_p8 = scmp.lt.u32.totalorder %s11614_s9, %s12254_s18 }
 0x139   : > { %p11622_p6 = por %p11621_p0, %p11620_p4 }
 0x13a   : > { %p11618_p9 = pneg %p11617_p10 }
 0x13b   : > { %p11624_p12 = por %p11623_p8, %p11622_p6 }
 0x13d   : > { %p11625_p5 = pnand %p11624_p12, %p11618_p9 }
 0x13f   : > { %11628 = shalt.err (!%p11625_p5)
}
 0x140   : > { %s11629_s12 = scalar_lea.vmem %s12258_s30, 43008  ;;  %s11782_s23 = smov [#allocation20]  }
 0x141   : > { %p11630_p7 = scmp.ne.s32.totalorder %s12258_s30, %s11629_s12  ;;  %s11634_s28 = sshll.u32 %s11782_s23, 4  ;;  %s11635_s28 = int_to_ptr.vmem [resolvable:$false] %s11634_s28 }
 0x142   : > { %s11636_s22 = scalar_lea.vmem %s11635_s28, 86016  ;;  %p11637_p1 = scmp.lt.s32.totalorder %s12258_s30, %s11635_s28 }
 0x143   : > { %p11632_p11 = pnand %p11630_p7, %p15278_p2  ;;  %p11638_p10 = scmp.lt.s32.totalorder %s11636_s22, %s11629_s12 }
 0x145   : > { %p11633_p3 = pneg %p11632_p11  ;;  %p11639_p4 = por %p11638_p10, %p11637_p1 }
 0x147   : > { %p11640_p0 = pnand %p11639_p4, %p11633_p3 }
 0x149   : > { %11643 = shalt.err (!%p11640_p0)
}
 0x14a   : > { %11124 = dma.hbm_to_vmem [thread:$0]  (!%p15282_p13), %s12254_s18, 43008, %s12258_s30, %s613_s15, %s11771_s3, %s11771_s3, %s11772_s29  }
 0x14b   : > { %s15286_s5 = sld [smem:[#allocation47_spill]]  ;;  %s658_s1 = scalar_lea.vmem [#allocation21], %s11040_s0 }
 0x14c   : > { %s665_s17 = sshll.u32 %s658_s1, 4  ;;  %s655_s7 = scalar_lea.sflag [#allocation22], %s11943_s25  ;;  %s12295_s17 = int_to_ptr.vmem [resolvable:$true] %s665_s17 }
 0x151   : > { %s12291_s27 = scalar_lea.hbm %s15286_s5, %s11041_s26  ;;  %s11649_s3 = scalar_lea.hbm %s15286_s5, 294912 }
 0x152   : > { %s11644_s10 = scalar_lea.hbm %s12291_s27, 36864  ;;  %p11650_p12 = scmp.lt.u32.totalorder %s12291_s27, %s15286_s5 }
 0x153   : > { %p11645_p9 = scmp.ne.s32.totalorder %s12291_s27, %s11644_s10  ;;  %p11651_p5 = scmp.lt.u32.totalorder %s11649_s3, %s11644_s10 }
 0x154   : > { %p11653_p11 = scmp.lt.u32.totalorder %s11644_s10, %s12291_s27 }
 0x155   : > { %p11647_p6 = pnand %p11645_p9, %p15278_p2  ;;  %p11652_p7 = por %p11651_p5, %p11650_p12 }
 0x157   : > { %p11648_p8 = pneg %p11647_p6  ;;  %p11654_p3 = por %p11653_p11, %p11652_p7 }
 0x159   : > { %p11655_p1 = pnand %p11654_p3, %p11648_p8 }
 0x15b   : > { %11658 = shalt.err (!%p11655_p1)
}
 0x15c   : > { %s11659_s0 = scalar_lea.vmem %s12295_s17, 36864  ;;  %s11783_s18 = smov [#allocation21]  }
 0x15d   : > { %p11660_p10 = scmp.ne.s32.totalorder %s12295_s17, %s11659_s0  ;;  %s11664_s30 = sshll.u32 %s11783_s18, 4  ;;  %s11665_s30 = int_to_ptr.vmem [resolvable:$false] %s11664_s30 }
 0x15e   : > { %s11666_s12 = scalar_lea.vmem %s11665_s30, 73728  ;;  %p11667_p9 = scmp.lt.s32.totalorder %s12295_s17, %s11665_s30 }
 0x15f   : > { %p11662_p4 = pnand %p11660_p10, %p15278_p2  ;;  %p11668_p6 = scmp.lt.s32.totalorder %s11666_s12, %s11659_s0 }
 0x161   : > { %p11663_p0 = pneg %p11662_p4  ;;  %p11669_p12 = por %p11668_p6, %p11667_p9 }
 0x163   : > { %p11670_p5 = pnand %p11669_p12, %p11663_p0 }
 0x165   : > { %11673 = shalt.err (!%p11670_p5)
}
 0x166   : > { %11127 = dma.hbm_to_vmem [thread:$0]  (!%p15282_p13), %s12291_s27, 36864, %s12295_s17, %s655_s7, %s11779_s20, %s11779_s20, %s11780_s19  }
 0x167   : > { %s15287_s16 = sld [smem:[#allocation38_spill]] }
 0x16d   : > { %p15288_p2 = scmp.ne.s32.totalorder %s15287_s16, 0 }
 0x16e   : > { %s15289_s23 = sld [smem:[#allocation34_spill]] (!%p15288_p2) }
 0x16f   : > { %677 = sbr.rel (%p15288_p2) target bundleno = 5013 (0x1395), region = 80 }
 0x174   : > { %p15290_p8 = scmp.eq.s32.totalorder (!%p15288_p2), %s15289_s23, 0 }
 0x176   : > { %11717 = dma.done.wait (%p15290_p8), [#allocation4], 48   ;;  %p15291_p7 = pmov %p15290_p8 }
 0x178   : > { %11719 = vsyncadd (%p15291_p7), [#allocation4], 4294967248  ;;  %p15292_p11 = pmov %p15291_p7 }
 0x179   : > { %p15293_p3 = pmov %p15291_p7 }
 0x17a   : > { %11721 = dma.done.wait (%p15292_p11), [#allocation7], 6192  }
 0x17b   : > { %11723 = vsyncadd (%p15293_p3), [#allocation7], 4294961104  ;;  %s15294_s24 = sld [smem:[#allocation32_spill]]  ;;  %s15295_s25 = sld [smem:[#allocation37_spill]] }
 0x17c   : > { %s691_s28 = sand.u32 1, %s15289_s23  }
 0x17d   : > { %s692_s22 = scalar_lea.sflag [#allocation10], %s691_s28 }
 0x181   : > { %s693_s20 = sand.u32 1, %s15294_s24   ;;  %p15296_p13 = scmp.ne.s32.totalorder %s15295_s25, 0 }
 0x182   : > { %s12336_s19 = smul.u32 3, %s693_s20 }
 0x184   : > { %s695_s14 = scalar_lea.vmem [#allocation9], %s12336_s19 }
 0x185   : > { %11725 = dma.done.wait (%p15296_p13), %s692_s22, 96  }
 0x186   : > { %11727 = vsyncadd (%p15296_p13), %s692_s22, 4294967200  ;;  %s11053_s9 = smul.u32 5376, %s693_s20  ;;  %s704_s27 = scalar_lea.vmem [#allocation11], %s12336_s19 }
 0x187   : > { %s710_s1 = scalar_lea.sflag [#allocation13], %s691_s28 }
 0x188   : > { %s12344_s17 = scalar_lea.vmem [#allocation12], %s11053_s9 }
 0x189   : > { %11729 = dma.done.wait (%p15296_p13), %s710_s1, 122880  }
 0x18a   : > { %11731 = vsyncadd (%p15296_p13), %s710_s1, 4294844416  ;;  %s11054_s7 = smul.u32 2304, %s693_s20  ;;  %s728_s21 = scalar_lea.sflag [#allocation16], %s691_s28 }
 0x18b   : > { %s731_s15 = scalar_lea.vmem [#allocation15], %s12336_s19 }
 0x18c   : > { %s12350_s10 = scalar_lea.vmem [#allocation14], %s11054_s7 }
 0x18d   : > { %11733 = dma.done.wait (%p15296_p13), %s728_s21, 96  }
 0x18e   : > { %11735 = vsyncadd (%p15296_p13), %s728_s21, 4294967200  ;;  %s11055_s3 = smul.u32 2688, %s693_s20  ;;  %s746_s26 = scalar_lea.sflag [#allocation19], %s691_s28 }
 0x190   : > { %s12358_s0 = scalar_lea.vmem [#allocation18], %s11055_s3 }
 0x191   : > { %11737 = dma.done.wait (%p15296_p13), %s746_s26, 86016  }
 0x192   : > { %11739 = vsyncadd (%p15296_p13), %s746_s26, 4294881280  ;;  %s12364_s18 = scalar_lea.vmem [#allocation20], %s11055_s3  ;;  %s764_s30 = scalar_lea.sflag [#allocation22], %s693_s20 }
 0x193   : > { %s12366_s12 = scalar_lea.vmem [#allocation21], %s11054_s7 }
 0x194   : > { %11741 = dma.done.wait (%p15296_p13), %s764_s30, 36864  }
 0x195   : > { %11743 = vsyncadd (%p15296_p13), %s764_s30, 4294930432  ;;  %p852_p1 = scmp.lt.s32.totalorder %s15289_s23, 7  ;;  %s15297_s22 = sld [smem:[#allocation44_spill]] }
 0x196   : > { %p15298_p10 = scmp.ne.s32.totalorder %s15289_s23, 0 }
 0x197   : > { %s12374_s16 = scalar_select %p852_p1, %s15289_s23, 7 }
 0x198   : > { %858 = sbr.rel (%p15298_p10) target bundleno = 740 (0x2e4), region = 132  ;;  %s15299_s7 = sld [smem:[#allocation39_spill]] (!%p15298_p10)  ;;  %v911_v32 = vlaneseq (!%p15298_p10)  ;;  %v865_v41 = vld [vmem:[#allocation3] sm:$0x7] (!%p15298_p10)  ;;  %v866_v42 = vld [vmem:[#allocation6] sm:$0x7] (!%p15298_p10) }
 0x19a   : > { %v912_v36 = vshrl.u32 (!%p15298_p10), %v911_v32, 7 }
 0x19b   : > { %s854_s9 = scalar_lea.vmem %s15297_s22, %s12374_s16 }
 0x19c   : > { %v913_v38 = vsub.s32 (!%p15298_p10), 0, %v912_v36  ;;  %v917_v39 = vsub.s32 (!%p15298_p10), 1, %v912_v36  ;;  %v921_v40 = vsub.s32 (!%p15298_p10), 2, %v912_v36 }
 0x19e   : > { %v859_v0 = vld [vmem:[%s15299_s7] sm:$0xff] (!%p15298_p10)  ;;  %v860_v1 = vld [vmem:[%s15299_s7 + $0x8] sm:$0xff] (!%p15298_p10)  ;;  %v861_v2 = vld [vmem:[%s15299_s7 + $0x10] sm:$0xff] (!%p15298_p10)  ;;  %v914_v43 = vrot.slane (!%p15298_p10), %v865_v41, %v913_v38  ;;  %v918_v44 = vrot.slane (!%p15298_p10), %v865_v41, %v917_v39  ;;  %v922_v45 = vrot.slane (!%p15298_p10), %v865_v41, %v921_v40  ;;  %v936_v47 = vrot.slane (!%p15298_p10), %v866_v42, %v913_v38 }
 0x19f   : > { %v867_v3 = vadd.f32 %v860_v1, %v859_v0  ;;  %v862_v4 = vld [vmem:[%s15299_s7 + $0x18] sm:$0xff]  ;;  %v863_v5 = vld [vmem:[%s15299_s7 + $0x20] sm:$0xff]  ;;  %v864_v6 = vld [vmem:[%s15299_s7 + $0x28] sm:$0xff]  ;;  %v940_v48 = vrot.slane %v866_v42, %v917_v39  ;;  %v944_v49 = vrot.slane %v866_v42, %v921_v40 }
 0x1a0   : > { %v871_v7 = vadd.f32 %v863_v5, %v862_v4 }
 0x1a1   : > { %v868_v8 = vadd.f32 %v867_v3, %v861_v2 }
 0x1a2   : > { %v872_v9 = vadd.f32 %v871_v7, %v864_v6 }
 0x1a3   : > { %869 = vadd.xlane.f32.xlu0 %v868_v8 }
 0x1a7   : > { %873 = vadd.xlane.f32.xlu0 %v872_v9 }
 0x230   : > { %v870_v10 = vpop.xlane.xlu0 %869 }
 0x231   : > { %v876_v11 = vmul.f32 0.0026041667, %v870_v10 }
 0x233   : > { %v878_v12 = vsub.f32 %v859_v0, %v876_v11  ;;  %v879_v13 = vsub.f32 %v860_v1, %v876_v11  ;;  %v880_v14 = vsub.f32 %v861_v2, %v876_v11 }
 0x234   : > { %v874_v15 = vpop.xlane.xlu0 %873 }
 0x235   : > { %v877_v16 = vmul.f32 0.0026041667, %v874_v15  ;;  %v884_v17 = vmul.f32 %v878_v12, %v878_v12  ;;  %v885_v18 = vmul.f32 %v879_v13, %v879_v13  ;;  %v886_v19 = vmul.f32 %v880_v14, %v880_v14 }
 0x237   : > { %v881_v20 = vsub.f32 %v862_v4, %v877_v16  ;;  %v882_v21 = vsub.f32 %v863_v5, %v877_v16  ;;  %v883_v22 = vsub.f32 %v864_v6, %v877_v16  ;;  %v890_v23 = vadd.f32 %v885_v18, %v884_v17 }
 0x239   : > { %v891_v24 = vadd.f32 %v890_v23, %v886_v19  ;;  %v887_v25 = vmul.f32 %v881_v20, %v881_v20  ;;  %v888_v26 = vmul.f32 %v882_v21, %v882_v21  ;;  %v889_v27 = vmul.f32 %v883_v22, %v883_v22 }
 0x23b   : > { %892 = vadd.xlane.f32.xlu1 %v891_v24  ;;  %v894_v28 = vadd.f32 %v888_v26, %v887_v25 }
 0x23d   : > { %v895_v29 = vadd.f32 %v894_v28, %v889_v27 }
 0x23f   : > { %896 = vadd.xlane.f32.xlu1 %v895_v29 }
 0x2c8   : > { %v893_v30 = vpop.xlane.xlu1 %892 }
 0x2c9   : > { %v898_v31 = vmul.f32 0.0026041667, %v893_v30 }
 0x2cb   : > { %v900_v33 = vadd.f32 1e-05, %v898_v31 }
 0x2cc   : > { %v897_v34 = vpop.xlane.xlu1 %896 }
 0x2cd   : > { %11188 = vrsqrt.f32 %v900_v33  ;;  %v899_v35 = vmul.f32 0.0026041667, %v897_v34 }
 0x2cf   : > { %v901_v37 = vadd.f32 1e-05, %v899_v35 }
 0x2d1   : > { %11190 = vrsqrt.f32 %v901_v37 }
 0x2d7   : > { %v11189_v46 = vpop.eup %11188 }
 0x2d8   : > { %v904_v50 = vmul.f32 %v11189_v46, %v878_v12  ;;  %v905_v51 = vmul.f32 %v11189_v46, %v879_v13  ;;  %v906_v52 = vmul.f32 %v11189_v46, %v880_v14 }
 0x2da   : > { %v926_v53 = vmul.f32 %v914_v43, %v904_v50  ;;  %v927_v54 = vmul.f32 %v918_v44, %v905_v51  ;;  %v928_v55 = vmul.f32 %v922_v45, %v906_v52 }
 0x2db   : > { %v11191_v56 = vpop.eup %11190 }
 0x2dc   : > { %v948_v57 = vadd.f32 %v936_v47, %v926_v53  ;;  %v949_v58 = vadd.f32 %v940_v48, %v927_v54  ;;  %v950_v59 = vadd.f32 %v944_v49, %v928_v55  ;;  %v907_v60 = vmul.f32 %v11191_v56, %v881_v20 }
 0x2dd   : > { %v908_v61 = vmul.f32 %v11191_v56, %v882_v21  ;;  %v909_v62 = vmul.f32 %v11191_v56, %v883_v22 }
 0x2de   : > { %954 = vst [vmem:[#allocation2] sm:$0xff] %v948_v57  ;;  %955 = vst [vmem:[#allocation2 + $0x8] sm:$0xff] %v949_v58  ;;  %v929_v63 = vmul.f32 %v914_v43, %v907_v60 }
 0x2df   : > { %956 = vst [vmem:[#allocation2 + $0x10] sm:$0xff] %v950_v59  ;;  %v930_v0 = vmul.f32 %v918_v44, %v908_v61  ;;  %v931_v1 = vmul.f32 %v922_v45, %v909_v62 }
 0x2e0   : > { %v951_v2 = vadd.f32 %v936_v47, %v929_v63 }
 0x2e1   : > { %v952_v3 = vadd.f32 %v940_v48, %v930_v0  ;;  %v953_v4 = vadd.f32 %v944_v49, %v931_v1 }
 0x2e2   : > { %957 = vst [vmem:[#allocation2 + $0x18] sm:$0xff] %v951_v2 }
 0x2e3   : > { %958 = vst [vmem:[#allocation2 + $0x20] sm:$0xff] %v952_v3  ;;  %959 = vst [vmem:[#allocation2 + $0x28] sm:$0xff] %v953_v4 }
 0x2e4 PF: > { %v1056_v15 = vld [vmem:[%s12344_s17 + $0x8] sm:$0xff]  ;;  %v1070_v16 = vld [vmem:[%s12344_s17 + $0x78] sm:$0xff]  ;;  %v1055_v17 = vld [vmem:[%s12344_s17] sm:$0xff]  ;;  %vm11785_vm0 = vmmov 0   ;;  %vm3309_vm14 = vcmask 64512   ;;  %s15305_s29 = sld [smem:[#allocation40_spill]] }
 0x2e5   : > { %v12400_v5 = vld [vmem:[#allocation2] sm:$0xff]  ;;  %v12402_v6 = vld [vmem:[#allocation2 + $0x8] sm:$0xff]  ;;  %v8964_v18 = vpack.c.bf16 %v1070_v16, %v1056_v15  ;;  %v1069_v19 = vld [vmem:[%s12344_s17 + $0x70] sm:$0xff] }
 0x2e6   : > { %v12404_v7 = vld [vmem:[#allocation2 + $0x10] sm:$0xff]  ;;  %v968_v8 = vadd.f32 %v12402_v6, %v12400_v5  ;;  %v1098_v21 = vld [vmem:[%s12344_s17 + $0x158] sm:$0xff]  ;;  %v8966_v22 = vpack.c.bf16 %v1069_v19, %v1055_v17  ;;  %v1083_v24 = vld [vmem:[%s12344_s17 + $0xe0] sm:$0xff] }
 0x2e7   : > { %v1084_v20 = vld [vmem:[%s12344_s17 + $0xe8] sm:$0xff]  ;;  %v1097_v25 = vld [vmem:[%s12344_s17 + $0x150] sm:$0xff]  ;;  %8965 = vmatprep.subr.bf16.mxu0 %v8964_v18  ;;  %v1126_v27 = vld [vmem:[%s12344_s17 + $0x238] sm:$0xff] }
 0x2e8   : > { %v969_v13 = vadd.f32 %v968_v8, %v12404_v7  ;;  %v8968_v23 = vpack.c.bf16 %v1098_v21, %v1084_v20  ;;  %v1112_v26 = vld [vmem:[%s12344_s17 + $0x1c8] sm:$0xff]  ;;  %8967 = vmatpush1.bf16.msra.mxu0 %v8966_v22  ;;  %v8970_v28 = vpack.c.bf16 %v1097_v25, %v1083_v24  ;;  %v1111_v30 = vld [vmem:[%s12344_s17 + $0x1c0] sm:$0xff]  ;;  %v1125_v31 = vld [vmem:[%s12344_s17 + $0x230] sm:$0xff] }
 0x2e9   : > { %v12408_v9 = vld [vmem:[#allocation2 + $0x18] sm:$0xff]  ;;  %v8972_v29 = vpack.c.bf16 %v1126_v27, %v1112_v26  ;;  %v1140_v32 = vld [vmem:[%s12344_s17 + $0x2a8] sm:$0xff]  ;;  %v8974_v34 = vpack.c.bf16 %v1125_v31, %v1111_v30  ;;  %v1139_v36 = vld [vmem:[%s12344_s17 + $0x2a0] sm:$0xff] }
 0x2ea   : > { %v12410_v10 = vld [vmem:[#allocation2 + $0x20] sm:$0xff]  ;;  %v12412_v11 = vld [vmem:[#allocation2 + $0x28] sm:$0xff]  ;;  %970 = vadd.xlane.f32.xlu0 %v969_v13  ;;  %8969 = vmatprep.subr.bf16.mxu0 %v8968_v23  ;;  %v1153_v37 = vld [vmem:[%s12344_s17 + $0x310] sm:$0xff] }
 0x2eb   : > { %v972_v12 = vadd.f32 %v12410_v10, %v12408_v9  ;;  %v1154_v33 = vld [vmem:[%s12344_s17 + $0x318] sm:$0xff]  ;;  %v1168_v38 = vld [vmem:[%s12344_s17 + $0x388] sm:$0xff]  ;;  %v8978_v42 = vpack.c.bf16 %v1153_v37, %v1139_v36  ;;  %v1167_v43 = vld [vmem:[%s12344_s17 + $0x380] sm:$0xff] }
 0x2ec   : > { %8971 = vmatpush1.bf16.msra.mxu0 %v8970_v28  ;;  %v8976_v35 = vpack.c.bf16 %v1154_v33, %v1140_v32  ;;  %v1182_v39 = vld [vmem:[%s12344_s17 + $0x3f8] sm:$0xff]  ;;  %v1504_v40 = vld [vmem:[%s12344_s17 + $0xe08] sm:$0xff]  ;;  %v1503_v45 = vld [vmem:[%s12344_s17 + $0xe00] sm:$0xff] }
 0x2ed   : > { %v973_v14 = vadd.f32 %v972_v12, %v12412_v11  ;;  %8973 = vmatprep.subr.bf16.mxu0 %v8972_v29  ;;  %v1518_v41 = vld [vmem:[%s12344_s17 + $0xe78] sm:$0xff]  ;;  %v1517_v46 = vld [vmem:[%s12344_s17 + $0xe70] sm:$0xff]  ;;  %v8980_v47 = vpack.c.bf16 %v1182_v39, %v1168_v38  ;;  %v1532_v50 = vld [vmem:[%s12344_s17 + $0xee8] sm:$0xff] }
 0x2ee   : > { %v9028_v44 = vpack.c.bf16 %v1518_v41, %v1504_v40  ;;  %v1181_v48 = vld [vmem:[%s12344_s17 + $0x3f0] sm:$0xff]  ;;  %v9030_v49 = vpack.c.bf16 %v1517_v46, %v1503_v45  ;;  %v1546_v51 = vld [vmem:[%s12344_s17 + $0xf58] sm:$0xff]  ;;  %v1196_v52 = vld [vmem:[%s12344_s17 + $0x468] sm:$0xff] }
 0x2ef   : > { %974 = vadd.xlane.f32.xlu0 %v973_v14  ;;  %v1210_v53 = vld [vmem:[%s12344_s17 + $0x4d8] sm:$0xff]  ;;  %v9032_v54 = vpack.c.bf16 %v1546_v51, %v1532_v50  ;;  %v1531_v55 = vld [vmem:[%s12344_s17 + $0xee0] sm:$0xff]  ;;  %v1545_v56 = vld [vmem:[%s12344_s17 + $0xf50] sm:$0xff]  ;;  %v8982_v57 = vpack.c.bf16 %v1181_v48, %v1167_v43 }
 0x2f0   : > { %8975 = vmatpush1.bf16.msra.mxu0 %v8974_v34  ;;  %9029 = vmatprep.subr.bf16.mxu1 %v9028_v44  ;;  %v1195_v58 = vld [vmem:[%s12344_s17 + $0x460] sm:$0xff]  ;;  %v9034_v59 = vpack.c.bf16 %v1545_v56, %v1531_v55  ;;  %v1560_v60 = vld [vmem:[%s12344_s17 + $0xfc8] sm:$0xff]  ;;  %v1574_v61 = vld [vmem:[%s12344_s17 + $0x1038] sm:$0xff]  ;;  %v8984_v62 = vpack.c.bf16 %v1210_v53, %v1196_v52 }
 0x2f1   : > { %8977 = vmatprep.subr.bf16.mxu0 %v8976_v35  ;;  %9031 = vmatpush1.bf16.msra.mxu1 %v9030_v49  ;;  %v1209_v63 = vld [vmem:[%s12344_s17 + $0x4d0] sm:$0xff]  ;;  %v9036_v0 = vpack.c.bf16 %v1574_v61, %v1560_v60  ;;  %v1559_v1 = vld [vmem:[%s12344_s17 + $0xfc0] sm:$0xff]  ;;  %v1224_v3 = vld [vmem:[%s12344_s17 + $0x548] sm:$0xff] }
 0x2f2   : > { %9033 = vmatprep.subr.bf16.mxu1 %v9032_v54  ;;  %v1573_v2 = vld [vmem:[%s12344_s17 + $0x1030] sm:$0xff]  ;;  %v1238_v4 = vld [vmem:[%s12344_s17 + $0x5b8] sm:$0xff]  ;;  %v8986_v12 = vpack.c.bf16 %v1209_v63, %v1195_v58  ;;  %v1223_v14 = vld [vmem:[%s12344_s17 + $0x540] sm:$0xff] }
 0x2f3   : > { %v9038_v8 = vpack.c.bf16 %v1573_v2, %v1559_v1  ;;  %v8988_v13 = vpack.c.bf16 %v1238_v4, %v1224_v3  ;;  %v1237_v15 = vld [vmem:[%s12344_s17 + $0x5b0] sm:$0xff]  ;;  %v1252_v16 = vld [vmem:[%s12344_s17 + $0x628] sm:$0xff]  ;;  %v1266_v17 = vld [vmem:[%s12344_s17 + $0x698] sm:$0xff] }
 0x2f4   : > { %8979 = vmatpush1.bf16.msra.mxu0 %v8978_v42  ;;  %v8990_v18 = vpack.c.bf16 %v1237_v15, %v1223_v14  ;;  %v8992_v19 = vpack.c.bf16 %v1266_v17, %v1252_v16  ;;  %v1251_v20 = vld [vmem:[%s12344_s17 + $0x620] sm:$0xff]  ;;  %v1265_v21 = vld [vmem:[%s12344_s17 + $0x690] sm:$0xff]  ;;  %v1280_v22 = vld [vmem:[%s12344_s17 + $0x708] sm:$0xff] }
 0x2f5   : > { %8981 = vmatprep.subr.bf16.mxu0 %v8980_v47  ;;  %9035 = vmatpush1.bf16.msra.mxu1 %v9034_v59  ;;  %v1294_v23 = vld [vmem:[%s12344_s17 + $0x778] sm:$0xff]  ;;  %v8994_v24 = vpack.c.bf16 %v1265_v21, %v1251_v20  ;;  %v1279_v26 = vld [vmem:[%s12344_s17 + $0x700] sm:$0xff]  ;;  %v1293_v27 = vld [vmem:[%s12344_s17 + $0x770] sm:$0xff] }
 0x2f6   : > { %9037 = vmatprep.subr.bf16.mxu1 %v9036_v0  ;;  %v8996_v25 = vpack.c.bf16 %v1294_v23, %v1280_v22  ;;  %v1308_v28 = vld [vmem:[%s12344_s17 + $0x7e8] sm:$0xff]  ;;  %v1322_v29 = vld [vmem:[%s12344_s17 + $0x858] sm:$0xff]  ;;  %v8998_v30 = vpack.c.bf16 %v1293_v27, %v1279_v26  ;;  %v1307_v32 = vld [vmem:[%s12344_s17 + $0x7e0] sm:$0xff] }
 0x2f7   : > { %v9000_v31 = vpack.c.bf16 %v1322_v29, %v1308_v28  ;;  %v1321_v33 = vld [vmem:[%s12344_s17 + $0x850] sm:$0xff]  ;;  %v1336_v34 = vld [vmem:[%s12344_s17 + $0x8c8] sm:$0xff]  ;;  %v1350_v35 = vld [vmem:[%s12344_s17 + $0x938] sm:$0xff] }
 0x2f8   : > { %8983 = vmatpush1.bf16.msra.mxu0 %v8982_v57  ;;  %v9002_v36 = vpack.c.bf16 %v1321_v33, %v1307_v32  ;;  %v9004_v37 = vpack.c.bf16 %v1350_v35, %v1336_v34  ;;  %v1335_v38 = vld [vmem:[%s12344_s17 + $0x8c0] sm:$0xff]  ;;  %v1349_v39 = vld [vmem:[%s12344_s17 + $0x930] sm:$0xff]  ;;  %v1602_v56 = vld [vmem:[%s12344_s17 + $0x1118] sm:$0xff] }
 0x2f9   : > { %8985 = vmatprep.subr.bf16.mxu0 %v8984_v62  ;;  %9039 = vmatpush1.bf16.msra.mxu1 %v9038_v8  ;;  %v9006_v40 = vpack.c.bf16 %v1349_v39, %v1335_v38  ;;  %v1364_v58 = vld [vmem:[%s12344_s17 + $0x9a8] sm:$0xff]  ;;  %v1378_v59 = vld [vmem:[%s12344_s17 + $0xa18] sm:$0xff]  ;;  %v1587_v60 = vld [vmem:[%s12344_s17 + $0x10a0] sm:$0xff] }
 0x2fa   : > { %v9008_v61 = vpack.c.bf16 %v1378_v59, %v1364_v58  ;;  %v1601_v62 = vld [vmem:[%s12344_s17 + $0x1110] sm:$0xff]  ;;  %v1363_v63 = vld [vmem:[%s12344_s17 + $0x9a0] sm:$0xff]  ;;  %v1616_v3 = vld [vmem:[%s12344_s17 + $0x1188] sm:$0xff] }
 0x2fb   : > { %v1377_v0 = vld [vmem:[%s12344_s17 + $0xa10] sm:$0xff]  ;;  %v9042_v1 = vpack.c.bf16 %v1601_v62, %v1587_v60  ;;  %v1630_v4 = vld [vmem:[%s12344_s17 + $0x11f8] sm:$0xff]  ;;  %v1615_v14 = vld [vmem:[%s12344_s17 + $0x1180] sm:$0xff]  ;;  %v15241_v60 = vmov 0.0  }
 0x2fc   : > { %8987 = vmatpush1.bf16.msra.mxu0 %v8986_v12  ;;  %v9010_v2 = vpack.c.bf16 %v1377_v0, %v1363_v63  ;;  %v9044_v8 = vpack.c.bf16 %v1630_v4, %v1616_v3  ;;  %v1392_v12 = vld [vmem:[%s12344_s17 + $0xa88] sm:$0xff]  ;;  %v1629_v16 = vld [vmem:[%s12344_s17 + $0x11f0] sm:$0xff]  ;;  %v1391_v17 = vld [vmem:[%s12344_s17 + $0xa80] sm:$0xff]  ;;  %1868 = vmatprep.mubr.f32.mxu1 %v15241_v60 }
 0x2fd   : > { %8989 = vmatprep.subr.bf16.mxu0 %v8988_v13  ;;  %v1406_v13 = vld [vmem:[%s12344_s17 + $0xaf8] sm:$0xff]  ;;  %v1644_v21 = vld [vmem:[%s12344_s17 + $0x1268] sm:$0xff]  ;;  %v1643_v26 = vld [vmem:[%s12344_s17 + $0x1260] sm:$0xff] }
 0x2fe   : > { %v9012_v15 = vpack.c.bf16 %v1406_v13, %v1392_v12  ;;  %v1658_v22 = vld [vmem:[%s12344_s17 + $0x12d8] sm:$0xff]  ;;  %v1657_v28 = vld [vmem:[%s12344_s17 + $0x12d0] sm:$0xff]  ;;  %v1419_v29 = vld [vmem:[%s12344_s17 + $0xb60] sm:$0xff] }
 0x2ff   : > { %v9048_v23 = vpack.c.bf16 %v1658_v22, %v1644_v21  ;;  %v1672_v33 = vld [vmem:[%s12344_s17 + $0x1348] sm:$0xff]  ;;  %v1686_v34 = vld [vmem:[%s12344_s17 + $0x13b8] sm:$0xff]  ;;  %v1671_v38 = vld [vmem:[%s12344_s17 + $0x1340] sm:$0xff] }
 0x300   : > { %8991 = vmatpush1.bf16.msra.mxu0 %v8990_v18  ;;  %v1405_v18 = vld [vmem:[%s12344_s17 + $0xaf0] sm:$0xff]  ;;  %v9052_v35 = vpack.c.bf16 %v1686_v34, %v1672_v33  ;;  %v1072_v58 = vld [vmem:[%s12344_s17 + $0x88] sm:$0xff]  ;;  %v1074_v62 = vld [vmem:[%s12344_s17 + $0x98] sm:$0xff] }
 0x301   : > { %8993 = vmatprep.subr.bf16.mxu0 %v8992_v19  ;;  %v9046_v19 = vpack.c.bf16 %v1629_v16, %v1615_v14  ;;  %v9014_v20 = vpack.c.bf16 %v1405_v18, %v1391_v17  ;;  %v966_v17 = vld [vmem:[%s695_s14] sm:$0x7]  ;;  %v967_v18 = vld [vmem:[%s704_s27] sm:$0x7] }
 0x304   : > { %8995 = vmatpush1.bf16.msra.mxu0 %v8994_v24  ;;  %v1420_v24 = vld [vmem:[%s12344_s17 + $0xb68] sm:$0xff] }
 0x305   : > { %8997 = vmatprep.subr.bf16.mxu0 %v8996_v25  ;;  %v1434_v25 = vld [vmem:[%s12344_s17 + $0xbd8] sm:$0xff] }
 0x306   : > { %v9016_v27 = vpack.c.bf16 %v1434_v25, %v1420_v24 }
 0x308   : > { %8999 = vmatpush1.bf16.msra.mxu0 %v8998_v30  ;;  %v1433_v30 = vld [vmem:[%s12344_s17 + $0xbd0] sm:$0xff] }
 0x309   : > { %9001 = vmatprep.subr.bf16.mxu0 %v9000_v31  ;;  %v9050_v31 = vpack.c.bf16 %v1657_v28, %v1643_v26  ;;  %v9018_v32 = vpack.c.bf16 %v1433_v30, %v1419_v29  ;;  %v1071_v28 = vld [vmem:[%s12344_s17 + $0x80] sm:$0xff]  ;;  %v1073_v30 = vld [vmem:[%s12344_s17 + $0x90] sm:$0xff] }
 0x30a   : > { %v1059_v29 = vld [vmem:[%s12344_s17 + $0x20] sm:$0xff] }
 0x30c   : > { %9003 = vmatpush1.bf16.msra.mxu0 %v9002_v36  ;;  %v1448_v36 = vld [vmem:[%s12344_s17 + $0xc48] sm:$0xff] }
 0x30d   : > { %9005 = vmatprep.subr.bf16.mxu0 %v9004_v37  ;;  %v1462_v37 = vld [vmem:[%s12344_s17 + $0xcb8] sm:$0xff] }
 0x30e   : > { %v9020_v39 = vpack.c.bf16 %v1462_v37, %v1448_v36 }
 0x310   : > { %9007 = vmatpush1.bf16.msra.mxu0 %v9006_v40  ;;  %v1685_v40 = vld [vmem:[%s12344_s17 + $0x13b0] sm:$0xff] }
 0x311   : > { %9009 = vmatprep.subr.bf16.mxu0 %v9008_v61  ;;  %v1060_v61 = vld [vmem:[%s12344_s17 + $0x28] sm:$0xff] }
 0x312   : > { %v9156_v63 = vpack.c.bf16 %v1074_v62, %v1060_v61  ;;  %v1113_v62 = vld [vmem:[%s12344_s17 + $0x1d0] sm:$0xff] }
 0x314   : > { %9011 = vmatpush1.bf16.msra.mxu0 %v9010_v2  ;;  %v15240_v2 = vlaneseq }
 0x315   : > { %9013 = vmatprep.subr.bf16.mxu0 %v9012_v15 }
 0x316   : > { %v12550_v12 = vshrl.u32 %v15240_v2, 7 }
 0x318   : > { %9015 = vmatpush1.bf16.msra.mxu0 %v9014_v20  ;;  %v12553_v14 = vsub.s32 1, %v12550_v12  ;;  %v12556_v15 = vsub.s32 2, %v12550_v12  ;;  %v12559_v16 = vsub.s32 0, %v12550_v12 }
 0x319   : > { %9017 = vmatprep.subr.bf16.mxu0 %v9016_v27 }
 0x31a   : > { %v1023_v20 = vrot.slane %v966_v17, %v12556_v15  ;;  %v1015_v21 = vrot.slane %v966_v17, %v12559_v16  ;;  %v1041_v27 = vrot.slane %v967_v18, %v12553_v14 }
 0x31c   : > { %9019 = vmatpush1.bf16.msra.mxu0 %v9018_v32  ;;  %v1037_v32 = vrot.slane %v967_v18, %v12559_v16 }
 0x31d   : > { %9021 = vmatprep.subr.bf16.mxu0 %v9020_v39  ;;  %v1102_v39 = vld [vmem:[%s12344_s17 + $0x178] sm:$0xff] }
 0x377   : > { %v971_v41 = vpop.xlane.xlu0 %970 }
 0x378   : > { %v977_v42 = vmul.f32 0.0026041667, %v971_v41  ;;  %v1447_v41 = vld [vmem:[%s12344_s17 + $0xc40] sm:$0xff] }
 0x37a   : > { %v12475_v43 = vsub.f32 %v12400_v5, %v977_v42  ;;  %v12478_v44 = vsub.f32 %v12402_v6, %v977_v42  ;;  %v12481_v45 = vsub.f32 %v12404_v7, %v977_v42  ;;  %v1461_v42 = vld [vmem:[%s12344_s17 + $0xcb0] sm:$0xff] }
 0x37c   : > { %v975_v46 = vpop.xlane.xlu0 %974  ;;  %v985_v48 = vmul.f32 %v12475_v43, %v12475_v43  ;;  %v986_v49 = vmul.f32 %v12478_v44, %v12478_v44  ;;  %v987_v5 = vmul.f32 %v12481_v45, %v12481_v45 }
 0x37d   : > { %v978_v47 = vmul.f32 0.0026041667, %v975_v46  ;;  %v9054_v46 = vpack.c.bf16 %v1685_v40, %v1671_v38  ;;  %v1088_v38 = vld [vmem:[%s12344_s17 + $0x108] sm:$0xff] }
 0x37e   : > { %v991_v51 = vadd.f32 %v986_v49, %v985_v48  ;;  %v1700_v48 = vld [vmem:[%s12344_s17 + $0x1428] sm:$0xff]  ;;  %v1714_v49 = vld [vmem:[%s12344_s17 + $0x1498] sm:$0xff] }
 0x37f   : > { %v12490_v6 = vsub.f32 %v12408_v9, %v978_v47  ;;  %v12493_v7 = vsub.f32 %v12410_v10, %v978_v47  ;;  %v12496_v50 = vsub.f32 %v12412_v11, %v978_v47  ;;  %v1588_v11 = vld [vmem:[%s12344_s17 + $0x10a8] sm:$0xff]  ;;  %v9022_v47 = vpack.c.bf16 %v1461_v42, %v1447_v41 }
 0x380   : > { %v992_v52 = vadd.f32 %v991_v51, %v987_v5  ;;  %v9040_v57 = vpack.c.bf16 %v1602_v56, %v1588_v11  ;;  %v9056_v5 = vpack.c.bf16 %v1714_v49, %v1700_v48  ;;  %v1476_v51 = vld [vmem:[%s12344_s17 + $0xd28] sm:$0xff]  ;;  %v1099_v48 = vld [vmem:[%s12344_s17 + $0x160] sm:$0xff] }
 0x381   : > { %v988_v53 = vmul.f32 %v12490_v6, %v12490_v6  ;;  %v989_v9 = vmul.f32 %v12493_v7, %v12493_v7  ;;  %v990_v54 = vmul.f32 %v12496_v50, %v12496_v50  ;;  %9023 = vmatpush1.bf16.msra.mxu0 %v9022_v47  ;;  %v1085_v47 = vld [vmem:[%s12344_s17 + $0xf0] sm:$0xff] }
 0x382   : > { %993 = vadd.xlane.f32.xlu1 %v992_v52  ;;  %9041 = vmatprep.subr.bf16.mxu1 %v9040_v57  ;;  %v1490_v52 = vld [vmem:[%s12344_s17 + $0xd98] sm:$0xff] }
 0x383   : > { %v995_v10 = vadd.f32 %v989_v9, %v988_v53  ;;  %9043 = vmatpush1.bf16.msra.mxu1 %v9042_v1  ;;  %v1699_v53 = vld [vmem:[%s12344_s17 + $0x1420] sm:$0xff]  ;;  %v9024_v9 = vpack.c.bf16 %v1490_v52, %v1476_v51  ;;  %v1058_v57 = vld [vmem:[%s12344_s17 + $0x18] sm:$0xff] }
 0x384   : > { %9045 = vmatprep.subr.bf16.mxu1 %v9044_v8  ;;  %v9060_v59 = vpack.c.bf16 %v1072_v58, %v1058_v57 }
 0x385   : > { %v996_v55 = vadd.f32 %v995_v10, %v990_v54  ;;  %v1713_v54 = vld [vmem:[%s12344_s17 + $0x1490] sm:$0xff]  ;;  %v1475_v10 = vld [vmem:[%s12344_s17 + $0xd20] sm:$0xff]  ;;  %9025 = vmatprep.subr.bf16.mxu0 %v9024_v9 }
 0x386   : > { %v9058_v11 = vpack.c.bf16 %v1713_v54, %v1699_v53  ;;  %v9160_v53 = vpack.c.bf16 %v1102_v39, %v1088_v38  ;;  %v1087_v9 = vld [vmem:[%s12344_s17 + $0x100] sm:$0xff]  ;;  %v1114_v54 = vld [vmem:[%s12344_s17 + $0x1d8] sm:$0xff]  ;;  %v1200_v38 = vld [vmem:[%s12344_s17 + $0x488] sm:$0xff] }
 0x387   : > { %997 = vadd.xlane.f32.xlu1 %v996_v55  ;;  %9047 = vmatpush1.bf16.msra.mxu1 %v9046_v19  ;;  %v1489_v55 = vld [vmem:[%s12344_s17 + $0xd90] sm:$0xff]  ;;  %v1019_v19 = vrot.slane %v966_v17, %v12553_v14  ;;  %v1144_v17 = vld [vmem:[%s12344_s17 + $0x2c8] sm:$0xff]  ;;  %v1214_v39 = vld [vmem:[%s12344_s17 + $0x4f8] sm:$0xff] }
 0x388   : > { %9049 = vmatprep.subr.bf16.mxu1 %v9048_v23  ;;  %v9026_v56 = vpack.c.bf16 %v1489_v55, %v1475_v10  ;;  %v1057_v23 = vld [vmem:[%s12344_s17 + $0x10] sm:$0xff]  ;;  %v9066_v10 = vpack.c.bf16 %v1099_v48, %v1085_v47  ;;  %v1128_v55 = vld [vmem:[%s12344_s17 + $0x248] sm:$0xff]  ;;  %v1211_v48 = vld [vmem:[%s12344_s17 + $0x4e0] sm:$0xff] }
 0x389   : > { %v9062_v37 = vpack.c.bf16 %v1071_v28, %v1057_v23  ;;  %v1155_v23 = vld [vmem:[%s12344_s17 + $0x320] sm:$0xff]  ;;  %v1184_v28 = vld [vmem:[%s12344_s17 + $0x408] sm:$0xff]  ;;  %v1197_v47 = vld [vmem:[%s12344_s17 + $0x470] sm:$0xff] }
 0x38a   : > { %9027 = vmatpush1.bf16.msra.mxu0 %v9026_v56  ;;  %v1130_v56 = vld [vmem:[%s12344_s17 + $0x258] sm:$0xff] }
 0x38b   : > { %9051 = vmatpush1.bf16.msra.mxu1 %v9050_v31  ;;  %9157 = vmatprep.subr.bf16.mxu0 %v9156_v63  ;;  %v1045_v31 = vrot.slane %v967_v18, %v12556_v15  ;;  %v1127_v63 = vld [vmem:[%s12344_s17 + $0x240] sm:$0xff]  ;;  %v1158_v18 = vld [vmem:[%s12344_s17 + $0x338] sm:$0xff] }
 0x38c   : > { %9053 = vmatprep.subr.bf16.mxu1 %v9052_v35  ;;  %v1086_v35 = vld [vmem:[%s12344_s17 + $0xf8] sm:$0xff] }
 0x38f   : > { %9055 = vmatpush1.bf16.msra.mxu1 %v9054_v46 }
 0x390   : > { %9057 = vmatprep.subr.bf16.mxu1 %v9056_v5 }
 0x393   : > { %9059 = vmatpush1.bf16.msra.mxu1 %v9058_v11  ;;  %v1116_v11 = vld [vmem:[%s12344_s17 + $0x1e8] sm:$0xff] }
 0x394   : > { %9061 = vmatprep.subr.bf16.mxu1 %v9060_v59 }
 0x40f   : > { %v994_v0 = vpop.xlane.xlu1 %993 }
 0x410   : > { %v999_v1 = vmul.f32 0.0026041667, %v994_v0  ;;  %v1115_v0 = vld [vmem:[%s12344_s17 + $0x1e0] sm:$0xff] }
 0x412   : > { %v1001_v3 = vadd.f32 1e-05, %v999_v1  ;;  %v9068_v1 = vpack.c.bf16 %v1128_v55, %v1114_v54  ;;  %v9082_v54 = vpack.c.bf16 %v1211_v48, %v1197_v47  ;;  %v1325_v47 = vld [vmem:[%s12344_s17 + $0x870] sm:$0xff]  ;;  %v1338_v48 = vld [vmem:[%s12344_s17 + $0x8d8] sm:$0xff] }
 0x414   : > { %v998_v4 = vpop.xlane.xlu1 %997  ;;  %11197 = vrsqrt.f32 %v1001_v3  ;;  %v9164_v3 = vpack.c.bf16 %v1130_v56, %v1116_v11  ;;  %v1225_v11 = vld [vmem:[%s12344_s17 + $0x550] sm:$0xff]  ;;  %v1239_v56 = vld [vmem:[%s12344_s17 + $0x5c0] sm:$0xff] }
 0x415   : > { %v1000_v8 = vmul.f32 0.0026041667, %v998_v4  ;;  %v1129_v4 = vld [vmem:[%s12344_s17 + $0x250] sm:$0xff] }
 0x417   : > { %v1002_v13 = vadd.f32 1e-05, %v1000_v8  ;;  %v1142_v8 = vld [vmem:[%s12344_s17 + $0x2b8] sm:$0xff] }
 0x419   : > { %11199 = vrsqrt.f32 %v1002_v13  ;;  %v1156_v13 = vld [vmem:[%s12344_s17 + $0x328] sm:$0xff] }
 0x41e   : > { %v11198_v22 = vpop.eup %11197 }
 0x41f   : > { %v1005_v24 = vmul.f32 %v11198_v22, %v12475_v43  ;;  %v1006_v25 = vmul.f32 %v11198_v22, %v12478_v44  ;;  %v1007_v26 = vmul.f32 %v11198_v22, %v12481_v45  ;;  %v1100_v44 = vld [vmem:[%s12344_s17 + $0x168] sm:$0xff]  ;;  %v9158_v45 = vpack.c.bf16 %v1073_v30, %v1059_v29  ;;  %v1141_v22 = vld [vmem:[%s12344_s17 + $0x2b0] sm:$0xff]  ;;  %v1186_v30 = vld [vmem:[%s12344_s17 + $0x418] sm:$0xff] }
 0x420   : > { %v9064_v51 = vpack.c.bf16 %v1100_v44, %v1086_v35  ;;  %v1172_v29 = vld [vmem:[%s12344_s17 + $0x3a8] sm:$0xff]  ;;  %v1171_v35 = vld [vmem:[%s12344_s17 + $0x3a0] sm:$0xff] }
 0x421   : > { %v1028_v33 = vmul.f32 %v1019_v19, %v1006_v25  ;;  %v1029_v34 = vmul.f32 %v1023_v20, %v1007_v26  ;;  %v1027_v43 = vmul.f32 %v1015_v21, %v1005_v24  ;;  %v1143_v24 = vld [vmem:[%s12344_s17 + $0x2c0] sm:$0xff]  ;;  %v9168_v25 = vpack.c.bf16 %v1158_v18, %v1144_v17  ;;  %v1157_v26 = vld [vmem:[%s12344_s17 + $0x330] sm:$0xff] }
 0x422   : > { %v9172_v44 = vpack.c.bf16 %v1186_v30, %v1172_v29  ;;  %v1253_v18 = vld [vmem:[%s12344_s17 + $0x630] sm:$0xff] }
 0x423   : > { %v11200_v36 = vpop.eup %11199  ;;  %v12585_v46 = vadd.f32 %v1041_v27, %v1028_v33  ;;  %v12589_v49 = vadd.f32 %v1045_v31, %v1029_v34  ;;  %v12591_v5 = vadd.f32 %v1037_v32, %v1027_v43  ;;  %v1169_v34 = vld [vmem:[%s12344_s17 + $0x390] sm:$0xff]  ;;  %v1183_v43 = vld [vmem:[%s12344_s17 + $0x400] sm:$0xff] }
 0x424   : > { %v1008_v40 = vmul.f32 %v11200_v36, %v12490_v6  ;;  %v1009_v41 = vmul.f32 %v11200_v36, %v12493_v7  ;;  %v1010_v42 = vmul.f32 %v11200_v36, %v12496_v50  ;;  %v1101_v50 = vld [vmem:[%s12344_s17 + $0x170] sm:$0xff] }
 0x425   : > { %1791 = vmatprep.mubr.f32.mxu0 %v12585_v46  ;;  %1869 = vmatmul.mubr.f32.vlgmr.msra.gmra.mrb[0].mxu1 %v12589_v49  ;;  %v9162_v61 = vpack.c.bf16 %v1101_v50, %v1087_v9  ;;  %v1185_v36 = vld [vmem:[%s12344_s17 + $0x410] sm:$0xff]  ;;  %v1228_v9 = vld [vmem:[%s12344_s17 + $0x568] sm:$0xff]  ;;  %v1242_v50 = vld [vmem:[%s12344_s17 + $0x5d8] sm:$0xff] }
 0x426   : > { %v1031_v6 = vmul.f32 %v1019_v19, %v1009_v41  ;;  %v1032_v52 = vmul.f32 %v1023_v20, %v1010_v42  ;;  %v1030_v7 = vmul.f32 %v1015_v21, %v1008_v40  ;;  %1792 = vmatmul.mubr.f32.vlgmr.msra.gmra.mrb[0].mxu0 %v12591_v5  ;;  %9063 = vmatpush1.bf16.msra.mxu1 %v9062_v37  ;;  %v1198_v37 = vld [vmem:[%s12344_s17 + $0x478] sm:$0xff]  ;;  %v1281_v30 = vld [vmem:[%s12344_s17 + $0x710] sm:$0xff] }
 0x427   : > { %9159 = vmatpush1.bf16.msra.mxu0 %v9158_v45  ;;  %1874 = vmatprep.mubr.f32.mxu1 %v15241_v60  ;;  %v9070_v19 = vpack.c.bf16 %v1127_v63, %v1113_v62  ;;  %v9166_v20 = vpack.c.bf16 %v1129_v4, %v1115_v0  ;;  %v9072_v21 = vpack.c.bf16 %v1156_v13, %v1142_v8  ;;  %v1212_v45 = vld [vmem:[%s12344_s17 + $0x4e8] sm:$0xff]  ;;  %v1241_v63 = vld [vmem:[%s12344_s17 + $0x5d0] sm:$0xff]  ;;  %v1254_v0 = vld [vmem:[%s12344_s17 + $0x638] sm:$0xff] }
 0x428   : > { %v12602_v57 = vadd.f32 %v1041_v27, %v1031_v6  ;;  %v12604_v58 = vadd.f32 %v1045_v31, %v1032_v52  ;;  %v12606_v59 = vadd.f32 %v1037_v32, %v1030_v7  ;;  %9065 = vmatprep.subr.bf16.mxu1 %v9064_v51  ;;  %9161 = vmatprep.subr.bf16.mxu0 %v9160_v53  ;;  %v1170_v27 = vld [vmem:[%s12344_s17 + $0x398] sm:$0xff]  ;;  %v1199_v51 = vld [vmem:[%s12344_s17 + $0x480] sm:$0xff]  ;;  %v1213_v52 = vld [vmem:[%s12344_s17 + $0x4f0] sm:$0xff] }
 0x429   : > { %v9074_v31 = vpack.c.bf16 %v1155_v23, %v1141_v22  ;;  %v9170_v32 = vpack.c.bf16 %v1157_v26, %v1143_v24  ;;  %v9076_v33 = vpack.c.bf16 %v1184_v28, %v1170_v27  ;;  %v9078_v40 = vpack.c.bf16 %v1183_v43, %v1169_v34  ;;  %v1226_v53 = vld [vmem:[%s12344_s17 + $0x558] sm:$0xff]  ;;  %v1240_v7 = vld [vmem:[%s12344_s17 + $0x5c8] sm:$0xff]  ;;  %v1269_v22 = vld [vmem:[%s12344_s17 + $0x6b0] sm:$0xff] }
 0x42a   : > { %1797 = vmatprep.mubr.f32.mxu0 %v12602_v57  ;;  %1875 = vmatmul.mubr.f32.gmra.mrb[2].mxu1 %v12604_v58  ;;  %v9174_v41 = vpack.c.bf16 %v1185_v36, %v1171_v35  ;;  %v9080_v42 = vpack.c.bf16 %v1212_v45, %v1198_v37  ;;  %v9176_v6 = vpack.c.bf16 %v1214_v39, %v1200_v38  ;;  %v1270_v4 = vld [vmem:[%s12344_s17 + $0x6b8] sm:$0xff]  ;;  %v1296_v24 = vld [vmem:[%s12344_s17 + $0x788] sm:$0xff]  ;;  %v1297_v34 = vld [vmem:[%s12344_s17 + $0x790] sm:$0xff] }
 0x42b   : > { %1798 = vmatmul.mubr.f32.gmra.mrb[2].mxu0 %v12606_v59  ;;  %9067 = vmatpush1.bf16.msra.mxu1 %v9066_v10  ;;  %v9178_v10 = vpack.c.bf16 %v1213_v52, %v1199_v51  ;;  %v9084_v55 = vpack.c.bf16 %v1240_v7, %v1226_v53  ;;  %v9180_v62 = vpack.c.bf16 %v1242_v50, %v1228_v9  ;;  %v1282_v23 = vld [vmem:[%s12344_s17 + $0x718] sm:$0xff]  ;;  %v1324_v35 = vld [vmem:[%s12344_s17 + $0x868] sm:$0xff]  ;;  %v1309_v39 = vld [vmem:[%s12344_s17 + $0x7f0] sm:$0xff] }
 0x42c   : > { %1945 = vmatprep.mubr.f32.mxu1 %v12585_v46  ;;  %9163 = vmatpush1.bf16.msra.mxu0 %v9162_v61  ;;  %v1227_v61 = vld [vmem:[%s12344_s17 + $0x560] sm:$0xff]  ;;  %v9086_v8 = vpack.c.bf16 %v1239_v56, %v1225_v11  ;;  %v1298_v26 = vld [vmem:[%s12344_s17 + $0x798] sm:$0xff]  ;;  %v9092_v29 = vpack.c.bf16 %v1296_v24, %v1282_v23  ;;  %v1352_v51 = vld [vmem:[%s12344_s17 + $0x948] sm:$0xff] }
 0x42d   : > { %2099 = vmatprep.mubr.f32.mxu0 %v12585_v46  ;;  %9069 = vmatprep.subr.bf16.mxu1 %v9068_v1  ;;  %v1268_v1 = vld [vmem:[%s12344_s17 + $0x6a8] sm:$0xff]  ;;  %v9182_v13 = vpack.c.bf16 %v1241_v63, %v1227_v61  ;;  %v1310_v43 = vld [vmem:[%s12344_s17 + $0x7f8] sm:$0xff]  ;;  %v9100_v9 = vpack.c.bf16 %v1352_v51, %v1338_v48  ;;  %v1337_v50 = vld [vmem:[%s12344_s17 + $0x8d0] sm:$0xff] }
 0x42e   : > { %9165 = vmatprep.subr.bf16.mxu0 %v9164_v3  ;;  %v1256_v3 = vld [vmem:[%s12344_s17 + $0x648] sm:$0xff]  ;;  %v9088_v17 = vpack.c.bf16 %v1268_v1, %v1254_v0  ;;  %v1326_v36 = vld [vmem:[%s12344_s17 + $0x878] sm:$0xff]  ;;  %v9096_v38 = vpack.c.bf16 %v1324_v35, %v1310_v43  ;;  %v1353_v11 = vld [vmem:[%s12344_s17 + $0x950] sm:$0xff] }
 0x42f   : > { %9071 = vmatpush1.bf16.msra.mxu1 %v9070_v19  ;;  %v1267_v19 = vld [vmem:[%s12344_s17 + $0x6a0] sm:$0xff]  ;;  %v1354_v52 = vld [vmem:[%s12344_s17 + $0x958] sm:$0xff]  ;;  %v1380_v61 = vld [vmem:[%s12344_s17 + $0xa28] sm:$0xff] }
 0x430   : > { %9167 = vmatpush1.bf16.msra.mxu0 %v9166_v20  ;;  %9073 = vmatprep.subr.bf16.mxu1 %v9072_v21  ;;  %v1255_v20 = vld [vmem:[%s12344_s17 + $0x640] sm:$0xff]  ;;  %v9184_v21 = vpack.c.bf16 %v1270_v4, %v1256_v3  ;;  %v9090_v27 = vpack.c.bf16 %v1267_v19, %v1253_v18  ;;  %v1366_v56 = vld [vmem:[%s12344_s17 + $0x9b8] sm:$0xff]  ;;  %v1365_v4 = vld [vmem:[%s12344_s17 + $0x9b0] sm:$0xff] }
 0x431   : > { %9169 = vmatprep.subr.bf16.mxu0 %v9168_v25  ;;  %v1284_v25 = vld [vmem:[%s12344_s17 + $0x728] sm:$0xff]  ;;  %v9186_v28 = vpack.c.bf16 %v1269_v22, %v1255_v20  ;;  %v1382_v63 = vld [vmem:[%s12344_s17 + $0xa38] sm:$0xff]  ;;  %v9104_v3 = vpack.c.bf16 %v1380_v61, %v1366_v56  ;;  %v1381_v18 = vld [vmem:[%s12344_s17 + $0xa30] sm:$0xff] }
 0x432   : > { %v1394_v19 = vld [vmem:[%s12344_s17 + $0xa98] sm:$0xff]  ;;  %v1408_v20 = vld [vmem:[%s12344_s17 + $0xb08] sm:$0xff] }
 0x433   : > { %9075 = vmatpush1.bf16.msra.mxu1 %v9074_v31  ;;  %v1295_v31 = vld [vmem:[%s12344_s17 + $0x780] sm:$0xff]  ;;  %v1410_v22 = vld [vmem:[%s12344_s17 + $0xb18] sm:$0xff] }
 0x434   : > { %9171 = vmatpush1.bf16.msra.mxu0 %v9170_v32  ;;  %9077 = vmatprep.subr.bf16.mxu1 %v9076_v33  ;;  %v1283_v32 = vld [vmem:[%s12344_s17 + $0x720] sm:$0xff]  ;;  %v9188_v33 = vpack.c.bf16 %v1298_v26, %v1284_v25  ;;  %v9094_v37 = vpack.c.bf16 %v1295_v31, %v1281_v30  ;;  %v9108_v25 = vpack.c.bf16 %v1408_v20, %v1394_v19  ;;  %v1393_v26 = vld [vmem:[%s12344_s17 + $0xa90] sm:$0xff]  ;;  %v1422_v31 = vld [vmem:[%s12344_s17 + $0xb78] sm:$0xff] }
 0x435   : > { %9173 = vmatprep.subr.bf16.mxu0 %v9172_v44  ;;  %v1312_v44 = vld [vmem:[%s12344_s17 + $0x808] sm:$0xff]  ;;  %v9190_v45 = vpack.c.bf16 %v1297_v34, %v1283_v32  ;;  %v1409_v30 = vld [vmem:[%s12344_s17 + $0xb10] sm:$0xff]  ;;  %v1438_v34 = vld [vmem:[%s12344_s17 + $0xbf8] sm:$0xff] }
 0x436   : > { %v1436_v32 = vld [vmem:[%s12344_s17 + $0xbe8] sm:$0xff] }
 0x437   : > { %9079 = vmatpush1.bf16.msra.mxu1 %v9078_v40  ;;  %v1323_v40 = vld [vmem:[%s12344_s17 + $0x860] sm:$0xff] }
 0x438   : > { %9175 = vmatpush1.bf16.msra.mxu0 %v9174_v41  ;;  %9081 = vmatprep.subr.bf16.mxu1 %v9080_v42  ;;  %v1311_v41 = vld [vmem:[%s12344_s17 + $0x800] sm:$0xff]  ;;  %v9192_v42 = vpack.c.bf16 %v1326_v36, %v1312_v44  ;;  %v9098_v53 = vpack.c.bf16 %v1323_v40, %v1309_v39  ;;  %v9112_v44 = vpack.c.bf16 %v1436_v32, %v1422_v31  ;;  %v1421_v36 = vld [vmem:[%s12344_s17 + $0xb70] sm:$0xff]  ;;  %v1450_v40 = vld [vmem:[%s12344_s17 + $0xc58] sm:$0xff] }
 0x439   : > { %9177 = vmatprep.subr.bf16.mxu0 %v9176_v6  ;;  %v1340_v6 = vld [vmem:[%s12344_s17 + $0x8e8] sm:$0xff]  ;;  %v9194_v7 = vpack.c.bf16 %v1325_v47, %v1311_v41  ;;  %v1437_v39 = vld [vmem:[%s12344_s17 + $0xbf0] sm:$0xff]  ;;  %v1466_v47 = vld [vmem:[%s12344_s17 + $0xcd8] sm:$0xff] }
 0x43a   : > { %v1464_v41 = vld [vmem:[%s12344_s17 + $0xcc8] sm:$0xff]  ;;  %v1550_v31 = vld [vmem:[%s12344_s17 + $0xf78] sm:$0xff] }
 0x43b   : > { %9083 = vmatpush1.bf16.msra.mxu1 %v9082_v54  ;;  %v1351_v54 = vld [vmem:[%s12344_s17 + $0x940] sm:$0xff] }
 0x43c   : > { %9179 = vmatpush1.bf16.msra.mxu0 %v9178_v10  ;;  %9085 = vmatprep.subr.bf16.mxu1 %v9084_v55  ;;  %v1339_v10 = vld [vmem:[%s12344_s17 + $0x8e0] sm:$0xff]  ;;  %v9196_v55 = vpack.c.bf16 %v1354_v52, %v1340_v6  ;;  %v9102_v0 = vpack.c.bf16 %v1351_v54, %v1337_v50  ;;  %v9116_v6 = vpack.c.bf16 %v1464_v41, %v1450_v40  ;;  %v1449_v52 = vld [vmem:[%s12344_s17 + $0xc50] sm:$0xff]  ;;  %v1478_v54 = vld [vmem:[%s12344_s17 + $0xd38] sm:$0xff] }
 0x43d   : > { %9181 = vmatprep.subr.bf16.mxu0 %v9180_v62  ;;  %v1368_v62 = vld [vmem:[%s12344_s17 + $0x9c8] sm:$0xff]  ;;  %v9198_v1 = vpack.c.bf16 %v1353_v11, %v1339_v10  ;;  %v1465_v50 = vld [vmem:[%s12344_s17 + $0xcd0] sm:$0xff]  ;;  %v1494_v11 = vld [vmem:[%s12344_s17 + $0xdb8] sm:$0xff] }
 0x43e   : > { %v1492_v10 = vld [vmem:[%s12344_s17 + $0xda8] sm:$0xff]  ;;  %v1578_v40 = vld [vmem:[%s12344_s17 + $0x1058] sm:$0xff] }
 0x43f   : > { %9087 = vmatpush1.bf16.msra.mxu1 %v9086_v8  ;;  %v1379_v8 = vld [vmem:[%s12344_s17 + $0xa20] sm:$0xff] }
 0x440   : > { %9183 = vmatpush1.bf16.msra.mxu0 %v9182_v13  ;;  %9089 = vmatprep.subr.bf16.mxu1 %v9088_v17  ;;  %v1367_v13 = vld [vmem:[%s12344_s17 + $0x9c0] sm:$0xff]  ;;  %v9200_v17 = vpack.c.bf16 %v1382_v63, %v1368_v62  ;;  %v9106_v23 = vpack.c.bf16 %v1379_v8, %v1365_v4  ;;  %v9120_v62 = vpack.c.bf16 %v1492_v10, %v1478_v54  ;;  %v1477_v63 = vld [vmem:[%s12344_s17 + $0xd30] sm:$0xff]  ;;  %v1506_v8 = vld [vmem:[%s12344_s17 + $0xe18] sm:$0xff] }
 0x441   : > { %9185 = vmatprep.subr.bf16.mxu0 %v9184_v21  ;;  %v1396_v21 = vld [vmem:[%s12344_s17 + $0xaa8] sm:$0xff]  ;;  %v9202_v24 = vpack.c.bf16 %v1381_v18, %v1367_v13  ;;  %v1493_v4 = vld [vmem:[%s12344_s17 + $0xdb0] sm:$0xff]  ;;  %v1522_v18 = vld [vmem:[%s12344_s17 + $0xe98] sm:$0xff] }
 0x442   : > { %v1520_v13 = vld [vmem:[%s12344_s17 + $0xe88] sm:$0xff]  ;;  %v1606_v54 = vld [vmem:[%s12344_s17 + $0x1138] sm:$0xff] }
 0x443   : > { %9091 = vmatpush1.bf16.msra.mxu1 %v9090_v27  ;;  %v1407_v27 = vld [vmem:[%s12344_s17 + $0xb00] sm:$0xff] }
 0x444   : > { %9187 = vmatpush1.bf16.msra.mxu0 %v9186_v28  ;;  %9093 = vmatprep.subr.bf16.mxu1 %v9092_v29  ;;  %v1395_v28 = vld [vmem:[%s12344_s17 + $0xaa0] sm:$0xff]  ;;  %v9204_v29 = vpack.c.bf16 %v1410_v22, %v1396_v21  ;;  %v9110_v43 = vpack.c.bf16 %v1407_v27, %v1393_v26  ;;  %v9124_v21 = vpack.c.bf16 %v1520_v13, %v1506_v8  ;;  %v1505_v22 = vld [vmem:[%s12344_s17 + $0xe10] sm:$0xff]  ;;  %v1548_v26 = vld [vmem:[%s12344_s17 + $0xf68] sm:$0xff] }
 0x445   : > { %9189 = vmatprep.subr.bf16.mxu0 %v9188_v33  ;;  %v1424_v33 = vld [vmem:[%s12344_s17 + $0xb88] sm:$0xff]  ;;  %v9206_v35 = vpack.c.bf16 %v1409_v30, %v1395_v28  ;;  %v1507_v27 = vld [vmem:[%s12344_s17 + $0xe20] sm:$0xff]  ;;  %v1521_v28 = vld [vmem:[%s12344_s17 + $0xe90] sm:$0xff] }
 0x446   : > { %v1536_v30 = vld [vmem:[%s12344_s17 + $0xf08] sm:$0xff]  ;;  %v1634_v8 = vld [vmem:[%s12344_s17 + $0x1218] sm:$0xff] }
 0x447   : > { %9095 = vmatpush1.bf16.msra.mxu1 %v9094_v37  ;;  %v1435_v37 = vld [vmem:[%s12344_s17 + $0xbe0] sm:$0xff] }
 0x448   : > { %9191 = vmatpush1.bf16.msra.mxu0 %v9190_v45  ;;  %9097 = vmatprep.subr.bf16.mxu1 %v9096_v38  ;;  %v1423_v45 = vld [vmem:[%s12344_s17 + $0xb80] sm:$0xff]  ;;  %v9208_v38 = vpack.c.bf16 %v1438_v34, %v1424_v33  ;;  %v9114_v48 = vpack.c.bf16 %v1435_v37, %v1421_v36  ;;  %v1533_v33 = vld [vmem:[%s12344_s17 + $0xef0] sm:$0xff]  ;;  %v9224_v36 = vpack.c.bf16 %v1550_v31, %v1536_v30 }
 0x449   : > { %9193 = vmatprep.subr.bf16.mxu0 %v9192_v42  ;;  %v1452_v42 = vld [vmem:[%s12344_s17 + $0xc68] sm:$0xff]  ;;  %v9210_v51 = vpack.c.bf16 %v1437_v39, %v1423_v45  ;;  %v1547_v34 = vld [vmem:[%s12344_s17 + $0xf60] sm:$0xff]  ;;  %v1549_v45 = vld [vmem:[%s12344_s17 + $0xf70] sm:$0xff] }
 0x44a   : > { %v1535_v37 = vld [vmem:[%s12344_s17 + $0xf00] sm:$0xff]  ;;  %v1564_v39 = vld [vmem:[%s12344_s17 + $0xfe8] sm:$0xff] }
 0x44b   : > { %9099 = vmatpush1.bf16.msra.mxu1 %v9098_v53  ;;  %v1463_v53 = vld [vmem:[%s12344_s17 + $0xcc0] sm:$0xff] }
 0x44c   : > { %9195 = vmatpush1.bf16.msra.mxu0 %v9194_v7  ;;  %9101 = vmatprep.subr.bf16.mxu1 %v9100_v9  ;;  %v1451_v7 = vld [vmem:[%s12344_s17 + $0xc60] sm:$0xff]  ;;  %v9212_v9 = vpack.c.bf16 %v1466_v47, %v1452_v42  ;;  %v9118_v56 = vpack.c.bf16 %v1463_v53, %v1449_v52  ;;  %v1561_v42 = vld [vmem:[%s12344_s17 + $0xfd0] sm:$0xff]  ;;  %v9228_v52 = vpack.c.bf16 %v1578_v40, %v1564_v39 }
 0x44d   : > { %9197 = vmatprep.subr.bf16.mxu0 %v9196_v55  ;;  %v1480_v55 = vld [vmem:[%s12344_s17 + $0xd48] sm:$0xff]  ;;  %v9214_v61 = vpack.c.bf16 %v1465_v50, %v1451_v7  ;;  %v1575_v47 = vld [vmem:[%s12344_s17 + $0x1040] sm:$0xff]  ;;  %v1577_v7 = vld [vmem:[%s12344_s17 + $0x1050] sm:$0xff] }
 0x44e   : > { %v1563_v53 = vld [vmem:[%s12344_s17 + $0xfe0] sm:$0xff]  ;;  %v1592_v50 = vld [vmem:[%s12344_s17 + $0x10c8] sm:$0xff] }
 0x44f   : > { %9103 = vmatpush1.bf16.msra.mxu1 %v9102_v0  ;;  %v1491_v0 = vld [vmem:[%s12344_s17 + $0xda0] sm:$0xff] }
 0x450   : > { %9199 = vmatpush1.bf16.msra.mxu0 %v9198_v1  ;;  %9105 = vmatprep.subr.bf16.mxu1 %v9104_v3  ;;  %v1479_v1 = vld [vmem:[%s12344_s17 + $0xd40] sm:$0xff]  ;;  %v9216_v3 = vpack.c.bf16 %v1494_v11, %v1480_v55  ;;  %v9122_v19 = vpack.c.bf16 %v1491_v0, %v1477_v63  ;;  %v1589_v55 = vld [vmem:[%s12344_s17 + $0x10b0] sm:$0xff]  ;;  %v9232_v63 = vpack.c.bf16 %v1606_v54, %v1592_v50 }
 0x451   : > { %9201 = vmatprep.subr.bf16.mxu0 %v9200_v17  ;;  %v1508_v17 = vld [vmem:[%s12344_s17 + $0xe28] sm:$0xff]  ;;  %v9218_v20 = vpack.c.bf16 %v1493_v4, %v1479_v1  ;;  %v1603_v11 = vld [vmem:[%s12344_s17 + $0x1120] sm:$0xff]  ;;  %v1605_v1 = vld [vmem:[%s12344_s17 + $0x1130] sm:$0xff] }
 0x452   : > { %v1591_v0 = vld [vmem:[%s12344_s17 + $0x10c0] sm:$0xff]  ;;  %v1620_v4 = vld [vmem:[%s12344_s17 + $0x11a8] sm:$0xff] }
 0x453   : > { %9107 = vmatpush1.bf16.msra.mxu1 %v9106_v23  ;;  %v1519_v23 = vld [vmem:[%s12344_s17 + $0xe80] sm:$0xff] }
 0x454   : > { %9203 = vmatpush1.bf16.msra.mxu0 %v9202_v24  ;;  %9109 = vmatprep.subr.bf16.mxu1 %v9108_v25  ;;  %v9220_v24 = vpack.c.bf16 %v1522_v18, %v1508_v17  ;;  %v1534_v25 = vld [vmem:[%s12344_s17 + $0xef8] sm:$0xff]  ;;  %v1617_v17 = vld [vmem:[%s12344_s17 + $0x1190] sm:$0xff]  ;;  %v1631_v18 = vld [vmem:[%s12344_s17 + $0x1200] sm:$0xff] }
 0x455   : > { %9205 = vmatprep.subr.bf16.mxu0 %v9204_v29  ;;  %v9126_v29 = vpack.c.bf16 %v1519_v23, %v1505_v22  ;;  %v9128_v32 = vpack.c.bf16 %v1548_v26, %v1534_v25  ;;  %v9236_v22 = vpack.c.bf16 %v1634_v8, %v1620_v4  ;;  %v1619_v23 = vld [vmem:[%s12344_s17 + $0x11a0] sm:$0xff]  ;;  %v9142_v25 = vpack.c.bf16 %v1631_v18, %v1617_v17  ;;  %v1648_v26 = vld [vmem:[%s12344_s17 + $0x1288] sm:$0xff] }
 0x456   : > { %v1659_v30 = vld [vmem:[%s12344_s17 + $0x12e0] sm:$0xff]  ;;  %v1104_v17 = vld [vmem:[%s12344_s17 + $0x188] sm:$0xff] }
 0x457   : > { %9111 = vmatpush1.bf16.msra.mxu1 %v9110_v43  ;;  %v9222_v43 = vpack.c.bf16 %v1521_v28, %v1507_v27  ;;  %v1662_v27 = vld [vmem:[%s12344_s17 + $0x12f8] sm:$0xff]  ;;  %v1687_v39 = vld [vmem:[%s12344_s17 + $0x13c0] sm:$0xff] }
 0x458   : > { %9207 = vmatpush1.bf16.msra.mxu0 %v9206_v35  ;;  %9113 = vmatprep.subr.bf16.mxu1 %v9112_v44  ;;  %v1562_v35 = vld [vmem:[%s12344_s17 + $0xfd8] sm:$0xff]  ;;  %v1576_v44 = vld [vmem:[%s12344_s17 + $0x1048] sm:$0xff]  ;;  %v1715_v50 = vld [vmem:[%s12344_s17 + $0x14a0] sm:$0xff] }
 0x459   : > { %9209 = vmatprep.subr.bf16.mxu0 %v9208_v38  ;;  %v9130_v38 = vpack.c.bf16 %v1547_v34, %v1533_v33  ;;  %v9132_v41 = vpack.c.bf16 %v1576_v44, %v1562_v35  ;;  %v1688_v33 = vld [vmem:[%s12344_s17 + $0x13c8] sm:$0xff]  ;;  %v9240_v34 = vpack.c.bf16 %v1662_v27, %v1648_v26  ;;  %v1661_v35 = vld [vmem:[%s12344_s17 + $0x12f0] sm:$0xff]  ;;  %v1075_v4 = vld [vmem:[%s12344_s17 + $0xa0] sm:$0xff] }
 0x45a   : > { %v1103_v26 = vld [vmem:[%s12344_s17 + $0x180] sm:$0xff] }
 0x45b   : > { %9115 = vmatpush1.bf16.msra.mxu1 %v9114_v48  ;;  %v9226_v48 = vpack.c.bf16 %v1549_v45, %v1535_v37  ;;  %v1690_v37 = vld [vmem:[%s12344_s17 + $0x13d8] sm:$0xff] }
 0x45c   : > { %9211 = vmatpush1.bf16.msra.mxu0 %v9210_v51  ;;  %9117 = vmatprep.subr.bf16.mxu1 %v9116_v6  ;;  %v1590_v51 = vld [vmem:[%s12344_s17 + $0x10b8] sm:$0xff]  ;;  %v1604_v6 = vld [vmem:[%s12344_s17 + $0x1128] sm:$0xff] }
 0x45d   : > { %9213 = vmatprep.subr.bf16.mxu0 %v9212_v9  ;;  %v9134_v9 = vpack.c.bf16 %v1575_v47, %v1561_v42  ;;  %v9136_v10 = vpack.c.bf16 %v1604_v6, %v1590_v51  ;;  %v1716_v42 = vld [vmem:[%s12344_s17 + $0x14a8] sm:$0xff]  ;;  %v1689_v51 = vld [vmem:[%s12344_s17 + $0x13d0] sm:$0xff] }
 0x45f   : > { %9119 = vmatpush1.bf16.msra.mxu1 %v9118_v56  ;;  %v9230_v56 = vpack.c.bf16 %v1577_v7, %v1563_v53  ;;  %v1718_v53 = vld [vmem:[%s12344_s17 + $0x14b8] sm:$0xff] }
 0x460   : > { %9215 = vmatpush1.bf16.msra.mxu0 %v9214_v61  ;;  %9121 = vmatprep.subr.bf16.mxu1 %v9120_v62  ;;  %v1618_v61 = vld [vmem:[%s12344_s17 + $0x1198] sm:$0xff]  ;;  %v1632_v62 = vld [vmem:[%s12344_s17 + $0x1208] sm:$0xff] }
 0x461   : > { %9217 = vmatprep.subr.bf16.mxu0 %v9216_v3  ;;  %v9138_v3 = vpack.c.bf16 %v1603_v11, %v1589_v55  ;;  %v9140_v13 = vpack.c.bf16 %v1632_v62, %v1618_v61  ;;  %v1076_v55 = vld [vmem:[%s12344_s17 + $0xa8] sm:$0xff]  ;;  %v1717_v61 = vld [vmem:[%s12344_s17 + $0x14b0] sm:$0xff] }
 0x463   : > { %9123 = vmatpush1.bf16.msra.mxu1 %v9122_v19  ;;  %v9234_v19 = vpack.c.bf16 %v1605_v1, %v1591_v0  ;;  %v1078_v0 = vld [vmem:[%s12344_s17 + $0xb8] sm:$0xff] }
 0x464   : > { %9219 = vmatpush1.bf16.msra.mxu0 %v9218_v20  ;;  %9125 = vmatprep.subr.bf16.mxu1 %v9124_v21  ;;  %v1646_v20 = vld [vmem:[%s12344_s17 + $0x1278] sm:$0xff]  ;;  %v1660_v21 = vld [vmem:[%s12344_s17 + $0x12e8] sm:$0xff] }
 0x465   : > { %9221 = vmatprep.subr.bf16.mxu0 %v9220_v24  ;;  %v1633_v24 = vld [vmem:[%s12344_s17 + $0x1210] sm:$0xff]  ;;  %v9144_v28 = vpack.c.bf16 %v1660_v21, %v1646_v20 }
 0x466   : > { %1946 = vmatmul.mubr.f32.vlgmr.msra.gmra.mrb[4].mxu1 %v12591_v5  ;;  %v9238_v31 = vpack.c.bf16 %v1633_v24, %v1619_v23  ;;  %v1077_v20 = vld [vmem:[%s12344_s17 + $0xb0] sm:$0xff]  ;;  %v1106_v23 = vld [vmem:[%s12344_s17 + $0x198] sm:$0xff] }
 0x467   : > { %1951 = vmatprep.mubr.f32.mxu1 %v12602_v57  ;;  %9127 = vmatpush1.bf16.msra.mxu1 %v9126_v29  ;;  %v1645_v29 = vld [vmem:[%s12344_s17 + $0x1270] sm:$0xff] }
 0x468   : > { %2100 = vmatmul.mubr.f32.vlgmr.msra.gmra.mrb[4].mxu0 %v12591_v5  ;;  %9129 = vmatprep.subr.bf16.mxu1 %v9128_v32  ;;  %v1674_v32 = vld [vmem:[%s12344_s17 + $0x1358] sm:$0xff]  ;;  %v9146_v44 = vpack.c.bf16 %v1659_v30, %v1645_v29  ;;  %v1132_v29 = vld [vmem:[%s12344_s17 + $0x268] sm:$0xff] }
 0x469   : > { %2105 = vmatprep.mubr.f32.mxu0 %v12602_v57  ;;  %9223 = vmatpush1.bf16.msra.mxu0 %v9222_v43  ;;  %v1647_v43 = vld [vmem:[%s12344_s17 + $0x1280] sm:$0xff]  ;;  %v9148_v45 = vpack.c.bf16 %v1688_v33, %v1674_v32  ;;  %v1105_v32 = vld [vmem:[%s12344_s17 + $0x190] sm:$0xff] }
 0x46a   : > { %1952 = vmatmul.mubr.f32.gmra.mrb[6].mxu1 %v12606_v59  ;;  %9225 = vmatprep.subr.bf16.mxu0 %v9224_v36  ;;  %v1676_v36 = vld [vmem:[%s12344_s17 + $0x1368] sm:$0xff]  ;;  %v9242_v40 = vpack.c.bf16 %v1661_v35, %v1647_v43  ;;  %v1134_v43 = vld [vmem:[%s12344_s17 + $0x278] sm:$0xff] }
 0x46b   : > { %9131 = vmatpush1.bf16.msra.mxu1 %v9130_v38  ;;  %2022 = vmatprep.mubr.f32.mxu1 %v15241_v60  ;;  %v1673_v38 = vld [vmem:[%s12344_s17 + $0x1350] sm:$0xff]  ;;  %v9244_v47 = vpack.c.bf16 %v1690_v37, %v1676_v36  ;;  %v1131_v36 = vld [vmem:[%s12344_s17 + $0x260] sm:$0xff] }
 0x46c   : > { %2106 = vmatmul.mubr.f32.gmra.mrb[6].mxu0 %v12606_v59  ;;  %9133 = vmatprep.subr.bf16.mxu1 %v9132_v41  ;;  %v1702_v41 = vld [vmem:[%s12344_s17 + $0x1438] sm:$0xff]  ;;  %v9150_v6 = vpack.c.bf16 %v1687_v39, %v1673_v38  ;;  %v1160_v38 = vld [vmem:[%s12344_s17 + $0x348] sm:$0xff] }
 0x46d   : > { %9227 = vmatpush1.bf16.msra.mxu0 %v9226_v48  ;;  %2176 = vmatprep.mubr.f32.mxu0 %v15241_v60  ;;  %v1675_v48 = vld [vmem:[%s12344_s17 + $0x1360] sm:$0xff]  ;;  %v9152_v7 = vpack.c.bf16 %v1716_v42, %v1702_v41  ;;  %v1133_v41 = vld [vmem:[%s12344_s17 + $0x270] sm:$0xff] }
 0x46e   : > { %9229 = vmatprep.subr.bf16.mxu0 %v9228_v52  ;;  %v1704_v52 = vld [vmem:[%s12344_s17 + $0x1448] sm:$0xff]  ;;  %v9246_v54 = vpack.c.bf16 %v1689_v51, %v1675_v48  ;;  %v1162_v48 = vld [vmem:[%s12344_s17 + $0x358] sm:$0xff] }
 0x46f   : > { %9135 = vmatpush1.bf16.msra.mxu1 %v9134_v9  ;;  %v1701_v9 = vld [vmem:[%s12344_s17 + $0x1430] sm:$0xff]  ;;  %v9248_v11 = vpack.c.bf16 %v1718_v53, %v1704_v52  ;;  %v1159_v52 = vld [vmem:[%s12344_s17 + $0x340] sm:$0xff] }
 0x470   : > { %9137 = vmatprep.subr.bf16.mxu1 %v9136_v10  ;;  %v1062_v10 = vld [vmem:[%s12344_s17 + $0x38] sm:$0xff]  ;;  %v9154_v62 = vpack.c.bf16 %v1715_v50, %v1701_v9  ;;  %v1188_v9 = vld [vmem:[%s12344_s17 + $0x428] sm:$0xff] }
 0x471   : > { %9231 = vmatpush1.bf16.msra.mxu0 %v9230_v56  ;;  %v1703_v56 = vld [vmem:[%s12344_s17 + $0x1440] sm:$0xff]  ;;  %v9252_v1 = vpack.c.bf16 %v1076_v55, %v1062_v10  ;;  %v1161_v10 = vld [vmem:[%s12344_s17 + $0x350] sm:$0xff] }
 0x472   : > { %9233 = vmatprep.subr.bf16.mxu0 %v9232_v63  ;;  %v1064_v63 = vld [vmem:[%s12344_s17 + $0x48] sm:$0xff]  ;;  %v9250_v8 = vpack.c.bf16 %v1717_v61, %v1703_v56  ;;  %v1190_v56 = vld [vmem:[%s12344_s17 + $0x438] sm:$0xff] }
 0x473   : > { %9139 = vmatpush1.bf16.msra.mxu1 %v9138_v3  ;;  %v1061_v3 = vld [vmem:[%s12344_s17 + $0x30] sm:$0xff]  ;;  %v9348_v18 = vpack.c.bf16 %v1078_v0, %v1064_v63  ;;  %v1187_v63 = vld [vmem:[%s12344_s17 + $0x420] sm:$0xff] }
 0x474   : > { %9141 = vmatprep.subr.bf16.mxu1 %v9140_v13  ;;  %v1090_v13 = vld [vmem:[%s12344_s17 + $0x118] sm:$0xff]  ;;  %v9254_v21 = vpack.c.bf16 %v1075_v4, %v1061_v3  ;;  %v1216_v3 = vld [vmem:[%s12344_s17 + $0x508] sm:$0xff] }
 0x475   : > { %9235 = vmatpush1.bf16.msra.mxu0 %v9234_v19  ;;  %v1063_v19 = vld [vmem:[%s12344_s17 + $0x40] sm:$0xff]  ;;  %v9256_v24 = vpack.c.bf16 %v1104_v17, %v1090_v13  ;;  %v1189_v13 = vld [vmem:[%s12344_s17 + $0x430] sm:$0xff] }
 0x476   : > { %9237 = vmatprep.subr.bf16.mxu0 %v9236_v22  ;;  %v1092_v22 = vld [vmem:[%s12344_s17 + $0x128] sm:$0xff]  ;;  %v9350_v27 = vpack.c.bf16 %v1077_v20, %v1063_v19  ;;  %v1218_v19 = vld [vmem:[%s12344_s17 + $0x518] sm:$0xff] }
 0x477   : > { %9143 = vmatpush1.bf16.msra.mxu1 %v9142_v25  ;;  %v1089_v25 = vld [vmem:[%s12344_s17 + $0x110] sm:$0xff]  ;;  %v9352_v30 = vpack.c.bf16 %v1106_v23, %v1092_v22  ;;  %v1215_v22 = vld [vmem:[%s12344_s17 + $0x500] sm:$0xff] }
 0x478   : > { %9145 = vmatprep.subr.bf16.mxu1 %v9144_v28  ;;  %v1118_v28 = vld [vmem:[%s12344_s17 + $0x1f8] sm:$0xff]  ;;  %v9258_v33 = vpack.c.bf16 %v1103_v26, %v1089_v25  ;;  %v1244_v25 = vld [vmem:[%s12344_s17 + $0x5e8] sm:$0xff] }
 0x479   : > { %9239 = vmatpush1.bf16.msra.mxu0 %v9238_v31  ;;  %v1091_v31 = vld [vmem:[%s12344_s17 + $0x120] sm:$0xff]  ;;  %v9260_v35 = vpack.c.bf16 %v1132_v29, %v1118_v28  ;;  %v1217_v28 = vld [vmem:[%s12344_s17 + $0x510] sm:$0xff] }
 0x47a   : > { %9241 = vmatprep.subr.bf16.mxu0 %v9240_v34  ;;  %v1120_v34 = vld [vmem:[%s12344_s17 + $0x208] sm:$0xff]  ;;  %v9354_v37 = vpack.c.bf16 %v1105_v32, %v1091_v31  ;;  %v1246_v31 = vld [vmem:[%s12344_s17 + $0x5f8] sm:$0xff] }
 0x47b   : > { %9147 = vmatpush1.bf16.msra.mxu1 %v9146_v44  ;;  %v1117_v44 = vld [vmem:[%s12344_s17 + $0x1f0] sm:$0xff]  ;;  %v9356_v39 = vpack.c.bf16 %v1134_v43, %v1120_v34  ;;  %v1243_v34 = vld [vmem:[%s12344_s17 + $0x5e0] sm:$0xff] }
 0x47c   : > { %9149 = vmatprep.subr.bf16.mxu1 %v9148_v45  ;;  %v1146_v45 = vld [vmem:[%s12344_s17 + $0x2d8] sm:$0xff]  ;;  %v9262_v42 = vpack.c.bf16 %v1131_v36, %v1117_v44  ;;  %v1272_v44 = vld [vmem:[%s12344_s17 + $0x6c8] sm:$0xff] }
 0x47d   : > { %9243 = vmatpush1.bf16.msra.mxu0 %v9242_v40  ;;  %v1119_v40 = vld [vmem:[%s12344_s17 + $0x200] sm:$0xff]  ;;  %v9264_v51 = vpack.c.bf16 %v1160_v38, %v1146_v45  ;;  %v1245_v45 = vld [vmem:[%s12344_s17 + $0x5f0] sm:$0xff] }
 0x47e   : > { %9245 = vmatprep.subr.bf16.mxu0 %v9244_v47  ;;  %v1148_v47 = vld [vmem:[%s12344_s17 + $0x2e8] sm:$0xff]  ;;  %v9358_v53 = vpack.c.bf16 %v1133_v41, %v1119_v40  ;;  %v1274_v40 = vld [vmem:[%s12344_s17 + $0x6d8] sm:$0xff] }
 0x47f   : > { %9151 = vmatpush1.bf16.msra.mxu1 %v9150_v6  ;;  %v1145_v6 = vld [vmem:[%s12344_s17 + $0x2d0] sm:$0xff]  ;;  %v9360_v50 = vpack.c.bf16 %v1162_v48, %v1148_v47  ;;  %v1271_v47 = vld [vmem:[%s12344_s17 + $0x6c0] sm:$0xff] }
 0x480   : > { %9153 = vmatprep.subr.bf16.mxu1 %v9152_v7  ;;  %v1174_v7 = vld [vmem:[%s12344_s17 + $0x3b8] sm:$0xff]  ;;  %v9266_v55 = vpack.c.bf16 %v1159_v52, %v1145_v6  ;;  %v1300_v6 = vld [vmem:[%s12344_s17 + $0x7a8] sm:$0xff] }
 0x481   : > { %9247 = vmatpush1.bf16.msra.mxu0 %v9246_v54  ;;  %v1147_v54 = vld [vmem:[%s12344_s17 + $0x2e0] sm:$0xff]  ;;  %v9268_v61 = vpack.c.bf16 %v1188_v9, %v1174_v7  ;;  %v1273_v7 = vld [vmem:[%s12344_s17 + $0x6d0] sm:$0xff] }
 0x482   : > { %9249 = vmatprep.subr.bf16.mxu0 %v9248_v11  ;;  %v1176_v11 = vld [vmem:[%s12344_s17 + $0x3c8] sm:$0xff]  ;;  %v9362_v0 = vpack.c.bf16 %v1161_v10, %v1147_v54  ;;  %v1302_v54 = vld [vmem:[%s12344_s17 + $0x7b8] sm:$0xff] }
 0x483   : > { %9155 = vmatpush1.bf16.msra.mxu1 %v9154_v62  ;;  %v1173_v62 = vld [vmem:[%s12344_s17 + $0x3b0] sm:$0xff]  ;;  %v9364_v4 = vpack.c.bf16 %v1190_v56, %v1176_v11  ;;  %v1299_v11 = vld [vmem:[%s12344_s17 + $0x7a0] sm:$0xff] }
 0x484   : > { %9253 = vmatprep.subr.bf16.mxu1 %v9252_v1  ;;  %v1202_v1 = vld [vmem:[%s12344_s17 + $0x498] sm:$0xff]  ;;  %v9270_v17 = vpack.c.bf16 %v1187_v63, %v1173_v62  ;;  %v1328_v62 = vld [vmem:[%s12344_s17 + $0x888] sm:$0xff] }
 0x485   : > { %9251 = vmatpush1.bf16.msra.mxu0 %v9250_v8  ;;  %v1175_v8 = vld [vmem:[%s12344_s17 + $0x3c0] sm:$0xff]  ;;  %v9272_v20 = vpack.c.bf16 %v1216_v3, %v1202_v1  ;;  %v1301_v1 = vld [vmem:[%s12344_s17 + $0x7b0] sm:$0xff] }
 0x486   : > { %2023 = vmatmul.mubr.f32.vlgmr.msra.gmra.mrb[4].mxu1 %v12589_v49  ;;  %9349 = vmatprep.subr.bf16.mxu0 %v9348_v18  ;;  %v1204_v18 = vld [vmem:[%s12344_s17 + $0x4a8] sm:$0xff]  ;;  %v9366_v23 = vpack.c.bf16 %v1189_v13, %v1175_v8  ;;  %v1330_v8 = vld [vmem:[%s12344_s17 + $0x898] sm:$0xff] }
 0x487   : > { %9255 = vmatpush1.bf16.msra.mxu1 %v9254_v21  ;;  %2028 = vmatprep.mubr.f32.mxu1 %v15241_v60  ;;  %v1201_v21 = vld [vmem:[%s12344_s17 + $0x490] sm:$0xff]  ;;  %v9368_v26 = vpack.c.bf16 %v1218_v19, %v1204_v18  ;;  %v1327_v18 = vld [vmem:[%s12344_s17 + $0x880] sm:$0xff] }
 0x488   : > { %2177 = vmatmul.mubr.f32.vlgmr.msra.gmra.mrb[4].mxu0 %v12589_v49  ;;  %9257 = vmatprep.subr.bf16.mxu1 %v9256_v24  ;;  %v1230_v24 = vld [vmem:[%s12344_s17 + $0x578] sm:$0xff]  ;;  %v9274_v29 = vpack.c.bf16 %v1215_v22, %v1201_v21  ;;  %v1356_v21 = vld [vmem:[%s12344_s17 + $0x968] sm:$0xff] }
 0x489   : > { %9351 = vmatpush1.bf16.msra.mxu0 %v9350_v27  ;;  %2182 = vmatprep.mubr.f32.mxu0 %v15241_v60  ;;  %v1203_v27 = vld [vmem:[%s12344_s17 + $0x4a0] sm:$0xff]  ;;  %v9276_v32 = vpack.c.bf16 %v1244_v25, %v1230_v24  ;;  %v1329_v24 = vld [vmem:[%s12344_s17 + $0x890] sm:$0xff] }
 0x48a   : > { %2029 = vmatmul.mubr.f32.gmra.mrb[6].mxu1 %v12604_v58  ;;  %9353 = vmatprep.subr.bf16.mxu0 %v9352_v30  ;;  %v1232_v30 = vld [vmem:[%s12344_s17 + $0x588] sm:$0xff]  ;;  %v9370_v43 = vpack.c.bf16 %v1217_v28, %v1203_v27  ;;  %v1358_v27 = vld [vmem:[%s12344_s17 + $0x978] sm:$0xff] }
 0x48b   : > { %9259 = vmatpush1.bf16.msra.mxu1 %v9258_v33  ;;  %2253 = vmatprep.mubr.f32.mxu1 %v12585_v46  ;;  %v1229_v33 = vld [vmem:[%s12344_s17 + $0x570] sm:$0xff]  ;;  %v9372_v36 = vpack.c.bf16 %v1246_v31, %v1232_v30  ;;  %v1355_v30 = vld [vmem:[%s12344_s17 + $0x960] sm:$0xff] }
 0x48c   : > { %2183 = vmatmul.mubr.f32.gmra.mrb[6].mxu0 %v12604_v58  ;;  %9261 = vmatprep.subr.bf16.mxu1 %v9260_v35  ;;  %v1258_v35 = vld [vmem:[%s12344_s17 + $0x658] sm:$0xff]  ;;  %v9278_v38 = vpack.c.bf16 %v1243_v34, %v1229_v33  ;;  %v1384_v33 = vld [vmem:[%s12344_s17 + $0xa48] sm:$0xff] }
 0x48d   : > { %9355 = vmatpush1.bf16.msra.mxu0 %v9354_v37  ;;  %2407 = vmatprep.mubr.f32.mxu0 %v12585_v46  ;;  %v1231_v37 = vld [vmem:[%s12344_s17 + $0x580] sm:$0xff]  ;;  %v9280_v41 = vpack.c.bf16 %v1272_v44, %v1258_v35  ;;  %v1357_v35 = vld [vmem:[%s12344_s17 + $0x970] sm:$0xff] }
 0x48e   : > { %9357 = vmatprep.subr.bf16.mxu0 %v9356_v39  ;;  %v1260_v39 = vld [vmem:[%s12344_s17 + $0x668] sm:$0xff]  ;;  %v9374_v48 = vpack.c.bf16 %v1245_v45, %v1231_v37  ;;  %v1386_v37 = vld [vmem:[%s12344_s17 + $0xa58] sm:$0xff] }
 0x48f   : > { %9263 = vmatpush1.bf16.msra.mxu1 %v9262_v42  ;;  %v1257_v42 = vld [vmem:[%s12344_s17 + $0x650] sm:$0xff]  ;;  %v9376_v52 = vpack.c.bf16 %v1274_v40, %v1260_v39  ;;  %v1383_v39 = vld [vmem:[%s12344_s17 + $0xa40] sm:$0xff] }
 0x490   : > { %9265 = vmatprep.subr.bf16.mxu1 %v9264_v51  ;;  %v1286_v51 = vld [vmem:[%s12344_s17 + $0x738] sm:$0xff]  ;;  %v9282_v9 = vpack.c.bf16 %v1271_v47, %v1257_v42  ;;  %v1412_v42 = vld [vmem:[%s12344_s17 + $0xb28] sm:$0xff] }
 0x491   : > { %9359 = vmatpush1.bf16.msra.mxu0 %v9358_v53  ;;  %v1259_v53 = vld [vmem:[%s12344_s17 + $0x660] sm:$0xff]  ;;  %v9284_v10 = vpack.c.bf16 %v1300_v6, %v1286_v51  ;;  %v1385_v51 = vld [vmem:[%s12344_s17 + $0xa50] sm:$0xff] }
 0x492   : > { %9361 = vmatprep.subr.bf16.mxu0 %v9360_v50  ;;  %v1288_v50 = vld [vmem:[%s12344_s17 + $0x748] sm:$0xff]  ;;  %v9378_v56 = vpack.c.bf16 %v1273_v7, %v1259_v53  ;;  %v1414_v53 = vld [vmem:[%s12344_s17 + $0xb38] sm:$0xff] }
 0x493   : > { %9267 = vmatpush1.bf16.msra.mxu1 %v9266_v55  ;;  %v1285_v55 = vld [vmem:[%s12344_s17 + $0x730] sm:$0xff]  ;;  %v9380_v63 = vpack.c.bf16 %v1302_v54, %v1288_v50  ;;  %v1411_v50 = vld [vmem:[%s12344_s17 + $0xb20] sm:$0xff] }
 0x494   : > { %9269 = vmatprep.subr.bf16.mxu1 %v9268_v61  ;;  %v1314_v61 = vld [vmem:[%s12344_s17 + $0x818] sm:$0xff]  ;;  %v9286_v3 = vpack.c.bf16 %v1299_v11, %v1285_v55  ;;  %v1440_v55 = vld [vmem:[%s12344_s17 + $0xc08] sm:$0xff] }
 0x495   : > { %9363 = vmatpush1.bf16.msra.mxu0 %v9362_v0  ;;  %v1287_v0 = vld [vmem:[%s12344_s17 + $0x740] sm:$0xff]  ;;  %v9288_v13 = vpack.c.bf16 %v1328_v62, %v1314_v61  ;;  %v1413_v61 = vld [vmem:[%s12344_s17 + $0xb30] sm:$0xff] }
 0x496   : > { %9365 = vmatprep.subr.bf16.mxu0 %v9364_v4  ;;  %v1316_v4 = vld [vmem:[%s12344_s17 + $0x828] sm:$0xff]  ;;  %v9382_v19 = vpack.c.bf16 %v1301_v1, %v1287_v0  ;;  %v1442_v0 = vld [vmem:[%s12344_s17 + $0xc18] sm:$0xff] }
 0x497   : > { %9271 = vmatpush1.bf16.msra.mxu1 %v9270_v17  ;;  %v1313_v17 = vld [vmem:[%s12344_s17 + $0x810] sm:$0xff]  ;;  %v9384_v22 = vpack.c.bf16 %v1330_v8, %v1316_v4  ;;  %v1439_v4 = vld [vmem:[%s12344_s17 + $0xc00] sm:$0xff] }
 0x498   : > { %9273 = vmatprep.subr.bf16.mxu1 %v9272_v20  ;;  %v1342_v20 = vld [vmem:[%s12344_s17 + $0x8f8] sm:$0xff]  ;;  %v9290_v25 = vpack.c.bf16 %v1327_v18, %v1313_v17  ;;  %v1468_v17 = vld [vmem:[%s12344_s17 + $0xce8] sm:$0xff] }
 0x499   : > { %9367 = vmatpush1.bf16.msra.mxu0 %v9366_v23  ;;  %v1315_v23 = vld [vmem:[%s12344_s17 + $0x820] sm:$0xff]  ;;  %v9292_v28 = vpack.c.bf16 %v1356_v21, %v1342_v20  ;;  %v1441_v20 = vld [vmem:[%s12344_s17 + $0xc10] sm:$0xff] }
 0x49a   : > { %9369 = vmatprep.subr.bf16.mxu0 %v9368_v26  ;;  %v1344_v26 = vld [vmem:[%s12344_s17 + $0x908] sm:$0xff]  ;;  %v9386_v31 = vpack.c.bf16 %v1329_v24, %v1315_v23  ;;  %v1470_v23 = vld [vmem:[%s12344_s17 + $0xcf8] sm:$0xff] }
 0x49b   : > { %9275 = vmatpush1.bf16.msra.mxu1 %v9274_v29  ;;  %v1341_v29 = vld [vmem:[%s12344_s17 + $0x8f0] sm:$0xff]  ;;  %v9388_v34 = vpack.c.bf16 %v1358_v27, %v1344_v26  ;;  %v1467_v26 = vld [vmem:[%s12344_s17 + $0xce0] sm:$0xff] }
 0x49c   : > { %9277 = vmatprep.subr.bf16.mxu1 %v9276_v32  ;;  %v1370_v32 = vld [vmem:[%s12344_s17 + $0x9d8] sm:$0xff]  ;;  %v9294_v44 = vpack.c.bf16 %v1355_v30, %v1341_v29  ;;  %v1496_v29 = vld [vmem:[%s12344_s17 + $0xdc8] sm:$0xff] }
 0x49d   : > { %9371 = vmatpush1.bf16.msra.mxu0 %v9370_v43  ;;  %v1343_v43 = vld [vmem:[%s12344_s17 + $0x900] sm:$0xff]  ;;  %v9296_v45 = vpack.c.bf16 %v1384_v33, %v1370_v32  ;;  %v1469_v32 = vld [vmem:[%s12344_s17 + $0xcf0] sm:$0xff] }
 0x49e   : > { %9373 = vmatprep.subr.bf16.mxu0 %v9372_v36  ;;  %v1372_v36 = vld [vmem:[%s12344_s17 + $0x9e8] sm:$0xff]  ;;  %v9390_v40 = vpack.c.bf16 %v1357_v35, %v1343_v43  ;;  %v1498_v43 = vld [vmem:[%s12344_s17 + $0xdd8] sm:$0xff] }
 0x49f   : > { %9279 = vmatpush1.bf16.msra.mxu1 %v9278_v38  ;;  %v1369_v38 = vld [vmem:[%s12344_s17 + $0x9d0] sm:$0xff]  ;;  %v9392_v47 = vpack.c.bf16 %v1386_v37, %v1372_v36  ;;  %v1495_v36 = vld [vmem:[%s12344_s17 + $0xdc0] sm:$0xff] }
 0x4a0   : > { %9281 = vmatprep.subr.bf16.mxu1 %v9280_v41  ;;  %v1398_v41 = vld [vmem:[%s12344_s17 + $0xab8] sm:$0xff]  ;;  %v9298_v6 = vpack.c.bf16 %v1383_v39, %v1369_v38  ;;  %v1524_v38 = vld [vmem:[%s12344_s17 + $0xea8] sm:$0xff] }
 0x4a1   : > { %9375 = vmatpush1.bf16.msra.mxu0 %v9374_v48  ;;  %v1371_v48 = vld [vmem:[%s12344_s17 + $0x9e0] sm:$0xff]  ;;  %v9300_v7 = vpack.c.bf16 %v1412_v42, %v1398_v41  ;;  %v1497_v41 = vld [vmem:[%s12344_s17 + $0xdd0] sm:$0xff] }
 0x4a2   : > { %9377 = vmatprep.subr.bf16.mxu0 %v9376_v52  ;;  %v1400_v52 = vld [vmem:[%s12344_s17 + $0xac8] sm:$0xff]  ;;  %v9394_v54 = vpack.c.bf16 %v1385_v51, %v1371_v48  ;;  %v1526_v48 = vld [vmem:[%s12344_s17 + $0xeb8] sm:$0xff] }
 0x4a3   : > { %9283 = vmatpush1.bf16.msra.mxu1 %v9282_v9  ;;  %v1397_v9 = vld [vmem:[%s12344_s17 + $0xab0] sm:$0xff]  ;;  %v9396_v11 = vpack.c.bf16 %v1414_v53, %v1400_v52  ;;  %v1523_v52 = vld [vmem:[%s12344_s17 + $0xea0] sm:$0xff] }
 0x4a4   : > { %9285 = vmatprep.subr.bf16.mxu1 %v9284_v10  ;;  %v1426_v10 = vld [vmem:[%s12344_s17 + $0xb98] sm:$0xff]  ;;  %v9302_v62 = vpack.c.bf16 %v1411_v50, %v1397_v9  ;;  %v1552_v9 = vld [vmem:[%s12344_s17 + $0xf88] sm:$0xff] }
 0x4a5   : > { %9379 = vmatpush1.bf16.msra.mxu0 %v9378_v56  ;;  %v1399_v56 = vld [vmem:[%s12344_s17 + $0xac0] sm:$0xff]  ;;  %v9304_v1 = vpack.c.bf16 %v1440_v55, %v1426_v10  ;;  %v1525_v10 = vld [vmem:[%s12344_s17 + $0xeb0] sm:$0xff] }
 0x4a6   : > { %9381 = vmatprep.subr.bf16.mxu0 %v9380_v63  ;;  %v1428_v63 = vld [vmem:[%s12344_s17 + $0xba8] sm:$0xff]  ;;  %v9398_v8 = vpack.c.bf16 %v1413_v61, %v1399_v56  ;;  %v1554_v56 = vld [vmem:[%s12344_s17 + $0xf98] sm:$0xff] }
 0x4a7   : > { %9287 = vmatpush1.bf16.msra.mxu1 %v9286_v3  ;;  %v1425_v3 = vld [vmem:[%s12344_s17 + $0xb90] sm:$0xff]  ;;  %v9400_v18 = vpack.c.bf16 %v1442_v0, %v1428_v63  ;;  %v1551_v63 = vld [vmem:[%s12344_s17 + $0xf80] sm:$0xff] }
 0x4a8   : > { %9289 = vmatprep.subr.bf16.mxu1 %v9288_v13  ;;  %v1454_v13 = vld [vmem:[%s12344_s17 + $0xc78] sm:$0xff]  ;;  %v9306_v21 = vpack.c.bf16 %v1439_v4, %v1425_v3  ;;  %v1580_v3 = vld [vmem:[%s12344_s17 + $0x1068] sm:$0xff] }
 0x4a9   : > { %9383 = vmatpush1.bf16.msra.mxu0 %v9382_v19  ;;  %v1427_v19 = vld [vmem:[%s12344_s17 + $0xba0] sm:$0xff]  ;;  %v9308_v24 = vpack.c.bf16 %v1468_v17, %v1454_v13  ;;  %v1553_v13 = vld [vmem:[%s12344_s17 + $0xf90] sm:$0xff] }
 0x4aa   : > { %9385 = vmatprep.subr.bf16.mxu0 %v9384_v22  ;;  %v1456_v22 = vld [vmem:[%s12344_s17 + $0xc88] sm:$0xff]  ;;  %v9402_v27 = vpack.c.bf16 %v1441_v20, %v1427_v19  ;;  %v1582_v19 = vld [vmem:[%s12344_s17 + $0x1078] sm:$0xff] }
 0x4ab   : > { %9291 = vmatpush1.bf16.msra.mxu1 %v9290_v25  ;;  %v1453_v25 = vld [vmem:[%s12344_s17 + $0xc70] sm:$0xff]  ;;  %v9404_v30 = vpack.c.bf16 %v1470_v23, %v1456_v22  ;;  %v1579_v22 = vld [vmem:[%s12344_s17 + $0x1060] sm:$0xff] }
 0x4ac   : > { %9293 = vmatprep.subr.bf16.mxu1 %v9292_v28  ;;  %v1482_v28 = vld [vmem:[%s12344_s17 + $0xd58] sm:$0xff]  ;;  %v9310_v33 = vpack.c.bf16 %v1467_v26, %v1453_v25  ;;  %v1608_v25 = vld [vmem:[%s12344_s17 + $0x1148] sm:$0xff] }
 0x4ad   : > { %9387 = vmatpush1.bf16.msra.mxu0 %v9386_v31  ;;  %v1455_v31 = vld [vmem:[%s12344_s17 + $0xc80] sm:$0xff]  ;;  %v9312_v35 = vpack.c.bf16 %v1496_v29, %v1482_v28  ;;  %v1581_v28 = vld [vmem:[%s12344_s17 + $0x1070] sm:$0xff] }
 0x4ae   : > { %9389 = vmatprep.subr.bf16.mxu0 %v9388_v34  ;;  %v1484_v34 = vld [vmem:[%s12344_s17 + $0xd68] sm:$0xff]  ;;  %v9406_v37 = vpack.c.bf16 %v1469_v32, %v1455_v31  ;;  %v1610_v31 = vld [vmem:[%s12344_s17 + $0x1158] sm:$0xff] }
 0x4af   : > { %9295 = vmatpush1.bf16.msra.mxu1 %v9294_v44  ;;  %v1481_v44 = vld [vmem:[%s12344_s17 + $0xd50] sm:$0xff]  ;;  %v9408_v39 = vpack.c.bf16 %v1498_v43, %v1484_v34  ;;  %v1607_v34 = vld [vmem:[%s12344_s17 + $0x1140] sm:$0xff] }
 0x4b0   : > { %9297 = vmatprep.subr.bf16.mxu1 %v9296_v45  ;;  %v1510_v45 = vld [vmem:[%s12344_s17 + $0xe38] sm:$0xff]  ;;  %v9314_v42 = vpack.c.bf16 %v1495_v36, %v1481_v44  ;;  %v1636_v44 = vld [vmem:[%s12344_s17 + $0x1228] sm:$0xff] }
 0x4b1   : > { %9391 = vmatpush1.bf16.msra.mxu0 %v9390_v40  ;;  %v1483_v40 = vld [vmem:[%s12344_s17 + $0xd60] sm:$0xff]  ;;  %v9316_v51 = vpack.c.bf16 %v1524_v38, %v1510_v45  ;;  %v1609_v45 = vld [vmem:[%s12344_s17 + $0x1150] sm:$0xff] }
 0x4b2   : > { %9393 = vmatprep.subr.bf16.mxu0 %v9392_v47  ;;  %v1512_v47 = vld [vmem:[%s12344_s17 + $0xe48] sm:$0xff]  ;;  %v9410_v53 = vpack.c.bf16 %v1497_v41, %v1483_v40  ;;  %v1638_v40 = vld [vmem:[%s12344_s17 + $0x1238] sm:$0xff] }
 0x4b3   : > { %9299 = vmatpush1.bf16.msra.mxu1 %v9298_v6  ;;  %v1509_v6 = vld [vmem:[%s12344_s17 + $0xe30] sm:$0xff]  ;;  %v9412_v50 = vpack.c.bf16 %v1526_v48, %v1512_v47  ;;  %v1635_v47 = vld [vmem:[%s12344_s17 + $0x1220] sm:$0xff] }
 0x4b4   : > { %9301 = vmatprep.subr.bf16.mxu1 %v9300_v7  ;;  %v1538_v7 = vld [vmem:[%s12344_s17 + $0xf18] sm:$0xff]  ;;  %v9318_v55 = vpack.c.bf16 %v1523_v52, %v1509_v6  ;;  %v1664_v6 = vld [vmem:[%s12344_s17 + $0x1308] sm:$0xff] }
 0x4b5   : > { %9395 = vmatpush1.bf16.msra.mxu0 %v9394_v54  ;;  %v1511_v54 = vld [vmem:[%s12344_s17 + $0xe40] sm:$0xff]  ;;  %v9320_v61 = vpack.c.bf16 %v1552_v9, %v1538_v7  ;;  %v1637_v7 = vld [vmem:[%s12344_s17 + $0x1230] sm:$0xff] }
 0x4b6   : > { %9397 = vmatprep.subr.bf16.mxu0 %v9396_v11  ;;  %v1540_v11 = vld [vmem:[%s12344_s17 + $0xf28] sm:$0xff]  ;;  %v9414_v0 = vpack.c.bf16 %v1525_v10, %v1511_v54  ;;  %v1666_v54 = vld [vmem:[%s12344_s17 + $0x1318] sm:$0xff] }
 0x4b7   : > { %9303 = vmatpush1.bf16.msra.mxu1 %v9302_v62  ;;  %v1537_v62 = vld [vmem:[%s12344_s17 + $0xf10] sm:$0xff]  ;;  %v9416_v4 = vpack.c.bf16 %v1554_v56, %v1540_v11  ;;  %v1663_v11 = vld [vmem:[%s12344_s17 + $0x1300] sm:$0xff] }
 0x4b8   : > { %9305 = vmatprep.subr.bf16.mxu1 %v9304_v1  ;;  %v1566_v1 = vld [vmem:[%s12344_s17 + $0xff8] sm:$0xff]  ;;  %v9322_v17 = vpack.c.bf16 %v1551_v63, %v1537_v62  ;;  %v1692_v62 = vld [vmem:[%s12344_s17 + $0x13e8] sm:$0xff] }
 0x4b9   : > { %9399 = vmatpush1.bf16.msra.mxu0 %v9398_v8  ;;  %v1539_v8 = vld [vmem:[%s12344_s17 + $0xf20] sm:$0xff]  ;;  %v9324_v20 = vpack.c.bf16 %v1580_v3, %v1566_v1  ;;  %v1665_v1 = vld [vmem:[%s12344_s17 + $0x1310] sm:$0xff] }
 0x4ba   : > { %9401 = vmatprep.subr.bf16.mxu0 %v9400_v18  ;;  %v1568_v18 = vld [vmem:[%s12344_s17 + $0x1008] sm:$0xff]  ;;  %v9418_v23 = vpack.c.bf16 %v1553_v13, %v1539_v8  ;;  %v1694_v8 = vld [vmem:[%s12344_s17 + $0x13f8] sm:$0xff] }
 0x4bb   : > { %9307 = vmatpush1.bf16.msra.mxu1 %v9306_v21  ;;  %v1565_v21 = vld [vmem:[%s12344_s17 + $0xff0] sm:$0xff]  ;;  %v9420_v26 = vpack.c.bf16 %v1582_v19, %v1568_v18  ;;  %v1691_v18 = vld [vmem:[%s12344_s17 + $0x13e0] sm:$0xff] }
 0x4bc   : > { %9309 = vmatprep.subr.bf16.mxu1 %v9308_v24  ;;  %v1594_v24 = vld [vmem:[%s12344_s17 + $0x10d8] sm:$0xff]  ;;  %v9326_v29 = vpack.c.bf16 %v1579_v22, %v1565_v21  ;;  %v1720_v21 = vld [vmem:[%s12344_s17 + $0x14c8] sm:$0xff] }
 0x4bd   : > { %9403 = vmatpush1.bf16.msra.mxu0 %v9402_v27  ;;  %v1567_v27 = vld [vmem:[%s12344_s17 + $0x1000] sm:$0xff]  ;;  %v9328_v32 = vpack.c.bf16 %v1608_v25, %v1594_v24  ;;  %v1693_v24 = vld [vmem:[%s12344_s17 + $0x13f0] sm:$0xff] }
 0x4be   : > { %9405 = vmatprep.subr.bf16.mxu0 %v9404_v30  ;;  %v1596_v30 = vld [vmem:[%s12344_s17 + $0x10e8] sm:$0xff]  ;;  %v9422_v43 = vpack.c.bf16 %v1581_v28, %v1567_v27  ;;  %v1722_v27 = vld [vmem:[%s12344_s17 + $0x14d8] sm:$0xff] }
 0x4bf   : > { %9311 = vmatpush1.bf16.msra.mxu1 %v9310_v33  ;;  %v1593_v33 = vld [vmem:[%s12344_s17 + $0x10d0] sm:$0xff]  ;;  %v9424_v36 = vpack.c.bf16 %v1610_v31, %v1596_v30  ;;  %v1719_v30 = vld [vmem:[%s12344_s17 + $0x14c0] sm:$0xff] }
 0x4c0   : > { %9313 = vmatprep.subr.bf16.mxu1 %v9312_v35  ;;  %v1622_v35 = vld [vmem:[%s12344_s17 + $0x11b8] sm:$0xff]  ;;  %v9330_v38 = vpack.c.bf16 %v1607_v34, %v1593_v33  ;;  %v1080_v33 = vld [vmem:[%s12344_s17 + $0xc8] sm:$0xff] }
 0x4c1   : > { %9407 = vmatpush1.bf16.msra.mxu0 %v9406_v37  ;;  %v1595_v37 = vld [vmem:[%s12344_s17 + $0x10e0] sm:$0xff]  ;;  %v9332_v41 = vpack.c.bf16 %v1636_v44, %v1622_v35  ;;  %v1721_v35 = vld [vmem:[%s12344_s17 + $0x14d0] sm:$0xff] }
 0x4c2   : > { %9409 = vmatprep.subr.bf16.mxu0 %v9408_v39  ;;  %v1624_v39 = vld [vmem:[%s12344_s17 + $0x11c8] sm:$0xff]  ;;  %v9426_v48 = vpack.c.bf16 %v1609_v45, %v1595_v37  ;;  %v1082_v37 = vld [vmem:[%s12344_s17 + $0xd8] sm:$0xff] }
 0x4c3   : > { %9315 = vmatpush1.bf16.msra.mxu1 %v9314_v42  ;;  %v1621_v42 = vld [vmem:[%s12344_s17 + $0x11b0] sm:$0xff]  ;;  %v9428_v52 = vpack.c.bf16 %v1638_v40, %v1624_v39  ;;  %v1079_v39 = vld [vmem:[%s12344_s17 + $0xc0] sm:$0xff] }
 0x4c4   : > { %9317 = vmatprep.subr.bf16.mxu1 %v9316_v51  ;;  %v1650_v51 = vld [vmem:[%s12344_s17 + $0x1298] sm:$0xff]  ;;  %v9334_v9 = vpack.c.bf16 %v1635_v47, %v1621_v42  ;;  %v1108_v42 = vld [vmem:[%s12344_s17 + $0x1a8] sm:$0xff] }
 0x4c5   : > { %9411 = vmatpush1.bf16.msra.mxu0 %v9410_v53  ;;  %v1623_v53 = vld [vmem:[%s12344_s17 + $0x11c0] sm:$0xff]  ;;  %v9336_v10 = vpack.c.bf16 %v1664_v6, %v1650_v51  ;;  %v1081_v51 = vld [vmem:[%s12344_s17 + $0xd0] sm:$0xff] }
 0x4c6   : > { %2254 = vmatmul.mubr.f32.vlgmr.msra.gmra.mrb[8].mxu1 %v12591_v5  ;;  %9413 = vmatprep.subr.bf16.mxu0 %v9412_v50  ;;  %v1652_v50 = vld [vmem:[%s12344_s17 + $0x12a8] sm:$0xff]  ;;  %v9430_v56 = vpack.c.bf16 %v1637_v7, %v1623_v53  ;;  %v1110_v53 = vld [vmem:[%s12344_s17 + $0x1b8] sm:$0xff] }
 0x4c7   : > { %2259 = vmatprep.mubr.f32.mxu1 %v12602_v57  ;;  %9319 = vmatpush1.bf16.msra.mxu1 %v9318_v55  ;;  %v1649_v55 = vld [vmem:[%s12344_s17 + $0x1290] sm:$0xff]  ;;  %v9432_v63 = vpack.c.bf16 %v1666_v54, %v1652_v50  ;;  %v1107_v50 = vld [vmem:[%s12344_s17 + $0x1a0] sm:$0xff] }
 0x4c8   : > { %2408 = vmatmul.mubr.f32.vlgmr.msra.gmra.mrb[8].mxu0 %v12591_v5  ;;  %9321 = vmatprep.subr.bf16.mxu1 %v9320_v61  ;;  %v1678_v61 = vld [vmem:[%s12344_s17 + $0x1378] sm:$0xff]  ;;  %v9338_v3 = vpack.c.bf16 %v1663_v11, %v1649_v55  ;;  %v1136_v55 = vld [vmem:[%s12344_s17 + $0x288] sm:$0xff] }
 0x4c9   : > { %2413 = vmatprep.mubr.f32.mxu0 %v12602_v57  ;;  %9415 = vmatpush1.bf16.msra.mxu0 %v9414_v0  ;;  %v1651_v0 = vld [vmem:[%s12344_s17 + $0x12a0] sm:$0xff]  ;;  %v9340_v13 = vpack.c.bf16 %v1692_v62, %v1678_v61  ;;  %v1109_v61 = vld [vmem:[%s12344_s17 + $0x1b0] sm:$0xff] }
 0x4ca   : > { %2260 = vmatmul.mubr.f32.gmra.mrb[10].mxu1 %v12606_v59  ;;  %9417 = vmatprep.subr.bf16.mxu0 %v9416_v4  ;;  %v1680_v4 = vld [vmem:[%s12344_s17 + $0x1388] sm:$0xff]  ;;  %v9434_v19 = vpack.c.bf16 %v1665_v1, %v1651_v0  ;;  %v1138_v0 = vld [vmem:[%s12344_s17 + $0x298] sm:$0xff] }
 0x4cb   : > { %9323 = vmatpush1.bf16.msra.mxu1 %v9322_v17  ;;  %2330 = vmatprep.mubr.f32.mxu1 %v15241_v60  ;;  %v1677_v17 = vld [vmem:[%s12344_s17 + $0x1370] sm:$0xff]  ;;  %v9436_v22 = vpack.c.bf16 %v1694_v8, %v1680_v4  ;;  %v1135_v4 = vld [vmem:[%s12344_s17 + $0x280] sm:$0xff] }
 0x4cc   : > { %2414 = vmatmul.mubr.f32.gmra.mrb[10].mxu0 %v12606_v59  ;;  %9325 = vmatprep.subr.bf16.mxu1 %v9324_v20  ;;  %v1706_v20 = vld [vmem:[%s12344_s17 + $0x1458] sm:$0xff]  ;;  %v9342_v25 = vpack.c.bf16 %v1691_v18, %v1677_v17  ;;  %v1164_v17 = vld [vmem:[%s12344_s17 + $0x368] sm:$0xff] }
 0x4cd   : > { %9419 = vmatpush1.bf16.msra.mxu0 %v9418_v23  ;;  %2484 = vmatprep.mubr.f32.mxu0 %v15241_v60  ;;  %v1679_v23 = vld [vmem:[%s12344_s17 + $0x1380] sm:$0xff]  ;;  %v9344_v28 = vpack.c.bf16 %v1720_v21, %v1706_v20  ;;  %v1137_v20 = vld [vmem:[%s12344_s17 + $0x290] sm:$0xff] }
 0x4ce   : > { %9421 = vmatprep.subr.bf16.mxu0 %v9420_v26  ;;  %v1708_v26 = vld [vmem:[%s12344_s17 + $0x1468] sm:$0xff]  ;;  %v9438_v31 = vpack.c.bf16 %v1693_v24, %v1679_v23  ;;  %v1166_v23 = vld [vmem:[%s12344_s17 + $0x378] sm:$0xff] }
 0x4cf   : > { %9327 = vmatpush1.bf16.msra.mxu1 %v9326_v29  ;;  %v1705_v29 = vld [vmem:[%s12344_s17 + $0x1450] sm:$0xff]  ;;  %v9440_v34 = vpack.c.bf16 %v1722_v27, %v1708_v26  ;;  %v1163_v26 = vld [vmem:[%s12344_s17 + $0x360] sm:$0xff] }
 0x4d0   : > { %9329 = vmatprep.subr.bf16.mxu1 %v9328_v32  ;;  %v1066_v32 = vld [vmem:[%s12344_s17 + $0x58] sm:$0xff]  ;;  %v9346_v44 = vpack.c.bf16 %v1719_v30, %v1705_v29  ;;  %v1192_v29 = vld [vmem:[%s12344_s17 + $0x448] sm:$0xff] }
 0x4d1   : > { %9423 = vmatpush1.bf16.msra.mxu0 %v9422_v43  ;;  %v1707_v43 = vld [vmem:[%s12344_s17 + $0x1460] sm:$0xff]  ;;  %v9444_v45 = vpack.c.bf16 %v1080_v33, %v1066_v32  ;;  %v1165_v32 = vld [vmem:[%s12344_s17 + $0x370] sm:$0xff] }
 0x4d2   : > { %9425 = vmatprep.subr.bf16.mxu0 %v9424_v36  ;;  %v1068_v36 = vld [vmem:[%s12344_s17 + $0x68] sm:$0xff]  ;;  %v9442_v40 = vpack.c.bf16 %v1721_v35, %v1707_v43  ;;  %v1194_v43 = vld [vmem:[%s12344_s17 + $0x458] sm:$0xff] }
 0x4d3   : > { %9331 = vmatpush1.bf16.msra.mxu1 %v9330_v38  ;;  %v1065_v38 = vld [vmem:[%s12344_s17 + $0x50] sm:$0xff]  ;;  %v9540_v47 = vpack.c.bf16 %v1082_v37, %v1068_v36  ;;  %v1206_v37 = vld [vmem:[%s12344_s17 + $0x4b8] sm:$0xff] }
 0x4d4   : > { %9333 = vmatprep.subr.bf16.mxu1 %v9332_v41  ;;  %v1094_v41 = vld [vmem:[%s12344_s17 + $0x138] sm:$0xff]  ;;  %v9446_v6 = vpack.c.bf16 %v1079_v39, %v1065_v38  ;;  %v1179_v39 = vld [vmem:[%s12344_s17 + $0x3e0] sm:$0xff] }
 0x4d5   : > { %9427 = vmatpush1.bf16.msra.mxu0 %v9426_v48  ;;  %v1067_v48 = vld [vmem:[%s12344_s17 + $0x60] sm:$0xff]  ;;  %v9448_v7 = vpack.c.bf16 %v1108_v42, %v1094_v41  ;;  %v1208_v42 = vld [vmem:[%s12344_s17 + $0x4c8] sm:$0xff] }
 0x4d6   : > { %9429 = vmatprep.subr.bf16.mxu0 %v9428_v52  ;;  %v1096_v52 = vld [vmem:[%s12344_s17 + $0x148] sm:$0xff]  ;;  %v9542_v54 = vpack.c.bf16 %v1081_v51, %v1067_v48  ;;  %v1205_v51 = vld [vmem:[%s12344_s17 + $0x4b0] sm:$0xff] }
 0x4d7   : > { %9335 = vmatpush1.bf16.msra.mxu1 %v9334_v9  ;;  %v1093_v9 = vld [vmem:[%s12344_s17 + $0x130] sm:$0xff]  ;;  %v9544_v11 = vpack.c.bf16 %v1110_v53, %v1096_v52  ;;  %v1234_v53 = vld [vmem:[%s12344_s17 + $0x598] sm:$0xff] }
 0x4d8   : > { %9337 = vmatprep.subr.bf16.mxu1 %v9336_v10  ;;  %v1122_v10 = vld [vmem:[%s12344_s17 + $0x218] sm:$0xff]  ;;  %v9450_v62 = vpack.c.bf16 %v1107_v50, %v1093_v9  ;;  %v1207_v50 = vld [vmem:[%s12344_s17 + $0x4c0] sm:$0xff] }
 0x4d9   : > { %9431 = vmatpush1.bf16.msra.mxu0 %v9430_v56  ;;  %v1095_v56 = vld [vmem:[%s12344_s17 + $0x140] sm:$0xff]  ;;  %v9452_v1 = vpack.c.bf16 %v1136_v55, %v1122_v10  ;;  %v1236_v55 = vld [vmem:[%s12344_s17 + $0x5a8] sm:$0xff] }
 0x4da   : > { %9433 = vmatprep.subr.bf16.mxu0 %v9432_v63  ;;  %v1124_v63 = vld [vmem:[%s12344_s17 + $0x228] sm:$0xff]  ;;  %v9546_v8 = vpack.c.bf16 %v1109_v61, %v1095_v56  ;;  %v1233_v61 = vld [vmem:[%s12344_s17 + $0x590] sm:$0xff] }
 0x4db   : > { %9339 = vmatpush1.bf16.msra.mxu1 %v9338_v3  ;;  %v1121_v3 = vld [vmem:[%s12344_s17 + $0x210] sm:$0xff]  ;;  %v9548_v18 = vpack.c.bf16 %v1138_v0, %v1124_v63 }
 0x4dc   : > { %9341 = vmatprep.subr.bf16.mxu1 %v9340_v13  ;;  %v1150_v13 = vld [vmem:[%s12344_s17 + $0x2f8] sm:$0xff]  ;;  %v9454_v21 = vpack.c.bf16 %v1135_v4, %v1121_v3  ;;  %v1276_v4 = vld [vmem:[%s12344_s17 + $0x6e8] sm:$0xff] }
 0x4dd   : > { %9435 = vmatpush1.bf16.msra.mxu0 %v9434_v19  ;;  %v1123_v19 = vld [vmem:[%s12344_s17 + $0x220] sm:$0xff]  ;;  %v9456_v24 = vpack.c.bf16 %v1164_v17, %v1150_v13  ;;  %v1262_v3 = vld [vmem:[%s12344_s17 + $0x678] sm:$0xff] }
 0x4de   : > { %9437 = vmatprep.subr.bf16.mxu0 %v9436_v22  ;;  %v1152_v22 = vld [vmem:[%s12344_s17 + $0x308] sm:$0xff]  ;;  %v9550_v27 = vpack.c.bf16 %v1137_v20, %v1123_v19  ;;  %v1235_v19 = vld [vmem:[%s12344_s17 + $0x5a0] sm:$0xff]  ;;  %v1249_v20 = vld [vmem:[%s12344_s17 + $0x610] sm:$0xff] }
 0x4df   : > { %9343 = vmatpush1.bf16.msra.mxu1 %v9342_v25  ;;  %v1149_v25 = vld [vmem:[%s12344_s17 + $0x2f0] sm:$0xff]  ;;  %v9552_v30 = vpack.c.bf16 %v1166_v23, %v1152_v22  ;;  %v1264_v23 = vld [vmem:[%s12344_s17 + $0x688] sm:$0xff] }
 0x4e0   : > { %9345 = vmatprep.subr.bf16.mxu1 %v9344_v28  ;;  %v1178_v28 = vld [vmem:[%s12344_s17 + $0x3d8] sm:$0xff]  ;;  %v9458_v33 = vpack.c.bf16 %v1163_v26, %v1149_v25  ;;  %v9472_v25 = vpack.c.bf16 %v1276_v4, %v1262_v3  ;;  %v1261_v26 = vld [vmem:[%s12344_s17 + $0x670] sm:$0xff] }
 0x4e1   : > { %9439 = vmatpush1.bf16.msra.mxu0 %v9438_v31  ;;  %v1151_v31 = vld [vmem:[%s12344_s17 + $0x300] sm:$0xff]  ;;  %v9460_v35 = vpack.c.bf16 %v1192_v29, %v1178_v28  ;;  %v1362_v3 = vld [vmem:[%s12344_s17 + $0x998] sm:$0xff] }
 0x4e2   : > { %9441 = vmatprep.subr.bf16.mxu0 %v9440_v34  ;;  %v1180_v34 = vld [vmem:[%s12344_s17 + $0x3e8] sm:$0xff]  ;;  %v9554_v36 = vpack.c.bf16 %v1165_v32, %v1151_v31  ;;  %v1290_v31 = vld [vmem:[%s12344_s17 + $0x758] sm:$0xff] }
 0x4e3   : > { %9347 = vmatpush1.bf16.msra.mxu1 %v9346_v44  ;;  %v1191_v44 = vld [vmem:[%s12344_s17 + $0x440] sm:$0xff]  ;;  %v9556_v38 = vpack.c.bf16 %v1194_v43, %v1180_v34  ;;  %v1304_v32 = vld [vmem:[%s12344_s17 + $0x7c8] sm:$0xff] }
 0x4e4   : > { %9445 = vmatprep.subr.bf16.mxu1 %v9444_v45  ;;  %v1220_v45 = vld [vmem:[%s12344_s17 + $0x528] sm:$0xff] }
 0x4e5   : > { %9443 = vmatpush1.bf16.msra.mxu0 %v9442_v40  ;;  %v1193_v40 = vld [vmem:[%s12344_s17 + $0x450] sm:$0xff]  ;;  %v9464_v48 = vpack.c.bf16 %v1220_v45, %v1206_v37  ;;  %v1292_v45 = vld [vmem:[%s12344_s17 + $0x768] sm:$0xff] }
 0x4e6   : > { %2331 = vmatmul.mubr.f32.vlgmr.msra.gmra.mrb[8].mxu1 %v12589_v49  ;;  %9541 = vmatprep.subr.bf16.mxu0 %v9540_v47  ;;  %v1222_v47 = vld [vmem:[%s12344_s17 + $0x538] sm:$0xff]  ;;  %v9558_v52 = vpack.c.bf16 %v1193_v40, %v1179_v39  ;;  %v9476_v39 = vpack.c.bf16 %v1304_v32, %v1290_v31  ;;  %v1289_v40 = vld [vmem:[%s12344_s17 + $0x750] sm:$0xff] }
 0x4e7   : > { %9447 = vmatpush1.bf16.msra.mxu1 %v9446_v6  ;;  %2336 = vmatprep.mubr.f32.mxu1 %v15241_v60  ;;  %v1219_v6 = vld [vmem:[%s12344_s17 + $0x520] sm:$0xff]  ;;  %v9560_v9 = vpack.c.bf16 %v1222_v47, %v1208_v42  ;;  %v1318_v47 = vld [vmem:[%s12344_s17 + $0x838] sm:$0xff] }
 0x4e8   : > { %2485 = vmatmul.mubr.f32.vlgmr.msra.gmra.mrb[8].mxu0 %v12589_v49  ;;  %9449 = vmatprep.subr.bf16.mxu1 %v9448_v7  ;;  %v1248_v7 = vld [vmem:[%s12344_s17 + $0x608] sm:$0xff]  ;;  %v9466_v10 = vpack.c.bf16 %v1219_v6, %v1205_v51  ;;  %v1291_v6 = vld [vmem:[%s12344_s17 + $0x760] sm:$0xff]  ;;  %v1402_v32 = vld [vmem:[%s12344_s17 + $0xad8] sm:$0xff] }
 0x4e9   : > { %9543 = vmatpush1.bf16.msra.mxu0 %v9542_v54  ;;  %2490 = vmatprep.mubr.f32.mxu0 %v15241_v60  ;;  %v1221_v54 = vld [vmem:[%s12344_s17 + $0x530] sm:$0xff]  ;;  %v9468_v56 = vpack.c.bf16 %v1248_v7, %v1234_v53  ;;  %v1320_v7 = vld [vmem:[%s12344_s17 + $0x848] sm:$0xff] }
 0x4ea   : > { %2337 = vmatmul.mubr.f32.gmra.mrb[10].mxu1 %v12604_v58  ;;  %9545 = vmatprep.subr.bf16.mxu0 %v9544_v11  ;;  %v1250_v11 = vld [vmem:[%s12344_s17 + $0x618] sm:$0xff] }
 0x4eb   : > { %9451 = vmatpush1.bf16.msra.mxu1 %v9450_v62  ;;  %2561 = vmatprep.mubr.f32.mxu1 %v12585_v46  ;;  %v1247_v62 = vld [vmem:[%s12344_s17 + $0x600] sm:$0xff] }
 0x4ec   : > { %2491 = vmatmul.mubr.f32.gmra.mrb[10].mxu0 %v12604_v58  ;;  %9453 = vmatprep.subr.bf16.mxu1 %v9452_v1  ;;  %v9562_v1 = vpack.c.bf16 %v1221_v54, %v1207_v50  ;;  %v9470_v22 = vpack.c.bf16 %v1247_v62, %v1233_v61  ;;  %v1317_v54 = vld [vmem:[%s12344_s17 + $0x830] sm:$0xff]  ;;  %v1319_v62 = vld [vmem:[%s12344_s17 + $0x840] sm:$0xff] }
 0x4ed   : > { %9547 = vmatpush1.bf16.msra.mxu0 %v9546_v8  ;;  %2715 = vmatprep.mubr.f32.mxu0 %v12585_v46  ;;  %v1177_v46 = vld [vmem:[%s12344_s17 + $0x3d0] sm:$0xff] }
 0x4ee   : > { %9549 = vmatprep.subr.bf16.mxu0 %v9548_v18  ;;  %v9462_v41 = vpack.c.bf16 %v1191_v44, %v1177_v46  ;;  %v9564_v18 = vpack.c.bf16 %v1250_v11, %v1236_v55  ;;  %v1263_v46 = vld [vmem:[%s12344_s17 + $0x680] sm:$0xff]  ;;  %v1277_v44 = vld [vmem:[%s12344_s17 + $0x6f0] sm:$0xff]  ;;  %v1346_v11 = vld [vmem:[%s12344_s17 + $0x918] sm:$0xff] }
 0x4ef   : > { %9455 = vmatpush1.bf16.msra.mxu1 %v9454_v21  ;;  %v9570_v42 = vpack.c.bf16 %v1277_v44, %v1263_v46  ;;  %v1389_v46 = vld [vmem:[%s12344_s17 + $0xa70] sm:$0xff] }
 0x4f0   : > { %9457 = vmatprep.subr.bf16.mxu1 %v9456_v24  ;;  %v1278_v24 = vld [vmem:[%s12344_s17 + $0x6f8] sm:$0xff] }
 0x4f1   : > { %9551 = vmatpush1.bf16.msra.mxu0 %v9550_v27  ;;  %v1275_v27 = vld [vmem:[%s12344_s17 + $0x6e0] sm:$0xff] }
 0x4f2   : > { %9553 = vmatprep.subr.bf16.mxu0 %v9552_v30  ;;  %v9566_v30 = vpack.c.bf16 %v1249_v20, %v1235_v19  ;;  %v9474_v37 = vpack.c.bf16 %v1275_v27, %v1261_v26  ;;  %v1374_v19 = vld [vmem:[%s12344_s17 + $0x9f8] sm:$0xff]  ;;  %v1388_v20 = vld [vmem:[%s12344_s17 + $0xa68] sm:$0xff] }
 0x4f3   : > { %9459 = vmatpush1.bf16.msra.mxu1 %v9458_v33  ;;  %v1376_v26 = vld [vmem:[%s12344_s17 + $0xa08] sm:$0xff]  ;;  %v1390_v27 = vld [vmem:[%s12344_s17 + $0xa78] sm:$0xff] }
 0x4f4   : > { %9461 = vmatprep.subr.bf16.mxu1 %v9460_v35  ;;  %v9568_v35 = vpack.c.bf16 %v1278_v24, %v1264_v23  ;;  %v1347_v23 = vld [vmem:[%s12344_s17 + $0x920] sm:$0xff]  ;;  %v1361_v24 = vld [vmem:[%s12344_s17 + $0x990] sm:$0xff] }
 0x4f5   : > { %9555 = vmatpush1.bf16.msra.mxu0 %v9554_v36  ;;  %v9582_v31 = vpack.c.bf16 %v1361_v24, %v1347_v23  ;;  %v1473_v23 = vld [vmem:[%s12344_s17 + $0xd10] sm:$0xff] }
 0x4f6   : > { %9557 = vmatprep.subr.bf16.mxu0 %v9556_v38  ;;  %v1306_v38 = vld [vmem:[%s12344_s17 + $0x7d8] sm:$0xff] }
 0x4f7   : > { %9463 = vmatpush1.bf16.msra.mxu1 %v9462_v41  ;;  %v1303_v41 = vld [vmem:[%s12344_s17 + $0x7c0] sm:$0xff]  ;;  %v9572_v51 = vpack.c.bf16 %v1306_v38, %v1292_v45  ;;  %v1418_v45 = vld [vmem:[%s12344_s17 + $0xb58] sm:$0xff] }
 0x4f8   : > { %9465 = vmatprep.subr.bf16.mxu1 %v9464_v48  ;;  %v1870_v63 = vpop.f32.mrb[0].mxu1  ;;  %v1332_v48 = vld [vmem:[%s12344_s17 + $0x8a8] sm:$0xff]  ;;  %v9478_v53 = vpack.c.bf16 %v1303_v41, %v1289_v40  ;;  %v1415_v40 = vld [vmem:[%s12344_s17 + $0xb40] sm:$0xff] }
 0x4f9   : > { %9559 = vmatpush1.bf16.msra.mxu0 %v9558_v52  ;;  %v1793_v0 = vpop.f32.mrb[0].mxu0  ;;  %v1872_v13 = vpop.f32.mrb[1].mxu1  ;;  %v1305_v52 = vld [vmem:[%s12344_s17 + $0x7d0] sm:$0xff]  ;;  %v9480_v50 = vpack.c.bf16 %v1332_v48, %v1318_v47  ;;  %v1444_v47 = vld [vmem:[%s12344_s17 + $0xc28] sm:$0xff] }
 0x4fa   : > { %v13066_v8 = vadd.f32 %v1870_v63, %v1793_v0  ;;  %9561 = vmatprep.subr.bf16.mxu0 %v9560_v9  ;;  %v1795_v17 = vpop.f32.mrb[1].mxu0  ;;  %v1334_v9 = vld [vmem:[%s12344_s17 + $0x8b8] sm:$0xff]  ;;  %v9574_v55 = vpack.c.bf16 %v1305_v52, %v1291_v6  ;;  %v1333_v63 = vld [vmem:[%s12344_s17 + $0x8b0] sm:$0xff] }
 0x4fb   : > { %9467 = vmatpush1.bf16.msra.mxu1 %v9466_v10  ;;  %v13070_v21 = vadd.f32 %v1872_v13, %v1795_v17  ;;  %v1331_v10 = vld [vmem:[%s12344_s17 + $0x8a0] sm:$0xff]  ;;  %v9576_v61 = vpack.c.bf16 %v1334_v9, %v1320_v7  ;;  %v1345_v13 = vld [vmem:[%s12344_s17 + $0x910] sm:$0xff]  ;;  %v1446_v7 = vld [vmem:[%s12344_s17 + $0xc38] sm:$0xff] }
 0x4fc   : > { %9469 = vmatprep.subr.bf16.mxu1 %v9468_v56  ;;  %v1360_v56 = vld [vmem:[%s12344_s17 + $0x988] sm:$0xff]  ;;  %v9482_v0 = vpack.c.bf16 %v1331_v10, %v1317_v54  ;;  %v1359_v17 = vld [vmem:[%s12344_s17 + $0x980] sm:$0xff]  ;;  %v1417_v6 = vld [vmem:[%s12344_s17 + $0xb50] sm:$0xff] }
 0x4fd   : > { %9563 = vmatpush1.bf16.msra.mxu0 %v9562_v1  ;;  %v1876_v28 = vpop.f32.mrb[2].mxu1  ;;  %v1348_v1 = vld [vmem:[%s12344_s17 + $0x928] sm:$0xff]  ;;  %v9484_v4 = vpack.c.bf16 %v1360_v56, %v1346_v11  ;;  %v1443_v54 = vld [vmem:[%s12344_s17 + $0xc20] sm:$0xff] }
 0x4fe   : > { %v1799_v29 = vpop.f32.mrb[2].mxu0  ;;  %v1878_v34 = vpop.f32.mrb[3].mxu1  ;;  %9565 = vmatprep.subr.bf16.mxu0 %v9564_v18  ;;  %v9578_v18 = vpack.c.bf16 %v1333_v63, %v1319_v62  ;;  %v1472_v11 = vld [vmem:[%s12344_s17 + $0xd08] sm:$0xff]  ;;  %v1445_v62 = vld [vmem:[%s12344_s17 + $0xc30] sm:$0xff] }
 0x4ff   : > { %v13078_v33 = vadd.f32 %v1876_v28, %v1799_v29  ;;  %v1801_v43 = vpop.f32.mrb[3].mxu0  ;;  %9471 = vmatpush1.bf16.msra.mxu1 %v9470_v22  ;;  %v9580_v22 = vpack.c.bf16 %v1362_v3, %v1348_v1  ;;  %v9488_v28 = vpack.c.bf16 %v1388_v20, %v1374_v19  ;;  %v1373_v29 = vld [vmem:[%s12344_s17 + $0x9f0] sm:$0xff]  ;;  %v1474_v1 = vld [vmem:[%s12344_s17 + $0xd18] sm:$0xff]  ;;  %v1500_v19 = vld [vmem:[%s12344_s17 + $0xde8] sm:$0xff] }
 0x500   : > { %v13082_v36 = vadd.f32 %v1878_v34, %v1801_v43  ;;  %9473 = vmatprep.subr.bf16.mxu1 %v9472_v25  ;;  %v9486_v25 = vpack.c.bf16 %v1359_v17, %v1345_v13  ;;  %v1416_v34 = vld [vmem:[%s12344_s17 + $0xb48] sm:$0xff]  ;;  %v9584_v43 = vpack.c.bf16 %v1390_v27, %v1376_v26  ;;  %v1471_v13 = vld [vmem:[%s12344_s17 + $0xd00] sm:$0xff]  ;;  %v1502_v26 = vld [vmem:[%s12344_s17 + $0xdf8] sm:$0xff] }
 0x501   : > { %9567 = vmatpush1.bf16.msra.mxu0 %v9566_v30  ;;  %v1387_v30 = vld [vmem:[%s12344_s17 + $0xa60] sm:$0xff]  ;;  %v9492_v38 = vpack.c.bf16 %v1416_v34, %v1402_v32  ;;  %v1528_v32 = vld [vmem:[%s12344_s17 + $0xec8] sm:$0xff] }
 0x502   : > { %9569 = vmatprep.subr.bf16.mxu0 %v9568_v35  ;;  %v1375_v35 = vld [vmem:[%s12344_s17 + $0xa00] sm:$0xff]  ;;  %v9490_v44 = vpack.c.bf16 %v1387_v30, %v1373_v29 }
 0x503   : > { %9475 = vmatpush1.bf16.msra.mxu1 %v9474_v37  ;;  %v1404_v37 = vld [vmem:[%s12344_s17 + $0xae8] sm:$0xff]  ;;  %v9586_v41 = vpack.c.bf16 %v1389_v46, %v1375_v35  ;;  %v1499_v29 = vld [vmem:[%s12344_s17 + $0xde0] sm:$0xff]  ;;  %v1501_v35 = vld [vmem:[%s12344_s17 + $0xdf0] sm:$0xff] }
 0x504   : > { %9477 = vmatprep.subr.bf16.mxu1 %v9476_v39  ;;  %v1401_v39 = vld [vmem:[%s12344_s17 + $0xad0] sm:$0xff]  ;;  %v9588_v48 = vpack.c.bf16 %v1418_v45, %v1404_v37  ;;  %v1530_v37 = vld [vmem:[%s12344_s17 + $0xed8] sm:$0xff] }
 0x505   : > { %9571 = vmatpush1.bf16.msra.mxu0 %v9570_v42  ;;  %v1430_v42 = vld [vmem:[%s12344_s17 + $0xbb8] sm:$0xff]  ;;  %v9494_v52 = vpack.c.bf16 %v1415_v40, %v1401_v39  ;;  %v1527_v39 = vld [vmem:[%s12344_s17 + $0xec0] sm:$0xff] }
 0x506   : > { %9573 = vmatprep.subr.bf16.mxu0 %v9572_v51  ;;  %v1403_v51 = vld [vmem:[%s12344_s17 + $0xae0] sm:$0xff]  ;;  %v9496_v9 = vpack.c.bf16 %v1444_v47, %v1430_v42  ;;  %v1556_v42 = vld [vmem:[%s12344_s17 + $0xfa8] sm:$0xff] }
 0x507   : > { %9479 = vmatpush1.bf16.msra.mxu1 %v9478_v53  ;;  %v1432_v53 = vld [vmem:[%s12344_s17 + $0xbc8] sm:$0xff]  ;;  %v9590_v10 = vpack.c.bf16 %v1417_v6, %v1403_v51  ;;  %v1529_v51 = vld [vmem:[%s12344_s17 + $0xed0] sm:$0xff] }
 0x508   : > { %9481 = vmatprep.subr.bf16.mxu1 %v9480_v50  ;;  %v1429_v50 = vld [vmem:[%s12344_s17 + $0xbb0] sm:$0xff]  ;;  %v9592_v56 = vpack.c.bf16 %v1446_v7, %v1432_v53  ;;  %v1558_v53 = vld [vmem:[%s12344_s17 + $0xfb8] sm:$0xff] }
 0x509   : > { %9575 = vmatpush1.bf16.msra.mxu0 %v9574_v55  ;;  %v1458_v55 = vld [vmem:[%s12344_s17 + $0xc98] sm:$0xff]  ;;  %v9498_v63 = vpack.c.bf16 %v1443_v54, %v1429_v50  ;;  %v1555_v50 = vld [vmem:[%s12344_s17 + $0xfa0] sm:$0xff] }
 0x50a   : > { %9577 = vmatprep.subr.bf16.mxu0 %v9576_v61  ;;  %v1431_v61 = vld [vmem:[%s12344_s17 + $0xbc0] sm:$0xff]  ;;  %v9500_v3 = vpack.c.bf16 %v1472_v11, %v1458_v55  ;;  %v1584_v55 = vld [vmem:[%s12344_s17 + $0x1088] sm:$0xff] }
 0x50b   : > { %9483 = vmatpush1.bf16.msra.mxu1 %v9482_v0  ;;  %v1460_v0 = vld [vmem:[%s12344_s17 + $0xca8] sm:$0xff]  ;;  %v9594_v17 = vpack.c.bf16 %v1445_v62, %v1431_v61  ;;  %v1557_v61 = vld [vmem:[%s12344_s17 + $0xfb0] sm:$0xff] }
 0x50c   : > { %9485 = vmatprep.subr.bf16.mxu1 %v9484_v4  ;;  %v1457_v4 = vld [vmem:[%s12344_s17 + $0xc90] sm:$0xff]  ;;  %v9596_v20 = vpack.c.bf16 %v1474_v1, %v1460_v0  ;;  %v1586_v0 = vld [vmem:[%s12344_s17 + $0x1098] sm:$0xff] }
 0x50d   : > { %9579 = vmatpush1.bf16.msra.mxu0 %v9578_v18  ;;  %v1486_v18 = vld [vmem:[%s12344_s17 + $0xd78] sm:$0xff]  ;;  %v9502_v24 = vpack.c.bf16 %v1471_v13, %v1457_v4  ;;  %v1583_v4 = vld [vmem:[%s12344_s17 + $0x1080] sm:$0xff] }
 0x50e   : > { %9581 = vmatprep.subr.bf16.mxu0 %v9580_v22  ;;  %v1459_v22 = vld [vmem:[%s12344_s17 + $0xca0] sm:$0xff]  ;;  %v9504_v27 = vpack.c.bf16 %v1500_v19, %v1486_v18  ;;  %v1612_v18 = vld [vmem:[%s12344_s17 + $0x1168] sm:$0xff] }
 0x50f   : > { %9487 = vmatpush1.bf16.msra.mxu1 %v9486_v25  ;;  %v1488_v25 = vld [vmem:[%s12344_s17 + $0xd88] sm:$0xff]  ;;  %v9598_v30 = vpack.c.bf16 %v1473_v23, %v1459_v22 }
 0x510   : > { %9489 = vmatprep.subr.bf16.mxu1 %v9488_v28  ;;  %v1485_v28 = vld [vmem:[%s12344_s17 + $0xd70] sm:$0xff]  ;;  %v9600_v34 = vpack.c.bf16 %v1502_v26, %v1488_v25  ;;  %v1600_v23 = vld [vmem:[%s12344_s17 + $0x1108] sm:$0xff]  ;;  %v1611_v26 = vld [vmem:[%s12344_s17 + $0x1160] sm:$0xff] }
 0x511   : > { %9583 = vmatpush1.bf16.msra.mxu0 %v9582_v31  ;;  %v1514_v31 = vld [vmem:[%s12344_s17 + $0xe58] sm:$0xff]  ;;  %v9506_v46 = vpack.c.bf16 %v1499_v29, %v1485_v28  ;;  %v1597_v25 = vld [vmem:[%s12344_s17 + $0x10f0] sm:$0xff]  ;;  %v1640_v29 = vld [vmem:[%s12344_s17 + $0x1248] sm:$0xff] }
 0x512   : > { %9585 = vmatprep.subr.bf16.mxu0 %v9584_v43  ;;  %v1487_v43 = vld [vmem:[%s12344_s17 + $0xd80] sm:$0xff]  ;;  %v9508_v45 = vpack.c.bf16 %v1528_v32, %v1514_v31  ;;  %v1626_v28 = vld [vmem:[%s12344_s17 + $0x11d8] sm:$0xff]  ;;  %v9522_v32 = vpack.c.bf16 %v1611_v26, %v1597_v25  ;;  %v1725_v26 = vld [vmem:[%s12344_s17 + $0x14f0] sm:$0xff] }
 0x513   : > { %9491 = vmatpush1.bf16.msra.mxu1 %v9490_v44  ;;  %v1516_v44 = vld [vmem:[%s12344_s17 + $0xe68] sm:$0xff]  ;;  %v9602_v40 = vpack.c.bf16 %v1501_v35, %v1487_v43  ;;  %v1599_v31 = vld [vmem:[%s12344_s17 + $0x1100] sm:$0xff]  ;;  %v1642_v43 = vld [vmem:[%s12344_s17 + $0x1258] sm:$0xff]  ;;  %v9524_v35 = vpack.c.bf16 %v1640_v29, %v1626_v28 }
 0x514   : > { %9493 = vmatprep.subr.bf16.mxu1 %v9492_v38  ;;  %v1513_v38 = vld [vmem:[%s12344_s17 + $0xe50] sm:$0xff]  ;;  %v9604_v47 = vpack.c.bf16 %v1530_v37, %v1516_v44  ;;  %v1639_v44 = vld [vmem:[%s12344_s17 + $0x1240] sm:$0xff] }
 0x515   : > { %9587 = vmatpush1.bf16.msra.mxu0 %v9586_v41  ;;  %v1542_v41 = vld [vmem:[%s12344_s17 + $0xf38] sm:$0xff]  ;;  %v9510_v6 = vpack.c.bf16 %v1527_v39, %v1513_v38  ;;  %v1668_v38 = vld [vmem:[%s12344_s17 + $0x1328] sm:$0xff]  ;;  %v1711_v25 = vld [vmem:[%s12344_s17 + $0x1480] sm:$0xff] }
 0x516   : > { %9589 = vmatprep.subr.bf16.mxu0 %v9588_v48  ;;  %v1515_v48 = vld [vmem:[%s12344_s17 + $0xe60] sm:$0xff]  ;;  %v9512_v7 = vpack.c.bf16 %v1556_v42, %v1542_v41  ;;  %v1641_v41 = vld [vmem:[%s12344_s17 + $0x1250] sm:$0xff]  ;;  %v9634_v28 = vpack.c.bf16 %v1725_v26, %v1711_v25  ;;  %v3715_v26 = vld [vmem:[%s12350_s10 + $0x2f8] sm:$0xff] }
 0x517   : > { %9495 = vmatpush1.bf16.msra.mxu1 %v9494_v52  ;;  %v1544_v52 = vld [vmem:[%s12344_s17 + $0xf48] sm:$0xff]  ;;  %v9606_v54 = vpack.c.bf16 %v1529_v51, %v1515_v48  ;;  %v1670_v48 = vld [vmem:[%s12344_s17 + $0x1338] sm:$0xff]  ;;  %v3712_v25 = vld [vmem:[%s12350_s10 + $0x2e0] sm:$0xff] }
 0x518   : > { %9497 = vmatprep.subr.bf16.mxu1 %v9496_v9  ;;  %v1541_v9 = vld [vmem:[%s12344_s17 + $0xf30] sm:$0xff]  ;;  %v9608_v11 = vpack.c.bf16 %v1558_v53, %v1544_v52  ;;  %v1667_v52 = vld [vmem:[%s12344_s17 + $0x1320] sm:$0xff] }
 0x519   : > { %9591 = vmatpush1.bf16.msra.mxu0 %v9590_v10  ;;  %v1570_v10 = vld [vmem:[%s12344_s17 + $0x1018] sm:$0xff]  ;;  %v9514_v62 = vpack.c.bf16 %v1555_v50, %v1541_v9  ;;  %v1696_v9 = vld [vmem:[%s12344_s17 + $0x1408] sm:$0xff] }
 0x51a   : > { %9593 = vmatprep.subr.bf16.mxu0 %v9592_v56  ;;  %v1543_v56 = vld [vmem:[%s12344_s17 + $0xf40] sm:$0xff]  ;;  %v9516_v1 = vpack.c.bf16 %v1584_v55, %v1570_v10  ;;  %v1669_v10 = vld [vmem:[%s12344_s17 + $0x1330] sm:$0xff] }
 0x51b   : > { %9499 = vmatpush1.bf16.msra.mxu1 %v9498_v63  ;;  %v1572_v63 = vld [vmem:[%s12344_s17 + $0x1028] sm:$0xff]  ;;  %v9610_v13 = vpack.c.bf16 %v1557_v61, %v1543_v56  ;;  %v1698_v56 = vld [vmem:[%s12344_s17 + $0x1418] sm:$0xff] }
 0x51c   : > { %9501 = vmatprep.subr.bf16.mxu1 %v9500_v3  ;;  %v1569_v3 = vld [vmem:[%s12344_s17 + $0x1010] sm:$0xff]  ;;  %v9612_v19 = vpack.c.bf16 %v1586_v0, %v1572_v63  ;;  %v1695_v63 = vld [vmem:[%s12344_s17 + $0x1400] sm:$0xff] }
 0x51d   : > { %9595 = vmatpush1.bf16.msra.mxu0 %v9594_v17  ;;  %v1598_v17 = vld [vmem:[%s12344_s17 + $0x10f8] sm:$0xff]  ;;  %v9518_v22 = vpack.c.bf16 %v1583_v4, %v1569_v3  ;;  %v1724_v3 = vld [vmem:[%s12344_s17 + $0x14e8] sm:$0xff] }
 0x51e   : > { %9597 = vmatprep.subr.bf16.mxu0 %v9596_v20  ;;  %v1585_v20 = vld [vmem:[%s12344_s17 + $0x1090] sm:$0xff] }
 0x51f   : > { %9503 = vmatpush1.bf16.msra.mxu1 %v9502_v24  ;;  %v9520_v24 = vpack.c.bf16 %v1612_v18, %v1598_v17  ;;  %v1697_v17 = vld [vmem:[%s12344_s17 + $0x1410] sm:$0xff] }
 0x520   : > { %9505 = vmatprep.subr.bf16.mxu1 %v9504_v27 }
 0x521   : > { %9599 = vmatpush1.bf16.msra.mxu0 %v9598_v30 }
 0x522   : > { %9601 = vmatprep.subr.bf16.mxu0 %v9600_v34  ;;  %v1628_v34 = vld [vmem:[%s12344_s17 + $0x11e8] sm:$0xff] }
 0x523   : > { %9507 = vmatpush1.bf16.msra.mxu1 %v9506_v46  ;;  %v1625_v46 = vld [vmem:[%s12344_s17 + $0x11d0] sm:$0xff]  ;;  %v9620_v39 = vpack.c.bf16 %v1642_v43, %v1628_v34 }
 0x524   : > { %9509 = vmatprep.subr.bf16.mxu1 %v9508_v45  ;;  %v1654_v45 = vld [vmem:[%s12344_s17 + $0x12b8] sm:$0xff]  ;;  %v9526_v42 = vpack.c.bf16 %v1639_v44, %v1625_v46 }
 0x525   : > { %9603 = vmatpush1.bf16.msra.mxu0 %v9602_v40  ;;  %v1627_v40 = vld [vmem:[%s12344_s17 + $0x11e0] sm:$0xff]  ;;  %v9528_v51 = vpack.c.bf16 %v1668_v38, %v1654_v45 }
 0x526   : > { %2562 = vmatmul.mubr.f32.vlgmr.msra.gmra.mrb[12].mxu1 %v12591_v5  ;;  %9605 = vmatprep.subr.bf16.mxu0 %v9604_v47  ;;  %v1656_v47 = vld [vmem:[%s12344_s17 + $0x12c8] sm:$0xff]  ;;  %v9622_v53 = vpack.c.bf16 %v1641_v41, %v1627_v40  ;;  %v3676_v38 = vld [vmem:[%s12350_s10 + $0x1c0] sm:$0xff] }
 0x527   : > { %2567 = vmatprep.mubr.f32.mxu1 %v12602_v57  ;;  %9511 = vmatpush1.bf16.msra.mxu1 %v9510_v6  ;;  %v1653_v6 = vld [vmem:[%s12344_s17 + $0x12b0] sm:$0xff]  ;;  %v9624_v50 = vpack.c.bf16 %v1670_v48, %v1656_v47  ;;  %v3628_v41 = vld [vmem:[%s12350_s10 + $0x40] sm:$0xff] }
 0x528   : > { %2716 = vmatmul.mubr.f32.vlgmr.msra.gmra.mrb[12].mxu0 %v12591_v5  ;;  %9513 = vmatprep.subr.bf16.mxu1 %v9512_v7  ;;  %v1571_v5 = vld [vmem:[%s12344_s17 + $0x1020] sm:$0xff]  ;;  %v1682_v7 = vld [vmem:[%s12344_s17 + $0x1398] sm:$0xff]  ;;  %v9530_v55 = vpack.c.bf16 %v1667_v52, %v1653_v6  ;;  %v3682_v48 = vld [vmem:[%s12350_s10 + $0x1f0] sm:$0xff] }
 0x529   : > { %2721 = vmatprep.mubr.f32.mxu0 %v12602_v57  ;;  %9607 = vmatpush1.bf16.msra.mxu0 %v9606_v54  ;;  %v1614_v57 = vld [vmem:[%s12344_s17 + $0x1178] sm:$0xff]  ;;  %v9614_v27 = vpack.c.bf16 %v1585_v20, %v1571_v5  ;;  %v1655_v54 = vld [vmem:[%s12344_s17 + $0x12c0] sm:$0xff]  ;;  %v9532_v61 = vpack.c.bf16 %v1696_v9, %v1682_v7  ;;  %v3634_v52 = vld [vmem:[%s12350_s10 + $0x70] sm:$0xff] }
 0x52a   : > { %2568 = vmatmul.mubr.f32.gmra.mrb[14].mxu1 %v12606_v59  ;;  %9609 = vmatprep.subr.bf16.mxu0 %v9608_v11  ;;  %v9616_v30 = vpack.c.bf16 %v1614_v57, %v1600_v23  ;;  %v1684_v11 = vld [vmem:[%s12344_s17 + $0x13a8] sm:$0xff]  ;;  %v9626_v0 = vpack.c.bf16 %v1669_v10, %v1655_v54  ;;  %v1726_v5 = vld [vmem:[%s12344_s17 + $0x14f8] sm:$0xff]  ;;  %v1723_v23 = vld [vmem:[%s12344_s17 + $0x14e0] sm:$0xff] }
 0x52b   : > { %9515 = vmatpush1.bf16.msra.mxu1 %v9514_v62  ;;  %2638 = vmatprep.mubr.f32.mxu1 %v15241_v60  ;;  %v1681_v62 = vld [vmem:[%s12344_s17 + $0x1390] sm:$0xff]  ;;  %v9628_v4 = vpack.c.bf16 %v1698_v56, %v1684_v11  ;;  %v3688_v9 = vld [vmem:[%s12350_s10 + $0x220] sm:$0xff] }
 0x52c   : > { %2722 = vmatmul.mubr.f32.gmra.mrb[14].mxu0 %v12606_v59  ;;  %9517 = vmatprep.subr.bf16.mxu1 %v9516_v1  ;;  %v1613_v59 = vld [vmem:[%s12344_s17 + $0x1170] sm:$0xff]  ;;  %v1710_v1 = vld [vmem:[%s12344_s17 + $0x1478] sm:$0xff]  ;;  %v9534_v18 = vpack.c.bf16 %v1695_v63, %v1681_v62  ;;  %v3640_v10 = vld [vmem:[%s12350_s10 + $0xa0] sm:$0xff] }
 0x52d   : > { %9611 = vmatpush1.bf16.msra.mxu0 %v9610_v13  ;;  %2792 = vmatprep.mubr.f32.mxu0 %v15241_v60  ;;  %v9618_v37 = vpack.c.bf16 %v1613_v59, %v1599_v31  ;;  %v1683_v13 = vld [vmem:[%s12344_s17 + $0x13a0] sm:$0xff]  ;;  %v9536_v20 = vpack.c.bf16 %v1724_v3, %v1710_v1  ;;  %v3694_v56 = vld [vmem:[%s12350_s10 + $0x250] sm:$0xff] }
 0x52e   : > { %9613 = vmatprep.subr.bf16.mxu0 %v9612_v19  ;;  %v1712_v19 = vld [vmem:[%s12344_s17 + $0x1488] sm:$0xff]  ;;  %v9630_v57 = vpack.c.bf16 %v1697_v17, %v1683_v13  ;;  %v3646_v63 = vld [vmem:[%s12350_s10 + $0xd0] sm:$0xff]  ;;  %v3700_v3 = vld [vmem:[%s12350_s10 + $0x280] sm:$0xff] }
 0x52f   : > { %9519 = vmatpush1.bf16.msra.mxu1 %v9518_v22  ;;  %v1709_v22 = vld [vmem:[%s12344_s17 + $0x1470] sm:$0xff]  ;;  %v3652_v17 = vld [vmem:[%s12350_s10 + $0x100] sm:$0xff] }
 0x530   : > { %9521 = vmatprep.subr.bf16.mxu1 %v9520_v24  ;;  %v9632_v24 = vpack.c.bf16 %v1726_v5, %v1712_v19  ;;  %v3706_v5 = vld [vmem:[%s12350_s10 + $0x2b0] sm:$0xff] }
 0x531   : > { %9615 = vmatpush1.bf16.msra.mxu0 %v9614_v27  ;;  %v9538_v27 = vpack.c.bf16 %v1723_v23, %v1709_v22  ;;  %v3658_v23 = vld [vmem:[%s12350_s10 + $0x130] sm:$0xff] }
 0x532   : > { %9617 = vmatprep.subr.bf16.mxu0 %v9616_v30 }
 0x533   : > { %9523 = vmatpush1.bf16.msra.mxu1 %v9522_v32  ;;  %v3670_v32 = vld [vmem:[%s12350_s10 + $0x190] sm:$0xff] }
 0x534   : > { %9525 = vmatprep.subr.bf16.mxu1 %v9524_v35  ;;  %v3622_v35 = vld [vmem:[%s12350_s10 + $0x10] sm:$0xff] }
 0x535   : > { %9619 = vmatpush1.bf16.msra.mxu0 %v9618_v37 }
 0x536   : > { %9621 = vmatprep.subr.bf16.mxu0 %v9620_v39  ;;  %v3679_v39 = vld [vmem:[%s12350_s10 + $0x1d8] sm:$0xff] }
 0x537   : > { %9527 = vmatpush1.bf16.msra.mxu1 %v9526_v42  ;;  %v9832_v40 = vpack.c.bf16 %v3679_v39, %v3676_v38  ;;  %v3631_v42 = vld [vmem:[%s12350_s10 + $0x58] sm:$0xff] }
 0x538   : > { %9529 = vmatprep.subr.bf16.mxu1 %v9528_v51  ;;  %v9834_v47 = vpack.c.bf16 %v3631_v42, %v3628_v41  ;;  %v3685_v51 = vld [vmem:[%s12350_s10 + $0x208] sm:$0xff] }
 0x539   : > { %9623 = vmatpush1.bf16.msra.mxu0 %v9622_v53  ;;  %v9836_v6 = vpack.c.bf16 %v3685_v51, %v3682_v48  ;;  %v3637_v53 = vld [vmem:[%s12350_s10 + $0x88] sm:$0xff] }
 0x53a   : > { %9625 = vmatprep.subr.bf16.mxu0 %v9624_v50  ;;  %v9838_v7 = vpack.c.bf16 %v3637_v53, %v3634_v52  ;;  %v3691_v50 = vld [vmem:[%s12350_s10 + $0x238] sm:$0xff] }
 0x53b   : > { %9531 = vmatpush1.bf16.msra.mxu1 %v9530_v55  ;;  %v9840_v54 = vpack.c.bf16 %v3691_v50, %v3688_v9  ;;  %v3643_v55 = vld [vmem:[%s12350_s10 + $0xb8] sm:$0xff] }
 0x53c   : > { %9533 = vmatprep.subr.bf16.mxu1 %v9532_v61  ;;  %v9842_v11 = vpack.c.bf16 %v3643_v55, %v3640_v10  ;;  %v3697_v61 = vld [vmem:[%s12350_s10 + $0x268] sm:$0xff] }
 0x53d   : > { %9627 = vmatpush1.bf16.msra.mxu0 %v9626_v0  ;;  %v9844_v62 = vpack.c.bf16 %v3697_v61, %v3694_v56  ;;  %v3649_v0 = vld [vmem:[%s12350_s10 + $0xe8] sm:$0xff] }
 0x53e   : > { %9629 = vmatprep.subr.bf16.mxu0 %v9628_v4  ;;  %v9846_v1 = vpack.c.bf16 %v3649_v0, %v3646_v63  ;;  %v3703_v4 = vld [vmem:[%s12350_s10 + $0x298] sm:$0xff] }
 0x53f   : > { %9535 = vmatpush1.bf16.msra.mxu1 %v9534_v18  ;;  %v9848_v13 = vpack.c.bf16 %v3703_v4, %v3700_v3  ;;  %v3655_v18 = vld [vmem:[%s12350_s10 + $0x118] sm:$0xff] }
 0x540   : > { %9537 = vmatprep.subr.bf16.mxu1 %v9536_v20  ;;  %v9850_v19 = vpack.c.bf16 %v3655_v18, %v3652_v17  ;;  %v3709_v20 = vld [vmem:[%s12350_s10 + $0x2c8] sm:$0xff] }
 0x541   : > { %9631 = vmatpush1.bf16.msra.mxu0 %v9630_v57  ;;  %v9852_v22 = vpack.c.bf16 %v3709_v20, %v3706_v5  ;;  %v3661_v57 = vld [vmem:[%s12350_s10 + $0x148] sm:$0xff] }
 0x542   : > { %9633 = vmatprep.subr.bf16.mxu0 %v9632_v24  ;;  %v9854_v24 = vpack.c.bf16 %v3661_v57, %v3658_v23 }
 0x543   : > { %9539 = vmatpush1.bf16.msra.mxu1 %v9538_v27  ;;  %v9856_v27 = vpack.c.bf16 %v3715_v26, %v3712_v25 }
 0x544   : > { %8819 = vmatprep.subr.mxu1 %v15241_v60 }
 0x545   : > { %9635 = vmatpush1.bf16.msra.mxu0 %v9634_v28  ;;  %v3664_v28 = vld [vmem:[%s12350_s10 + $0x160] sm:$0xff] }
 0x546   : > { %2639 = vmatmul.mubr.f32.vlgmr.msra.gmra.mrb[12].mxu1 %v12589_v49 }
 0x547   : > { %2644 = vmatprep.mubr.f32.mxu1 %v15241_v60 }
 0x548   : > { %2793 = vmatmul.mubr.f32.vlgmr.msra.gmra.mrb[12].mxu0 %v12589_v49  ;;  %v3673_v49 = vld [vmem:[%s12350_s10 + $0x1a8] sm:$0xff] }
 0x549   : > { %2798 = vmatprep.mubr.f32.mxu0 %v15241_v60  ;;  %v9828_v43 = vpack.c.bf16 %v3673_v49, %v3670_v32  ;;  %v3667_v32 = vld [vmem:[%s12350_s10 + $0x178] sm:$0xff] }
 0x54a   : > { %2645 = vmatmul.mubr.f32.gmra.mrb[14].mxu1 %v12604_v58  ;;  %v9858_v49 = vpack.c.bf16 %v3667_v32, %v3664_v28 }
 0x54b   : > { %9829 = vmatprep.subr.bf16.mxu0 %v9828_v43  ;;  %8821 = vmatprep.mubr.msk.f32.mxu1 %vm11785_vm0, %v15241_v60 }
 0x54c   : > { %2799 = vmatmul.mubr.f32.gmra.mrb[14].mxu0 %v12604_v58  ;;  %v3625_v58 = vld [vmem:[%s12350_s10 + $0x28] sm:$0xff] }
 0x54d   : > { %v9830_v44 = vpack.c.bf16 %v3625_v58, %v3622_v35 }
 0x54f   : > { %9831 = vmatpush3.bf16.msra.mxu0 %v9830_v44 }
 0x550   : > { %9833 = vmatprep.subr.bf16.mxu0 %v9832_v40 }
 0x553   : > { %9835 = vmatpush3.bf16.msra.mxu0 %v9834_v47 }
 0x554   : > { %9837 = vmatprep.subr.bf16.mxu0 %v9836_v6 }
 0x557   : > { %9839 = vmatpush3.bf16.msra.mxu0 %v9838_v7 }
 0x558   : > { %9841 = vmatprep.subr.bf16.mxu0 %v9840_v54 }
 0x559   : > { %v13225_v29 = vpop.f32.mrb[4].mxu1 }
 0x55a   : > { %v13227_v30 = vpop.f32.mrb[5].mxu1 }
 0x55b   : > { %v13229_v31 = vpop.f32.mrb[4].mxu0  ;;  %9843 = vmatpush3.bf16.msra.mxu0 %v9842_v11 }
 0x55c   : > { %v13231_v59 = vpop.f32.mrb[5].mxu0  ;;  %9845 = vmatprep.subr.bf16.mxu0 %v9844_v62 }
 0x55d   : > { %v13235_v34 = vpop.f32.mrb[6].mxu1 }
 0x55e   : > { %v13239_v46 = vpop.f32.mrb[7].mxu1 }
 0x55f   : > { %v13241_v37 = vpop.f32.mrb[6].mxu0  ;;  %9847 = vmatpush3.bf16.msra.mxu0 %v9846_v1 }
 0x560   : > { %v13243_v45 = vpop.f32.mrb[7].mxu0  ;;  %9849 = vmatprep.subr.bf16.mxu0 %v9848_v13 }
 0x563   : > { %9851 = vmatpush3.bf16.msra.mxu0 %v9850_v19 }
 0x564   : > { %9853 = vmatprep.subr.bf16.mxu0 %v9852_v22  ;;  %v15243_v22 = vmov -1.0  }
 0x567   : > { %9855 = vmatpush3.bf16.msra.mxu0 %v9854_v24 }
 0x568   : > { %9857 = vmatprep.subr.bf16.mxu0 %v9856_v27 }
 0x56b   : > { %9859 = vmatpush3.bf16.msra.mxu0 %v9858_v49 }
 0x5b9   : > { %v2332_v43 = vpop.f32.mrb[8].mxu1 }
 0x5ba   : > { %v2817_v35 = vmul.f32 0.70710677, %v2332_v43  ;;  %v2334_v58 = vpop.f32.mrb[9].mxu1  ;;  %v13283_v62 = vmul.f32 0.5, %v2332_v43 }
 0x5bb   : > { %v2818_v44 = vmul.f32 0.70710677, %v2334_v58  ;;  %v2486_v38 = vpop.f32.mrb[8].mxu0  ;;  %v13285_v63 = vmul.f32 0.5, %v2334_v58 }
 0x5bc   : > { %v2853_v39 = vand.u32 2147483647, %v2817_v35  ;;  %v2819_v40 = vmul.f32 0.70710677, %v2486_v38  ;;  %v2488_v42 = vpop.f32.mrb[9].mxu0  ;;  %vm2829_vm1 = vcmp.ge.f32.partialorder %v2817_v35, 0.0 }
 0x5bd   : > { %v2854_v41 = vand.u32 2147483647, %v2818_v44  ;;  %v13275_v47 = vpop.f32.mrb[10].mxu1  ;;  %v2820_v7 = vmul.f32 0.70710677, %v2488_v42  ;;  %vm2830_vm2 = vcmp.ge.f32.partialorder %v2818_v44, 0.0 }
 0x5be   : > { %v2865_v48 = vmul.f32 0.3275911, %v2853_v39  ;;  %v13277_v51 = vpop.f32.mrb[11].mxu1  ;;  %v2855_v52 = vand.u32 2147483647, %v2819_v40  ;;  %v3021_v55 = vsub.f32 0.0, %v2853_v39 }
 0x5bf   : > { %v2866_v6 = vmul.f32 0.3275911, %v2854_v41  ;;  %v13279_v9 = vpop.f32.mrb[10].mxu0  ;;  %v3022_v11 = vsub.f32 0.0, %v2854_v41  ;;  %v2856_v56 = vand.u32 2147483647, %v2820_v7 }
 0x5c0   : > { %v2877_v53 = vadd.f32 1.0, %v2865_v48  ;;  %v2867_v54 = vmul.f32 0.3275911, %v2855_v52  ;;  %v13281_v10 = vpop.f32.mrb[11].mxu0  ;;  %v13287_v1 = vmul.f32 0.5, %v2486_v38  ;;  %vm2831_vm3 = vcmp.ge.f32.partialorder %v2819_v40, 0.0 }
 0x5c1   : > { %v2878_v50 = vadd.f32 1.0, %v2866_v6  ;;  %v2868_v0 = vmul.f32 0.3275911, %v2856_v56  ;;  %v2823_v3 = vmul.f32 0.70710677, %v13275_v47  ;;  %v3033_v4 = vmul.f32 %v3021_v55, %v2853_v39 }
 0x5c2   : > { %11201 = vrcp.f32 %v2877_v53  ;;  %v2879_v61 = vadd.f32 1.0, %v2867_v54  ;;  %v3034_v13 = vmul.f32 %v3022_v11, %v2854_v41  ;;  %v3023_v18 = vsub.f32 0.0, %v2855_v52 }
 0x5c3   : > { %11203 = vrcp.f32 %v2878_v50  ;;  %v2880_v17 = vadd.f32 1.0, %v2868_v0  ;;  %v3024_v19 = vsub.f32 0.0, %v2856_v56  ;;  %v2859_v5 = vand.u32 2147483647, %v2823_v3 }
 0x5c4   : > { %11205 = vrcp.f32 %v2879_v61  ;;  %v13291_v20 = vmul.f32 0.70710677, %v13277_v51  ;;  %v13295_v23 = vsel %vm2829_vm1, 1.0, %v15243_v22  ;;  %v13298_v57 = vsel %vm2830_vm2, 1.0, %v15243_v22 }
 0x5c5   : > { %v13301_v24 = vsel %vm2831_vm3, 1.0, %v15243_v22  ;;  %11207 = vrcp.f32 %v2880_v17  ;;  %v13303_v25 = vmul.f32 0.5, %v2488_v42  ;;  %vm2832_vm4 = vcmp.ge.f32.partialorder %v2820_v7, 0.0 }
 0x5c6   : > { %v2871_v26 = vmul.f32 0.3275911, %v2859_v5  ;;  %v2860_v27 = vand.u32 2147483647, %v13291_v20  ;;  %v3045_v28 = vmul.f32 1.442695, %v3033_v4  ;;  %v3035_v43 = vmul.f32 %v3023_v18, %v2855_v52 }
 0x5c7   : > { %v3047_v32 = vmul.f32 1.442695, %v3034_v13  ;;  %v13307_v49 = vmul.f32 0.70710677, %v13279_v9  ;;  %v3036_v35 = vmul.f32 %v3024_v19, %v2856_v56  ;;  %v13312_v39 = vsel %vm2832_vm4, 1.0, %v15243_v22 }
 0x5c8   : > { %v2883_v58 = vadd.f32 1.0, %v2871_v26  ;;  %v2872_v44 = vmul.f32 0.3275911, %v2860_v27  ;;  %vm2835_vm5 = vcmp.ge.f32.partialorder %v2823_v3, 0.0  ;;  %v3027_v40 = vsub.f32 0.0, %v2859_v5 }
 0x5c9   : > { %v2861_v41 = vand.u32 2147483647, %v13307_v49  ;;  %v3028_v53 = vsub.f32 0.0, %v2860_v27  ;;  %v13320_v50 = vmul.f32 0.70710677, %v13281_v10  ;;  %v13328_v18 = vsel %vm2835_vm5, 1.0, %v15243_v22 }
 0x5ca   : > { %11209 = vrcp.f32 %v2883_v58  ;;  %v2884_v6 = vadd.f32 1.0, %v2872_v44  ;;  %v3049_v55 = vmul.f32 1.442695, %v3035_v43  ;;  %v3051_v11 = vmul.f32 1.442695, %v3036_v35 }
 0x5cb   : > { %11211 = vpow2.f32 %v3045_v28  ;;  %v2873_v7 = vmul.f32 0.3275911, %v2861_v41  ;;  %v3039_v0 = vmul.f32 %v3027_v40, %v2859_v5  ;;  %v3040_v19 = vmul.f32 %v3028_v53, %v2860_v27 }
 0x5cc   : > { %v13309_v38 = vpop.eup %11201  ;;  %11213 = vpow2.f32 %v3047_v32  ;;  %v3029_v32 = vsub.f32 0.0, %v2861_v41  ;;  %v2862_v43 = vand.u32 2147483647, %v13320_v50  ;;  %v11787_v44 = vmov 0  }
 0x5cd   : > { %v13315_v42 = vpop.eup %11203  ;;  %v2913_v48 = vmul.f32 1.0614054, %v13309_v38  ;;  %11215 = vrcp.f32 %v2884_v6  ;;  %v2885_v4 = vadd.f32 1.0, %v2873_v7  ;;  %11192 = vset.pattern.permute.xlu0 %v11787_v44  ;;  %v3057_v3 = vmul.f32 1.442695, %v3039_v0 }
 0x5ce   : > { %v2914_v52 = vmul.f32 1.0614054, %v13315_v42  ;;  %v13322_v56 = vpop.eup %11205  ;;  %v3287_v0 = vld [vmem:[%s854_s9] sm:$0x1]  ;;  %vm2836_vm6 = vcmp.ge.f32.partialorder %v13291_v20, 0.0  ;;  %vm2837_vm7 = vcmp.ge.f32.partialorder %v13307_v49, 0.0 }
 0x5cf   : > { %v2925_v54 = vadd.f32 -1.4531521, %v2913_v48  ;;  %v2915_v17 = vmul.f32 1.0614054, %v13322_v56  ;;  %v13330_v26 = vpop.eup %11207  ;;  %11217 = vrcp.f32 %v2885_v4  ;;  %v2874_v48 = vmul.f32 0.3275911, %v2862_v43 }
 0x5d0   : > { %v2926_v61 = vadd.f32 -1.4531521, %v2914_v52  ;;  %v2916_v58 = vmul.f32 1.0614054, %v13330_v26  ;;  %11219 = vpow2.f32 %v3049_v55  ;;  %v3030_v52 = vsub.f32 0.0, %v2862_v43 }
 0x5d1   : > { %v2937_v13 = vmul.f32 %v13309_v38, %v2925_v54  ;;  %v2927_v5 = vadd.f32 -1.4531521, %v2915_v17  ;;  %11221 = vpow2.f32 %v3051_v11  ;;  %v3059_v54 = vmul.f32 1.442695, %v3040_v19 }
 0x5d2   : > { %v2938_v28 = vmul.f32 %v13315_v42, %v2926_v61  ;;  %v2928_v53 = vadd.f32 -1.4531521, %v2916_v58  ;;  %v2886_v61 = vadd.f32 1.0, %v2874_v48  ;;  %v3042_v11 = vmul.f32 %v3030_v52, %v2862_v43 }
 0x5d3   : > { %v2949_v35 = vadd.f32 1.4214138, %v2937_v13  ;;  %v2939_v6 = vmul.f32 %v13322_v56, %v2927_v5  ;;  %v2813_v49 = vmul.f32 0.5, %v13279_v9  ;;  %vm2838_vm8 = vcmp.ge.f32.partialorder %v13320_v50, 0.0 }
 0x5d4   : > { %v2950_v40 = vadd.f32 1.4214138, %v2938_v28  ;;  %v13338_v13 = vpop.eup %11209  ;;  %v2940_v55 = vmul.f32 %v13330_v26, %v2928_v53  ;;  %v3041_v28 = vmul.f32 %v3029_v32, %v2861_v41  ;;  %11223 = vrcp.f32 %v2886_v61 }
 0x5d5   : > { %v2961_v27 = vmul.f32 %v13309_v38, %v2949_v35  ;;  %v2951_v17 = vadd.f32 1.4214138, %v2939_v6  ;;  %v11212_v35 = vpop.eup %11211  ;;  %v2919_v58 = vmul.f32 1.0614054, %v13338_v13  ;;  %11225 = vpow2.f32 %v3057_v3 }
 0x5d6   : > { %v2962_v7 = vmul.f32 %v13315_v42, %v2950_v40  ;;  %v11214_v19 = vpop.eup %11213  ;;  %v2952_v48 = vadd.f32 1.4214138, %v2940_v55  ;;  %11227 = vpow2.f32 %v3059_v54  ;;  %v3288_v6 = vmul.f32 1.442695, %v3287_v0 }
 0x5d7   : > { %v2973_v4 = vadd.f32 -0.28449672, %v2961_v27  ;;  %v2963_v40 = vmul.f32 %v13322_v56, %v2951_v17  ;;  %v13349_v27 = vpop.eup %11215  ;;  %v2931_v32 = vadd.f32 -1.4531521, %v2919_v58  ;;  %v3063_v17 = vmul.f32 1.442695, %v3042_v11 }
 0x5d8   : > { %v2974_v5 = vadd.f32 -0.28449672, %v2962_v7  ;;  %v2964_v2 = vmul.f32 %v13330_v26, %v2952_v48  ;;  %v2920_v43 = vmul.f32 1.0614054, %v13349_v27  ;;  %11229 = vpow2.f32 %v3288_v6 }
 0x5d9   : > { %v2985_v44 = vmul.f32 %v13309_v38, %v2973_v4  ;;  %v2975_v7 = vadd.f32 -0.28449672, %v2963_v40  ;;  %v2943_v61 = vmul.f32 %v13338_v13, %v2931_v32  ;;  %v3061_v4 = vmul.f32 1.442695, %v3041_v28  ;;  %v13355_v55 = vpop.eup %11217 }
 0x5da   : > { %v2986_v41 = vmul.f32 %v13315_v42, %v2974_v5  ;;  %v2976_v58 = vadd.f32 -0.28449672, %v2964_v2  ;;  %v2932_v54 = vadd.f32 -1.4531521, %v2920_v43  ;;  %v11220_v0 = vpop.eup %11219  ;;  %v2921_v48 = vmul.f32 1.0614054, %v13355_v55 }
 0x5db   : > { %v2997_v53 = vadd.f32 0.2548296, %v2985_v44  ;;  %v2987_v5 = vmul.f32 %v13322_v56, %v2975_v7  ;;  %v2955_v40 = vadd.f32 1.4214138, %v2943_v61  ;;  %v11222_v32 = vpop.eup %11221  ;;  %11231 = vpow2.f32 %v3061_v4 }
 0x5dc   : > { %v2998_v52 = vadd.f32 0.2548296, %v2986_v41  ;;  %v2988_v28 = vmul.f32 %v13330_v26, %v2976_v58  ;;  %v2944_v11 = vmul.f32 %v13349_v27, %v2932_v54  ;;  %11233 = vpow2.f32 %v3063_v17 }
 0x5dd   : > { %v3009_v3 = vmul.f32 %v13309_v38, %v2997_v53  ;;  %v2999_v60 = vadd.f32 0.2548296, %v2987_v5  ;;  %v2967_v38 = vmul.f32 %v13338_v13, %v2955_v40  ;;  %v2933_v53 = vadd.f32 -1.4531521, %v2921_v48 }
 0x5de   : > { %v3010_v44 = vmul.f32 %v13315_v42, %v2998_v52  ;;  %v3000_v42 = vadd.f32 0.2548296, %v2988_v28  ;;  %v2956_v43 = vadd.f32 1.4214138, %v2944_v11  ;;  %v13365_v52 = vpop.eup %11223  ;;  %v2814_v50 = vmul.f32 0.5, %v13281_v10 }
 0x5df   : > { %v3069_v41 = vmul.f32 %v11212_v35, %v3009_v3  ;;  %v3011_v7 = vmul.f32 %v13322_v56, %v2999_v60  ;;  %v2979_v35 = vadd.f32 -0.28449672, %v2967_v38  ;;  %v2945_v61 = vmul.f32 %v13355_v55, %v2933_v53  ;;  %v11226_v3 = vpop.eup %11225 }
 0x5e0   : > { %v3070_v22 = vmul.f32 %v11214_v19, %v3010_v44  ;;  %v3012_v58 = vmul.f32 %v13330_v26, %v3000_v42  ;;  %v2968_v4 = vmul.f32 %v13349_v27, %v2956_v43  ;;  %v11228_v54 = vpop.eup %11227 }
 0x5e1   : > { %v3081_v2 = vsub.f32 1.0, %v3069_v41  ;;  %v3071_v19 = vmul.f32 %v11220_v0, %v3011_v7  ;;  %v2991_v56 = vmul.f32 %v13338_v13, %v2979_v35  ;;  %v2957_v44 = vadd.f32 1.4214138, %v2945_v61 }
 0x5e2   : > { %v3082_v6 = vsub.f32 1.0, %v3070_v22  ;;  %v2922_v22 = vmul.f32 1.0614054, %v13365_v52  ;;  %v3072_v41 = vmul.f32 %v11222_v32, %v3012_v58  ;;  %v2980_v17 = vadd.f32 -0.28449672, %v2968_v4 }
 0x5e3   : > { %v3093_v5 = vmul.f32 %v3081_v2, %v13295_v23  ;;  %v3083_v48 = vsub.f32 1.0, %v3071_v19  ;;  %v3003_v11 = vadd.f32 0.2548296, %v2991_v56  ;;  %v2969_v23 = vmul.f32 %v13355_v55, %v2957_v44  ;;  %v11230_v2 = vpop.eup %11229 }
 0x5e4   : > { %v3094_v60 = vmul.f32 %v3082_v6, %v13298_v57  ;;  %v2934_v0 = vadd.f32 -1.4531521, %v2922_v22  ;;  %v3084_v53 = vsub.f32 1.0, %v3072_v41  ;;  %v2992_v57 = vmul.f32 %v13349_v27, %v2980_v17 }
 0x5e5   : > { %v3105_v40 = vadd.f32 1.0, %v3093_v5  ;;  %v3095_v38 = vmul.f32 %v3083_v48, %v13301_v24  ;;  %v3015_v42 = vmul.f32 %v13338_v13, %v3003_v11  ;;  %v2981_v43 = vadd.f32 -0.28449672, %v2969_v23  ;;  %v11232_v5 = vpop.eup %11231 }
 0x5e6   : > { %v3106_v28 = vadd.f32 1.0, %v3094_v60  ;;  %v2946_v32 = vmul.f32 %v13365_v52, %v2934_v0  ;;  %v3096_v61 = vmul.f32 %v3084_v53, %v13312_v39  ;;  %v3290_v56 = vadd.f32 1.0, %v11230_v2 }
 0x5e7   : > { %v3117_v26 = vmul.f32 %v3105_v40, %v13283_v62  ;;  %v3107_v35 = vadd.f32 1.0, %v3095_v38  ;;  %v3004_v62 = vadd.f32 0.2548296, %v2992_v57  ;;  %v3075_v24 = vmul.f32 %v11226_v3, %v3015_v42 }
 0x5e8   : > { %v3118_v7 = vmul.f32 %v3106_v28, %v13285_v63  ;;  %v2993_v19 = vmul.f32 %v13355_v55, %v2981_v43  ;;  %v2958_v58 = vadd.f32 1.4214138, %v2946_v32  ;;  %v3108_v13 = vadd.f32 1.0, %v3096_v61 }
 0x5e9   : > { %v13382_v6 = vmul.f32 %v3117_v26, %v13066_v8  ;;  %v3119_v63 = vmul.f32 %v3107_v35, %v13287_v1  ;;  %v3016_v60 = vmul.f32 %v13349_v27, %v3004_v62  ;;  %v11234_v8 = vpop.eup %11233  ;;  %v3087_v44 = vsub.f32 1.0, %v3075_v24 }
 0x5ea   : > { %v13387_v4 = vmul.f32 %v3118_v7, %v13070_v21  ;;  %v3005_v39 = vadd.f32 0.2548296, %v2993_v19  ;;  %v2970_v22 = vmul.f32 %v13365_v52, %v2958_v58  ;;  %v3120_v21 = vmul.f32 %v3108_v13, %v13303_v25 }
 0x5eb   : > { %v13395_v3 = vmul.f32 %v3119_v63, %v13225_v29  ;;  %v3076_v40 = vmul.f32 %v11228_v54, %v3016_v60  ;;  %11235 = vlog2.f32 %v3290_v56  ;;  %v3099_v1 = vmul.f32 %v3087_v44, %v13328_v18 }
 0x5ec   : > { %4203 = vmatprep.mubr.f32.mxu0 %v13387_v4  ;;  %v3017_v27 = vmul.f32 %v13355_v55, %v3005_v39  ;;  %v2982_v48 = vadd.f32 -0.28449672, %v2970_v22  ;;  %v13402_v20 = vmul.f32 %v3120_v21, %v13227_v30  ;;  %v2811_v41 = vmul.f32 0.5, %v13275_v47 }
 0x5ed   : > { %4204 = vmatmul.mubr.f32.vlgmr.msra.gmra.mrb[16].mxu0 %v13382_v6  ;;  %v15301_v17 = vmov -1.0   ;;  %v3088_v29 = vsub.f32 1.0, %v3076_v40  ;;  %v3111_v11 = vadd.f32 1.0, %v3099_v1  ;;  %v2812_v55 = vmul.f32 0.5, %v13277_v51 }
 0x5ee   : > { %v2848_v28 = vsel %vm2836_vm6, 1.0, %v15301_v17  ;;  %v3077_v25 = vmul.f32 %v11232_v5, %v3017_v27  ;;  %v2994_v54 = vmul.f32 %v13365_v52, %v2982_v48  ;;  %v2849_v30 = vsel %vm2837_vm7, 1.0, %v15301_v17 }
 0x5ef   : > { %v3100_v23 = vmul.f32 %v3088_v29, %v2848_v28  ;;  %v3123_v0 = vmul.f32 %v3111_v11, %v2811_v41  ;;  %v2850_v62 = vsel %vm2838_vm8, 1.0, %v15301_v17  ;;  %v15302_v39 = vmov 0.0  }
 0x5f0   : > { %v3089_v18 = vsub.f32 1.0, %v3077_v25  ;;  %v3006_v26 = vadd.f32 0.2548296, %v2994_v54 }
 0x5f1   : > { %v3112_v38 = vadd.f32 1.0, %v3100_v23  ;;  %v13412_v57 = vmul.f32 %v3123_v0, %v13078_v33 }
 0x5f2   : > { %v3101_v53 = vmul.f32 %v3089_v18, %v2849_v30  ;;  %v3018_v47 = vmul.f32 %v13365_v52, %v3006_v26 }
 0x5f3   : > { %v3124_v2 = vmul.f32 %v3112_v38, %v2812_v55 }
 0x5f4   : > { %v3113_v7 = vadd.f32 1.0, %v3101_v53  ;;  %v3078_v42 = vmul.f32 %v11234_v8, %v3018_v47 }
 0x5f5   : > { %v11236_v43 = vpop.eup %11235  ;;  %v13417_v32 = vmul.f32 %v3124_v2, %v13082_v36 }
 0x5f6   : > { %v3125_v51 = vmul.f32 %v3113_v7, %v2813_v49  ;;  %v3090_v35 = vsub.f32 1.0, %v3078_v42  ;;  %v3292_v61 = vmul.f32 0.6931472, %v11236_v43 }
 0x5f7   : > { %4208 = vmatprep.mubr.f32.mxu0 %v13417_v32 }
 0x5f8   : > { %v3102_v33 = vmul.f32 %v3090_v35, %v2850_v62  ;;  %4209 = vmatmul.mubr.f32.gmra.mrb[18].mxu0 %v13412_v57  ;;  %v3300_v9 = vrot.slane %v3292_v61, %v12559_v16  ;;  %v13424_v52 = vmul.f32 %v3125_v51, %v13235_v34 }
 0x5fa   : > { %v3114_v5 = vadd.f32 1.0, %v3102_v33  ;;  %3302 = vperm.xlu0 %11192, %v3300_v9  }
 0x5fc   : > { %v3126_v36 = vmul.f32 %v3114_v5, %v2814_v50 }
 0x5fe   : > { %v13428_v24 = vmul.f32 %v3126_v36, %v13239_v46 }
 0x619   : > { %v13430_v19 = vpop.f32.mrb[12].mxu1 }
 0x61a   : > { %v13433_v58 = vmul.f32 0.70710677, %v13430_v19  ;;  %v13435_v63 = vpop.f32.mrb[13].mxu1 }
 0x61b   : > { %v13438_v13 = vmul.f32 0.70710677, %v13435_v63  ;;  %v2794_v34 = vpop.f32.mrb[12].mxu0 }
 0x61c   : > { %v2857_v60 = vand.u32 2147483647, %v13433_v58  ;;  %v2796_v10 = vpop.f32.mrb[13].mxu0  ;;  %vm2833_vm9 = vcmp.ge.f32.partialorder %v13433_v58, 0.0 }
 0x61d   : > { %v2858_v56 = vand.u32 2147483647, %v13438_v13  ;;  %8820 = vmatpush3.xpose.msra.mxu1 %v2796_v10  ;;  %v13442_v8 = vpop.f32.mrb[14].mxu1  ;;  %vm2834_vm10 = vcmp.ge.f32.partialorder %v13438_v13, 0.0 }
 0x61e   : > { %v2869_v46 = vmul.f32 0.3275911, %v2857_v60  ;;  %v13444_v44 = vpop.f32.mrb[15].mxu1  ;;  %8824 = vmatprep.subr.mxu1 %v15302_v39  ;;  %v13448_v21 = vmul.f32 0.70710677, %v13442_v8  ;;  %v3025_v23 = vsub.f32 0.0, %v2857_v60 }
 0x61f   : > { %v2870_v22 = vmul.f32 0.3275911, %v2858_v56  ;;  %v13451_v1 = vmul.f32 0.70710677, %v13444_v44  ;;  %v2800_v27 = vpop.f32.mrb[14].mxu0  ;;  %v3026_v18 = vsub.f32 0.0, %v2858_v56 }
 0x620   : > { %v2881_v40 = vadd.f32 1.0, %v2869_v46  ;;  %8822 = vmatmul.mubr.f32.vlgmr.msra.gmra.mrb[16].mxu1 %v2794_v34  ;;  %v2863_v41 = vand.u32 2147483647, %v13448_v21  ;;  %v2802_v28 = vpop.f32.mrb[15].mxu0  ;;  %v3037_v55 = vmul.f32 %v3025_v23, %v2857_v60  ;;  %vm2839_vm11 = vcmp.ge.f32.partialorder %v13448_v21, 0.0 }
 0x621   : > { %v2882_v48 = vadd.f32 1.0, %v2870_v22  ;;  %8826 = vmatprep.mubr.msk.f32.mxu1 %vm11785_vm0, %v15302_v39  ;;  %8825 = vmatpush3.xpose.msra.mxu1 %v2802_v28  ;;  %v2864_v11 = vand.u32 2147483647, %v13451_v1  ;;  %v3038_v53 = vmul.f32 %v3026_v18, %v2858_v56  ;;  %vm2840_vm12 = vcmp.ge.f32.partialorder %v13451_v1, 0.0 }
 0x622   : > { %11237 = vrcp.f32 %v2881_v40  ;;  %v2875_v29 = vmul.f32 0.3275911, %v2863_v41  ;;  %v3031_v47 = vsub.f32 0.0, %v2863_v41  ;;  %v3053_v7 = vmul.f32 1.442695, %v3037_v55 }
 0x623   : > { %11239 = vrcp.f32 %v2882_v48  ;;  %v2876_v54 = vmul.f32 0.3275911, %v2864_v11  ;;  %v3032_v43 = vsub.f32 0.0, %v2864_v11  ;;  %v3055_v61 = vmul.f32 1.442695, %v3038_v53 }
 0x624   : > { %v2887_v25 = vadd.f32 1.0, %v2875_v29  ;;  %8827 = vmatmul.mubr.f32.vlgmr.msra.gmra.mrb[18].mxu1 %v2800_v27  ;;  %v3043_v62 = vmul.f32 %v3031_v47, %v2863_v41  ;;  %v2816_v1 = vmul.f32 0.5, %v13444_v44 }
 0x625   : > { %3399 = vmatprep.mubr.f32.mxu1 %v15302_v39  ;;  %v2888_v0 = vadd.f32 1.0, %v2876_v54  ;;  %v3044_v60 = vmul.f32 %v3032_v43, %v2864_v11 }
 0x626   : > { %11241 = vrcp.f32 %v2887_v25  ;;  %v3065_v56 = vmul.f32 1.442695, %v3043_v62 }
 0x627   : > { %11243 = vrcp.f32 %v2888_v0  ;;  %v3067_v25 = vmul.f32 1.442695, %v3044_v60 }
 0x628   : > { %11245 = vpow2.f32 %v3053_v7 }
 0x629   : > { %11247 = vpow2.f32 %v3055_v61 }
 0x62a   : > { %11249 = vpow2.f32 %v3065_v56 }
 0x62b   : > { %11251 = vpow2.f32 %v3067_v25 }
 0x62c   : > { %v11238_v26 = vpop.eup %11237 }
 0x62d   : > { %v11240_v38 = vpop.eup %11239  ;;  %v2917_v30 = vmul.f32 1.0614054, %v11238_v26 }
 0x62e   : > { %v2918_v2 = vmul.f32 1.0614054, %v11240_v38 }
 0x62f   : > { %v2929_v49 = vadd.f32 -1.4531521, %v2917_v30 }
 0x630   : > { %v2930_v42 = vadd.f32 -1.4531521, %v2918_v2  ;;  %v11242_v51 = vpop.eup %11241 }
 0x631   : > { %v2941_v35 = vmul.f32 %v11238_v26, %v2929_v49  ;;  %v2923_v9 = vmul.f32 1.0614054, %v11242_v51  ;;  %v11244_v5 = vpop.eup %11243 }
 0x632   : > { %v2942_v33 = vmul.f32 %v11240_v38, %v2930_v42  ;;  %v2924_v46 = vmul.f32 1.0614054, %v11244_v5  ;;  %v11246_v2 = vpop.eup %11245 }
 0x633   : > { %v2953_v50 = vadd.f32 1.4214138, %v2941_v35  ;;  %v2935_v34 = vadd.f32 -1.4531521, %v2923_v9  ;;  %v11248_v42 = vpop.eup %11247 }
 0x634   : > { %v2954_v36 = vadd.f32 1.4214138, %v2942_v33  ;;  %v2936_v48 = vadd.f32 -1.4531521, %v2924_v46  ;;  %v2809_v46 = vmul.f32 0.5, %v13430_v19 }
 0x635   : > { %v2965_v10 = vmul.f32 %v11238_v26, %v2953_v50  ;;  %v2947_v40 = vmul.f32 %v11242_v51, %v2935_v34  ;;  %v2845_v50 = vsel %vm2833_vm9, 1.0, %v15301_v17  ;;  %vm6752_vm9 = vcmask 1043456  }
 0x636   : > { %v2966_v22 = vmul.f32 %v11240_v38, %v2954_v36  ;;  %v2948_v54 = vmul.f32 %v11244_v5, %v2936_v48 }
 0x637   : > { %v2977_v27 = vadd.f32 -0.28449672, %v2965_v10  ;;  %v2959_v29 = vadd.f32 1.4214138, %v2947_v40 }
 0x638   : > { %v2978_v28 = vadd.f32 -0.28449672, %v2966_v22  ;;  %v2960_v55 = vadd.f32 1.4214138, %v2948_v54 }
 0x639   : > { %v2989_v41 = vmul.f32 %v11238_v26, %v2977_v27  ;;  %v2971_v0 = vmul.f32 %v11242_v51, %v2959_v29  ;;  %v2810_v27 = vmul.f32 0.5, %v13435_v63  ;;  %v2852_v63 = vsel %vm2840_vm12, 1.0, %v15301_v17 }
 0x63a   : > { %v2990_v23 = vmul.f32 %v11240_v38, %v2978_v28  ;;  %v2972_v47 = vmul.f32 %v11244_v5, %v2960_v55 }
 0x63b   : > { %v3001_v18 = vadd.f32 0.2548296, %v2989_v41  ;;  %v2983_v11 = vadd.f32 -0.28449672, %v2971_v0 }
 0x63c   : > { %v3002_v30 = vadd.f32 0.2548296, %v2990_v23  ;;  %v2984_v35 = vadd.f32 -0.28449672, %v2972_v47 }
 0x63d   : > { %v3013_v53 = vmul.f32 %v11238_v26, %v3001_v18  ;;  %v2995_v7 = vmul.f32 %v11242_v51, %v2983_v11  ;;  %v11250_v26 = vpop.eup %11249 }
 0x63e   : > { %v3014_v49 = vmul.f32 %v11240_v38, %v3002_v30  ;;  %v2996_v9 = vmul.f32 %v11244_v5, %v2984_v35  ;;  %v2846_v38 = vsel %vm2834_vm10, 1.0, %v15301_v17  ;;  %v11252_v40 = vpop.eup %11251  ;;  %vm6725_vm10 = vcmask 31744  }
 0x63f   : > { %v3073_v43 = vmul.f32 %v11246_v2, %v3013_v53  ;;  %v3007_v62 = vadd.f32 0.2548296, %v2995_v7 }
 0x640   : > { %v3074_v61 = vmul.f32 %v11248_v42, %v3014_v49  ;;  %v3008_v10 = vadd.f32 0.2548296, %v2996_v9 }
 0x641   : > { %v3085_v33 = vsub.f32 1.0, %v3073_v43  ;;  %v3019_v34 = vmul.f32 %v11242_v51, %v3007_v62  ;;  %v2851_v51 = vsel %vm2839_vm11, 1.0, %v15301_v17 }
 0x642   : > { %v3086_v36 = vsub.f32 1.0, %v3074_v61  ;;  %v3020_v22 = vmul.f32 %v11244_v5, %v3008_v10  ;;  %v2815_v5 = vmul.f32 0.5, %v13442_v8 }
 0x643   : > { %v3097_v60 = vmul.f32 %v3085_v33, %v2845_v50  ;;  %v3079_v58 = vmul.f32 %v11250_v26, %v3019_v34 }
 0x644   : > { %v3098_v56 = vmul.f32 %v3086_v36, %v2846_v38  ;;  %v3080_v25 = vmul.f32 %v11252_v40, %v3020_v22 }
 0x645   : > { %v3109_v13 = vadd.f32 1.0, %v3097_v60  ;;  %v3091_v28 = vsub.f32 1.0, %v3079_v58 }
 0x646   : > { %v3110_v48 = vadd.f32 1.0, %v3098_v56  ;;  %v3092_v23 = vsub.f32 1.0, %v3080_v25  ;;  %v3718_v25 = vld [vmem:[%s12350_s10 + $0x310] sm:$0xff] }
 0x647   : > { %v3121_v29 = vmul.f32 %v3109_v13, %v2809_v46  ;;  %v3103_v54 = vmul.f32 %v3091_v28, %v2851_v51  ;;  %v3766_v28 = vld [vmem:[%s12350_s10 + $0x490] sm:$0xff] }
 0x648   : > { %v3122_v41 = vmul.f32 %v3110_v48, %v2810_v27  ;;  %v3104_v18 = vmul.f32 %v3092_v23, %v2852_v63  ;;  %v3772_v23 = vld [vmem:[%s12350_s10 + $0x4c0] sm:$0xff]  ;;  %v3727_v63 = vld [vmem:[%s12350_s10 + $0x358] sm:$0xff] }
 0x649   : > { %v3133_v21 = vmul.f32 %v3121_v29, %v13229_v31  ;;  %v3115_v0 = vadd.f32 1.0, %v3103_v54  ;;  %v3769_v29 = vld [vmem:[%s12350_s10 + $0x4a8] sm:$0xff] }
 0x64a   : > { %v13469_v19 = vmul.f32 %v3122_v41, %v13231_v59  ;;  %v3116_v30 = vadd.f32 1.0, %v3104_v18  ;;  %v9860_v51 = vpack.c.bf16 %v3769_v29, %v3766_v28  ;;  %v3721_v41 = vld [vmem:[%s12350_s10 + $0x328] sm:$0xff] }
 0x64b   : > { %3335 = vmatprep.subr.mxu1 %v3133_v21  ;;  %v3127_v55 = vmul.f32 %v3115_v0, %v2815_v5  ;;  %v9862_v54 = vpack.c.bf16 %v3721_v41, %v3718_v25  ;;  %v3775_v21 = vld [vmem:[%s12350_s10 + $0x4d8] sm:$0xff]  ;;  %v3724_v0 = vld [vmem:[%s12350_s10 + $0x340] sm:$0xff]  ;;  %v3757_v28 = vld [vmem:[%s12350_s10 + $0x448] sm:$0xff] }
 0x64c   : > { %3336 = vmatpush1.msra.mxu1 %v13402_v20  ;;  %v3128_v59 = vmul.f32 %v3116_v30, %v2816_v1  ;;  %v15303_v20 = vlaneseq  ;;  %9861 = vmatprep.subr.bf16.mxu0 %v9860_v51  ;;  %v9864_v5 = vpack.c.bf16 %v3775_v21, %v3772_v23  ;;  %v3778_v1 = vld [vmem:[%s12350_s10 + $0x4f0] sm:$0xff]  ;;  %v3781_v30 = vld [vmem:[%s12350_s10 + $0x508] sm:$0xff]  ;;  %v3623_v25 = vld [vmem:[%s12350_s10 + $0x18] sm:$0xff] }
 0x64d   : > { %8829 = vmatprep.subr.mxu1 %v15302_v39  ;;  %v13477_v31 = vmul.f32 %v3127_v55, %v13241_v37  ;;  %9863 = vmatpush3.bf16.msra.mxu0 %v9862_v54  ;;  %v9866_v55 = vpack.c.bf16 %v3727_v63, %v3724_v0  ;;  %v3808_v54 = vld [vmem:[%s12350_s10 + $0x5e0] sm:$0xff]  ;;  %v3811_v23 = vld [vmem:[%s12350_s10 + $0x5f8] sm:$0xff]  ;;  %v3630_v21 = vld [vmem:[%s12350_s10 + $0x50] sm:$0xff] }
 0x64e   : > { %v13480_v11 = vmul.f32 %v3128_v59, %v13243_v45  ;;  %v3286_v44 = vand.u32 127, %v15303_v20  ;;  %9865 = vmatprep.subr.bf16.mxu0 %v9864_v5  ;;  %v9868_v59 = vpack.c.bf16 %v3781_v30, %v3778_v1  ;;  %v3787_v20 = vld [vmem:[%s12350_s10 + $0x538] sm:$0xff]  ;;  %v9888_v5 = vpack.c.bf16 %v3811_v23, %v3808_v54  ;;  %v3760_v0 = vld [vmem:[%s12350_s10 + $0x460] sm:$0xff]  ;;  %v3629_v1 = vld [vmem:[%s12350_s10 + $0x48] sm:$0xff] }
 0x64f   : > { %v3763_v63 = vld [vmem:[%s12350_s10 + $0x478] sm:$0xff]  ;;  %v3668_v54 = vld [vmem:[%s12350_s10 + $0x180] sm:$0xff] }
 0x650   : > { %v3294_v42 = vsub.s32 %v3286_v44, %v12550_v12  ;;  %vm3293_vm13 = vcmp.le.s32.totalorder %v3286_v44, %v12550_v12  ;;  %v9890_v30 = vpack.c.bf16 %v3763_v63, %v3760_v0  ;;  %v3671_v23 = vld [vmem:[%s12350_s10 + $0x198] sm:$0xff]  ;;  %v3674_v0 = vld [vmem:[%s12350_s10 + $0x1b0] sm:$0xff]  ;;  %v3677_v63 = vld [vmem:[%s12350_s10 + $0x1c8] sm:$0xff] }
 0x651   : > { %9867 = vmatpush3.bf16.msra.mxu0 %v9866_v55  ;;  %v3626_v55 = vld [vmem:[%s12350_s10 + $0x30] sm:$0xff] }
 0x652   : > { %v3295_v43 = vcvt.s32.f32 %v3294_v42  ;;  %9869 = vmatprep.subr.bf16.mxu0 %v9868_v59  ;;  %v3633_v59 = vld [vmem:[%s12350_s10 + $0x68] sm:$0xff] }
 0x679   : > { %v3303_v35 = vpop.permute.xlu0 %3302 }
 0x67a   : > { %v3305_v37 = vmul.f32 %v3303_v35, %v3295_v43  ;;  %v3736_v43 = vld [vmem:[%s12350_s10 + $0x3a0] sm:$0xff]  ;;  %v3739_v35 = vld [vmem:[%s12350_s10 + $0x3b8] sm:$0xff] }
 0x67c   : > { %v3306_v61 = vsel %vm3293_vm13, %v3305_v37, -1e+30  ;;  %v9874_v37 = vpack.c.bf16 %v3739_v35, %v3736_v43  ;;  %v3638_v35 = vld [vmem:[%s12350_s10 + $0x90] sm:$0xff] }
 0x6c0   : > { %v8451_v8 = vpop.f32.mrb[16].mxu0 }
 0x6c1   : > { %v8452_v53 = vpop.f32.mrb[17].mxu0 }
 0x6c2   : > { %v13482_v47 = vadd.f32 %v8452_v53, %v8451_v8  ;;  %v3730_v8 = vld [vmem:[%s12350_s10 + $0x370] sm:$0xff]  ;;  %v3733_v53 = vld [vmem:[%s12350_s10 + $0x388] sm:$0xff] }
 0x6cb   : > { %v8454_v2 = vpop.f32.mrb[18].mxu0 }
 0x6cc   : > { %v8455_v49 = vpop.f32.mrb[19].mxu0 }
 0x6cd   : > { %v13484_v7 = vadd.f32 %v8455_v49, %v8454_v2  ;;  %v9870_v2 = vpack.c.bf16 %v3733_v53, %v3730_v8  ;;  %v3784_v49 = vld [vmem:[%s12350_s10 + $0x520] sm:$0xff] }
 0x6ce   : > { %v9872_v42 = vpack.c.bf16 %v3787_v20, %v3784_v49  ;;  %v3636_v8 = vld [vmem:[%s12350_s10 + $0x80] sm:$0xff]  ;;  %v3635_v49 = vld [vmem:[%s12350_s10 + $0x78] sm:$0xff] }
 0x6cf   : > { %9871 = vmatpush3.bf16.msra.mxu0 %v9870_v2  ;;  %v9644_v53 = vpack.c.bf16 %v3636_v8, %v3633_v59  ;;  %v3632_v2 = vld [vmem:[%s12350_s10 + $0x60] sm:$0xff]  ;;  %v3639_v20 = vld [vmem:[%s12350_s10 + $0x98] sm:$0xff] }
 0x6d0   : > { %9873 = vmatprep.subr.bf16.mxu0 %v9872_v42  ;;  %v9646_v42 = vpack.c.bf16 %v3635_v49, %v3632_v2  ;;  %v3680_v59 = vld [vmem:[%s12350_s10 + $0x1e0] sm:$0xff]  ;;  %v3683_v8 = vld [vmem:[%s12350_s10 + $0x1f8] sm:$0xff] }
 0x6d1   : > { %v9678_v2 = vpack.c.bf16 %v3683_v8, %v3680_v59  ;;  %v3734_v59 = vld [vmem:[%s12350_s10 + $0x390] sm:$0xff]  ;;  %v3737_v8 = vld [vmem:[%s12350_s10 + $0x3a8] sm:$0xff] }
 0x6d3   : > { %9875 = vmatpush3.bf16.msra.mxu0 %v9874_v37  ;;  %v3641_v37 = vld [vmem:[%s12350_s10 + $0xa8] sm:$0xff] }
 0x6f3   : > { %v3207_v45 = vpop.f32.mrb[16].mxu1 }
 0x6f4   : > { %v3281_v62 = vmul.f32 0.14433756, %v3207_v45  ;;  %v8823_v33 = vpop.f32.mrb[17].mxu1  ;;  %v3793_v45 = vld [vmem:[%s12350_s10 + $0x568] sm:$0xff] }
 0x6f6   : > { %v3307_v9 = vadd.f32 %v3306_v61, %v3281_v62 }
 0x6f7   : > { %v3277_v50 = vpop.f32.mrb[18].mxu1 }
 0x6f8   : > { %v3310_v36 = vsel %vm3309_vm14, %v3307_v9, -inf  ;;  %v3282_v34 = vmul.f32 0.14433756, %v3277_v50  ;;  %v8828_v26 = vpop.f32.mrb[19].mxu1  ;;  %v3745_v50 = vld [vmem:[%s12350_s10 + $0x3e8] sm:$0xff] }
 0x6f9   : > { %3311 = vmax.xlane.f32.xlu1 %v3310_v36  ;;  %v3796_v26 = vld [vmem:[%s12350_s10 + $0x580] sm:$0xff] }
 0x6fa   : > { %v3308_v60 = vadd.f32 %v3306_v61, %v3282_v34  ;;  %v3790_v61 = vld [vmem:[%s12350_s10 + $0x550] sm:$0xff] }
 0x6fb   : > { %v9876_v62 = vpack.c.bf16 %v3793_v45, %v3790_v61  ;;  %v3648_v61 = vld [vmem:[%s12350_s10 + $0xe0] sm:$0xff]  ;;  %v9650_v45 = vpack.c.bf16 %v3641_v37, %v3638_v35 }
 0x6fc   : > { %v3313_v38 = vsel %vm3309_vm14, %v3308_v60, -inf }
 0x6fd   : > { %3314 = vmax.xlane.f32.xlu1 %v3313_v38  ;;  %9877 = vmatprep.subr.bf16.mxu0 %v9876_v62 }
 0x786   : > { %v3312_v10 = vpop.xlane.xlu1 %3311 }
 0x787   : > { %v3316_v12 = vsub.f32 %v3307_v9, %v3312_v10  ;;  %v3742_v9 = vld [vmem:[%s12350_s10 + $0x3d0] sm:$0xff]  ;;  %v3748_v10 = vld [vmem:[%s12350_s10 + $0x400] sm:$0xff] }
 0x788   : > { %v9878_v34 = vpack.c.bf16 %v3745_v50, %v3742_v9  ;;  %v3647_v9 = vld [vmem:[%s12350_s10 + $0xd8] sm:$0xff] }
 0x789   : > { %v3318_v56 = vmul.f32 1.442695, %v3316_v12  ;;  %v3751_v12 = vld [vmem:[%s12350_s10 + $0x418] sm:$0xff] }
 0x78a   : > { %v3315_v58 = vpop.xlane.xlu1 %3314  ;;  %9879 = vmatpush3.bf16.msra.mxu0 %v9878_v34  ;;  %v3651_v50 = vld [vmem:[%s12350_s10 + $0xf8] sm:$0xff] }
 0x78b   : > { %11253 = vpow2.f32 %v3318_v56  ;;  %v3317_v46 = vsub.f32 %v3308_v60, %v3315_v58  ;;  %v3799_v60 = vld [vmem:[%s12350_s10 + $0x598] sm:$0xff]  ;;  %v9882_v56 = vpack.c.bf16 %v3751_v12, %v3748_v10  ;;  %v3802_v58 = vld [vmem:[%s12350_s10 + $0x5b0] sm:$0xff]  ;;  %v3657_v10 = vld [vmem:[%s12350_s10 + $0x128] sm:$0xff] }
 0x78c   : > { %v9880_v38 = vpack.c.bf16 %v3799_v60, %v3796_v26  ;;  %v3650_v60 = vld [vmem:[%s12350_s10 + $0xf0] sm:$0xff]  ;;  %v3660_v12 = vld [vmem:[%s12350_s10 + $0x140] sm:$0xff] }
 0x78d   : > { %v3320_v13 = vmul.f32 1.442695, %v3317_v46  ;;  %v3805_v46 = vld [vmem:[%s12350_s10 + $0x5c8] sm:$0xff] }
 0x78e   : > { %9881 = vmatprep.subr.bf16.mxu0 %v9880_v38  ;;  %v3653_v38 = vld [vmem:[%s12350_s10 + $0x108] sm:$0xff] }
 0x78f   : > { %11255 = vpow2.f32 %v3320_v13  ;;  %9883 = vmatpush3.bf16.msra.mxu0 %v9882_v56  ;;  %v9658_v56 = vpack.c.bf16 %v3653_v38, %v3650_v60 }
 0x795   : > { %v11254_v22 = vpop.eup %11253 }
 0x796   : > { %v3322_v40 = vsel %vm3309_vm14, %v11254_v22, 0.0 }
 0x797   : > { %3323 = vadd.xlane.f32.xlu1 %v3322_v40  ;;  %v3624_v40 = vld [vmem:[%s12350_s10 + $0x20] sm:$0xff] }
 0x799   : > { %v13492_v27 = vpop.eup %11255 }
 0x79a   : > { %v3325_v48 = vsel %vm3309_vm14, %v13492_v27, 0.0 }
 0x79b   : > { %3326 = vadd.xlane.f32.xlu1 %v3325_v48  ;;  %v3754_v48 = vld [vmem:[%s12350_s10 + $0x430] sm:$0xff] }
 0x79c   : > { %v9886_v41 = vpack.c.bf16 %v3757_v28, %v3754_v48  ;;  %v3662_v48 = vld [vmem:[%s12350_s10 + $0x150] sm:$0xff]  ;;  %v3665_v28 = vld [vmem:[%s12350_s10 + $0x168] sm:$0xff] }
 0x824   : > { %v3324_v18 = vpop.xlane.xlu1 %3323 }
 0x825   : > { %11257 = vrcp.f32 %v3324_v18 }
 0x828   : > { %v3327_v44 = vpop.xlane.xlu1 %3326 }
 0x829   : > { %11259 = vrcp.f32 %v3327_v44  ;;  %v3642_v44 = vld [vmem:[%s12350_s10 + $0xb0] sm:$0xff] }
 0x82a   : > { %v9648_v43 = vpack.c.bf16 %v3642_v44, %v3639_v20  ;;  %v3686_v20 = vld [vmem:[%s12350_s10 + $0x210] sm:$0xff]  ;;  %v3689_v44 = vld [vmem:[%s12350_s10 + $0x228] sm:$0xff] }
 0x82b   : > { %v9682_v35 = vpack.c.bf16 %v3689_v44, %v3686_v20  ;;  %v3865_v20 = vld [vmem:[%s12350_s10 + $0x7a8] sm:$0xff]  ;;  %v3740_v44 = vld [vmem:[%s12350_s10 + $0x3c0] sm:$0xff] }
 0x82f   : > { %v11258_v33 = vpop.eup %11257 }
 0x830   : > { %v3329_v36 = vmul.f32 %v11258_v33, %v11254_v22  ;;  %v3621_v22 = vld [vmem:[%s12350_s10 + $0x8] sm:$0xff]  ;;  %v3644_v33 = vld [vmem:[%s12350_s10 + $0xc0] sm:$0xff] }
 0x831   : > { %v9636_v51 = vpack.c.bf16 %v3624_v40, %v3621_v22  ;;  %v9654_v34 = vpack.c.bf16 %v3647_v9, %v3644_v33  ;;  %v3663_v22 = vld [vmem:[%s12350_s10 + $0x158] sm:$0xff]  ;;  %v3666_v40 = vld [vmem:[%s12350_s10 + $0x170] sm:$0xff] }
 0x832   : > { %8390 = vmatmul.mubr.msk.f32.vlgmr.msra.gmra.mrb[20].mxu1 %vm3309_vm14, %v3329_v36 }
 0x833   : > { %8830 = vmatpush3.msra.mxu1 %v13469_v19  ;;  %8831 = vmatprep.mubr.msk.f32.mxu1 %vm11785_vm0, %v15302_v39  ;;  %v11260_v13 = vpop.eup %11259  ;;  %v9884_v19 = vpack.c.bf16 %v3805_v46, %v3802_v58  ;;  %v9660_v58 = vpack.c.bf16 %v3660_v12, %v3657_v10  ;;  %v3656_v46 = vld [vmem:[%s12350_s10 + $0x120] sm:$0xff]  ;;  %v3707_v12 = vld [vmem:[%s12350_s10 + $0x2b8] sm:$0xff] }
 0x834   : > { %3479 = vmatprep.subr.mxu1 %v13477_v31  ;;  %v3620_v31 = vld [vmem:[%s12350_s10] sm:$0xff]  ;;  %v3331_v29 = vmul.f32 %v11260_v13, %v13492_v27  ;;  %v3659_v13 = vld [vmem:[%s12350_s10 + $0x138] sm:$0xff] }
 0x835   : > { %9885 = vmatprep.subr.bf16.mxu0 %v9884_v19  ;;  %v9638_v27 = vpack.c.bf16 %v3623_v25, %v3620_v31  ;;  %v9662_v19 = vpack.c.bf16 %v3659_v13, %v3656_v46  ;;  %v9664_v31 = vpack.c.bf16 %v3666_v40, %v3663_v22  ;;  %v9666_v25 = vpack.c.bf16 %v3665_v28, %v3662_v48  ;;  %v3704_v10 = vld [vmem:[%s12350_s10 + $0x2a0] sm:$0xff]  ;;  %v3710_v22 = vld [vmem:[%s12350_s10 + $0x2d0] sm:$0xff]  ;;  %v3713_v40 = vld [vmem:[%s12350_s10 + $0x2e8] sm:$0xff] }
 0x836   : > { %8832 = vmatmul.mubr.msk.f32.vlgmr.msra.gmra.mrb[22].mxu1 %vm3309_vm14, %v3329_v36  ;;  %9887 = vmatpush3.bf16.msra.mxu0 %v9886_v41  ;;  %v3654_v36 = vld [vmem:[%s12350_s10 + $0x110] sm:$0xff]  ;;  %v9694_v46 = vpack.c.bf16 %v3707_v12, %v3704_v10  ;;  %v9698_v48 = vpack.c.bf16 %v3713_v40, %v3710_v22 }
 0x837   : > { %3480 = vmatpush1.msra.mxu1 %v13428_v24  ;;  %3543 = vmatprep.mubr.f32.mxu1 %v15302_v39  ;;  %v3627_v24 = vld [vmem:[%s12350_s10 + $0x38] sm:$0xff]  ;;  %v9656_v26 = vpack.c.bf16 %v3654_v36, %v3651_v50  ;;  %v3698_v50 = vld [vmem:[%s12350_s10 + $0x270] sm:$0xff]  ;;  %v3701_v36 = vld [vmem:[%s12350_s10 + $0x288] sm:$0xff] }
 0x838   : > { %8834 = vmatprep.subr.mxu1 %v15302_v39  ;;  %v9640_v18 = vpack.c.bf16 %v3630_v21, %v3627_v24  ;;  %9889 = vmatprep.subr.bf16.mxu0 %v9888_v5  ;;  %v3675_v24 = vld [vmem:[%s12350_s10 + $0x1b8] sm:$0xff]  ;;  %v3678_v21 = vld [vmem:[%s12350_s10 + $0x1d0] sm:$0xff]  ;;  %v9670_v5 = vpack.c.bf16 %v3671_v23, %v3668_v54  ;;  %v9690_v60 = vpack.c.bf16 %v3701_v36, %v3698_v50 }
 0x83a   : > { %8392 = vmatmul.mubr.msk.f32.vlgmr.msra.gmra.mrb[24].mxu1 %vm3309_vm14, %v3331_v29  ;;  %9891 = vmatpush3.bf16.msra.mxu0 %v9890_v30 }
 0x83b   : > { %8835 = vmatpush3.msra.mxu1 %v13480_v11  ;;  %8836 = vmatprep.mubr.msk.f32.mxu1 %vm11785_vm0, %v15302_v39  ;;  %v9642_v11 = vpack.c.bf16 %v3629_v1, %v3626_v55  ;;  %v3684_v55 = vld [vmem:[%s12350_s10 + $0x200] sm:$0xff]  ;;  %v9674_v1 = vpack.c.bf16 %v3677_v63, %v3674_v0 }
 0x83c   : > { %9637 = vmatprep.subr.bf16.mxu1 %v9636_v51  ;;  %v3672_v51 = vld [vmem:[%s12350_s10 + $0x1a0] sm:$0xff] }
 0x83e   : > { %8837 = vmatmul.mubr.msk.f32.vlgmr.msra.gmra.mrb[26].mxu1 %vm3309_vm14, %v3331_v29  ;;  %v3669_v29 = vld [vmem:[%s12350_s10 + $0x188] sm:$0xff] }
 0x83f   : > { %9639 = vmatpush1.bf16.msra.mxu1 %v9638_v27  ;;  %3972 = vmatprep.mubr.f32.mxu1 %v13387_v4  ;;  %v3645_v4 = vld [vmem:[%s12350_s10 + $0xc8] sm:$0xff]  ;;  %v9668_v41 = vpack.c.bf16 %v3672_v51, %v3669_v29  ;;  %v9672_v27 = vpack.c.bf16 %v3678_v21, %v3675_v24  ;;  %v3716_v29 = vld [vmem:[%s12350_s10 + $0x300] sm:$0xff]  ;;  %v3719_v51 = vld [vmem:[%s12350_s10 + $0x318] sm:$0xff] }
 0x840   : > { %9641 = vmatprep.subr.bf16.mxu1 %v9640_v18  ;;  %v9652_v62 = vpack.c.bf16 %v3648_v61, %v3645_v4  ;;  %v3681_v18 = vld [vmem:[%s12350_s10 + $0x1e8] sm:$0xff]  ;;  %v3692_v4 = vld [vmem:[%s12350_s10 + $0x240] sm:$0xff]  ;;  %v3695_v61 = vld [vmem:[%s12350_s10 + $0x258] sm:$0xff]  ;;  %v9702_v54 = vpack.c.bf16 %v3719_v51, %v3716_v29 }
 0x841   : > { %v9676_v30 = vpack.c.bf16 %v3684_v55, %v3681_v18  ;;  %v9686_v33 = vpack.c.bf16 %v3695_v61, %v3692_v4  ;;  %v3722_v24 = vld [vmem:[%s12350_s10 + $0x330] sm:$0xff]  ;;  %v3725_v21 = vld [vmem:[%s12350_s10 + $0x348] sm:$0xff]  ;;  %v3728_v18 = vld [vmem:[%s12350_s10 + $0x360] sm:$0xff] }
 0x842   : > { %v9706_v0 = vpack.c.bf16 %v3725_v21, %v3722_v24  ;;  %v3731_v55 = vld [vmem:[%s12350_s10 + $0x378] sm:$0xff] }
 0x843   : > { %9643 = vmatpush1.bf16.msra.mxu1 %v9642_v11  ;;  %v3687_v11 = vld [vmem:[%s12350_s10 + $0x218] sm:$0xff] }
 0x844   : > { %9645 = vmatprep.subr.bf16.mxu1 %v9644_v53  ;;  %v3690_v53 = vld [vmem:[%s12350_s10 + $0x230] sm:$0xff] }
 0x845   : > { %v9680_v49 = vpack.c.bf16 %v3690_v53, %v3687_v11  ;;  %v3741_v11 = vld [vmem:[%s12350_s10 + $0x3c8] sm:$0xff]  ;;  %v3744_v53 = vld [vmem:[%s12350_s10 + $0x3e0] sm:$0xff] }
 0x847   : > { %9647 = vmatpush1.bf16.msra.mxu1 %v9646_v42  ;;  %v3693_v42 = vld [vmem:[%s12350_s10 + $0x248] sm:$0xff] }
 0x848   : > { %9649 = vmatprep.subr.bf16.mxu1 %v9648_v43  ;;  %v3696_v43 = vld [vmem:[%s12350_s10 + $0x260] sm:$0xff] }
 0x849   : > { %v9684_v37 = vpack.c.bf16 %v3696_v43, %v3693_v42  ;;  %v3743_v42 = vld [vmem:[%s12350_s10 + $0x3d8] sm:$0xff] }
 0x84a   : > { %v9718_v4 = vpack.c.bf16 %v3743_v42, %v3740_v44  ;;  %v3794_v44 = vld [vmem:[%s12350_s10 + $0x570] sm:$0xff]  ;;  %v3797_v42 = vld [vmem:[%s12350_s10 + $0x588] sm:$0xff] }
 0x84b   : > { %9651 = vmatpush1.bf16.msra.mxu1 %v9650_v45  ;;  %v3699_v45 = vld [vmem:[%s12350_s10 + $0x278] sm:$0xff] }
 0x84c   : > { %9653 = vmatprep.subr.bf16.mxu1 %v9652_v62  ;;  %v3702_v62 = vld [vmem:[%s12350_s10 + $0x290] sm:$0xff] }
 0x84d   : > { %v9688_v9 = vpack.c.bf16 %v3702_v62, %v3699_v45  ;;  %v3746_v45 = vld [vmem:[%s12350_s10 + $0x3f0] sm:$0xff]  ;;  %v3749_v62 = vld [vmem:[%s12350_s10 + $0x408] sm:$0xff] }
 0x84e   : > { %v9722_v50 = vpack.c.bf16 %v3749_v62, %v3746_v45  ;;  %v3803_v45 = vld [vmem:[%s12350_s10 + $0x5b8] sm:$0xff] }
 0x84f   : > { %9655 = vmatpush1.bf16.msra.mxu1 %v9654_v34  ;;  %v3705_v34 = vld [vmem:[%s12350_s10 + $0x2a8] sm:$0xff]  ;;  %v3807_v62 = vld [vmem:[%s12350_s10 + $0x5d8] sm:$0xff] }
 0x850   : > { %9657 = vmatprep.subr.bf16.mxu1 %v9656_v26  ;;  %v3708_v26 = vld [vmem:[%s12350_s10 + $0x2c0] sm:$0xff] }
 0x851   : > { %v9692_v38 = vpack.c.bf16 %v3708_v26, %v3705_v34  ;;  %v3752_v34 = vld [vmem:[%s12350_s10 + $0x420] sm:$0xff]  ;;  %v3755_v26 = vld [vmem:[%s12350_s10 + $0x438] sm:$0xff] }
 0x852   : > { %v9726_v10 = vpack.c.bf16 %v3755_v26, %v3752_v34  ;;  %v3809_v34 = vld [vmem:[%s12350_s10 + $0x5e8] sm:$0xff] }
 0x853   : > { %9659 = vmatpush1.bf16.msra.mxu1 %v9658_v56  ;;  %v3711_v56 = vld [vmem:[%s12350_s10 + $0x2d8] sm:$0xff]  ;;  %v3813_v26 = vld [vmem:[%s12350_s10 + $0x608] sm:$0xff] }
 0x854   : > { %9661 = vmatprep.subr.bf16.mxu1 %v9660_v58  ;;  %v3714_v58 = vld [vmem:[%s12350_s10 + $0x2f0] sm:$0xff] }
 0x855   : > { %v9696_v13 = vpack.c.bf16 %v3714_v58, %v3711_v56  ;;  %v3758_v56 = vld [vmem:[%s12350_s10 + $0x450] sm:$0xff]  ;;  %v3761_v58 = vld [vmem:[%s12350_s10 + $0x468] sm:$0xff] }
 0x856   : > { %v9730_v22 = vpack.c.bf16 %v3761_v58, %v3758_v56  ;;  %v3815_v56 = vld [vmem:[%s12350_s10 + $0x618] sm:$0xff]  ;;  %v3814_v58 = vld [vmem:[%s12350_s10 + $0x610] sm:$0xff] }
 0x857   : > { %9663 = vmatpush1.bf16.msra.mxu1 %v9662_v19  ;;  %v3717_v19 = vld [vmem:[%s12350_s10 + $0x308] sm:$0xff] }
 0x858   : > { %9665 = vmatprep.subr.bf16.mxu1 %v9664_v31  ;;  %v3720_v31 = vld [vmem:[%s12350_s10 + $0x320] sm:$0xff] }
 0x859   : > { %v9700_v28 = vpack.c.bf16 %v3720_v31, %v3717_v19  ;;  %v3764_v19 = vld [vmem:[%s12350_s10 + $0x480] sm:$0xff]  ;;  %v3767_v31 = vld [vmem:[%s12350_s10 + $0x498] sm:$0xff] }
 0x85a   : > { %v9734_v29 = vpack.c.bf16 %v3767_v31, %v3764_v19  ;;  %v3871_v19 = vld [vmem:[%s12350_s10 + $0x7d8] sm:$0xff] }
 0x85b   : > { %9667 = vmatpush1.bf16.msra.mxu1 %v9666_v25  ;;  %v3723_v25 = vld [vmem:[%s12350_s10 + $0x338] sm:$0xff] }
 0x85c   : > { %9669 = vmatprep.subr.bf16.mxu1 %v9668_v41  ;;  %v3726_v41 = vld [vmem:[%s12350_s10 + $0x350] sm:$0xff] }
 0x85d   : > { %v9704_v23 = vpack.c.bf16 %v3726_v41, %v3723_v25  ;;  %v3770_v25 = vld [vmem:[%s12350_s10 + $0x4b0] sm:$0xff]  ;;  %v3773_v41 = vld [vmem:[%s12350_s10 + $0x4c8] sm:$0xff] }
 0x85e   : > { %v9738_v24 = vpack.c.bf16 %v3773_v41, %v3770_v25 }
 0x85f   : > { %9671 = vmatpush1.bf16.msra.mxu1 %v9670_v5  ;;  %v3729_v5 = vld [vmem:[%s12350_s10 + $0x368] sm:$0xff] }
 0x860   : > { %9673 = vmatprep.subr.bf16.mxu1 %v9672_v27  ;;  %v3732_v27 = vld [vmem:[%s12350_s10 + $0x380] sm:$0xff] }
 0x861   : > { %v9708_v63 = vpack.c.bf16 %v3732_v27, %v3729_v5  ;;  %v3776_v5 = vld [vmem:[%s12350_s10 + $0x4e0] sm:$0xff]  ;;  %v3779_v27 = vld [vmem:[%s12350_s10 + $0x4f8] sm:$0xff] }
 0x863   : > { %9675 = vmatpush1.bf16.msra.mxu1 %v9674_v1  ;;  %v3735_v1 = vld [vmem:[%s12350_s10 + $0x398] sm:$0xff] }
 0x864   : > { %9677 = vmatprep.subr.bf16.mxu1 %v9676_v30  ;;  %v3738_v30 = vld [vmem:[%s12350_s10 + $0x3b0] sm:$0xff] }
 0x867   : > { %9679 = vmatpush1.bf16.msra.mxu1 %v9678_v2  ;;  %v3862_v2 = vld [vmem:[%s12350_s10 + $0x790] sm:$0xff] }
 0x868   : > { %9681 = vmatprep.subr.bf16.mxu1 %v9680_v49  ;;  %v9714_v49 = vpack.c.bf16 %v3737_v8, %v3734_v59  ;;  %v9892_v43 = vpack.c.bf16 %v3865_v20, %v3862_v2  ;;  %v3795_v2 = vld [vmem:[%s12350_s10 + $0x578] sm:$0xff] }
 0x86a   : > { %9893 = vmatprep.subr.bf16.mxu0 %v9892_v43  ;;  %v3801_v43 = vld [vmem:[%s12350_s10 + $0x5a8] sm:$0xff] }
 0x86b   : > { %9683 = vmatpush1.bf16.msra.mxu1 %v9682_v35  ;;  %v3747_v35 = vld [vmem:[%s12350_s10 + $0x3f8] sm:$0xff] }
 0x86c   : > { %9685 = vmatprep.subr.bf16.mxu1 %v9684_v37  ;;  %v3750_v37 = vld [vmem:[%s12350_s10 + $0x410] sm:$0xff] }
 0x86d   : > { %v9720_v61 = vpack.c.bf16 %v3750_v37, %v3747_v35  ;;  %v3804_v35 = vld [vmem:[%s12350_s10 + $0x5c0] sm:$0xff]  ;;  %v9754_v37 = vpack.c.bf16 %v3797_v42, %v3794_v44  ;;  %v3830_v44 = vld [vmem:[%s12350_s10 + $0x690] sm:$0xff]  ;;  %v3833_v42 = vld [vmem:[%s12350_s10 + $0x6a8] sm:$0xff] }
 0x86f   : > { %9687 = vmatpush1.bf16.msra.mxu1 %v9686_v33  ;;  %v3753_v33 = vld [vmem:[%s12350_s10 + $0x428] sm:$0xff] }
 0x870   : > { %9689 = vmatprep.subr.bf16.mxu1 %v9688_v9  ;;  %v3756_v9 = vld [vmem:[%s12350_s10 + $0x440] sm:$0xff] }
 0x871   : > { %v9724_v36 = vpack.c.bf16 %v3756_v9, %v3753_v33  ;;  %v3810_v33 = vld [vmem:[%s12350_s10 + $0x5f0] sm:$0xff] }
 0x873   : > { %9691 = vmatpush1.bf16.msra.mxu1 %v9690_v60  ;;  %v3759_v60 = vld [vmem:[%s12350_s10 + $0x458] sm:$0xff] }
 0x874   : > { %9693 = vmatprep.subr.bf16.mxu1 %v9692_v38  ;;  %v3762_v38 = vld [vmem:[%s12350_s10 + $0x470] sm:$0xff] }
 0x875   : > { %v9728_v12 = vpack.c.bf16 %v3762_v38, %v3759_v60  ;;  %v3816_v60 = vld [vmem:[%s12350_s10 + $0x620] sm:$0xff] }
 0x877   : > { %9695 = vmatpush1.bf16.msra.mxu1 %v9694_v46  ;;  %v3765_v46 = vld [vmem:[%s12350_s10 + $0x488] sm:$0xff] }
 0x878   : > { %9697 = vmatprep.subr.bf16.mxu1 %v9696_v13  ;;  %v3768_v13 = vld [vmem:[%s12350_s10 + $0x4a0] sm:$0xff] }
 0x879   : > { %v9732_v40 = vpack.c.bf16 %v3768_v13, %v3765_v46  ;;  %v3817_v46 = vld [vmem:[%s12350_s10 + $0x628] sm:$0xff]  ;;  %v3819_v13 = vld [vmem:[%s12350_s10 + $0x638] sm:$0xff] }
 0x87b   : > { %9699 = vmatpush1.bf16.msra.mxu1 %v9698_v48  ;;  %v3771_v48 = vld [vmem:[%s12350_s10 + $0x4b8] sm:$0xff] }
 0x87c   : > { %9701 = vmatprep.subr.bf16.mxu1 %v9700_v28  ;;  %v3774_v28 = vld [vmem:[%s12350_s10 + $0x4d0] sm:$0xff] }
 0x87d   : > { %v9736_v51 = vpack.c.bf16 %v3774_v28, %v3771_v48  ;;  %v9894_v48 = vpack.c.bf16 %v3817_v46, %v3814_v58  ;;  %v3818_v28 = vld [vmem:[%s12350_s10 + $0x630] sm:$0xff]  ;;  %v3841_v58 = vld [vmem:[%s12350_s10 + $0x6e8] sm:$0xff] }
 0x87e   : > { %3973 = vmatmul.mubr.f32.vlgmr.msra.gmra.mrb[28].mxu1 %v13382_v6  ;;  %v9710_v6 = vpack.c.bf16 %v3731_v55, %v3728_v18  ;;  %v9742_v18 = vpack.c.bf16 %v3779_v27, %v3776_v5  ;;  %v3828_v5 = vld [vmem:[%s12350_s10 + $0x680] sm:$0xff]  ;;  %v3874_v27 = vld [vmem:[%s12350_s10 + $0x7f0] sm:$0xff] }
 0x87f   : > { %3978 = vmatprep.mubr.f32.mxu1 %v13417_v32  ;;  %9703 = vmatpush1.bf16.msra.mxu1 %v9702_v54  ;;  %v9712_v32 = vpack.c.bf16 %v3738_v30, %v3735_v1  ;;  %v3777_v54 = vld [vmem:[%s12350_s10 + $0x4e8] sm:$0xff]  ;;  %v3782_v1 = vld [vmem:[%s12350_s10 + $0x510] sm:$0xff] }
 0x880   : > { %9705 = vmatprep.subr.bf16.mxu1 %v9704_v23  ;;  %v3780_v23 = vld [vmem:[%s12350_s10 + $0x500] sm:$0xff]  ;;  %v3785_v30 = vld [vmem:[%s12350_s10 + $0x528] sm:$0xff] }
 0x881   : > { %v9740_v21 = vpack.c.bf16 %v3780_v23, %v3777_v54  ;;  %v9746_v59 = vpack.c.bf16 %v3785_v30, %v3782_v1  ;;  %v3820_v54 = vld [vmem:[%s12350_s10 + $0x640] sm:$0xff]  ;;  %v3823_v23 = vld [vmem:[%s12350_s10 + $0x658] sm:$0xff] }
 0x882   : > { %3979 = vmatmul.mubr.f32.gmra.mrb[30].mxu1 %v13412_v57  ;;  %v9716_v57 = vpack.c.bf16 %v3744_v53, %v3741_v11  ;;  %v3788_v11 = vld [vmem:[%s12350_s10 + $0x540] sm:$0xff]  ;;  %v3791_v53 = vld [vmem:[%s12350_s10 + $0x558] sm:$0xff] }
 0x883   : > { %9707 = vmatpush1.bf16.msra.mxu1 %v9706_v0  ;;  %v3783_v0 = vld [vmem:[%s12350_s10 + $0x518] sm:$0xff]  ;;  %v9750_v20 = vpack.c.bf16 %v3791_v53, %v3788_v11  ;;  %v3834_v53 = vld [vmem:[%s12350_s10 + $0x6b0] sm:$0xff] }
 0x884   : > { %9709 = vmatprep.subr.bf16.mxu1 %v9708_v63  ;;  %v3786_v63 = vld [vmem:[%s12350_s10 + $0x530] sm:$0xff]  ;;  %v3831_v11 = vld [vmem:[%s12350_s10 + $0x698] sm:$0xff] }
 0x885   : > { %v9744_v55 = vpack.c.bf16 %v3786_v63, %v3783_v0  ;;  %v3877_v0 = vld [vmem:[%s12350_s10 + $0x808] sm:$0xff] }
 0x887   : > { %9711 = vmatpush1.bf16.msra.mxu1 %v9710_v6  ;;  %v3789_v6 = vld [vmem:[%s12350_s10 + $0x548] sm:$0xff] }
 0x888   : > { %9713 = vmatprep.subr.bf16.mxu1 %v9712_v32  ;;  %v3792_v32 = vld [vmem:[%s12350_s10 + $0x560] sm:$0xff] }
 0x889   : > { %v9748_v8 = vpack.c.bf16 %v3792_v32, %v3789_v6  ;;  %v9900_v6 = vpack.c.bf16 %v3877_v0, %v3874_v27  ;;  %v3827_v32 = vld [vmem:[%s12350_s10 + $0x678] sm:$0xff] }
 0x88b   : > { %9715 = vmatpush1.bf16.msra.mxu1 %v9714_v49  ;;  %v3798_v49 = vld [vmem:[%s12350_s10 + $0x590] sm:$0xff] }
 0x88c   : > { %9717 = vmatprep.subr.bf16.mxu1 %v9716_v57  ;;  %v9752_v57 = vpack.c.bf16 %v3798_v49, %v3795_v2  ;;  %v3880_v2 = vld [vmem:[%s12350_s10 + $0x820] sm:$0xff]  ;;  %v3883_v49 = vld [vmem:[%s12350_s10 + $0x838] sm:$0xff] }
 0x88f   : > { %9719 = vmatpush1.bf16.msra.mxu1 %v9718_v4  ;;  %v9756_v4 = vpack.c.bf16 %v3804_v35, %v3801_v43  ;;  %v3832_v35 = vld [vmem:[%s12350_s10 + $0x6a0] sm:$0xff] }
 0x890   : > { %9721 = vmatprep.subr.bf16.mxu1 %v9720_v61  ;;  %v3800_v61 = vld [vmem:[%s12350_s10 + $0x5a0] sm:$0xff] }
 0x891   : > { %v9758_v9 = vpack.c.bf16 %v3803_v45, %v3800_v61  ;;  %v9776_v45 = vpack.c.bf16 %v3834_v53, %v3831_v11 }
 0x893   : > { %9723 = vmatpush1.bf16.msra.mxu1 %v9722_v50  ;;  %v9760_v50 = vpack.c.bf16 %v3810_v33, %v3807_v62  ;;  %v9904_v62 = vpack.c.bf16 %v3883_v49, %v3880_v2  ;;  %v3840_v33 = vld [vmem:[%s12350_s10 + $0x6e0] sm:$0xff]  ;;  %v3854_v2 = vld [vmem:[%s12350_s10 + $0x750] sm:$0xff] }
 0x894   : > { %9725 = vmatprep.subr.bf16.mxu1 %v9724_v36  ;;  %v3806_v36 = vld [vmem:[%s12350_s10 + $0x5d0] sm:$0xff] }
 0x895   : > { %v9762_v38 = vpack.c.bf16 %v3809_v34, %v3806_v36  ;;  %v9778_v36 = vpack.c.bf16 %v3833_v42, %v3830_v44  ;;  %v3856_v44 = vld [vmem:[%s12350_s10 + $0x760] sm:$0xff]  ;;  %v3859_v42 = vld [vmem:[%s12350_s10 + $0x778] sm:$0xff] }
 0x897   : > { %9727 = vmatpush1.bf16.msra.mxu1 %v9726_v10  ;;  %v9764_v10 = vpack.c.bf16 %v3816_v60, %v3813_v26  ;;  %v3836_v26 = vld [vmem:[%s12350_s10 + $0x6c0] sm:$0xff]  ;;  %v3839_v60 = vld [vmem:[%s12350_s10 + $0x6d8] sm:$0xff] }
 0x898   : > { %9729 = vmatprep.subr.bf16.mxu1 %v9728_v12  ;;  %v3812_v12 = vld [vmem:[%s12350_s10 + $0x600] sm:$0xff] }
 0x899   : > { %v9766_v31 = vpack.c.bf16 %v3815_v56, %v3812_v12  ;;  %v3838_v56 = vld [vmem:[%s12350_s10 + $0x6d0] sm:$0xff] }
 0x89b   : > { %9731 = vmatpush1.bf16.msra.mxu1 %v9730_v22  ;;  %v3822_v22 = vld [vmem:[%s12350_s10 + $0x650] sm:$0xff] }
 0x89c   : > { %9733 = vmatprep.subr.bf16.mxu1 %v9732_v40  ;;  %v3868_v40 = vld [vmem:[%s12350_s10 + $0x7c0] sm:$0xff]  ;;  %v9768_v25 = vpack.c.bf16 %v3822_v22, %v3819_v13  ;;  %v3846_v13 = vld [vmem:[%s12350_s10 + $0x710] sm:$0xff] }
 0x89d   : > { %v9896_v41 = vpack.c.bf16 %v3871_v19, %v3868_v40  ;;  %v3892_v22 = vld [vmem:[%s12350_s10 + $0x880] sm:$0xff]  ;;  %v3895_v40 = vld [vmem:[%s12350_s10 + $0x898] sm:$0xff]  ;;  %v9782_v19 = vpack.c.bf16 %v3839_v60, %v3836_v26  ;;  %v3866_v26 = vld [vmem:[%s12350_s10 + $0x7b0] sm:$0xff] }
 0x89e   : > { %v3869_v60 = vld [vmem:[%s12350_s10 + $0x7c8] sm:$0xff] }
 0x89f   : > { %9735 = vmatpush1.bf16.msra.mxu1 %v9734_v29  ;;  %v3821_v29 = vld [vmem:[%s12350_s10 + $0x648] sm:$0xff] }
 0x8a0   : > { %9737 = vmatprep.subr.bf16.mxu1 %v9736_v51  ;;  %v9770_v63 = vpack.c.bf16 %v3821_v29, %v3818_v28  ;;  %v3845_v28 = vld [vmem:[%s12350_s10 + $0x708] sm:$0xff] }
 0x8a3   : > { %9739 = vmatpush1.bf16.msra.mxu1 %v9738_v24  ;;  %v3825_v24 = vld [vmem:[%s12350_s10 + $0x668] sm:$0xff] }
 0x8a4   : > { %9741 = vmatprep.subr.bf16.mxu1 %v9740_v21  ;;  %v9772_v30 = vpack.c.bf16 %v3828_v5, %v3825_v24  ;;  %v3898_v24 = vld [vmem:[%s12350_s10 + $0x8b0] sm:$0xff]  ;;  %v3901_v5 = vld [vmem:[%s12350_s10 + $0x8c8] sm:$0xff] }
 0x8a7   : > { %9743 = vmatpush1.bf16.msra.mxu1 %v9742_v18  ;;  %v9898_v18 = vpack.c.bf16 %v3823_v23, %v3820_v54  ;;  %v3849_v54 = vld [vmem:[%s12350_s10 + $0x728] sm:$0xff]  ;;  %v3852_v23 = vld [vmem:[%s12350_s10 + $0x740] sm:$0xff] }
 0x8a8   : > { %9745 = vmatprep.subr.bf16.mxu1 %v9744_v55  ;;  %v3824_v55 = vld [vmem:[%s12350_s10 + $0x660] sm:$0xff] }
 0x8ab   : > { %9747 = vmatpush1.bf16.msra.mxu1 %v9746_v59  ;;  %v3826_v59 = vld [vmem:[%s12350_s10 + $0x670] sm:$0xff] }
 0x8ac   : > { %9749 = vmatprep.subr.bf16.mxu1 %v9748_v8  ;;  %v3829_v8 = vld [vmem:[%s12350_s10 + $0x688] sm:$0xff] }
 0x8af   : > { %9751 = vmatpush1.bf16.msra.mxu1 %v9750_v20  ;;  %v9774_v20 = vpack.c.bf16 %v3827_v32, %v3824_v55  ;;  %v9788_v55 = vpack.c.bf16 %v3852_v23, %v3849_v54  ;;  %v3855_v32 = vld [vmem:[%s12350_s10 + $0x758] sm:$0xff] }
 0x8b0   : > { %9753 = vmatprep.subr.bf16.mxu1 %v9752_v57  ;;  %v9902_v57 = vpack.c.bf16 %v3829_v8, %v3826_v59  ;;  %v3858_v59 = vld [vmem:[%s12350_s10 + $0x770] sm:$0xff]  ;;  %v3904_v8 = vld [vmem:[%s12350_s10 + $0x8e0] sm:$0xff]  ;;  %v3887_v54 = vld [vmem:[%s12350_s10 + $0x858] sm:$0xff] }
 0x8b1   : > { %v9792_v49 = vpack.c.bf16 %v3858_v59, %v3855_v32  ;;  %v3891_v23 = vld [vmem:[%s12350_s10 + $0x878] sm:$0xff] }
 0x8b2   : > { %v3899_v32 = vld [vmem:[%s12350_s10 + $0x8b8] sm:$0xff] }
 0x8b3   : > { %9755 = vmatpush1.bf16.msra.mxu1 %v9754_v37  ;;  %v3835_v37 = vld [vmem:[%s12350_s10 + $0x6b8] sm:$0xff] }
 0x8b4   : > { %9757 = vmatprep.subr.bf16.mxu1 %v9756_v4  ;;  %v3837_v4 = vld [vmem:[%s12350_s10 + $0x6c8] sm:$0xff]  ;;  %v9906_v34 = vpack.c.bf16 %v3835_v37, %v3832_v35  ;;  %v3864_v35 = vld [vmem:[%s12350_s10 + $0x7a0] sm:$0xff]  ;;  %v3903_v59 = vld [vmem:[%s12350_s10 + $0x8d8] sm:$0xff] }
 0x8b7   : > { %9759 = vmatpush1.bf16.msra.mxu1 %v9758_v9  ;;  %v3886_v9 = vld [vmem:[%s12350_s10 + $0x850] sm:$0xff] }
 0x8b8   : > { %9761 = vmatprep.subr.bf16.mxu1 %v9760_v50  ;;  %v3889_v50 = vld [vmem:[%s12350_s10 + $0x868] sm:$0xff] }
 0x8b9   : > { %v9908_v12 = vpack.c.bf16 %v3889_v50, %v3886_v9  ;;  %v3867_v9 = vld [vmem:[%s12350_s10 + $0x7b8] sm:$0xff]  ;;  %v3870_v50 = vld [vmem:[%s12350_s10 + $0x7d0] sm:$0xff] }
 0x8bb   : > { %9763 = vmatpush1.bf16.msra.mxu1 %v9762_v38 }
 0x8bc   : > { %9765 = vmatprep.subr.bf16.mxu1 %v9764_v10  ;;  %v9780_v10 = vpack.c.bf16 %v3840_v33, %v3837_v4  ;;  %v9922_v4 = vpack.c.bf16 %v3859_v42, %v3856_v44  ;;  %v3863_v33 = vld [vmem:[%s12350_s10 + $0x798] sm:$0xff] }
 0x905   : > { %v3401_v51 = vpop.f32.mrb[20].mxu1 }
 0x906   : > { %v13692_v21 = vpop.f32.mrb[21].mxu1  ;;  %4049 = vmatprep.mubr.f32.mxu1 %v3401_v51  ;;  %4278 = vmatprep.mubr.f32.mxu0 %v3401_v51  ;;  %v9912_v51 = vpack.c.bf16 %v3895_v40, %v3892_v22  ;;  %v3882_v22 = vld [vmem:[%s12350_s10 + $0x830] sm:$0xff] }
 0x907   : > { %4050 = vmatmul.mubr.f32.vlgmr.msra.gmra.mrb[28].mxu1 %v13395_v3  ;;  %4279 = vmatmul.mubr.f32.vlgmr.msra.gmra.mrb[20].mxu0 %v13395_v3 }
 0x908   : > { %9767 = vmatpush1.bf16.msra.mxu1 %v9766_v31  ;;  %9895 = vmatpush3.bf16.msra.mxu0 %v9894_v48  ;;  %v9910_v31 = vpack.c.bf16 %v3841_v58, %v3838_v56  ;;  %v3842_v48 = vld [vmem:[%s12350_s10 + $0x6f0] sm:$0xff]  ;;  %v9802_v56 = vpack.c.bf16 %v3869_v60, %v3866_v26 }
 0x909   : > { %v3472_v1 = vpop.f32.mrb[22].mxu1  ;;  %9769 = vmatprep.subr.bf16.mxu1 %v9768_v25  ;;  %9897 = vmatprep.subr.bf16.mxu0 %v9896_v41  ;;  %v3844_v25 = vld [vmem:[%s12350_s10 + $0x700] sm:$0xff]  ;;  %v3847_v41 = vld [vmem:[%s12350_s10 + $0x718] sm:$0xff]  ;;  %v9786_v27 = vpack.c.bf16 %v3845_v28, %v3842_v48  ;;  %v3881_v48 = vld [vmem:[%s12350_s10 + $0x828] sm:$0xff] }
 0x90a   : > { %v8833_v3 = vpop.f32.mrb[23].mxu1  ;;  %v9914_v0 = vpack.c.bf16 %v3847_v41, %v3844_v25  ;;  %v3885_v28 = vld [vmem:[%s12350_s10 + $0x848] sm:$0xff]  ;;  %v3884_v41 = vld [vmem:[%s12350_s10 + $0x840] sm:$0xff] }
 0x90b   : > { %v3907_v3 = vld [vmem:[%s12350_s10 + $0x8f8] sm:$0xff] }
 0x90c   : > { %9771 = vmatpush1.bf16.msra.mxu1 %v9770_v63  ;;  %9899 = vmatpush3.bf16.msra.mxu0 %v9898_v18  ;;  %v3848_v63 = vld [vmem:[%s12350_s10 + $0x720] sm:$0xff]  ;;  %v3851_v18 = vld [vmem:[%s12350_s10 + $0x738] sm:$0xff] }
 0x90d   : > { %v3545_v43 = vpop.f32.mrb[24].mxu1  ;;  %9773 = vmatprep.subr.bf16.mxu1 %v9772_v30  ;;  %9901 = vmatprep.subr.bf16.mxu0 %v9900_v6  ;;  %v3850_v30 = vld [vmem:[%s12350_s10 + $0x730] sm:$0xff]  ;;  %v3853_v6 = vld [vmem:[%s12350_s10 + $0x748] sm:$0xff]  ;;  %v9790_v11 = vpack.c.bf16 %v3851_v18, %v3848_v63 }
 0x90e   : > { %v13712_v61 = vpop.f32.mrb[25].mxu1  ;;  %4055 = vmatprep.mubr.f32.mxu1 %v3545_v43  ;;  %4283 = vmatprep.mubr.f32.mxu0 %v3545_v43  ;;  %v9918_v53 = vpack.c.bf16 %v3853_v6, %v3850_v30  ;;  %v3861_v43 = vld [vmem:[%s12350_s10 + $0x788] sm:$0xff]  ;;  %v3896_v6 = vld [vmem:[%s12350_s10 + $0x8a0] sm:$0xff] }
 0x90f   : > { %4056 = vmatmul.mubr.f32.gmra.mrb[30].mxu1 %v13424_v52  ;;  %4284 = vmatmul.mubr.f32.gmra.mrb[22].mxu0 %v13424_v52  ;;  %v3843_v52 = vld [vmem:[%s12350_s10 + $0x6f8] sm:$0xff]  ;;  %v3893_v63 = vld [vmem:[%s12350_s10 + $0x888] sm:$0xff] }
 0x910   : > { %9775 = vmatpush1.bf16.msra.mxu1 %v9774_v20  ;;  %9903 = vmatpush3.bf16.msra.mxu0 %v9902_v57  ;;  %v9784_v29 = vpack.c.bf16 %v3846_v13, %v3843_v52  ;;  %v9920_v20 = vpack.c.bf16 %v3907_v3, %v3904_v8  ;;  %v3857_v57 = vld [vmem:[%s12350_s10 + $0x768] sm:$0xff]  ;;  %v3872_v52 = vld [vmem:[%s12350_s10 + $0x7e0] sm:$0xff]  ;;  %v3879_v13 = vld [vmem:[%s12350_s10 + $0x818] sm:$0xff]  ;;  %v9822_v3 = vpack.c.bf16 %v3899_v32, %v3896_v6 }
 0x911   : > { %4126 = vmatprep.mubr.f32.mxu1 %v3472_v1  ;;  %4353 = vmatprep.mubr.f32.mxu0 %v3472_v1  ;;  %v13721_v38 = vpop.f32.mrb[26].mxu1  ;;  %v9916_v1 = vpack.c.bf16 %v3901_v5, %v3898_v24  ;;  %v9794_v37 = vpack.c.bf16 %v3857_v57, %v3854_v2  ;;  %v3894_v24 = vld [vmem:[%s12350_s10 + $0x890] sm:$0xff]  ;;  %v9814_v5 = vpack.c.bf16 %v3887_v54, %v3884_v41  ;;  %v3897_v18 = vld [vmem:[%s12350_s10 + $0x8a8] sm:$0xff] }
 0x912   : > { %v8838_v46 = vpop.f32.mrb[27].mxu1  ;;  %9777 = vmatprep.subr.bf16.mxu1 %v9776_v45  ;;  %9905 = vmatprep.subr.bf16.mxu0 %v9904_v62  ;;  %v9796_v45 = vpack.c.bf16 %v3864_v35, %v3861_v43  ;;  %v3860_v62 = vld [vmem:[%s12350_s10 + $0x780] sm:$0xff]  ;;  %v3906_v8 = vld [vmem:[%s12350_s10 + $0x8f0] sm:$0xff]  ;;  %v3905_v2 = vld [vmem:[%s12350_s10 + $0x8e8] sm:$0xff] }
 0x913   : > { %v3875_v46 = vld [vmem:[%s12350_s10 + $0x7f8] sm:$0xff]  ;;  %v4461_v41 = vld [vmem:[%s12358_s0 + $0x18] sm:$0xff]  ;;  %v4482_v32 = vld [vmem:[%s12358_s0 + $0xc0] sm:$0xff] }
 0x914   : > { %9779 = vmatpush1.bf16.msra.mxu1 %v9778_v36  ;;  %9907 = vmatpush3.bf16.msra.mxu0 %v9906_v34  ;;  %v9798_v36 = vpack.c.bf16 %v3863_v33, %v3860_v62  ;;  %v9800_v34 = vpack.c.bf16 %v3870_v50, %v3867_v9  ;;  %v9806_v40 = vpack.c.bf16 %v3875_v46, %v3872_v52  ;;  %v11312_v52 = vld [vmem:[#allocation2 + $0x18] sm:$0xff] }
 0x915   : > { %9781 = vmatprep.subr.bf16.mxu1 %v9780_v10  ;;  %9909 = vmatprep.subr.bf16.mxu0 %v9908_v12  ;;  %v3873_v10 = vld [vmem:[%s12350_s10 + $0x7e8] sm:$0xff]  ;;  %v3876_v12 = vld [vmem:[%s12350_s10 + $0x800] sm:$0xff]  ;;  %v4475_v6 = vld [vmem:[%s12358_s0 + $0x88] sm:$0xff] }
 0x916   : > { %v9804_v58 = vpack.c.bf16 %v3876_v12, %v3873_v10  ;;  %v11310_v10 = vld [vmem:[#allocation2 + $0x8] sm:$0xff]  ;;  %v11311_v12 = vld [vmem:[#allocation2 + $0x10] sm:$0xff] }
 0x918   : > { %9783 = vmatpush1.bf16.msra.mxu1 %v9782_v19  ;;  %9911 = vmatpush3.bf16.msra.mxu0 %v9910_v31  ;;  %v9808_v19 = vpack.c.bf16 %v3882_v22, %v3879_v13  ;;  %v3878_v31 = vld [vmem:[%s12350_s10 + $0x810] sm:$0xff]  ;;  %v11313_v22 = vld [vmem:[#allocation2 + $0x20] sm:$0xff] }
 0x919   : > { %9785 = vmatprep.subr.bf16.mxu1 %v9784_v29  ;;  %9913 = vmatprep.subr.bf16.mxu0 %v9912_v51  ;;  %v3888_v29 = vld [vmem:[%s12350_s10 + $0x860] sm:$0xff]  ;;  %v9810_v51 = vpack.c.bf16 %v3881_v48, %v3878_v31 }
 0x91a   : > { %v9812_v25 = vpack.c.bf16 %v3888_v29, %v3885_v28  ;;  %v11314_v31 = vld [vmem:[#allocation2 + $0x28] sm:$0xff] }
 0x91c   : > { %9787 = vmatpush1.bf16.msra.mxu1 %v9786_v27  ;;  %9915 = vmatpush3.bf16.msra.mxu0 %v9914_v0  ;;  %v9816_v27 = vpack.c.bf16 %v3894_v24, %v3891_v23  ;;  %v3890_v0 = vld [vmem:[%s12350_s10 + $0x870] sm:$0xff]  ;;  %v4468_v23 = vld [vmem:[%s12358_s0 + $0x50] sm:$0xff] }
 0x91d   : > { %9789 = vmatprep.subr.bf16.mxu1 %v9788_v55  ;;  %9917 = vmatprep.subr.bf16.mxu0 %v9916_v1  ;;  %v3900_v55 = vld [vmem:[%s12350_s10 + $0x8c0] sm:$0xff]  ;;  %v9818_v1 = vpack.c.bf16 %v3893_v63, %v3890_v0  ;;  %v4458_v24 = vld [vmem:[%s12358_s0] sm:$0xff] }
 0x91e   : > { %v9820_v30 = vpack.c.bf16 %v3900_v55, %v3897_v18  ;;  %v4460_v63 = vld [vmem:[%s12358_s0 + $0x10] sm:$0xff]  ;;  %v4467_v18 = vld [vmem:[%s12358_s0 + $0x48] sm:$0xff]  ;;  %v4473_v55 = vld [vmem:[%s12358_s0 + $0x78] sm:$0xff] }
 0x920   : > { %9791 = vmatpush1.bf16.msra.mxu1 %v9790_v11  ;;  %9919 = vmatpush3.bf16.msra.mxu0 %v9918_v53  ;;  %v9824_v11 = vpack.c.bf16 %v3906_v8, %v3903_v59  ;;  %v3902_v53 = vld [vmem:[%s12350_s10 + $0x8d0] sm:$0xff]  ;;  %v10024_v8 = vpack.c.bf16 %v4482_v32, %v4475_v6  ;;  %s15304_s10 = scalar_lea.vmem [#allocation17], %s12336_s19 }
 0x921   : > { %9793 = vmatprep.subr.bf16.mxu1 %v9792_v49  ;;  %9921 = vmatprep.subr.bf16.mxu0 %v9920_v20  ;;  %v9826_v49 = vpack.c.bf16 %v3905_v2, %v3902_v53  ;;  %v4474_v53 = vld [vmem:[%s12358_s0 + $0x80] sm:$0xff] }
 0x922   : > { %v4530_v6 = vld [vmem:[%s12358_s0 + $0x240] sm:$0xff] }
 0x924   : > { %9795 = vmatpush1.bf16.msra.mxu1 %v9794_v37  ;;  %9923 = vmatpush3.bf16.msra.mxu0 %v9922_v4 }
 0x925   : > { %9797 = vmatprep.subr.bf16.mxu1 %v9796_v45 }
 0x927   : > { %4354 = vmatmul.mubr.f32.vlgmr.msra.gmra.mrb[24].mxu0 %v13692_v21 }
 0x928   : > { %9799 = vmatpush1.bf16.msra.mxu1 %v9798_v36  ;;  %4358 = vmatprep.mubr.f32.mxu0 %v13721_v38 }
 0x929   : > { %9801 = vmatprep.subr.bf16.mxu1 %v9800_v34 }
 0x92b   : > { %4359 = vmatmul.mubr.f32.gmra.mrb[26].mxu0 %v13712_v61 }
 0x92c   : > { %9803 = vmatpush1.bf16.msra.mxu1 %v9802_v56 }
 0x92d   : > { %9805 = vmatprep.subr.bf16.mxu1 %v9804_v58 }
 0x930   : > { %9807 = vmatpush1.bf16.msra.mxu1 %v9806_v40 }
 0x931   : > { %9809 = vmatprep.subr.bf16.mxu1 %v9808_v19 }
 0x934   : > { %9811 = vmatpush1.bf16.msra.mxu1 %v9810_v51  ;;  %v4459_v51 = vld [vmem:[%s12358_s0 + $0x8] sm:$0xff] }
 0x935   : > { %9813 = vmatprep.subr.bf16.mxu1 %v9812_v25  ;;  %v4466_v25 = vld [vmem:[%s12358_s0 + $0x40] sm:$0xff] }
 0x936   : > { %v9924_v54 = vpack.c.bf16 %v4466_v25, %v4459_v51  ;;  %v4514_v51 = vld [vmem:[%s12358_s0 + $0x1c0] sm:$0xff]  ;;  %v4521_v25 = vld [vmem:[%s12358_s0 + $0x1f8] sm:$0xff] }
 0x938   : > { %9815 = vmatpush1.bf16.msra.mxu1 %v9814_v5  ;;  %v4465_v5 = vld [vmem:[%s12358_s0 + $0x38] sm:$0xff]  ;;  %9925 = vmatprep.subr.bf16.mxu0 %v9924_v54 }
 0x939   : > { %9817 = vmatprep.subr.bf16.mxu1 %v9816_v27  ;;  %v10020_v27 = vpack.c.bf16 %v4468_v23, %v4461_v41  ;;  %v9926_v0 = vpack.c.bf16 %v4465_v5, %v4458_v24  ;;  %v4516_v41 = vld [vmem:[%s12358_s0 + $0x1d0] sm:$0xff]  ;;  %v4523_v23 = vld [vmem:[%s12358_s0 + $0x208] sm:$0xff]  ;;  %v4529_v24 = vld [vmem:[%s12358_s0 + $0x238] sm:$0xff] }
 0x93a   : > { %v4536_v5 = vld [vmem:[%s12358_s0 + $0x270] sm:$0xff] }
 0x93b   : > { %9927 = vmatpush1.bf16.msra.mxu0 %v9926_v0  ;;  %v4538_v0 = vld [vmem:[%s12358_s0 + $0x280] sm:$0xff] }
 0x93c   : > { %9819 = vmatpush1.bf16.msra.mxu1 %v9818_v1  ;;  %v10022_v1 = vpack.c.bf16 %v4467_v18, %v4460_v63  ;;  %v9942_v63 = vpack.c.bf16 %v4521_v25, %v4514_v51  ;;  %v10038_v18 = vpack.c.bf16 %v4523_v23, %v4516_v41  ;;  %v4585_v51 = vld [vmem:[%s12358_s0 + $0x3f8] sm:$0xff]  ;;  %v4592_v25 = vld [vmem:[%s12358_s0 + $0x430] sm:$0xff]  ;;  %v4587_v41 = vld [vmem:[%s12358_s0 + $0x408] sm:$0xff] }
 0x93d   : > { %9821 = vmatprep.subr.bf16.mxu1 %v9820_v30  ;;  %v4480_v30 = vld [vmem:[%s12358_s0 + $0xb0] sm:$0xff] }
 0x93e   : > { %v9928_v59 = vpack.c.bf16 %v4480_v30, %v4473_v55  ;;  %v9944_v55 = vpack.c.bf16 %v4536_v5, %v4529_v24  ;;  %v4535_v30 = vld [vmem:[%s12358_s0 + $0x268] sm:$0xff]  ;;  %v9960_v5 = vpack.c.bf16 %v4592_v25, %v4585_v51 }
 0x940   : > { %9823 = vmatpush1.bf16.msra.mxu1 %v9822_v3  ;;  %v4472_v3 = vld [vmem:[%s12358_s0 + $0x70] sm:$0xff]  ;;  %9929 = vmatprep.subr.bf16.mxu0 %v9928_v59  ;;  %v4537_v59 = vld [vmem:[%s12358_s0 + $0x278] sm:$0xff] }
 0x941   : > { %9825 = vmatprep.subr.bf16.mxu1 %v9824_v11  ;;  %v4479_v11 = vld [vmem:[%s12358_s0 + $0xa8] sm:$0xff] }
 0x942   : > { %v9930_v2 = vpack.c.bf16 %v4479_v11, %v4472_v3  ;;  %v4550_v3 = vld [vmem:[%s12358_s0 + $0x2e0] sm:$0xff]  ;;  %v4545_v11 = vld [vmem:[%s12358_s0 + $0x2b8] sm:$0xff] }
 0x944   : > { %9827 = vmatpush1.bf16.msra.mxu1 %v9826_v49  ;;  %v4481_v49 = vld [vmem:[%s12358_s0 + $0xb8] sm:$0xff]  ;;  %9931 = vmatpush1.bf16.msra.mxu0 %v9930_v2 }
 0x945   : > { %10021 = vmatprep.subr.bf16.mxu1 %v10020_v27  ;;  %v4531_v27 = vld [vmem:[%s12358_s0 + $0x248] sm:$0xff] }
 0x946   : > { %v10040_v32 = vpack.c.bf16 %v4538_v0, %v4531_v27  ;;  %v4584_v27 = vld [vmem:[%s12358_s0 + $0x3f0] sm:$0xff]  ;;  %v4591_v0 = vld [vmem:[%s12358_s0 + $0x428] sm:$0xff] }
 0x947   : > { %4127 = vmatmul.mubr.f32.vlgmr.msra.gmra.mrb[28].mxu1 %v13692_v21 }
 0x948   : > { %4132 = vmatprep.mubr.f32.mxu1 %v13721_v38  ;;  %10023 = vmatpush1.bf16.msra.mxu1 %v10022_v1  ;;  %v4528_v1 = vld [vmem:[%s12358_s0 + $0x230] sm:$0xff] }
 0x949   : > { %10025 = vmatprep.subr.bf16.mxu1 %v10024_v8  ;;  %v4543_v8 = vld [vmem:[%s12358_s0 + $0x2a8] sm:$0xff]  ;;  %v9946_v2 = vpack.c.bf16 %v4535_v30, %v4528_v1  ;;  %v4606_v30 = vld [vmem:[%s12358_s0 + $0x4a0] sm:$0xff] }
 0x94a   : > { %v4599_v1 = vld [vmem:[%s12358_s0 + $0x468] sm:$0xff] }
 0x94b   : > { %4133 = vmatmul.mubr.f32.gmra.mrb[30].mxu1 %v13712_v61  ;;  %v11309_v61 = vld [vmem:[#allocation2] sm:$0xff] }
 0x9da   : > { %v8489_v20 = vpop.f32.mrb[20].mxu0 }
 0x9db   : > { %v8490_v57 = vpop.f32.mrb[21].mxu0 }
 0x9dc   : > { %v8491_v44 = vadd.f32 %v8490_v57, %v8489_v20  ;;  %v4487_v20 = vld [vmem:[%s12358_s0 + $0xe8] sm:$0xff]  ;;  %v4494_v57 = vld [vmem:[%s12358_s0 + $0x120] sm:$0xff] }
 0x9de   : > { %v4281_v42 = vadd.f32 %v8491_v44, %v13482_v47  ;;  %v10026_v44 = vpack.c.bf16 %v4481_v49, %v4474_v53  ;;  %v4552_v53 = vld [vmem:[%s12358_s0 + $0x2f0] sm:$0xff]  ;;  %v10042_v49 = vpack.c.bf16 %v4537_v59, %v4530_v6  ;;  %v4601_v6 = vld [vmem:[%s12358_s0 + $0x478] sm:$0xff]  ;;  %v9962_v59 = vpack.c.bf16 %v4591_v0, %v4584_v27 }
 0x9df   : > { %v4629_v27 = vld [vmem:[%s12358_s0 + $0x558] sm:$0xff] }
 0x9e0   : > { %10027 = vmatpush1.bf16.msra.mxu1 %v10026_v44  ;;  %v4549_v44 = vld [vmem:[%s12358_s0 + $0x2d8] sm:$0xff] }
 0x9e2   : > { %v8492_v43 = vpop.f32.mrb[22].mxu0 }
 0x9e3   : > { %v8493_v35 = vpop.f32.mrb[23].mxu0 }
 0x9e4   : > { %v8494_v37 = vadd.f32 %v8493_v35, %v8492_v43  ;;  %v4489_v43 = vld [vmem:[%s12358_s0 + $0xf8] sm:$0xff]  ;;  %v4496_v35 = vld [vmem:[%s12358_s0 + $0x130] sm:$0xff] }
 0x9e6   : > { %v4286_v4 = vadd.f32 %v8494_v37, %v13484_v7  ;;  %v4486_v37 = vld [vmem:[%s12358_s0 + $0xe0] sm:$0xff] }
 0x9fa   : > { %v8527_v45 = vpop.f32.mrb[24].mxu0 }
 0x9fb   : > { %v8528_v62 = vpop.f32.mrb[25].mxu0 }
 0x9fc   : > { %v8529_v33 = vadd.f32 %v8528_v62, %v8527_v45  ;;  %v4493_v45 = vld [vmem:[%s12358_s0 + $0x118] sm:$0xff]  ;;  %v4488_v62 = vld [vmem:[%s12358_s0 + $0xf0] sm:$0xff] }
 0x9fe   : > { %v4356_v9 = vadd.f32 %v8529_v33, %v4281_v42  ;;  %v8530_v50 = vpop.f32.mrb[26].mxu0  ;;  %v9932_v42 = vpack.c.bf16 %v4494_v57, %v4487_v20  ;;  %v4495_v33 = vld [vmem:[%s12358_s0 + $0x128] sm:$0xff]  ;;  %v9948_v20 = vpack.c.bf16 %v4550_v3, %v4543_v8  ;;  %v4542_v57 = vld [vmem:[%s12358_s0 + $0x2a0] sm:$0xff]  ;;  %v9964_v3 = vpack.c.bf16 %v4606_v30, %v4599_v1 }
 0x9ff   : > { %v8531_v21 = vpop.f32.mrb[27].mxu0 }
 0xa00   : > { %v8532_v36 = vadd.f32 %v8531_v21, %v8530_v50  ;;  %v13793_v56 = vadd.f32 %v11311_v12, %v4356_v9  ;;  %v9934_v9 = vpack.c.bf16 %v4493_v45, %v4486_v37  ;;  %v4501_v50 = vld [vmem:[%s12358_s0 + $0x158] sm:$0xff]  ;;  %v4508_v21 = vld [vmem:[%s12358_s0 + $0x190] sm:$0xff]  ;;  %9933 = vmatprep.subr.bf16.mxu0 %v9932_v42  ;;  %v4559_v45 = vld [vmem:[%s12358_s0 + $0x328] sm:$0xff] }
 0xa01   : > { %v4544_v42 = vld [vmem:[%s12358_s0 + $0x2b0] sm:$0xff]  ;;  %v4557_v37 = vld [vmem:[%s12358_s0 + $0x318] sm:$0xff] }
 0xa02   : > { %v4361_v38 = vadd.f32 %v8532_v36, %v4286_v4  ;;  %v10028_v4 = vpack.c.bf16 %v4496_v35, %v4489_v43  ;;  %v4503_v36 = vld [vmem:[%s12358_s0 + $0x168] sm:$0xff]  ;;  %9935 = vmatpush1.bf16.msra.mxu0 %v9934_v9  ;;  %v10044_v43 = vpack.c.bf16 %v4552_v53, %v4545_v11  ;;  %v4598_v11 = vld [vmem:[%s12358_s0 + $0x460] sm:$0xff]  ;;  %v4605_v53 = vld [vmem:[%s12358_s0 + $0x498] sm:$0xff] }
 0xa03   : > { %v4551_v35 = vld [vmem:[%s12358_s0 + $0x2e8] sm:$0xff] }
 0xa04   : > { %v13802_v48 = vadd.f32 %v11314_v31, %v4361_v38  ;;  %v10030_v38 = vpack.c.bf16 %v4495_v33, %v4488_v62  ;;  %10029 = vmatprep.subr.bf16.mxu1 %v10028_v4  ;;  %v4564_v4 = vld [vmem:[%s12358_s0 + $0x350] sm:$0xff]  ;;  %v4566_v62 = vld [vmem:[%s12358_s0 + $0x360] sm:$0xff]  ;;  %v9950_v33 = vpack.c.bf16 %v4549_v44, %v4542_v57  ;;  %v10046_v9 = vpack.c.bf16 %v4551_v35, %v4544_v42 }
 0xa05   : > { %v9966_v57 = vpack.c.bf16 %v4605_v53, %v4598_v11  ;;  %v4643_v11 = vld [vmem:[%s12358_s0 + $0x5c8] sm:$0xff]  ;;  %v4650_v53 = vld [vmem:[%s12358_s0 + $0x600] sm:$0xff] }
 0xa06   : > { %10031 = vmatpush1.bf16.msra.mxu1 %v10030_v38  ;;  %v4558_v38 = vld [vmem:[%s12358_s0 + $0x320] sm:$0xff] }
 0xa1a   : > { %v4128_v34 = vpop.f32.mrb[28].mxu1 }
 0xa1b   : > { %v13789_v26 = vadd.f32 %v11309_v61, %v4128_v34  ;;  %v4130_v60 = vpop.f32.mrb[29].mxu1  ;;  %v9936_v34 = vpack.c.bf16 %v4508_v21, %v4501_v50  ;;  %v4510_v61 = vld [vmem:[%s12358_s0 + $0x1a0] sm:$0xff]  ;;  %v9952_v50 = vpack.c.bf16 %v4564_v4, %v4557_v37  ;;  %v4556_v21 = vld [vmem:[%s12358_s0 + $0x310] sm:$0xff] }
 0xa1c   : > { %v13791_v47 = vadd.f32 %v11310_v10, %v4130_v60  ;;  %v4500_v60 = vld [vmem:[%s12358_s0 + $0x150] sm:$0xff]  ;;  %v4507_v10 = vld [vmem:[%s12358_s0 + $0x188] sm:$0xff]  ;;  %v10032_v12 = vpack.c.bf16 %v4510_v61, %v4503_v36  ;;  %v4565_v61 = vld [vmem:[%s12358_s0 + $0x358] sm:$0xff] }
 0xa1d   : > { %v9938_v31 = vpack.c.bf16 %v4507_v10, %v4500_v60  ;;  %9937 = vmatprep.subr.bf16.mxu0 %v9936_v34  ;;  %v4563_v36 = vld [vmem:[%s12358_s0 + $0x348] sm:$0xff]  ;;  %v10048_v34 = vpack.c.bf16 %v4566_v62, %v4559_v45  ;;  %v4578_v10 = vld [vmem:[%s12358_s0 + $0x3c0] sm:$0xff] }
 0xa1e   : > { %v4134_v7 = vpop.f32.mrb[30].mxu1  ;;  %v4372_v58 = vadd.f32 %v13791_v47, %v13789_v26  ;;  %10033 = vmatprep.subr.bf16.mxu1 %v10032_v12  ;;  %v4571_v60 = vld [vmem:[%s12358_s0 + $0x388] sm:$0xff]  ;;  %v4573_v12 = vld [vmem:[%s12358_s0 + $0x398] sm:$0xff] }
 0xa1f   : > { %v13797_v46 = vadd.f32 %v11312_v52, %v4134_v7  ;;  %v4136_v13 = vpop.f32.mrb[31].mxu1  ;;  %v4502_v7 = vld [vmem:[%s12358_s0 + $0x160] sm:$0xff]  ;;  %v4515_v52 = vld [vmem:[%s12358_s0 + $0x1c8] sm:$0xff]  ;;  %9939 = vmatpush1.bf16.msra.mxu0 %v9938_v31  ;;  %v4572_v31 = vld [vmem:[%s12358_s0 + $0x390] sm:$0xff] }
 0xa20   : > { %v13799_v40 = vadd.f32 %v11313_v22, %v4136_v13  ;;  %v4373_v19 = vadd.f32 %v4372_v58, %v13793_v56  ;;  %v4509_v58 = vld [vmem:[%s12358_s0 + $0x198] sm:$0xff]  ;;  %v4522_v13 = vld [vmem:[%s12358_s0 + $0x200] sm:$0xff] }
 0xa21   : > { %v4517_v22 = vld [vmem:[%s12358_s0 + $0x1d8] sm:$0xff] }
 0xa22   : > { %4374 = vadd.xlane.f32.xlu1 %v4373_v19  ;;  %v4376_v28 = vadd.f32 %v13799_v40, %v13797_v46  ;;  %v4524_v19 = vld [vmem:[%s12358_s0 + $0x210] sm:$0xff] }
 0xa23   : > { %v10036_v54 = vpack.c.bf16 %v4524_v19, %v4517_v22  ;;  %v4570_v22 = vld [vmem:[%s12358_s0 + $0x380] sm:$0xff]  ;;  %v4577_v19 = vld [vmem:[%s12358_s0 + $0x3b8] sm:$0xff] }
 0xa24   : > { %v4377_v29 = vadd.f32 %v4376_v28, %v13802_v48  ;;  %v10034_v28 = vpack.c.bf16 %v4509_v58, %v4502_v7  ;;  %v4580_v7 = vld [vmem:[%s12358_s0 + $0x3d0] sm:$0xff]  ;;  %v9954_v58 = vpack.c.bf16 %v4563_v36, %v4556_v21  ;;  %v9958_v23 = vpack.c.bf16 %v4577_v19, %v4570_v22  ;;  %v4615_v22 = vld [vmem:[%s12358_s0 + $0x4e8] sm:$0xff] }
 0xa26   : > { %4378 = vadd.xlane.f32.xlu1 %v4377_v29  ;;  %v9940_v29 = vpack.c.bf16 %v4522_v13, %v4515_v52  ;;  %10035 = vmatpush1.bf16.msra.mxu1 %v10034_v28  ;;  %v10050_v52 = vpack.c.bf16 %v4565_v61, %v4558_v38  ;;  %v9956_v13 = vpack.c.bf16 %v4578_v10, %v4571_v60 }
 0xa27   : > { %10037 = vmatprep.subr.bf16.mxu1 %v10036_v54  ;;  %v10052_v28 = vpack.c.bf16 %v4580_v7, %v4573_v12  ;;  %v4594_v54 = vld [vmem:[%s12358_s0 + $0x440] sm:$0xff] }
 0xa28   : > { %9941 = vmatprep.subr.bf16.mxu0 %v9940_v29  ;;  %v4579_v29 = vld [vmem:[%s12358_s0 + $0x3c8] sm:$0xff] }
 0xa29   : > { %9943 = vmatpush1.bf16.msra.mxu0 %v9942_v63  ;;  %v10054_v24 = vpack.c.bf16 %v4579_v29, %v4572_v31  ;;  %v4586_v63 = vld [vmem:[%s12358_s0 + $0x400] sm:$0xff]  ;;  %v4619_v29 = vld [vmem:[%s12358_s0 + $0x508] sm:$0xff] }
 0xa2a   : > { %10039 = vmatpush1.bf16.msra.mxu1 %v10038_v18  ;;  %9945 = vmatprep.subr.bf16.mxu0 %v9944_v55  ;;  %v10056_v18 = vpack.c.bf16 %v4594_v54, %v4587_v41  ;;  %v4593_v55 = vld [vmem:[%s12358_s0 + $0x438] sm:$0xff]  ;;  %v4622_v31 = vld [vmem:[%s12358_s0 + $0x520] sm:$0xff] }
 0xa2b   : > { %10041 = vmatprep.subr.bf16.mxu1 %v10040_v32  ;;  %v4608_v32 = vld [vmem:[%s12358_s0 + $0x4b0] sm:$0xff]  ;;  %v10058_v8 = vpack.c.bf16 %v4593_v55, %v4586_v63  ;;  %v10064_v51 = vpack.c.bf16 %v4622_v31, %v4615_v22  ;;  %v4614_v41 = vld [vmem:[%s12358_s0 + $0x4e0] sm:$0xff]  ;;  %v4621_v54 = vld [vmem:[%s12358_s0 + $0x518] sm:$0xff] }
 0xa2c   : > { %v4636_v63 = vld [vmem:[%s12358_s0 + $0x590] sm:$0xff]  ;;  %v4633_v55 = vld [vmem:[%s12358_s0 + $0x578] sm:$0xff]  ;;  %v4671_v22 = vld [vmem:[%s12358_s0 + $0x6a8] sm:$0xff] }
 0xa2d   : > { %9947 = vmatpush1.bf16.msra.mxu0 %v9946_v2  ;;  %v10060_v2 = vpack.c.bf16 %v4608_v32, %v4601_v6  ;;  %v10068_v1 = vpack.c.bf16 %v4636_v63, %v4629_v27  ;;  %v4628_v6 = vld [vmem:[%s12358_s0 + $0x550] sm:$0xff]  ;;  %v4635_v32 = vld [vmem:[%s12358_s0 + $0x588] sm:$0xff]  ;;  %v4690_v27 = vld [vmem:[%s12358_s0 + $0x740] sm:$0xff] }
 0xa2e   : > { %10043 = vmatpush1.bf16.msra.mxu1 %v10042_v49  ;;  %9949 = vmatprep.subr.bf16.mxu0 %v9948_v20  ;;  %v4600_v49 = vld [vmem:[%s12358_s0 + $0x470] sm:$0xff]  ;;  %v4607_v20 = vld [vmem:[%s12358_s0 + $0x4a8] sm:$0xff] }
 0xa2f   : > { %10045 = vmatprep.subr.bf16.mxu1 %v10044_v43  ;;  %v10062_v44 = vpack.c.bf16 %v4607_v20, %v4600_v49  ;;  %v10072_v49 = vpack.c.bf16 %v4650_v53, %v4643_v11  ;;  %v4640_v20 = vld [vmem:[%s12358_s0 + $0x5b0] sm:$0xff]  ;;  %v13975_v11 = vld [vmem:[%s15304_s10] sm:$0x7] }
 0xa31   : > { %9951 = vmatpush1.bf16.msra.mxu0 %v9950_v33 }
 0xa32   : > { %10047 = vmatpush1.bf16.msra.mxu1 %v10046_v9  ;;  %9953 = vmatprep.subr.bf16.mxu0 %v9952_v50 }
 0xa33   : > { %10049 = vmatprep.subr.bf16.mxu1 %v10048_v34 }
 0xa35   : > { %9955 = vmatpush1.bf16.msra.mxu0 %v9954_v58 }
 0xa36   : > { %10051 = vmatpush1.bf16.msra.mxu1 %v10050_v52  ;;  %9957 = vmatprep.subr.bf16.mxu0 %v9956_v13  ;;  %v4613_v52 = vld [vmem:[%s12358_s0 + $0x4d8] sm:$0xff]  ;;  %v4620_v13 = vld [vmem:[%s12358_s0 + $0x510] sm:$0xff] }
 0xa37   : > { %10053 = vmatprep.subr.bf16.mxu1 %v10052_v28  ;;  %v9968_v19 = vpack.c.bf16 %v4620_v13, %v4613_v52  ;;  %v4612_v28 = vld [vmem:[%s12358_s0 + $0x4d0] sm:$0xff]  ;;  %v4669_v52 = vld [vmem:[%s12358_s0 + $0x698] sm:$0xff] }
 0xa38   : > { %v9970_v25 = vpack.c.bf16 %v4619_v29, %v4612_v28  ;;  %v4676_v13 = vld [vmem:[%s12358_s0 + $0x6d0] sm:$0xff]  ;;  %v4678_v28 = vld [vmem:[%s12358_s0 + $0x6e0] sm:$0xff] }
 0xa39   : > { %9959 = vmatpush1.bf16.msra.mxu0 %v9958_v23  ;;  %v10066_v23 = vpack.c.bf16 %v4621_v54, %v4614_v41  ;;  %v9984_v31 = vpack.c.bf16 %v4676_v13, %v4669_v52  ;;  %v4668_v29 = vld [vmem:[%s12358_s0 + $0x690] sm:$0xff]  ;;  %v4670_v41 = vld [vmem:[%s12358_s0 + $0x6a0] sm:$0xff]  ;;  %v4677_v54 = vld [vmem:[%s12358_s0 + $0x6d8] sm:$0xff] }
 0xa3a   : > { %10055 = vmatpush1.bf16.msra.mxu1 %v10054_v24  ;;  %9961 = vmatprep.subr.bf16.mxu0 %v9960_v5  ;;  %v4627_v24 = vld [vmem:[%s12358_s0 + $0x548] sm:$0xff]  ;;  %v4634_v5 = vld [vmem:[%s12358_s0 + $0x580] sm:$0xff] }
 0xa3b   : > { %10057 = vmatprep.subr.bf16.mxu1 %v10056_v18  ;;  %v9972_v0 = vpack.c.bf16 %v4634_v5, %v4627_v24  ;;  %v4626_v18 = vld [vmem:[%s12358_s0 + $0x540] sm:$0xff]  ;;  %v10082_v24 = vpack.c.bf16 %v4677_v54, %v4670_v41  ;;  %v4683_v5 = vld [vmem:[%s12358_s0 + $0x708] sm:$0xff] }
 0xa3c   : > { %v9974_v30 = vpack.c.bf16 %v4633_v55, %v4626_v18  ;;  %v9988_v63 = vpack.c.bf16 %v4690_v27, %v4683_v5  ;;  %v4692_v18 = vld [vmem:[%s12358_s0 + $0x750] sm:$0xff] }
 0xa3d   : > { %9963 = vmatpush1.bf16.msra.mxu0 %v9962_v59  ;;  %v4641_v59 = vld [vmem:[%s12358_s0 + $0x5b8] sm:$0xff] }
 0xa3e   : > { %10059 = vmatpush1.bf16.msra.mxu1 %v10058_v8  ;;  %9965 = vmatprep.subr.bf16.mxu0 %v9964_v3  ;;  %v10070_v8 = vpack.c.bf16 %v4635_v32, %v4628_v6  ;;  %v4648_v3 = vld [vmem:[%s12358_s0 + $0x5f0] sm:$0xff] }
 0xa3f   : > { %10061 = vmatprep.subr.bf16.mxu1 %v10060_v2  ;;  %v9976_v2 = vpack.c.bf16 %v4648_v3, %v4641_v59  ;;  %v13971_v3 = vld [vmem:[%s731_s15] sm:$0x7] }
 0xa40   : > { %v4422_v53 = vrot.slane %v13971_v3, %v12553_v14 }
 0xa41   : > { %9967 = vmatpush1.bf16.msra.mxu0 %v9966_v57  ;;  %v4647_v57 = vld [vmem:[%s12358_s0 + $0x5e8] sm:$0xff] }
 0xa42   : > { %10063 = vmatpush1.bf16.msra.mxu1 %v10062_v44  ;;  %9969 = vmatprep.subr.bf16.mxu0 %v9968_v19  ;;  %v4642_v44 = vld [vmem:[%s12358_s0 + $0x5c0] sm:$0xff] }
 0xa43   : > { %10065 = vmatprep.subr.bf16.mxu1 %v10064_v51  ;;  %v4675_v51 = vld [vmem:[%s12358_s0 + $0x6c8] sm:$0xff] }
 0xa45   : > { %9971 = vmatpush1.bf16.msra.mxu0 %v9970_v25  ;;  %v10080_v25 = vpack.c.bf16 %v4678_v28, %v4671_v22  ;;  %v4696_v22 = vld [vmem:[%s12358_s0 + $0x770] sm:$0xff] }
 0xa46   : > { %10067 = vmatpush1.bf16.msra.mxu1 %v10066_v23  ;;  %9973 = vmatprep.subr.bf16.mxu0 %v9972_v0  ;;  %v9986_v23 = vpack.c.bf16 %v4675_v51, %v4668_v29  ;;  %v4685_v0 = vld [vmem:[%s12358_s0 + $0x718] sm:$0xff]  ;;  %v4698_v29 = vld [vmem:[%s12358_s0 + $0x780] sm:$0xff] }
 0xa47   : > { %10069 = vmatprep.subr.bf16.mxu1 %v10068_v1  ;;  %v10084_v55 = vpack.c.bf16 %v4692_v18, %v4685_v0  ;;  %v4705_v51 = vld [vmem:[%s12358_s0 + $0x7b8] sm:$0xff] }
 0xa48   : > { %v10090_v0 = vpack.c.bf16 %v4705_v51, %v4698_v29  ;;  %v4717_v18 = vld [vmem:[%s12358_s0 + $0x818] sm:$0xff]  ;;  %v4762_v29 = vld [vmem:[%s12358_s0 + $0x980] sm:$0xff] }
 0xa49   : > { %9975 = vmatpush1.bf16.msra.mxu0 %v9974_v30 }
 0xa4a   : > { %10071 = vmatpush1.bf16.msra.mxu1 %v10070_v8  ;;  %9977 = vmatprep.subr.bf16.mxu0 %v9976_v2  ;;  %v4418_v2 = vrot.slane %v13971_v3, %v12559_v16 }
 0xa4b   : > { %10073 = vmatprep.subr.bf16.mxu1 %v10072_v49 }
 0xaaf   : > { %v4375_v42 = vpop.xlane.xlu1 %4374 }
 0xab0   : > { %v4380_v43 = vmul.f32 0.0026041667, %v4375_v42  ;;  %v9978_v42 = vpack.c.bf16 %v4647_v57, %v4640_v20  ;;  %v4682_v20 = vld [vmem:[%s12358_s0 + $0x700] sm:$0xff] }
 0xab2   : > { %v13896_v35 = vsub.f32 %v13789_v26, %v4380_v43  ;;  %v13899_v37 = vsub.f32 %v13791_v47, %v4380_v43  ;;  %v13902_v4 = vsub.f32 %v13793_v56, %v4380_v43  ;;  %v4649_v43 = vld [vmem:[%s12358_s0 + $0x5f8] sm:$0xff]  ;;  %9979 = vmatpush1.bf16.msra.mxu0 %v9978_v42 }
 0xab3   : > { %v4379_v45 = vpop.xlane.xlu1 %4378 }
 0xab4   : > { %v4381_v62 = vmul.f32 0.0026041667, %v4379_v45  ;;  %v4388_v33 = vmul.f32 %v13896_v35, %v13896_v35  ;;  %v4389_v9 = vmul.f32 %v13899_v37, %v13899_v37  ;;  %v4390_v50 = vmul.f32 %v13902_v4, %v13902_v4  ;;  %v4655_v45 = vld [vmem:[%s12358_s0 + $0x628] sm:$0xff] }
 0xab6   : > { %v13911_v21 = vsub.f32 %v13797_v46, %v4381_v62  ;;  %v13914_v36 = vsub.f32 %v13799_v40, %v4381_v62  ;;  %v13917_v38 = vsub.f32 %v13802_v48, %v4381_v62  ;;  %v4394_v34 = vadd.f32 %v4389_v9, %v4388_v33  ;;  %v4662_v62 = vld [vmem:[%s12358_s0 + $0x660] sm:$0xff] }
 0xab7   : > { %v10074_v33 = vpack.c.bf16 %v4649_v43, %v4642_v44  ;;  %v9980_v9 = vpack.c.bf16 %v4662_v62, %v4655_v45  ;;  %v4444_v44 = vrot.slane %v13975_v11, %v12553_v14  ;;  %v4440_v43 = vrot.slane %v13975_v11, %v12559_v16  ;;  %v4689_v45 = vld [vmem:[%s12358_s0 + $0x738] sm:$0xff]  ;;  %v4684_v62 = vld [vmem:[%s12358_s0 + $0x710] sm:$0xff] }
 0xab8   : > { %v4395_v61 = vadd.f32 %v4394_v34, %v4390_v50  ;;  %v4391_v60 = vmul.f32 %v13911_v21, %v13911_v21  ;;  %v4392_v10 = vmul.f32 %v13914_v36, %v13914_v36  ;;  %v4393_v12 = vmul.f32 %v13917_v38, %v13917_v38  ;;  %v4657_v50 = vld [vmem:[%s12358_s0 + $0x638] sm:$0xff]  ;;  %v4664_v34 = vld [vmem:[%s12358_s0 + $0x670] sm:$0xff] }
 0xab9   : > { %10075 = vmatpush1.bf16.msra.mxu1 %v10074_v33  ;;  %9981 = vmatprep.subr.bf16.mxu0 %v9980_v9  ;;  %v4691_v33 = vld [vmem:[%s12358_s0 + $0x748] sm:$0xff]  ;;  %v4697_v9 = vld [vmem:[%s12358_s0 + $0x778] sm:$0xff] }
 0xaba   : > { %4396 = vadd.xlane.f32.xlu1 %v4395_v61  ;;  %v4398_v7 = vadd.f32 %v4392_v10, %v4391_v60  ;;  %v4654_v61 = vld [vmem:[%s12358_s0 + $0x620] sm:$0xff]  ;;  %v10076_v60 = vpack.c.bf16 %v4664_v34, %v4657_v50  ;;  %v4661_v10 = vld [vmem:[%s12358_s0 + $0x658] sm:$0xff] }
 0xabc   : > { %v4399_v58 = vadd.f32 %v4398_v7, %v4393_v12  ;;  %v4656_v12 = vld [vmem:[%s12358_s0 + $0x630] sm:$0xff]  ;;  %v4663_v7 = vld [vmem:[%s12358_s0 + $0x668] sm:$0xff]  ;;  %10077 = vmatprep.subr.bf16.mxu1 %v10076_v60  ;;  %v4706_v60 = vld [vmem:[%s12358_s0 + $0x7c0] sm:$0xff] }
 0xabd   : > { %v10078_v19 = vpack.c.bf16 %v4663_v7, %v4656_v12  ;;  %v10086_v12 = vpack.c.bf16 %v4691_v33, %v4684_v62  ;;  %v4733_v62 = vld [vmem:[%s12358_s0 + $0x898] sm:$0xff]  ;;  %v4739_v33 = vld [vmem:[%s12358_s0 + $0x8c8] sm:$0xff] }
 0xabe   : > { %4400 = vadd.xlane.f32.xlu1 %v4399_v58  ;;  %v9982_v58 = vpack.c.bf16 %v4661_v10, %v4654_v61  ;;  %v4699_v61 = vld [vmem:[%s12358_s0 + $0x788] sm:$0xff] }
 0xabf   : > { %10079 = vmatpush1.bf16.msra.mxu1 %v10078_v19  ;;  %v4703_v19 = vld [vmem:[%s12358_s0 + $0x7a8] sm:$0xff]  ;;  %v10088_v28 = vpack.c.bf16 %v4706_v60, %v4699_v61  ;;  %v4738_v60 = vld [vmem:[%s12358_s0 + $0x8c0] sm:$0xff] }
 0xac0   : > { %9983 = vmatpush1.bf16.msra.mxu0 %v9982_v58  ;;  %10081 = vmatprep.subr.bf16.mxu1 %v10080_v25  ;;  %v4711_v25 = vld [vmem:[%s12358_s0 + $0x7e8] sm:$0xff] }
 0xac1   : > { %9985 = vmatprep.subr.bf16.mxu0 %v9984_v31 }
 0xac3   : > { %10083 = vmatpush1.bf16.msra.mxu1 %v10082_v24  ;;  %v4720_v24 = vld [vmem:[%s12358_s0 + $0x830] sm:$0xff] }
 0xac4   : > { %9987 = vmatpush1.bf16.msra.mxu0 %v9986_v23  ;;  %10085 = vmatprep.subr.bf16.mxu1 %v10084_v55  ;;  %v4718_v23 = vld [vmem:[%s12358_s0 + $0x820] sm:$0xff] }
 0xac5   : > { %9989 = vmatprep.subr.bf16.mxu0 %v9988_v63  ;;  %v4710_v63 = vld [vmem:[%s12358_s0 + $0x7e0] sm:$0xff]  ;;  %v9996_v55 = vpack.c.bf16 %v4718_v23, %v4711_v25 }
 0xb47   : > { %v4397_v1 = vpop.xlane.xlu1 %4396 }
 0xb48   : > { %v4402_v30 = vmul.f32 0.0026041667, %v4397_v1 }
 0xb4a   : > { %v4404_v6 = vadd.f32 1e-05, %v4402_v30  ;;  %v4712_v30 = vld [vmem:[%s12358_s0 + $0x7f0] sm:$0xff] }
 0xb4b   : > { %v4401_v32 = vpop.xlane.xlu1 %4400 }
 0xb4c   : > { %11261 = vrsqrt.f32 %v4404_v6  ;;  %v4403_v59 = vmul.f32 0.0026041667, %v4401_v32  ;;  %v4719_v6 = vld [vmem:[%s12358_s0 + $0x828] sm:$0xff]  ;;  %v4725_v32 = vld [vmem:[%s12358_s0 + $0x858] sm:$0xff] }
 0xb4e   : > { %v4405_v8 = vadd.f32 1e-05, %v4403_v59  ;;  %v4732_v59 = vld [vmem:[%s12358_s0 + $0x890] sm:$0xff] }
 0xb50   : > { %11263 = vrsqrt.f32 %v4405_v8  ;;  %v4727_v8 = vld [vmem:[%s12358_s0 + $0x868] sm:$0xff] }
 0xb56   : > { %v13981_v49 = vpop.eup %11261 }
 0xb57   : > { %v4409_v57 = vmul.f32 %v13981_v49, %v13899_v37  ;;  %v4408_v42 = vmul.f32 %v13981_v49, %v13896_v35  ;;  %v4704_v37 = vld [vmem:[%s12358_s0 + $0x7b0] sm:$0xff]  ;;  %v9990_v35 = vpack.c.bf16 %v4689_v45, %v4682_v20  ;;  %v10094_v20 = vpack.c.bf16 %v4719_v6, %v4712_v30  ;;  %v4726_v45 = vld [vmem:[%s12358_s0 + $0x860] sm:$0xff] }
 0xb58   : > { %v9992_v31 = vpack.c.bf16 %v4704_v37, %v4697_v9  ;;  %v4746_v9 = vld [vmem:[%s12358_s0 + $0x900] sm:$0xff]  ;;  %v10098_v61 = vpack.c.bf16 %v4733_v62, %v4726_v45  ;;  %v4780_v62 = vld [vmem:[%s12358_s0 + $0xa10] sm:$0xff] }
 0xb59   : > { %v4431_v50 = vmul.f32 %v4422_v53, %v4409_v57  ;;  %v4430_v34 = vmul.f32 %v4418_v2, %v4408_v42  ;;  %v4724_v57 = vld [vmem:[%s12358_s0 + $0x850] sm:$0xff]  ;;  %v10000_v42 = vpack.c.bf16 %v4732_v59, %v4725_v32  ;;  %v4766_v6 = vld [vmem:[%s12358_s0 + $0x9a0] sm:$0xff]  ;;  %v4773_v32 = vld [vmem:[%s12358_s0 + $0x9d8] sm:$0xff] }
 0xb5a   : > { %v13999_v10 = vpop.eup %11263 }
 0xb5b   : > { %v14001_v7 = vadd.f32 %v4444_v44, %v4431_v50  ;;  %v14003_v58 = vadd.f32 %v4440_v43, %v4430_v34  ;;  %v4412_v52 = vmul.f32 %v13999_v10, %v13914_v36  ;;  %v4411_v13 = vmul.f32 %v13999_v10, %v13911_v21  ;;  %v4713_v36 = vld [vmem:[%s12358_s0 + $0x7f8] sm:$0xff]  ;;  %v4748_v34 = vld [vmem:[%s12358_s0 + $0x910] sm:$0xff] }
 0xb5c   : > { %v9994_v21 = vpack.c.bf16 %v4703_v19, %v4696_v22  ;;  %v10092_v1 = vpack.c.bf16 %v4720_v24, %v4713_v36  ;;  %v4741_v50 = vld [vmem:[%s12358_s0 + $0x8d8] sm:$0xff]  ;;  %v4747_v22 = vld [vmem:[%s12358_s0 + $0x908] sm:$0xff]  ;;  %v4754_v24 = vld [vmem:[%s12358_s0 + $0x940] sm:$0xff] }
 0xb5d   : > { %4858 = vmatprep.mubr.f32.mxu0 %v14001_v7  ;;  %5012 = vmatprep.mubr.f32.mxu1 %v14001_v7  ;;  %v4434_v41 = vmul.f32 %v4422_v53, %v4412_v52  ;;  %v4433_v54 = vmul.f32 %v4418_v2, %v4411_v13  ;;  %v4734_v53 = vld [vmem:[%s12358_s0 + $0x8a0] sm:$0xff]  ;;  %v9998_v2 = vpack.c.bf16 %v4717_v18, %v4710_v63  ;;  %v4740_v13 = vld [vmem:[%s12358_s0 + $0x8d0] sm:$0xff]  ;;  %v4753_v19 = vld [vmem:[%s12358_s0 + $0x938] sm:$0xff] }
 0xb5e   : > { %4859 = vmatmul.mubr.f32.vlgmr.msra.gmra.mrb[28].mxu0 %v14003_v58  ;;  %5013 = vmatmul.mubr.f32.vlgmr.msra.gmra.mrb[32].mxu1 %v14003_v58  ;;  %v10100_v52 = vpack.c.bf16 %v4748_v34, %v4741_v50  ;;  %v10102_v25 = vpack.c.bf16 %v4747_v22, %v4740_v13  ;;  %v4774_v63 = vld [vmem:[%s12358_s0 + $0x9e0] sm:$0xff]  ;;  %v4769_v18 = vld [vmem:[%s12358_s0 + $0x9b8] sm:$0xff]  ;;  %v4426_v50 = vrot.slane %v13971_v3, %v12556_v15  ;;  %v4583_v13 = vld [vmem:[%s12358_s0 + $0x3e8] sm:$0xff] }
 0xb5f   : > { %9991 = vmatpush1.bf16.msra.mxu0 %v9990_v35  ;;  %10087 = vmatpush1.bf16.msra.mxu1 %v10086_v12  ;;  %v14021_v5 = vadd.f32 %v4444_v44, %v4434_v41  ;;  %v14023_v27 = vadd.f32 %v4440_v43, %v4433_v54  ;;  %v4731_v44 = vld [vmem:[%s12358_s0 + $0x888] sm:$0xff]  ;;  %v10096_v43 = vpack.c.bf16 %v4734_v53, %v4727_v8  ;;  %v4745_v35 = vld [vmem:[%s12358_s0 + $0x8f8] sm:$0xff]  ;;  %v4752_v41 = vld [vmem:[%s12358_s0 + $0x930] sm:$0xff] }
 0xb60   : > { %9993 = vmatprep.subr.bf16.mxu0 %v9992_v31  ;;  %10089 = vmatprep.subr.bf16.mxu1 %v10088_v28  ;;  %v10002_v37 = vpack.c.bf16 %v4731_v44, %v4724_v57  ;;  %v10004_v12 = vpack.c.bf16 %v4746_v9, %v4739_v33  ;;  %v4760_v31 = vld [vmem:[%s12358_s0 + $0x970] sm:$0xff]  ;;  %v4755_v28 = vld [vmem:[%s12358_s0 + $0x948] sm:$0xff]  ;;  %v10006_v51 = vpack.c.bf16 %v4745_v35, %v4738_v60  ;;  %v4782_v9 = vld [vmem:[%s12358_s0 + $0xa20] sm:$0xff] }
 0xb61   : > { %4864 = vmatprep.mubr.f32.mxu0 %v14021_v5  ;;  %5018 = vmatprep.mubr.f32.mxu1 %v14021_v5  ;;  %v4759_v54 = vld [vmem:[%s12358_s0 + $0x968] sm:$0xff]  ;;  %v10008_v23 = vpack.c.bf16 %v4760_v31, %v4753_v19  ;;  %v10104_v36 = vpack.c.bf16 %v4762_v29, %v4755_v28  ;;  %v4768_v53 = vld [vmem:[%s12358_s0 + $0x9b0] sm:$0xff]  ;;  %v4410_v60 = vmul.f32 %v13981_v49, %v13902_v4  ;;  %v4462_v4 = vld [vmem:[%s12358_s0 + $0x20] sm:$0xff] }
 0xb62   : > { %4865 = vmatmul.mubr.f32.gmra.mrb[30].mxu0 %v14023_v27  ;;  %5019 = vmatmul.mubr.f32.gmra.mrb[34].mxu1 %v14023_v27  ;;  %v4788_v57 = vld [vmem:[%s12358_s0 + $0xa50] sm:$0xff]  ;;  %v4783_v44 = vld [vmem:[%s12358_s0 + $0xa28] sm:$0xff]  ;;  %v4448_v3 = vrot.slane %v13975_v11, %v12556_v15  ;;  %v4469_v29 = vld [vmem:[%s12358_s0 + $0x58] sm:$0xff]  ;;  %v4413_v11 = vmul.f32 %v13999_v10, %v13917_v38 }
 0xb63   : > { %9995 = vmatpush1.bf16.msra.mxu0 %v9994_v21  ;;  %10091 = vmatpush1.bf16.msra.mxu1 %v10090_v0  ;;  %v4761_v21 = vld [vmem:[%s12358_s0 + $0x978] sm:$0xff]  ;;  %v4767_v0 = vld [vmem:[%s12358_s0 + $0x9a8] sm:$0xff]  ;;  %v4432_v49 = vmul.f32 %v4426_v50, %v4410_v60  ;;  %v4476_v38 = vld [vmem:[%s12358_s0 + $0x90] sm:$0xff] }
 0xb64   : > { %9997 = vmatprep.subr.bf16.mxu0 %v9996_v55  ;;  %10093 = vmatprep.subr.bf16.mxu1 %v10092_v1  ;;  %v4776_v55 = vld [vmem:[%s12358_s0 + $0x9f0] sm:$0xff]  ;;  %v10010_v1 = vpack.c.bf16 %v4759_v54, %v4752_v41  ;;  %v10106_v30 = vpack.c.bf16 %v4761_v21, %v4754_v24  ;;  %v10012_v59 = vpack.c.bf16 %v4774_v63, %v4767_v0  ;;  %v4787_v33 = vld [vmem:[%s12358_s0 + $0xa48] sm:$0xff]  ;;  %v4477_v41 = vld [vmem:[%s12358_s0 + $0x98] sm:$0xff] }
 0xb65   : > { %4935 = vmatprep.mubr.f32.mxu0 %v15302_v39  ;;  %5089 = vmatprep.mubr.f32.mxu1 %v15302_v39  ;;  %v10108_v8 = vpack.c.bf16 %v4776_v55, %v4769_v18  ;;  %v4463_v35 = vld [vmem:[%s12358_s0 + $0x28] sm:$0xff]  ;;  %v10018_v22 = vpack.c.bf16 %v4787_v33, %v4780_v62  ;;  %v4484_v54 = vld [vmem:[%s12358_s0 + $0xd0] sm:$0xff]  ;;  %v10118_v24 = vpack.c.bf16 %v4469_v29, %v4462_v4  ;;  %v4505_v33 = vld [vmem:[%s12358_s0 + $0x178] sm:$0xff] }
 0xb66   : > { %v14095_v0 = vadd.f32 %v4448_v3, %v4432_v49  ;;  %v4435_v63 = vmul.f32 %v4426_v50, %v4413_v11  ;;  %v4483_v10 = vld [vmem:[%s12358_s0 + $0xc8] sm:$0xff]  ;;  %v10120_v18 = vpack.c.bf16 %v4484_v54, %v4477_v41  ;;  %v4618_v50 = vld [vmem:[%s12358_s0 + $0x500] sm:$0xff]  ;;  %v4533_v54 = vld [vmem:[%s12358_s0 + $0x258] sm:$0xff] }
 0xb67   : > { %9999 = vmatpush1.bf16.msra.mxu0 %v9998_v2  ;;  %10095 = vmatpush1.bf16.msra.mxu1 %v10094_v20  ;;  %v4775_v2 = vld [vmem:[%s12358_s0 + $0x9e8] sm:$0xff]  ;;  %v4781_v20 = vld [vmem:[%s12358_s0 + $0xa18] sm:$0xff]  ;;  %v4518_v29 = vld [vmem:[%s12358_s0 + $0x1e0] sm:$0xff] }
 0xb68   : > { %10001 = vmatprep.subr.bf16.mxu0 %v10000_v42  ;;  %10097 = vmatprep.subr.bf16.mxu1 %v10096_v43  ;;  %v4790_v42 = vld [vmem:[%s12358_s0 + $0xa60] sm:$0xff]  ;;  %v10014_v43 = vpack.c.bf16 %v4773_v32, %v4766_v6  ;;  %v10110_v45 = vpack.c.bf16 %v4775_v2, %v4768_v53  ;;  %v10016_v34 = vpack.c.bf16 %v4788_v57, %v4781_v20  ;;  %v4491_v6 = vld [vmem:[%s12358_s0 + $0x108] sm:$0xff] }
 0xb69   : > { %v4498_v32 = vld [vmem:[%s12358_s0 + $0x140] sm:$0xff]  ;;  %v10122_v53 = vpack.c.bf16 %v4483_v10, %v4476_v38  ;;  %v14109_v2 = vadd.f32 %v4448_v3, %v4435_v63  ;;  %v4499_v62 = vld [vmem:[%s12358_s0 + $0x148] sm:$0xff]  ;;  %v4513_v3 = vld [vmem:[%s12358_s0 + $0x1b8] sm:$0xff] }
 0xb6a   : > { %v4490_v57 = vld [vmem:[%s12358_s0 + $0x100] sm:$0xff]  ;;  %v4527_v41 = vld [vmem:[%s12358_s0 + $0x228] sm:$0xff]  ;;  %v4532_v10 = vld [vmem:[%s12358_s0 + $0x250] sm:$0xff] }
 0xb6b   : > { %10003 = vmatpush1.bf16.msra.mxu0 %v10002_v37  ;;  %10099 = vmatpush1.bf16.msra.mxu1 %v10098_v61  ;;  %v10112_v37 = vpack.c.bf16 %v4790_v42, %v4783_v44  ;;  %v4789_v61 = vld [vmem:[%s12358_s0 + $0xa58] sm:$0xff]  ;;  %v4492_v42 = vld [vmem:[%s12358_s0 + $0x110] sm:$0xff] }
 0xb6c   : > { %10005 = vmatprep.subr.bf16.mxu0 %v10004_v12  ;;  %10101 = vmatprep.subr.bf16.mxu1 %v10100_v52  ;;  %v4470_v12 = vld [vmem:[%s12358_s0 + $0x60] sm:$0xff]  ;;  %v4576_v52 = vld [vmem:[%s12358_s0 + $0x3b0] sm:$0xff]  ;;  %v10114_v19 = vpack.c.bf16 %v4789_v61, %v4782_v9  ;;  %v4497_v44 = vld [vmem:[%s12358_s0 + $0x138] sm:$0xff]  ;;  %v10222_v61 = vpack.c.bf16 %v4499_v62, %v4492_v42 }
 0xb6d   : > { %v10116_v31 = vpack.c.bf16 %v4470_v12, %v4463_v35  ;;  %v10212_v28 = vpack.c.bf16 %v4583_v13, %v4576_v52  ;;  %v4512_v9 = vld [vmem:[%s12358_s0 + $0x1b0] sm:$0xff]  ;;  %v4511_v12 = vld [vmem:[%s12358_s0 + $0x1a8] sm:$0xff]  ;;  %v4506_v52 = vld [vmem:[%s12358_s0 + $0x180] sm:$0xff] }
 0xb6e   : > { %v10128_v60 = vpack.c.bf16 %v4512_v9, %v4505_v33  ;;  %v4504_v35 = vld [vmem:[%s12358_s0 + $0x170] sm:$0xff]  ;;  %v10226_v49 = vpack.c.bf16 %v4513_v3, %v4506_v52  ;;  %v4553_v42 = vld [vmem:[%s12358_s0 + $0x2f8] sm:$0xff]  ;;  %v4555_v62 = vld [vmem:[%s12358_s0 + $0x308] sm:$0xff] }
 0xb6f   : > { %10007 = vmatpush1.bf16.msra.mxu0 %v10006_v51  ;;  %10103 = vmatpush1.bf16.msra.mxu1 %v10102_v25  ;;  %v4464_v51 = vld [vmem:[%s12358_s0 + $0x30] sm:$0xff]  ;;  %v4471_v25 = vld [vmem:[%s12358_s0 + $0x68] sm:$0xff]  ;;  %v10130_v4 = vpack.c.bf16 %v4511_v12, %v4504_v35  ;;  %v4561_v33 = vld [vmem:[%s12358_s0 + $0x338] sm:$0xff] }
 0xb70   : > { %10009 = vmatprep.subr.bf16.mxu0 %v10008_v23  ;;  %10105 = vmatprep.subr.bf16.mxu1 %v10104_v36  ;;  %v4590_v23 = vld [vmem:[%s12358_s0 + $0x420] sm:$0xff]  ;;  %v4597_v36 = vld [vmem:[%s12358_s0 + $0x458] sm:$0xff]  ;;  %v10214_v21 = vpack.c.bf16 %v4471_v25, %v4464_v51  ;;  %v4520_v25 = vld [vmem:[%s12358_s0 + $0x1f0] sm:$0xff] }
 0xb71   : > { %v10216_v55 = vpack.c.bf16 %v4597_v36, %v4590_v23  ;;  %v4525_v51 = vld [vmem:[%s12358_s0 + $0x218] sm:$0xff]  ;;  %v4540_v23 = vld [vmem:[%s12358_s0 + $0x290] sm:$0xff]  ;;  %v4646_v36 = vld [vmem:[%s12358_s0 + $0x5e0] sm:$0xff]  ;;  %v10230_v63 = vpack.c.bf16 %v4527_v41, %v4520_v25 }
 0xb72   : > { %v10136_v38 = vpack.c.bf16 %v4540_v23, %v4533_v54  ;;  %v4568_v9 = vld [vmem:[%s12358_s0 + $0x370] sm:$0xff]  ;;  %v4567_v12 = vld [vmem:[%s12358_s0 + $0x368] sm:$0xff]  ;;  %v4562_v52 = vld [vmem:[%s12358_s0 + $0x340] sm:$0xff] }
 0xb73   : > { %10011 = vmatpush1.bf16.msra.mxu0 %v10010_v1  ;;  %10107 = vmatpush1.bf16.msra.mxu1 %v10106_v30  ;;  %v4478_v1 = vld [vmem:[%s12358_s0 + $0xa0] sm:$0xff]  ;;  %v4485_v30 = vld [vmem:[%s12358_s0 + $0xd8] sm:$0xff]  ;;  %v4560_v35 = vld [vmem:[%s12358_s0 + $0x330] sm:$0xff] }
 0xb74   : > { %10013 = vmatprep.subr.bf16.mxu0 %v10012_v59  ;;  %10109 = vmatprep.subr.bf16.mxu1 %v10108_v8  ;;  %v4604_v59 = vld [vmem:[%s12358_s0 + $0x490] sm:$0xff]  ;;  %v4611_v8 = vld [vmem:[%s12358_s0 + $0x4c8] sm:$0xff]  ;;  %v10218_v20 = vpack.c.bf16 %v4485_v30, %v4478_v1  ;;  %v4541_v30 = vld [vmem:[%s12358_s0 + $0x298] sm:$0xff] }
 0xb75   : > { %v4569_v3 = vld [vmem:[%s12358_s0 + $0x378] sm:$0xff]  ;;  %v4596_v41 = vld [vmem:[%s12358_s0 + $0x450] sm:$0xff]  ;;  %v4702_v54 = vld [vmem:[%s12358_s0 + $0x7a0] sm:$0xff] }
 0xb76   : > { %v4709_v23 = vld [vmem:[%s12358_s0 + $0x7d8] sm:$0xff] }
 0xb77   : > { %10015 = vmatpush1.bf16.msra.mxu0 %v10014_v43  ;;  %10111 = vmatpush1.bf16.msra.mxu1 %v10110_v45  ;;  %v10124_v43 = vpack.c.bf16 %v4498_v32, %v4491_v6  ;;  %v10220_v45 = vpack.c.bf16 %v4611_v8, %v4604_v59  ;;  %v4547_v6 = vld [vmem:[%s12358_s0 + $0x2c8] sm:$0xff]  ;;  %v4554_v32 = vld [vmem:[%s12358_s0 + $0x300] sm:$0xff]  ;;  %v4660_v59 = vld [vmem:[%s12358_s0 + $0x650] sm:$0xff] }
 0xb78   : > { %10017 = vmatprep.subr.bf16.mxu0 %v10016_v34  ;;  %10113 = vmatprep.subr.bf16.mxu1 %v10112_v37  ;;  %v4625_v34 = vld [vmem:[%s12358_s0 + $0x538] sm:$0xff]  ;;  %v10126_v37 = vpack.c.bf16 %v4497_v44, %v4490_v57  ;;  %v4667_v8 = vld [vmem:[%s12358_s0 + $0x688] sm:$0xff]  ;;  %v10140_v57 = vpack.c.bf16 %v4554_v32, %v4547_v6  ;;  %v4546_v44 = vld [vmem:[%s12358_s0 + $0x2c0] sm:$0xff] }
 0xb79   : > { %v10224_v13 = vpack.c.bf16 %v4625_v34, %v4618_v50  ;;  %v4674_v50 = vld [vmem:[%s12358_s0 + $0x6c0] sm:$0xff]  ;;  %v4681_v34 = vld [vmem:[%s12358_s0 + $0x6f8] sm:$0xff] }
 0xb7a   : > { %v4602_v6 = vld [vmem:[%s12358_s0 + $0x480] sm:$0xff]  ;;  %v4609_v32 = vld [vmem:[%s12358_s0 + $0x4b8] sm:$0xff] }
 0xb7b   : > { %10019 = vmatpush1.bf16.msra.mxu0 %v10018_v22  ;;  %10115 = vmatpush1.bf16.msra.mxu1 %v10114_v19  ;;  %v4519_v22 = vld [vmem:[%s12358_s0 + $0x1e8] sm:$0xff]  ;;  %v4526_v19 = vld [vmem:[%s12358_s0 + $0x220] sm:$0xff] }
 0xb7c   : > { %10117 = vmatprep.subr.bf16.mxu0 %v10116_v31  ;;  %10213 = vmatprep.subr.bf16.mxu1 %v10212_v28  ;;  %v4632_v31 = vld [vmem:[%s12358_s0 + $0x570] sm:$0xff]  ;;  %v10132_v28 = vpack.c.bf16 %v4526_v19, %v4519_v22  ;;  %v4575_v22 = vld [vmem:[%s12358_s0 + $0x3a8] sm:$0xff]  ;;  %v4582_v19 = vld [vmem:[%s12358_s0 + $0x3e0] sm:$0xff] }
 0xb7e   : > { %4936 = vmatmul.mubr.f32.vlgmr.msra.gmra.mrb[28].mxu0 %v14095_v0  ;;  %5090 = vmatmul.mubr.f32.vlgmr.msra.gmra.mrb[32].mxu1 %v14095_v0 }
 0xb7f   : > { %10119 = vmatpush1.bf16.msra.mxu0 %v10118_v24  ;;  %10215 = vmatpush3.bf16.msra.mxu1 %v10214_v21  ;;  %v4653_v24 = vld [vmem:[%s12358_s0 + $0x618] sm:$0xff]  ;;  %v10134_v21 = vpack.c.bf16 %v4525_v51, %v4518_v29  ;;  %v4574_v29 = vld [vmem:[%s12358_s0 + $0x3a0] sm:$0xff] }
 0xb80   : > { %4941 = vmatprep.mubr.f32.mxu0 %v15302_v39  ;;  %5095 = vmatprep.mubr.f32.mxu1 %v15302_v39  ;;  %v10232_v1 = vpack.c.bf16 %v4653_v24, %v4646_v36  ;;  %v4581_v51 = vld [vmem:[%s12358_s0 + $0x3d8] sm:$0xff]  ;;  %v4588_v24 = vld [vmem:[%s12358_s0 + $0x410] sm:$0xff] }
 0xb81   : > { %10121 = vmatprep.subr.bf16.mxu0 %v10120_v18  ;;  %10217 = vmatprep.subr.bf16.mxu1 %v10216_v55  ;;  %v4539_v18 = vld [vmem:[%s12358_s0 + $0x288] sm:$0xff]  ;;  %v4534_v55 = vld [vmem:[%s12358_s0 + $0x260] sm:$0xff]  ;;  %v10150_v36 = vpack.c.bf16 %v4581_v51, %v4574_v29 }
 0xb82   : > { %4942 = vmatmul.mubr.f32.gmra.mrb[30].mxu0 %v14109_v2  ;;  %5096 = vmatmul.mubr.f32.gmra.mrb[34].mxu1 %v14109_v2  ;;  %v4659_v29 = vld [vmem:[%s12358_s0 + $0x648] sm:$0xff]  ;;  %v4666_v51 = vld [vmem:[%s12358_s0 + $0x680] sm:$0xff] }
 0xb83   : > { %10123 = vmatpush1.bf16.msra.mxu0 %v10122_v53  ;;  %5166 = vmatprep.mubr.f32.mxu0 %v14001_v7  ;;  %v10138_v53 = vpack.c.bf16 %v4539_v18, %v4532_v10  ;;  %v4603_v10 = vld [vmem:[%s12358_s0 + $0x488] sm:$0xff]  ;;  %v4610_v18 = vld [vmem:[%s12358_s0 + $0x4c0] sm:$0xff] }
 0xb84   : > { %10219 = vmatpush3.bf16.msra.mxu1 %v10218_v20  ;;  %5320 = vmatprep.mubr.f32.mxu1 %v14001_v7  ;;  %v4639_v7 = vld [vmem:[%s12358_s0 + $0x5a8] sm:$0xff]  ;;  %v10234_v20 = vpack.c.bf16 %v4541_v30, %v4534_v55  ;;  %v4716_v55 = vld [vmem:[%s12358_s0 + $0x810] sm:$0xff] }
 0xb85   : > { %10125 = vmatprep.subr.bf16.mxu0 %v10124_v43  ;;  %10221 = vmatprep.subr.bf16.mxu1 %v10220_v45  ;;  %v10228_v11 = vpack.c.bf16 %v4639_v7, %v4632_v31  ;;  %v4548_v43 = vld [vmem:[%s12358_s0 + $0x2d0] sm:$0xff]  ;;  %v10236_v45 = vpack.c.bf16 %v4667_v8, %v4660_v59  ;;  %v4695_v7 = vld [vmem:[%s12358_s0 + $0x768] sm:$0xff]  ;;  %v10156_v59 = vpack.c.bf16 %v4610_v18, %v4603_v10  ;;  %v4793_v10 = vld [vmem:[%s12358_s0 + $0xa78] sm:$0xff] }
 0xb86   : > { %v4688_v31 = vld [vmem:[%s12358_s0 + $0x730] sm:$0xff] }
 0xb87   : > { %10127 = vmatpush1.bf16.msra.mxu0 %v10126_v37  ;;  %v10142_v37 = vpack.c.bf16 %v4553_v42, %v4546_v44  ;;  %v10244_v25 = vpack.c.bf16 %v4695_v7, %v4688_v31  ;;  %v4737_v44 = vld [vmem:[%s12358_s0 + $0x8b8] sm:$0xff]  ;;  %v10158_v42 = vpack.c.bf16 %v4609_v32, %v4602_v6  ;;  %v4687_v32 = vld [vmem:[%s12358_s0 + $0x728] sm:$0xff] }
 0xb88   : > { %10223 = vmatpush3.bf16.msra.mxu1 %v10222_v61  ;;  %10129 = vmatprep.subr.bf16.mxu0 %v10128_v60  ;;  %v10238_v61 = vpack.c.bf16 %v4555_v62, %v4548_v43  ;;  %v10144_v60 = vpack.c.bf16 %v4568_v9, %v4561_v33  ;;  %v4623_v62 = vld [vmem:[%s12358_s0 + $0x528] sm:$0xff] }
 0xb89   : > { %10225 = vmatprep.subr.bf16.mxu1 %v10224_v13  ;;  %v10240_v13 = vpack.c.bf16 %v4681_v34, %v4674_v50  ;;  %v4631_v9 = vld [vmem:[%s12358_s0 + $0x568] sm:$0xff]  ;;  %v4638_v50 = vld [vmem:[%s12358_s0 + $0x5a0] sm:$0xff]  ;;  %v4744_v34 = vld [vmem:[%s12358_s0 + $0x8f0] sm:$0xff] }
 0xb8b   : > { %10131 = vmatpush1.bf16.msra.mxu0 %v10130_v4  ;;  %v10146_v4 = vpack.c.bf16 %v4567_v12, %v4560_v35  ;;  %v4630_v35 = vld [vmem:[%s12358_s0 + $0x560] sm:$0xff]  ;;  %v4637_v12 = vld [vmem:[%s12358_s0 + $0x598] sm:$0xff] }
 0xb8c   : > { %10227 = vmatpush3.bf16.msra.mxu1 %v10226_v49  ;;  %10133 = vmatprep.subr.bf16.mxu0 %v10132_v28  ;;  %v10242_v49 = vpack.c.bf16 %v4569_v3, %v4562_v52  ;;  %v10148_v28 = vpack.c.bf16 %v4582_v19, %v4575_v22  ;;  %v4652_v3 = vld [vmem:[%s12358_s0 + $0x610] sm:$0xff]  ;;  %v4758_v22 = vld [vmem:[%s12358_s0 + $0x960] sm:$0xff]  ;;  %v4765_v19 = vld [vmem:[%s12358_s0 + $0x998] sm:$0xff]  ;;  %v10166_v31 = vpack.c.bf16 %v4637_v12, %v4630_v35 }
 0xb8d   : > { %10229 = vmatprep.subr.bf16.mxu1 %v10228_v11  ;;  %v4589_v11 = vld [vmem:[%s12358_s0 + $0x418] sm:$0xff]  ;;  %v4707_v35 = vld [vmem:[%s12358_s0 + $0x7c8] sm:$0xff]  ;;  %v5592_v12 = vld [vmem:[%s12364_s18 + $0x70] sm:$0xff] }
 0xb8f   : > { %10135 = vmatpush1.bf16.msra.mxu0 %v10134_v21  ;;  %v4595_v21 = vld [vmem:[%s12358_s0 + $0x448] sm:$0xff] }
 0xb90   : > { %10231 = vmatpush3.bf16.msra.mxu1 %v10230_v63  ;;  %10137 = vmatprep.subr.bf16.mxu0 %v10136_v38  ;;  %v10152_v63 = vpack.c.bf16 %v4596_v41, %v4589_v11  ;;  %v10248_v38 = vpack.c.bf16 %v4709_v23, %v4702_v54  ;;  %v10154_v30 = vpack.c.bf16 %v4595_v21, %v4588_v24  ;;  %v4779_v11 = vld [vmem:[%s12358_s0 + $0xa08] sm:$0xff]  ;;  %v4658_v23 = vld [vmem:[%s12358_s0 + $0x640] sm:$0xff]  ;;  %v4673_v21 = vld [vmem:[%s12358_s0 + $0x6b8] sm:$0xff] }
 0xb91   : > { %10233 = vmatprep.subr.bf16.mxu1 %v10232_v1  ;;  %v4723_v1 = vld [vmem:[%s12358_s0 + $0x848] sm:$0xff]  ;;  %v10172_v54 = vpack.c.bf16 %v4666_v51, %v4659_v29  ;;  %v4721_v29 = vld [vmem:[%s12358_s0 + $0x838] sm:$0xff] }
 0xb92   : > { %v10252_v8 = vpack.c.bf16 %v4723_v1, %v4716_v55  ;;  %v4672_v1 = vld [vmem:[%s12358_s0 + $0x6b0] sm:$0xff] }
 0xb93   : > { %10139 = vmatpush1.bf16.msra.mxu0 %v10138_v53  ;;  %v4617_v53 = vld [vmem:[%s12358_s0 + $0x4f8] sm:$0xff] }
 0xb94   : > { %10235 = vmatpush3.bf16.msra.mxu1 %v10234_v20  ;;  %10141 = vmatprep.subr.bf16.mxu0 %v10140_v57  ;;  %v4624_v20 = vld [vmem:[%s12358_s0 + $0x530] sm:$0xff]  ;;  %v4730_v57 = vld [vmem:[%s12358_s0 + $0x880] sm:$0xff] }
 0xb95   : > { %10237 = vmatprep.subr.bf16.mxu1 %v10236_v45  ;;  %v10160_v43 = vpack.c.bf16 %v4624_v20, %v4617_v53  ;;  %v4616_v45 = vld [vmem:[%s12358_s0 + $0x4f0] sm:$0xff]  ;;  %v10256_v33 = vpack.c.bf16 %v4737_v44, %v4730_v57  ;;  %v5586_v53 = vld [vmem:[%s12364_s18 + $0x40] sm:$0xff] }
 0xb96   : > { %v4686_v44 = vld [vmem:[%s12358_s0 + $0x720] sm:$0xff] }
 0xb97   : > { %10143 = vmatpush1.bf16.msra.mxu0 %v10142_v37  ;;  %v4751_v37 = vld [vmem:[%s12358_s0 + $0x928] sm:$0xff] }
 0xb98   : > { %10239 = vmatpush3.bf16.msra.mxu1 %v10238_v61  ;;  %10145 = vmatprep.subr.bf16.mxu0 %v10144_v60  ;;  %v10162_v61 = vpack.c.bf16 %v4623_v62, %v4616_v45  ;;  %v10164_v60 = vpack.c.bf16 %v4638_v50, %v4631_v9  ;;  %v10260_v52 = vpack.c.bf16 %v4751_v37, %v4744_v34  ;;  %v5578_v45 = vld [vmem:[%s12364_s18] sm:$0xff]  ;;  %v5585_v62 = vld [vmem:[%s12364_s18 + $0x38] sm:$0xff]  ;;  %v4708_v9 = vld [vmem:[%s12358_s0 + $0x7d0] sm:$0xff] }
 0xb99   : > { %10241 = vmatprep.subr.bf16.mxu1 %v10240_v13  ;;  %v4645_v13 = vld [vmem:[%s12358_s0 + $0x5d8] sm:$0xff]  ;;  %v5600_v34 = vld [vmem:[%s12364_s18 + $0xb0] sm:$0xff] }
 0xb9a   : > { %v10168_v7 = vpack.c.bf16 %v4652_v3, %v4645_v13  ;;  %v5593_v50 = vld [vmem:[%s12364_s18 + $0x78] sm:$0xff]  ;;  %v5599_v3 = vld [vmem:[%s12364_s18 + $0xa8] sm:$0xff] }
 0xb9b   : > { %10147 = vmatpush1.bf16.msra.mxu0 %v10146_v4  ;;  %v4644_v4 = vld [vmem:[%s12358_s0 + $0x5d0] sm:$0xff]  ;;  %v10280_v13 = vpack.c.bf16 %v5600_v34, %v5593_v50 }
 0xb9c   : > { %10243 = vmatpush3.bf16.msra.mxu1 %v10242_v49  ;;  %10149 = vmatprep.subr.bf16.mxu0 %v10148_v28  ;;  %v4651_v49 = vld [vmem:[%s12358_s0 + $0x608] sm:$0xff]  ;;  %v10264_v28 = vpack.c.bf16 %v4765_v19, %v4758_v22  ;;  %v4722_v19 = vld [vmem:[%s12358_s0 + $0x840] sm:$0xff] }
 0xb9d   : > { %10245 = vmatprep.subr.bf16.mxu1 %v10244_v25  ;;  %v10170_v41 = vpack.c.bf16 %v4651_v49, %v4644_v4  ;;  %v4715_v22 = vld [vmem:[%s12358_s0 + $0x808] sm:$0xff]  ;;  %v14235_v4 = vld [vmem:[%s15305_s29 + $0x4] ss:$12 sps:$4 sm:$0xff]   ;;  %v10282_v49 = vpack.c.bf16 %v5599_v3, %v5592_v12 }
 0xb9e   : > { %v10188_v51 = vpack.c.bf16 %v4722_v19, %v4715_v22  ;;  %v5648_v12 = vld [vmem:[%s12364_s18 + $0x230] sm:$0xff]  ;;  %v4778_v3 = vld [vmem:[%s12358_s0 + $0xa00] sm:$0xff]  ;;  %v5663_v22 = vld [vmem:[%s12364_s18 + $0x2a8] sm:$0xff] }
 0xb9f   : > { %5321 = vmatmul.mubr.f32.vlgmr.msra.gmra.mrb[36].mxu1 %v14003_v58  ;;  %10151 = vmatpush1.bf16.msra.mxu0 %v10150_v36  ;;  %v4665_v36 = vld [vmem:[%s12358_s0 + $0x678] sm:$0xff]  ;;  %v5670_v19 = vld [vmem:[%s12364_s18 + $0x2e0] sm:$0xff] }
 0xba0   : > { %5325 = vmatprep.mubr.f32.mxu1 %v14021_v5  ;;  %10247 = vmatpush3.bf16.msra.mxu1 %v10244_v25  ;;  %v4772_v25 = vld [vmem:[%s12358_s0 + $0x9d0] sm:$0xff]  ;;  %v10174_v18 = vpack.c.bf16 %v4665_v36, %v4658_v23  ;;  %v5621_v23 = vld [vmem:[%s12364_s18 + $0x158] sm:$0xff] }
 0xba1   : > { %10153 = vmatprep.subr.bf16.mxu0 %v10152_v63  ;;  %10249 = vmatprep.subr.bf16.mxu1 %v10248_v38  ;;  %v10268_v24 = vpack.c.bf16 %v4779_v11, %v4772_v25  ;;  %v4680_v63 = vld [vmem:[%s12358_s0 + $0x6f0] sm:$0xff]  ;;  %v5606_v11 = vld [vmem:[%s12364_s18 + $0xe0] sm:$0xff] }
 0xba2   : > { %v10176_v55 = vpack.c.bf16 %v4680_v63, %v4673_v21  ;;  %v5628_v36 = vld [vmem:[%s12364_s18 + $0x190] sm:$0xff] }
 0xba3   : > { %5326 = vmatmul.mubr.f32.gmra.mrb[38].mxu1 %v14023_v27  ;;  %10155 = vmatpush1.bf16.msra.mxu0 %v10154_v30  ;;  %v4679_v30 = vld [vmem:[%s12358_s0 + $0x6e8] sm:$0xff]  ;;  %v4728_v63 = vld [vmem:[%s12358_s0 + $0x870] sm:$0xff] }
 0xba4   : > { %10251 = vmatpush3.bf16.msra.mxu1 %v10248_v38  ;;  %8871 = vmatprep.mubr.f32.mxu1 %v14095_v0  ;;  %v4786_v38 = vld [vmem:[%s12358_s0 + $0xa40] sm:$0xff]  ;;  %v10178_v20 = vpack.c.bf16 %v4679_v30, %v4672_v1  ;;  %v4743_v1 = vld [vmem:[%s12358_s0 + $0x8e8] sm:$0xff] }
 0xba5   : > { %10157 = vmatprep.subr.bf16.mxu0 %v10156_v59  ;;  %10253 = vmatprep.subr.bf16.mxu1 %v10252_v8  ;;  %v10272_v6 = vpack.c.bf16 %v4793_v10, %v4786_v38  ;;  %v4694_v59 = vld [vmem:[%s12358_s0 + $0x760] sm:$0xff]  ;;  %v10288_v10 = vpack.c.bf16 %v5628_v36, %v5621_v23 }
 0xba6   : > { %v10180_v57 = vpack.c.bf16 %v4694_v59, %v4687_v32  ;;  %v4750_v30 = vld [vmem:[%s12358_s0 + $0x920] sm:$0xff] }
 0xba7   : > { %10159 = vmatpush1.bf16.msra.mxu0 %v10158_v42  ;;  %v4693_v42 = vld [vmem:[%s12358_s0 + $0x758] sm:$0xff]  ;;  %v5642_v32 = vld [vmem:[%s12364_s18 + $0x200] sm:$0xff] }
 0xba8   : > { %10255 = vmatpush3.bf16.msra.mxu1 %v10252_v8  ;;  %10161 = vmatprep.subr.bf16.mxu0 %v10160_v43  ;;  %v5579_v8 = vld [vmem:[%s12364_s18 + $0x8] sm:$0xff]  ;;  %v10182_v37 = vpack.c.bf16 %v4693_v42, %v4686_v44  ;;  %v5634_v42 = vld [vmem:[%s12364_s18 + $0x1c0] sm:$0xff] }
 0xba9   : > { %10257 = vmatprep.subr.bf16.mxu1 %v10256_v33  ;;  %v10276_v43 = vpack.c.bf16 %v5586_v53, %v5579_v8  ;;  %v4742_v53 = vld [vmem:[%s12358_s0 + $0x8e0] sm:$0xff] }
 0xbab   : > { %10163 = vmatpush1.bf16.msra.mxu0 %v10162_v61  ;;  %v10278_v61 = vpack.c.bf16 %v5585_v62, %v5578_v45  ;;  %v4757_v45 = vld [vmem:[%s12358_s0 + $0x958] sm:$0xff]  ;;  %v4764_v62 = vld [vmem:[%s12358_s0 + $0x990] sm:$0xff] }
 0xbac   : > { %10259 = vmatpush3.bf16.msra.mxu1 %v10256_v33  ;;  %10165 = vmatprep.subr.bf16.mxu0 %v10164_v60  ;;  %v4701_v33 = vld [vmem:[%s12358_s0 + $0x798] sm:$0xff]  ;;  %v4700_v60 = vld [vmem:[%s12358_s0 + $0x790] sm:$0xff] }
 0xbad   : > { %10261 = vmatprep.subr.bf16.mxu1 %v10260_v52 }
 0xbaf   : > { %10167 = vmatpush1.bf16.msra.mxu0 %v10166_v31  ;;  %v5607_v31 = vld [vmem:[%s12364_s18 + $0xe8] sm:$0xff] }
 0xbb0   : > { %10263 = vmatpush3.bf16.msra.mxu1 %v10260_v52  ;;  %10169 = vmatprep.subr.bf16.mxu0 %v10168_v7  ;;  %v10184_v52 = vpack.c.bf16 %v4708_v9, %v4701_v33  ;;  %v5614_v7 = vld [vmem:[%s12364_s18 + $0x120] sm:$0xff]  ;;  %v5649_v33 = vld [vmem:[%s12364_s18 + $0x238] sm:$0xff]  ;;  %v5656_v9 = vld [vmem:[%s12364_s18 + $0x270] sm:$0xff] }
 0xbb1   : > { %10265 = vmatprep.subr.bf16.mxu1 %v10264_v28  ;;  %v10284_v25 = vpack.c.bf16 %v5614_v7, %v5607_v31 }
 0xbb3   : > { %10171 = vmatpush1.bf16.msra.mxu0 %v10170_v41  ;;  %v5613_v41 = vld [vmem:[%s12364_s18 + $0x118] sm:$0xff] }
 0xbb4   : > { %10267 = vmatpush3.bf16.msra.mxu1 %v10264_v28  ;;  %10173 = vmatprep.subr.bf16.mxu0 %v10172_v54  ;;  %v4714_v28 = vld [vmem:[%s12358_s0 + $0x800] sm:$0xff]  ;;  %v4729_v54 = vld [vmem:[%s12358_s0 + $0x878] sm:$0xff]  ;;  %v10286_v21 = vpack.c.bf16 %v5613_v41, %v5606_v11  ;;  %v4792_v41 = vld [vmem:[%s12358_s0 + $0xa70] sm:$0xff] }
 0xbb5   : > { %10269 = vmatprep.subr.bf16.mxu1 %v10268_v24  ;;  %v4785_v11 = vld [vmem:[%s12358_s0 + $0xa38] sm:$0xff] }
 0xbb7   : > { %10175 = vmatpush1.bf16.msra.mxu0 %v10174_v18  ;;  %v5620_v18 = vld [vmem:[%s12364_s18 + $0x150] sm:$0xff] }
 0xbb8   : > { %10271 = vmatpush3.bf16.msra.mxu1 %v10268_v24  ;;  %10177 = vmatprep.subr.bf16.mxu0 %v10176_v55  ;;  %v10190_v24 = vpack.c.bf16 %v4721_v29, %v4714_v28  ;;  %v5627_v55 = vld [vmem:[%s12364_s18 + $0x188] sm:$0xff]  ;;  %v10300_v29 = vpack.c.bf16 %v5670_v19, %v5663_v22 }
 0xbb9   : > { %10273 = vmatprep.subr.bf16.mxu1 %v10272_v6  ;;  %v10290_v8 = vpack.c.bf16 %v5627_v55, %v5620_v18  ;;  %v5691_v18 = vld [vmem:[%s12364_s18 + $0x388] sm:$0xff]  ;;  %v5698_v55 = vld [vmem:[%s12364_s18 + $0x3c0] sm:$0xff] }
 0xbbb   : > { %10179 = vmatpush1.bf16.msra.mxu0 %v10178_v20  ;;  %v4749_v20 = vld [vmem:[%s12358_s0 + $0x918] sm:$0xff] }
 0xbbc   : > { %10275 = vmatpush3.bf16.msra.mxu1 %v10272_v6  ;;  %10181 = vmatprep.subr.bf16.mxu0 %v10180_v57  ;;  %v5635_v6 = vld [vmem:[%s12364_s18 + $0x1c8] sm:$0xff]  ;;  %v10196_v57 = vpack.c.bf16 %v4750_v30, %v4743_v1  ;;  %v10198_v50 = vpack.c.bf16 %v4749_v20, %v4742_v53  ;;  %v5581_v1 = vld [vmem:[%s12364_s18 + $0x18] sm:$0xff]  ;;  %v5588_v30 = vld [vmem:[%s12364_s18 + $0x50] sm:$0xff] }
 0xbbd   : > { %10277 = vmatprep.subr.bf16.mxu1 %v10276_v43  ;;  %v10292_v44 = vpack.c.bf16 %v5642_v32, %v5635_v6  ;;  %v5641_v43 = vld [vmem:[%s12364_s18 + $0x1f8] sm:$0xff]  ;;  %v10372_v53 = vpack.c.bf16 %v5588_v30, %v5581_v1  ;;  %v5746_v1 = vld [vmem:[%s12364_s18 + $0x540] sm:$0xff] }
 0xbbe   : > { %5167 = vmatmul.mubr.f32.vlgmr.msra.gmra.mrb[32].mxu0 %v14003_v58  ;;  %v10186_v58 = vpack.c.bf16 %v4707_v35, %v4700_v60  ;;  %v10294_v34 = vpack.c.bf16 %v5641_v43, %v5634_v42  ;;  %v10200_v60 = vpack.c.bf16 %v4764_v62, %v4757_v45  ;;  %v10296_v35 = vpack.c.bf16 %v5656_v9, %v5649_v33  ;;  %v5697_v20 = vld [vmem:[%s12364_s18 + $0x3b8] sm:$0xff]  ;;  %v5712_v43 = vld [vmem:[%s12364_s18 + $0x430] sm:$0xff]  ;;  %v5595_v45 = vld [vmem:[%s12364_s18 + $0x88] sm:$0xff] }
 0xbbf   : > { %8872 = vmatmul.mubr.f32.vlgmr.msra.gmra.mrb[40].mxu1 %v14109_v2  ;;  %5172 = vmatprep.mubr.f32.mxu0 %v14021_v5  ;;  %v4736_v5 = vld [vmem:[%s12358_s0 + $0x8b0] sm:$0xff]  ;;  %v5705_v42 = vld [vmem:[%s12364_s18 + $0x3f8] sm:$0xff]  ;;  %v5602_v62 = vld [vmem:[%s12364_s18 + $0xc0] sm:$0xff] }
 0xbc0   : > { %10183 = vmatpush1.bf16.msra.mxu0 %v10182_v37  ;;  %10279 = vmatpush1.bf16.msra.mxu1 %v10278_v61  ;;  %v10192_v38 = vpack.c.bf16 %v4736_v5, %v4729_v54  ;;  %v4756_v37 = vld [vmem:[%s12358_s0 + $0x950] sm:$0xff]  ;;  %v4763_v61 = vld [vmem:[%s12358_s0 + $0x988] sm:$0xff]  ;;  %v5677_v54 = vld [vmem:[%s12364_s18 + $0x318] sm:$0xff] }
 0xbc1   : > { %10185 = vmatprep.subr.bf16.mxu0 %v10184_v52  ;;  %10281 = vmatprep.subr.bf16.mxu1 %v10280_v13  ;;  %v5655_v52 = vld [vmem:[%s12364_s18 + $0x268] sm:$0xff]  ;;  %v10202_v31 = vpack.c.bf16 %v4763_v61, %v4756_v37  ;;  %v5684_v5 = vld [vmem:[%s12364_s18 + $0x350] sm:$0xff]  ;;  %v10312_v37 = vpack.c.bf16 %v5712_v43, %v5705_v42  ;;  %v5594_v61 = vld [vmem:[%s12364_s18 + $0x80] sm:$0xff] }
 0xbc2   : > { %5173 = vmatmul.mubr.f32.gmra.mrb[34].mxu0 %v14023_v27  ;;  %5988 = vmatprep.mubr.f32.mxu1 %v14235_v4  ;;  %v4735_v27 = vld [vmem:[%s12358_s0 + $0x8a8] sm:$0xff]  ;;  %v10298_v7 = vpack.c.bf16 %v5655_v52, %v5648_v12  ;;  %v10376_v12 = vpack.c.bf16 %v5602_v62, %v5595_v45  ;;  %v5726_v52 = vld [vmem:[%s12364_s18 + $0x4a0] sm:$0xff]  ;;  %v5753_v30 = vld [vmem:[%s12364_s18 + $0x578] sm:$0xff] }
 0xbc3   : > { %5243 = vmatprep.mubr.f32.mxu0 %v15302_v39  ;;  %v10194_v59 = vpack.c.bf16 %v4735_v27, %v4728_v63  ;;  %v4771_v13 = vld [vmem:[%s12358_s0 + $0x9c8] sm:$0xff]  ;;  %v10208_v63 = vpack.c.bf16 %v4792_v41, %v4785_v11  ;;  %v10304_v27 = vpack.c.bf16 %v5684_v5, %v5677_v54  ;;  %v5630_v11 = vld [vmem:[%s12364_s18 + $0x1a0] sm:$0xff]  ;;  %v5732_v5 = vld [vmem:[%s12364_s18 + $0x4d0] sm:$0xff]  ;;  %v10326_v42 = vpack.c.bf16 %v5753_v30, %v5746_v1 }
 0xbc4   : > { %10187 = vmatpush1.bf16.msra.mxu0 %v10186_v58  ;;  %10283 = vmatpush1.bf16.msra.mxu1 %v10282_v49  ;;  %v4770_v58 = vld [vmem:[%s12358_s0 + $0x9c0] sm:$0xff]  ;;  %v4777_v49 = vld [vmem:[%s12358_s0 + $0x9f8] sm:$0xff]  ;;  %v10204_v28 = vpack.c.bf16 %v4778_v3, %v4771_v13  ;;  %v5616_v3 = vld [vmem:[%s12364_s18 + $0x130] sm:$0xff] }
 0xbc5   : > { %10189 = vmatprep.subr.bf16.mxu0 %v10188_v51  ;;  %10285 = vmatprep.subr.bf16.mxu1 %v10284_v25  ;;  %v5662_v51 = vld [vmem:[%s12364_s18 + $0x2a0] sm:$0xff]  ;;  %v5669_v25 = vld [vmem:[%s12364_s18 + $0x2d8] sm:$0xff]  ;;  %v10206_v23 = vpack.c.bf16 %v4777_v49, %v4770_v58  ;;  %v5760_v45 = vld [vmem:[%s12364_s18 + $0x5b0] sm:$0xff] }
 0xbc6   : > { %v10302_v36 = vpack.c.bf16 %v5669_v25, %v5662_v51  ;;  %v5609_v13 = vld [vmem:[%s12364_s18 + $0xf8] sm:$0xff]  ;;  %v5623_v25 = vld [vmem:[%s12364_s18 + $0x168] sm:$0xff]  ;;  %v5692_v1 = vld [vmem:[%s12364_s18 + $0x390] sm:$0xff] }
 0xbc7   : > { %v10380_v49 = vpack.c.bf16 %v5616_v3, %v5609_v13  ;;  %v5733_v51 = vld [vmem:[%s12364_s18 + $0x4d8] sm:$0xff]  ;;  %v5767_v62 = vld [vmem:[%s12364_s18 + $0x5e8] sm:$0xff]  ;;  %v5774_v13 = vld [vmem:[%s12364_s18 + $0x620] sm:$0xff] }
 0xbc8   : > { %10191 = vmatpush1.bf16.msra.mxu0 %v10190_v24  ;;  %10287 = vmatpush1.bf16.msra.mxu1 %v10286_v21  ;;  %v4784_v24 = vld [vmem:[%s12358_s0 + $0xa30] sm:$0xff]  ;;  %v4791_v21 = vld [vmem:[%s12358_s0 + $0xa68] sm:$0xff]  ;;  %v5781_v3 = vld [vmem:[%s12364_s18 + $0x658] sm:$0xff] }
 0xbc9   : > { %10193 = vmatprep.subr.bf16.mxu0 %v10192_v38  ;;  %10289 = vmatprep.subr.bf16.mxu1 %v10288_v10  ;;  %v5676_v38 = vld [vmem:[%s12364_s18 + $0x310] sm:$0xff]  ;;  %v5683_v10 = vld [vmem:[%s12364_s18 + $0x348] sm:$0xff]  ;;  %v10210_v6 = vpack.c.bf16 %v4791_v21, %v4784_v24  ;;  %v10384_v24 = vpack.c.bf16 %v5630_v11, %v5623_v25  ;;  %v5622_v21 = vld [vmem:[%s12364_s18 + $0x160] sm:$0xff] }
 0xbca   : > { %v10306_v32 = vpack.c.bf16 %v5683_v10, %v5676_v38  ;;  %v5754_v38 = vld [vmem:[%s12364_s18 + $0x580] sm:$0xff]  ;;  %v5644_v10 = vld [vmem:[%s12364_s18 + $0x210] sm:$0xff]  ;;  %v5795_v11 = vld [vmem:[%s12364_s18 + $0x6c8] sm:$0xff] }
 0xbcb   : > { %v5788_v25 = vld [vmem:[%s12364_s18 + $0x690] sm:$0xff]  ;;  %v5699_v30 = vld [vmem:[%s12364_s18 + $0x3c8] sm:$0xff] }
 0xbcc   : > { %10195 = vmatpush1.bf16.msra.mxu0 %v10194_v59  ;;  %10291 = vmatpush1.bf16.msra.mxu1 %v10290_v8  ;;  %v5690_v59 = vld [vmem:[%s12364_s18 + $0x380] sm:$0xff]  ;;  %v10308_v8 = vpack.c.bf16 %v5698_v55, %v5691_v18 }
 0xbcd   : > { %10197 = vmatprep.subr.bf16.mxu0 %v10196_v57  ;;  %10293 = vmatprep.subr.bf16.mxu1 %v10292_v44  ;;  %v5580_v57 = vld [vmem:[%s12364_s18 + $0x10] sm:$0xff]  ;;  %v5587_v44 = vld [vmem:[%s12364_s18 + $0x48] sm:$0xff]  ;;  %v10310_v33 = vpack.c.bf16 %v5697_v20, %v5690_v59 }
 0xbce   : > { %v10374_v9 = vpack.c.bf16 %v5587_v44, %v5580_v57  ;;  %v5636_v59 = vld [vmem:[%s12364_s18 + $0x1d0] sm:$0xff]  ;;  %v5651_v57 = vld [vmem:[%s12364_s18 + $0x248] sm:$0xff]  ;;  %v5658_v44 = vld [vmem:[%s12364_s18 + $0x280] sm:$0xff] }
 0xbcf   : > { %v5768_v20 = vld [vmem:[%s12364_s18 + $0x5f0] sm:$0xff] }
 0xbd0   : > { %10199 = vmatpush1.bf16.msra.mxu0 %v10198_v50  ;;  %10295 = vmatpush1.bf16.msra.mxu1 %v10294_v34  ;;  %v5704_v50 = vld [vmem:[%s12364_s18 + $0x3f0] sm:$0xff]  ;;  %v5711_v34 = vld [vmem:[%s12364_s18 + $0x428] sm:$0xff] }
 0xbd1   : > { %10201 = vmatprep.subr.bf16.mxu0 %v10200_v60  ;;  %10297 = vmatprep.subr.bf16.mxu1 %v10296_v35  ;;  %v5601_v60 = vld [vmem:[%s12364_s18 + $0xb8] sm:$0xff]  ;;  %v5719_v35 = vld [vmem:[%s12364_s18 + $0x468] sm:$0xff]  ;;  %v10314_v22 = vpack.c.bf16 %v5711_v34, %v5704_v50  ;;  %v5650_v50 = vld [vmem:[%s12364_s18 + $0x240] sm:$0xff] }
 0xbd2   : > { %v10378_v19 = vpack.c.bf16 %v5601_v60, %v5594_v61  ;;  %v10316_v58 = vpack.c.bf16 %v5726_v52, %v5719_v35  ;;  %v5657_v34 = vld [vmem:[%s12364_s18 + $0x278] sm:$0xff]  ;;  %v5782_v61 = vld [vmem:[%s12364_s18 + $0x660] sm:$0xff]  ;;  %v5672_v35 = vld [vmem:[%s12364_s18 + $0x2f0] sm:$0xff] }
 0xbd3   : > { %v5665_v60 = vld [vmem:[%s12364_s18 + $0x2b8] sm:$0xff]  ;;  %v10394_v52 = vpack.c.bf16 %v5657_v34, %v5650_v50  ;;  %v5838_v50 = vld [vmem:[%s12364_s18 + $0x820] sm:$0xff] }
 0xbd4   : > { %10203 = vmatpush1.bf16.msra.mxu0 %v10202_v31  ;;  %10299 = vmatpush1.bf16.msra.mxu1 %v10298_v7  ;;  %v5718_v31 = vld [vmem:[%s12364_s18 + $0x460] sm:$0xff]  ;;  %v5725_v7 = vld [vmem:[%s12364_s18 + $0x498] sm:$0xff] }
 0xbd5   : > { %10205 = vmatprep.subr.bf16.mxu0 %v10204_v28  ;;  %10301 = vmatprep.subr.bf16.mxu1 %v10300_v29  ;;  %v5608_v28 = vld [vmem:[%s12364_s18 + $0xf0] sm:$0xff]  ;;  %v5615_v29 = vld [vmem:[%s12364_s18 + $0x128] sm:$0xff]  ;;  %v10318_v41 = vpack.c.bf16 %v5725_v7, %v5718_v31  ;;  %v5721_v34 = vld [vmem:[%s12364_s18 + $0x478] sm:$0xff] }
 0xbd6   : > { %v10382_v54 = vpack.c.bf16 %v5615_v29, %v5608_v28  ;;  %v5664_v31 = vld [vmem:[%s12364_s18 + $0x2b0] sm:$0xff]  ;;  %v5671_v7 = vld [vmem:[%s12364_s18 + $0x2e8] sm:$0xff]  ;;  %v5686_v29 = vld [vmem:[%s12364_s18 + $0x360] sm:$0xff] }
 0xbd7   : > { %v5679_v28 = vld [vmem:[%s12364_s18 + $0x328] sm:$0xff] }
 0xbd8   : > { %10207 = vmatpush1.bf16.msra.mxu0 %v10206_v23  ;;  %10303 = vmatpush1.bf16.msra.mxu1 %v10302_v36  ;;  %v5739_v23 = vld [vmem:[%s12364_s18 + $0x508] sm:$0xff] }
 0xbd9   : > { %10209 = vmatprep.subr.bf16.mxu0 %v10208_v63  ;;  %10305 = vmatprep.subr.bf16.mxu1 %v10304_v27  ;;  %v5629_v63 = vld [vmem:[%s12364_s18 + $0x198] sm:$0xff]  ;;  %v5747_v27 = vld [vmem:[%s12364_s18 + $0x548] sm:$0xff]  ;;  %v10322_v18 = vpack.c.bf16 %v5739_v23, %v5732_v5  ;;  %v5678_v5 = vld [vmem:[%s12364_s18 + $0x320] sm:$0xff] }
 0xbda   : > { %v10386_v55 = vpack.c.bf16 %v5629_v63, %v5622_v21  ;;  %v5685_v23 = vld [vmem:[%s12364_s18 + $0x358] sm:$0xff]  ;;  %v5700_v63 = vld [vmem:[%s12364_s18 + $0x3d0] sm:$0xff] }
 0xbdb   : > { %v5693_v21 = vld [vmem:[%s12364_s18 + $0x398] sm:$0xff] }
 0xbdc   : > { %10211 = vmatpush1.bf16.msra.mxu0 %v10210_v6  ;;  %10307 = vmatpush1.bf16.msra.mxu1 %v10306_v32  ;;  %v10324_v6 = vpack.c.bf16 %v5754_v38, %v5747_v27  ;;  %v10338_v27 = vpack.c.bf16 %v5795_v11, %v5788_v25  ;;  %v10402_v38 = vpack.c.bf16 %v5685_v23, %v5678_v5  ;;  %v5734_v11 = vld [vmem:[%s12364_s18 + $0x4e0] sm:$0xff]  ;;  %v5749_v23 = vld [vmem:[%s12364_s18 + $0x558] sm:$0xff] }
 0xbdd   : > { %10309 = vmatprep.subr.bf16.mxu1 %v10308_v8  ;;  %10373 = vmatprep.subr.bf16.mxu0 %v10372_v53  ;;  %v5643_v8 = vld [vmem:[%s12364_s18 + $0x208] sm:$0xff]  ;;  %v5761_v53 = vld [vmem:[%s12364_s18 + $0x5b8] sm:$0xff]  ;;  %v5866_v5 = vld [vmem:[%s12364_s18 + $0x900] sm:$0xff] }
 0xbde   : > { %v10390_v43 = vpack.c.bf16 %v5643_v8, %v5636_v59  ;;  %v5707_v59 = vld [vmem:[%s12364_s18 + $0x408] sm:$0xff]  ;;  %v5714_v8 = vld [vmem:[%s12364_s18 + $0x440] sm:$0xff] }
 0xbdf   : > { %5244 = vmatmul.mubr.f32.vlgmr.msra.gmra.mrb[32].mxu0 %v14095_v0  ;;  %v5740_v0 = vld [vmem:[%s12364_s18 + $0x510] sm:$0xff] }
 0xbe0   : > { %10311 = vmatpush1.bf16.msra.mxu1 %v10310_v33  ;;  %10375 = vmatpush1.bf16.msra.mxu0 %v10374_v9  ;;  %v10320_v36 = vpack.c.bf16 %v5740_v0, %v5733_v51  ;;  %v10328_v33 = vpack.c.bf16 %v5768_v20, %v5761_v53  ;;  %v10392_v9 = vpack.c.bf16 %v5658_v44, %v5651_v57  ;;  %v14369_v53 = vld [vmem:[%s15305_s29] ss:$12 sps:$4 sm:$0xff]  }
 0xbe1   : > { %5249 = vmatprep.mubr.f32.mxu0 %v15302_v39  ;;  %10313 = vmatprep.subr.bf16.mxu1 %v10312_v37  ;;  %v5775_v37 = vld [vmem:[%s12364_s18 + $0x628] sm:$0xff]  ;;  %v10334_v51 = vpack.c.bf16 %v5781_v3, %v5774_v13  ;;  %v10398_v0 = vpack.c.bf16 %v5671_v7, %v5664_v31  ;;  %v10406_v57 = vpack.c.bf16 %v5699_v30, %v5692_v1  ;;  %v5816_v44 = vld [vmem:[%s12364_s18 + $0x770] sm:$0xff] }
 0xbe2   : > { %10377 = vmatprep.subr.bf16.mxu0 %v10376_v12  ;;  %v10330_v12 = vpack.c.bf16 %v5767_v62, %v5760_v45  ;;  %v10408_v45 = vpack.c.bf16 %v5714_v8, %v5707_v59  ;;  %v5706_v62 = vld [vmem:[%s12364_s18 + $0x400] sm:$0xff]  ;;  %v5720_v3 = vld [vmem:[%s12364_s18 + $0x470] sm:$0xff]  ;;  %v5735_v7 = vld [vmem:[%s12364_s18 + $0x4e8] sm:$0xff] }
 0xbe3   : > { %5250 = vmatmul.mubr.f32.gmra.mrb[34].mxu0 %v14109_v2  ;;  %v5637_v2 = vld [vmem:[%s12364_s18 + $0x1d8] sm:$0xff]  ;;  %v5852_v31 = vld [vmem:[%s12364_s18 + $0x890] sm:$0xff]  ;;  %v5763_v30 = vld [vmem:[%s12364_s18 + $0x5c8] sm:$0xff] }
 0xbe4   : > { %10315 = vmatpush1.bf16.msra.mxu1 %v10314_v22  ;;  %10379 = vmatpush1.bf16.msra.mxu0 %v10378_v19  ;;  %v10388_v32 = vpack.c.bf16 %v5644_v10, %v5637_v2  ;;  %v10332_v22 = vpack.c.bf16 %v5782_v61, %v5775_v37  ;;  %v10396_v19 = vpack.c.bf16 %v5672_v35, %v5665_v60  ;;  %v5802_v2 = vld [vmem:[%s12364_s18 + $0x700] sm:$0xff]  ;;  %v5809_v10 = vld [vmem:[%s12364_s18 + $0x738] sm:$0xff]  ;;  %v5728_v37 = vld [vmem:[%s12364_s18 + $0x4b0] sm:$0xff] }
 0xbe5   : > { %10317 = vmatprep.subr.bf16.mxu1 %v10316_v58  ;;  %10381 = vmatprep.subr.bf16.mxu0 %v10380_v49  ;;  %v5789_v58 = vld [vmem:[%s12364_s18 + $0x698] sm:$0xff]  ;;  %v5796_v49 = vld [vmem:[%s12364_s18 + $0x6d0] sm:$0xff]  ;;  %v10342_v20 = vpack.c.bf16 %v5809_v10, %v5802_v2  ;;  %v5830_v35 = vld [vmem:[%s12364_s18 + $0x7e0] sm:$0xff]  ;;  %v10412_v13 = vpack.c.bf16 %v5728_v37, %v5721_v34 }
 0xbe6   : > { %6130 = vmatprep.mubr.f32.mxu0 %v14235_v4  ;;  %v5748_v10 = vld [vmem:[%s12364_s18 + $0x550] sm:$0xff]  ;;  %v5886_v37 = vld [vmem:[%s12364_s18 + $0x9a0] sm:$0xff] }
 0xbe7   : > { %v5880_v1 = vld [vmem:[%s12364_s18 + $0x970] sm:$0xff] }
 0xbe8   : > { %10319 = vmatpush1.bf16.msra.mxu1 %v10318_v41  ;;  %10383 = vmatpush1.bf16.msra.mxu0 %v10382_v54  ;;  %v10336_v41 = vpack.c.bf16 %v5796_v49, %v5789_v58  ;;  %v10400_v54 = vpack.c.bf16 %v5686_v29, %v5679_v28  ;;  %v5742_v58 = vld [vmem:[%s12364_s18 + $0x520] sm:$0xff]  ;;  %v5844_v29 = vld [vmem:[%s12364_s18 + $0x850] sm:$0xff] }
 0xbe9   : > { %10321 = vmatprep.subr.bf16.mxu1 %v10320_v36  ;;  %10385 = vmatprep.subr.bf16.mxu0 %v10384_v24  ;;  %v5803_v36 = vld [vmem:[%s12364_s18 + $0x708] sm:$0xff]  ;;  %v5810_v24 = vld [vmem:[%s12364_s18 + $0x740] sm:$0xff]  ;;  %v10416_v25 = vpack.c.bf16 %v5742_v58, %v5735_v7  ;;  %v5872_v8 = vld [vmem:[%s12364_s18 + $0x930] sm:$0xff] }
 0xbea   : > { %v5900_v58 = vld [vmem:[%s12364_s18 + $0xa10] sm:$0xff] }
 0xbec   : > { %10323 = vmatpush1.bf16.msra.mxu1 %v10322_v18  ;;  %10387 = vmatpush1.bf16.msra.mxu0 %v10386_v55  ;;  %v10340_v18 = vpack.c.bf16 %v5810_v24, %v5803_v36  ;;  %v10404_v55 = vpack.c.bf16 %v5700_v63, %v5693_v21  ;;  %v5756_v36 = vld [vmem:[%s12364_s18 + $0x590] sm:$0xff]  ;;  %v5858_v63 = vld [vmem:[%s12364_s18 + $0x8c0] sm:$0xff] }
 0xbed   : > { %10325 = vmatprep.subr.bf16.mxu1 %v10324_v6  ;;  %10389 = vmatprep.subr.bf16.mxu0 %v10388_v32  ;;  %v5817_v6 = vld [vmem:[%s12364_s18 + $0x778] sm:$0xff]  ;;  %v5824_v32 = vld [vmem:[%s12364_s18 + $0x7b0] sm:$0xff]  ;;  %v10420_v2 = vpack.c.bf16 %v5756_v36, %v5749_v23 }
 0xbee   : > { %v5804_v36 = vld [vmem:[%s12364_s18 + $0x710] sm:$0xff] }
 0xbf0   : > { %10327 = vmatpush1.bf16.msra.mxu1 %v10326_v42  ;;  %10391 = vmatpush1.bf16.msra.mxu0 %v10390_v43  ;;  %v5823_v42 = vld [vmem:[%s12364_s18 + $0x7a8] sm:$0xff]  ;;  %v10344_v43 = vpack.c.bf16 %v5824_v32, %v5817_v6  ;;  %v5770_v6 = vld [vmem:[%s12364_s18 + $0x600] sm:$0xff] }
 0xbf1   : > { %10329 = vmatprep.subr.bf16.mxu1 %v10328_v33  ;;  %10393 = vmatprep.subr.bf16.mxu0 %v10392_v9  ;;  %v5713_v33 = vld [vmem:[%s12364_s18 + $0x438] sm:$0xff]  ;;  %v5831_v9 = vld [vmem:[%s12364_s18 + $0x7e8] sm:$0xff]  ;;  %v10346_v61 = vpack.c.bf16 %v5823_v42, %v5816_v44  ;;  %v10424_v44 = vpack.c.bf16 %v5770_v6, %v5763_v30  ;;  %v5762_v42 = vld [vmem:[%s12364_s18 + $0x5c0] sm:$0xff] }
 0xbf2   : > { %v10410_v60 = vpack.c.bf16 %v5713_v33, %v5706_v62  ;;  %v5894_v62 = vld [vmem:[%s12364_s18 + $0x9e0] sm:$0xff]  ;;  %v5777_v33 = vld [vmem:[%s12364_s18 + $0x638] sm:$0xff] }
 0xbf4   : > { %10331 = vmatpush1.bf16.msra.mxu1 %v10330_v12  ;;  %10395 = vmatpush1.bf16.msra.mxu0 %v10394_v52  ;;  %v5837_v12 = vld [vmem:[%s12364_s18 + $0x818] sm:$0xff]  ;;  %v10348_v52 = vpack.c.bf16 %v5838_v50, %v5831_v9  ;;  %v5784_v9 = vld [vmem:[%s12364_s18 + $0x670] sm:$0xff] }
 0xbf5   : > { %10333 = vmatprep.subr.bf16.mxu1 %v10332_v22  ;;  %10397 = vmatprep.subr.bf16.mxu0 %v10396_v19  ;;  %v5727_v22 = vld [vmem:[%s12364_s18 + $0x4a8] sm:$0xff]  ;;  %v5845_v19 = vld [vmem:[%s12364_s18 + $0x858] sm:$0xff]  ;;  %v10350_v49 = vpack.c.bf16 %v5837_v12, %v5830_v35  ;;  %v10428_v35 = vpack.c.bf16 %v5784_v9, %v5777_v33  ;;  %v5776_v12 = vld [vmem:[%s12364_s18 + $0x630] sm:$0xff] }
 0xbf6   : > { %v10414_v28 = vpack.c.bf16 %v5727_v22, %v5720_v3  ;;  %v5908_v3 = vld [vmem:[%s12364_s18 + $0xa50] sm:$0xff]  ;;  %v5791_v22 = vld [vmem:[%s12364_s18 + $0x6a8] sm:$0xff] }
 0xbf8   : > { %10335 = vmatpush1.bf16.msra.mxu1 %v10334_v51  ;;  %10399 = vmatpush1.bf16.msra.mxu0 %v10398_v0  ;;  %v5851_v51 = vld [vmem:[%s12364_s18 + $0x888] sm:$0xff]  ;;  %v10352_v0 = vpack.c.bf16 %v5852_v31, %v5845_v19  ;;  %v5798_v19 = vld [vmem:[%s12364_s18 + $0x6e0] sm:$0xff] }
 0xbf9   : > { %10337 = vmatprep.subr.bf16.mxu1 %v10336_v41  ;;  %10401 = vmatprep.subr.bf16.mxu0 %v10400_v54  ;;  %v5741_v41 = vld [vmem:[%s12364_s18 + $0x518] sm:$0xff]  ;;  %v5859_v54 = vld [vmem:[%s12364_s18 + $0x8c8] sm:$0xff]  ;;  %v10354_v24 = vpack.c.bf16 %v5851_v51, %v5844_v29  ;;  %v10432_v29 = vpack.c.bf16 %v5798_v19, %v5791_v22  ;;  %v5790_v51 = vld [vmem:[%s12364_s18 + $0x6a0] sm:$0xff] }
 0xbfa   : > { %v10418_v21 = vpack.c.bf16 %v5741_v41, %v5734_v11  ;;  %v5812_v11 = vld [vmem:[%s12364_s18 + $0x750] sm:$0xff]  ;;  %v5583_v41 = vld [vmem:[%s12364_s18 + $0x28] sm:$0xff] }
 0xbfc   : > { %10339 = vmatpush1.bf16.msra.mxu1 %v10338_v27  ;;  %10403 = vmatpush1.bf16.msra.mxu0 %v10402_v38  ;;  %v5865_v27 = vld [vmem:[%s12364_s18 + $0x8f8] sm:$0xff]  ;;  %v10356_v38 = vpack.c.bf16 %v5866_v5, %v5859_v54  ;;  %v5590_v54 = vld [vmem:[%s12364_s18 + $0x60] sm:$0xff] }
 0xbfd   : > { %10341 = vmatprep.subr.bf16.mxu1 %v10340_v18  ;;  %10405 = vmatprep.subr.bf16.mxu0 %v10404_v55  ;;  %v5755_v18 = vld [vmem:[%s12364_s18 + $0x588] sm:$0xff]  ;;  %v5873_v55 = vld [vmem:[%s12364_s18 + $0x938] sm:$0xff]  ;;  %v10358_v32 = vpack.c.bf16 %v5865_v27, %v5858_v63  ;;  %v10468_v63 = vpack.c.bf16 %v5590_v54, %v5583_v41  ;;  %v5582_v27 = vld [vmem:[%s12364_s18 + $0x20] sm:$0xff] }
 0xbfe   : > { %v10422_v59 = vpack.c.bf16 %v5755_v18, %v5748_v10  ;;  %v5826_v10 = vld [vmem:[%s12364_s18 + $0x7c0] sm:$0xff]  ;;  %v5597_v18 = vld [vmem:[%s12364_s18 + $0x98] sm:$0xff]  ;;  %v5860_v54 = vld [vmem:[%s12364_s18 + $0x8d0] sm:$0xff] }
 0xbff   : > { %5989 = vmatmul.mubr.f32.vlgmr.msra.gmra.mrb[42].mxu1 %v14369_v53 }
 0xc00   : > { %10343 = vmatpush1.bf16.msra.mxu1 %v10342_v20  ;;  %10407 = vmatpush1.bf16.msra.mxu0 %v10406_v57  ;;  %v5879_v20 = vld [vmem:[%s12364_s18 + $0x968] sm:$0xff]  ;;  %v10360_v57 = vpack.c.bf16 %v5880_v1, %v5873_v55  ;;  %v5604_v55 = vld [vmem:[%s12364_s18 + $0xd0] sm:$0xff]  ;;  %v14440_v1 = vld [vmem:[%s15305_s29 + $0x8] ss:$12 sps:$4 sm:$0xff]  }
 0xc01   : > { %10345 = vmatprep.subr.bf16.mxu1 %v10344_v43  ;;  %10409 = vmatprep.subr.bf16.mxu0 %v10408_v45  ;;  %v5769_v43 = vld [vmem:[%s12364_s18 + $0x5f8] sm:$0xff]  ;;  %v5887_v45 = vld [vmem:[%s12364_s18 + $0x9a8] sm:$0xff]  ;;  %v10362_v50 = vpack.c.bf16 %v5879_v20, %v5872_v8  ;;  %v10472_v20 = vpack.c.bf16 %v5604_v55, %v5597_v18  ;;  %v5874_v55 = vld [vmem:[%s12364_s18 + $0x940] sm:$0xff] }
 0xc02   : > { %6059 = vmatprep.mubr.f32.mxu1 %v15302_v39  ;;  %v10426_v34 = vpack.c.bf16 %v5769_v43, %v5762_v42  ;;  %v5833_v42 = vld [vmem:[%s12364_s18 + $0x7f8] sm:$0xff]  ;;  %v5840_v43 = vld [vmem:[%s12364_s18 + $0x830] sm:$0xff] }
 0xc04   : > { %10347 = vmatpush1.bf16.msra.mxu1 %v10346_v61  ;;  %10411 = vmatpush1.bf16.msra.mxu0 %v10410_v60  ;;  %v5893_v61 = vld [vmem:[%s12364_s18 + $0x9d8] sm:$0xff]  ;;  %v10364_v60 = vpack.c.bf16 %v5894_v62, %v5887_v45  ;;  %v5611_v45 = vld [vmem:[%s12364_s18 + $0x108] sm:$0xff]  ;;  %v5618_v62 = vld [vmem:[%s12364_s18 + $0x140] sm:$0xff] }
 0xc05   : > { %10349 = vmatprep.subr.bf16.mxu1 %v10348_v52  ;;  %10413 = vmatprep.subr.bf16.mxu0 %v10412_v13  ;;  %v5783_v52 = vld [vmem:[%s12364_s18 + $0x668] sm:$0xff]  ;;  %v5901_v13 = vld [vmem:[%s12364_s18 + $0xa18] sm:$0xff]  ;;  %v10366_v31 = vpack.c.bf16 %v5893_v61, %v5886_v37  ;;  %v10444_v37 = vpack.c.bf16 %v5840_v43, %v5833_v42  ;;  %v10476_v61 = vpack.c.bf16 %v5618_v62, %v5611_v45  ;;  %v5674_v42 = vld [vmem:[%s12364_s18 + $0x300] sm:$0xff] }
 0xc06   : > { %v10430_v7 = vpack.c.bf16 %v5783_v52, %v5776_v12  ;;  %v5847_v12 = vld [vmem:[%s12364_s18 + $0x868] sm:$0xff]  ;;  %v5854_v52 = vld [vmem:[%s12364_s18 + $0x8a0] sm:$0xff]  ;;  %v5888_v62 = vld [vmem:[%s12364_s18 + $0x9b0] sm:$0xff] }
 0xc08   : > { %10351 = vmatpush1.bf16.msra.mxu1 %v10350_v49  ;;  %10415 = vmatpush1.bf16.msra.mxu0 %v10414_v28  ;;  %v5907_v49 = vld [vmem:[%s12364_s18 + $0xa48] sm:$0xff]  ;;  %v10368_v28 = vpack.c.bf16 %v5908_v3, %v5901_v13  ;;  %v5625_v13 = vld [vmem:[%s12364_s18 + $0x178] sm:$0xff]  ;;  %v5632_v3 = vld [vmem:[%s12364_s18 + $0x1b0] sm:$0xff] }
 0xc09   : > { %10353 = vmatprep.subr.bf16.mxu1 %v10352_v0  ;;  %10417 = vmatprep.subr.bf16.mxu0 %v10416_v25  ;;  %v5797_v0 = vld [vmem:[%s12364_s18 + $0x6d8] sm:$0xff]  ;;  %v10370_v5 = vpack.c.bf16 %v5907_v49, %v5900_v58  ;;  %v10448_v58 = vpack.c.bf16 %v5854_v52, %v5847_v12  ;;  %v10480_v49 = vpack.c.bf16 %v5632_v3, %v5625_v13  ;;  %v5688_v12 = vld [vmem:[%s12364_s18 + $0x370] sm:$0xff]  ;;  %v5902_v3 = vld [vmem:[%s12364_s18 + $0xa20] sm:$0xff] }
 0xc0a   : > { %v5805_v25 = vld [vmem:[%s12364_s18 + $0x718] sm:$0xff]  ;;  %v10434_v23 = vpack.c.bf16 %v5797_v0, %v5790_v51  ;;  %v5639_v0 = vld [vmem:[%s12364_s18 + $0x1e8] sm:$0xff] }
 0xc0b   : > { %v5861_v51 = vld [vmem:[%s12364_s18 + $0x8d8] sm:$0xff] }
 0xc0c   : > { %10355 = vmatpush1.bf16.msra.mxu1 %v10354_v24  ;;  %10419 = vmatpush1.bf16.msra.mxu0 %v10418_v21  ;;  %v5811_v24 = vld [vmem:[%s12364_s18 + $0x748] sm:$0xff]  ;;  %v10436_v21 = vpack.c.bf16 %v5812_v11, %v5805_v25  ;;  %v5646_v25 = vld [vmem:[%s12364_s18 + $0x220] sm:$0xff] }
 0xc0d   : > { %10357 = vmatprep.subr.bf16.mxu1 %v10356_v38  ;;  %10421 = vmatprep.subr.bf16.mxu0 %v10420_v2  ;;  %v5589_v38 = vld [vmem:[%s12364_s18 + $0x58] sm:$0xff]  ;;  %v5819_v2 = vld [vmem:[%s12364_s18 + $0x788] sm:$0xff]  ;;  %v10438_v30 = vpack.c.bf16 %v5811_v24, %v5804_v36  ;;  %v10484_v36 = vpack.c.bf16 %v5646_v25, %v5639_v0  ;;  %v5638_v24 = vld [vmem:[%s12364_s18 + $0x1e0] sm:$0xff] }
 0xc0e   : > { %v10470_v6 = vpack.c.bf16 %v5589_v38, %v5582_v27  ;;  %v10440_v8 = vpack.c.bf16 %v5826_v10, %v5819_v2  ;;  %v5882_v27 = vld [vmem:[%s12364_s18 + $0x980] sm:$0xff]  ;;  %v5653_v38 = vld [vmem:[%s12364_s18 + $0x258] sm:$0xff]  ;;  %v5660_v2 = vld [vmem:[%s12364_s18 + $0x290] sm:$0xff] }
 0xc0f   : > { %v5694_v25 = vld [vmem:[%s12364_s18 + $0x3a0] sm:$0xff] }
 0xc10   : > { %10359 = vmatpush1.bf16.msra.mxu1 %v10358_v32  ;;  %10423 = vmatpush1.bf16.msra.mxu0 %v10422_v59  ;;  %v5818_v32 = vld [vmem:[%s12364_s18 + $0x780] sm:$0xff]  ;;  %v5825_v59 = vld [vmem:[%s12364_s18 + $0x7b8] sm:$0xff] }
 0xc11   : > { %10361 = vmatprep.subr.bf16.mxu1 %v10360_v57  ;;  %10425 = vmatprep.subr.bf16.mxu0 %v10424_v44  ;;  %v5596_v57 = vld [vmem:[%s12364_s18 + $0x90] sm:$0xff]  ;;  %v5603_v44 = vld [vmem:[%s12364_s18 + $0xc8] sm:$0xff]  ;;  %v10442_v33 = vpack.c.bf16 %v5825_v59, %v5818_v32  ;;  %v10488_v32 = vpack.c.bf16 %v5660_v2, %v5653_v38 }
 0xc12   : > { %v10474_v9 = vpack.c.bf16 %v5603_v44, %v5596_v57  ;;  %v5652_v59 = vld [vmem:[%s12364_s18 + $0x250] sm:$0xff]  ;;  %v5667_v44 = vld [vmem:[%s12364_s18 + $0x2c8] sm:$0xff] }
 0xc13   : > { %v5896_v57 = vld [vmem:[%s12364_s18 + $0x9f0] sm:$0xff] }
 0xc14   : > { %10363 = vmatpush1.bf16.msra.mxu1 %v10362_v50  ;;  %10427 = vmatpush1.bf16.msra.mxu0 %v10426_v34  ;;  %v5832_v50 = vld [vmem:[%s12364_s18 + $0x7f0] sm:$0xff]  ;;  %v5839_v34 = vld [vmem:[%s12364_s18 + $0x828] sm:$0xff] }
 0xc15   : > { %10365 = vmatprep.subr.bf16.mxu1 %v10364_v60  ;;  %10429 = vmatprep.subr.bf16.mxu0 %v10428_v35  ;;  %v5610_v60 = vld [vmem:[%s12364_s18 + $0x100] sm:$0xff]  ;;  %v5617_v35 = vld [vmem:[%s12364_s18 + $0x138] sm:$0xff]  ;;  %v10446_v22 = vpack.c.bf16 %v5839_v34, %v5832_v50  ;;  %v10492_v50 = vpack.c.bf16 %v5674_v42, %v5667_v44  ;;  %v5708_v2 = vld [vmem:[%s12364_s18 + $0x410] sm:$0xff] }
 0xc16   : > { %v10478_v19 = vpack.c.bf16 %v5617_v35, %v5610_v60  ;;  %v5666_v34 = vld [vmem:[%s12364_s18 + $0x2c0] sm:$0xff]  ;;  %v5681_v35 = vld [vmem:[%s12364_s18 + $0x338] sm:$0xff] }
 0xc17   : > { %v5910_v60 = vld [vmem:[%s12364_s18 + $0xa60] sm:$0xff] }
 0xc18   : > { %10367 = vmatpush1.bf16.msra.mxu1 %v10366_v31  ;;  %10431 = vmatpush1.bf16.msra.mxu0 %v10430_v7  ;;  %v5846_v31 = vld [vmem:[%s12364_s18 + $0x860] sm:$0xff]  ;;  %v5853_v7 = vld [vmem:[%s12364_s18 + $0x898] sm:$0xff] }
 0xc19   : > { %10369 = vmatprep.subr.bf16.mxu1 %v10368_v28  ;;  %10433 = vmatprep.subr.bf16.mxu0 %v10432_v29  ;;  %v5624_v28 = vld [vmem:[%s12364_s18 + $0x170] sm:$0xff]  ;;  %v5631_v29 = vld [vmem:[%s12364_s18 + $0x1a8] sm:$0xff]  ;;  %v10450_v11 = vpack.c.bf16 %v5853_v7, %v5846_v31  ;;  %v10496_v31 = vpack.c.bf16 %v5688_v12, %v5681_v35  ;;  %v5722_v42 = vld [vmem:[%s12364_s18 + $0x480] sm:$0xff] }
 0xc1a   : > { %v10482_v41 = vpack.c.bf16 %v5631_v29, %v5624_v28  ;;  %v5680_v7 = vld [vmem:[%s12364_s18 + $0x330] sm:$0xff]  ;;  %v5702_v28 = vld [vmem:[%s12364_s18 + $0x3e0] sm:$0xff] }
 0xc1b   : > { %v5696_v29 = vld [vmem:[%s12364_s18 + $0x3b0] sm:$0xff] }
 0xc1c   : > { %10371 = vmatpush1.bf16.msra.mxu1 %v10370_v5  ;;  %10435 = vmatpush1.bf16.msra.mxu0 %v10434_v23  ;;  %v5867_v5 = vld [vmem:[%s12364_s18 + $0x908] sm:$0xff] }
 0xc1d   : > { %10437 = vmatprep.subr.bf16.mxu0 %v10436_v21  ;;  %10469 = vmatprep.subr.bf16.mxu1 %v10468_v63  ;;  %v5645_v21 = vld [vmem:[%s12364_s18 + $0x218] sm:$0xff]  ;;  %v5875_v63 = vld [vmem:[%s12364_s18 + $0x948] sm:$0xff]  ;;  %v10454_v10 = vpack.c.bf16 %v5867_v5, %v5860_v54  ;;  %v5584_v5 = vld [vmem:[%s12364_s18 + $0x30] sm:$0xff] }
 0xc1e   : > { %v10486_v18 = vpack.c.bf16 %v5645_v21, %v5638_v24  ;;  %v5716_v24 = vld [vmem:[%s12364_s18 + $0x450] sm:$0xff]  ;;  %v5710_v21 = vld [vmem:[%s12364_s18 + $0x420] sm:$0xff] }
 0xc1f   : > { %6060 = vmatmul.mubr.f32.vlgmr.msra.gmra.mrb[42].mxu1 %v14440_v1  ;;  %6131 = vmatmul.mubr.f32.vlgmr.msra.gmra.mrb[36].mxu0 %v14369_v53 }
 0xc20   : > { %10439 = vmatpush1.bf16.msra.mxu0 %v10438_v30  ;;  %10471 = vmatpush1.bf16.msra.mxu1 %v10470_v6  ;;  %v5881_v30 = vld [vmem:[%s12364_s18 + $0x978] sm:$0xff]  ;;  %v10456_v6 = vpack.c.bf16 %v5882_v27, %v5875_v63 }
 0xc21   : > { %10441 = vmatprep.subr.bf16.mxu0 %v10440_v8  ;;  %10473 = vmatprep.subr.bf16.mxu1 %v10472_v20  ;;  %v5659_v8 = vld [vmem:[%s12364_s18 + $0x288] sm:$0xff]  ;;  %v5889_v20 = vld [vmem:[%s12364_s18 + $0x9b8] sm:$0xff]  ;;  %v10458_v43 = vpack.c.bf16 %v5881_v30, %v5874_v55  ;;  %v5598_v30 = vld [vmem:[%s12364_s18 + $0xa0] sm:$0xff] }
 0xc22   : > { %6201 = vmatprep.mubr.f32.mxu0 %v15302_v39  ;;  %6272 = vmatprep.mubr.f32.mxu1 %v14235_v4  ;;  %v5868_v4 = vld [vmem:[%s12364_s18 + $0x910] sm:$0xff]  ;;  %v10490_v45 = vpack.c.bf16 %v5659_v8, %v5652_v59  ;;  %v5717_v63 = vld [vmem:[%s12364_s18 + $0x458] sm:$0xff]  ;;  %v5730_v59 = vld [vmem:[%s12364_s18 + $0x4c0] sm:$0xff] }
 0xc23   : > { %v10452_v23 = vpack.c.bf16 %v5868_v4, %v5861_v51  ;;  %v5703_v51 = vld [vmem:[%s12364_s18 + $0x3e8] sm:$0xff]  ;;  %v10568_v55 = vpack.c.bf16 %v5717_v63, %v5710_v21  ;;  %v5724_v8 = vld [vmem:[%s12364_s18 + $0x490] sm:$0xff] }
 0xc24   : > { %10443 = vmatpush1.bf16.msra.mxu0 %v10442_v33  ;;  %10475 = vmatpush1.bf16.msra.mxu1 %v10474_v9  ;;  %v5895_v33 = vld [vmem:[%s12364_s18 + $0x9e8] sm:$0xff]  ;;  %v10460_v9 = vpack.c.bf16 %v5896_v57, %v5889_v20  ;;  %v10564_v54 = vpack.c.bf16 %v5703_v51, %v5696_v29 }
 0xc25   : > { %10445 = vmatprep.subr.bf16.mxu0 %v10444_v37  ;;  %10477 = vmatprep.subr.bf16.mxu1 %v10476_v61  ;;  %v5673_v37 = vld [vmem:[%s12364_s18 + $0x2f8] sm:$0xff]  ;;  %v5903_v61 = vld [vmem:[%s12364_s18 + $0xa28] sm:$0xff]  ;;  %v10462_v52 = vpack.c.bf16 %v5895_v33, %v5888_v62  ;;  %v5612_v33 = vld [vmem:[%s12364_s18 + $0x110] sm:$0xff] }
 0xc26   : > { %v10494_v13 = vpack.c.bf16 %v5673_v37, %v5666_v34  ;;  %v5731_v20 = vld [vmem:[%s12364_s18 + $0x4c8] sm:$0xff]  ;;  %v5744_v34 = vld [vmem:[%s12364_s18 + $0x530] sm:$0xff]  ;;  %v5738_v37 = vld [vmem:[%s12364_s18 + $0x500] sm:$0xff] }
 0xc27   : > { %v10572_v62 = vpack.c.bf16 %v5731_v20, %v5724_v8 }
 0xc28   : > { %10447 = vmatpush1.bf16.msra.mxu0 %v10446_v22  ;;  %10479 = vmatpush1.bf16.msra.mxu1 %v10478_v19  ;;  %v5909_v22 = vld [vmem:[%s12364_s18 + $0xa58] sm:$0xff]  ;;  %v10464_v19 = vpack.c.bf16 %v5910_v60, %v5903_v61  ;;  %v11315_v60 = vld [vmem:[%s15305_s29 + $0x4] ss:$12 sps:$4 sm:$0xff]  }
 0xc29   : > { %10449 = vmatprep.subr.bf16.mxu0 %v10448_v58  ;;  %10481 = vmatprep.subr.bf16.mxu1 %v10480_v49  ;;  %v5687_v58 = vld [vmem:[%s12364_s18 + $0x368] sm:$0xff]  ;;  %v10466_v4 = vpack.c.bf16 %v5909_v22, %v5902_v3  ;;  %v5745_v61 = vld [vmem:[%s12364_s18 + $0x538] sm:$0xff] }
 0xc2a   : > { %v5695_v49 = vld [vmem:[%s12364_s18 + $0x3a8] sm:$0xff]  ;;  %v10498_v0 = vpack.c.bf16 %v5687_v58, %v5680_v7  ;;  %v10576_v22 = vpack.c.bf16 %v5745_v61, %v5738_v37  ;;  %v5758_v58 = vld [vmem:[%s12364_s18 + $0x5a0] sm:$0xff]  ;;  %v5800_v61 = vld [vmem:[%s12364_s18 + $0x6f0] sm:$0xff] }
 0xc2b   : > { %v5751_v7 = vld [vmem:[%s12364_s18 + $0x568] sm:$0xff] }
 0xc2c   : > { %10451 = vmatpush1.bf16.msra.mxu0 %v10450_v11  ;;  %10483 = vmatpush1.bf16.msra.mxu1 %v10482_v41  ;;  %v5701_v11 = vld [vmem:[%s12364_s18 + $0x3d8] sm:$0xff]  ;;  %v10500_v41 = vpack.c.bf16 %v5702_v28, %v5695_v49  ;;  %v5752_v49 = vld [vmem:[%s12364_s18 + $0x570] sm:$0xff]  ;;  %v5759_v28 = vld [vmem:[%s12364_s18 + $0x5a8] sm:$0xff] }
 0xc2d   : > { %10453 = vmatprep.subr.bf16.mxu0 %v10452_v23  ;;  %10485 = vmatprep.subr.bf16.mxu1 %v10484_v36  ;;  %v5591_v23 = vld [vmem:[%s12364_s18 + $0x68] sm:$0xff]  ;;  %v5709_v36 = vld [vmem:[%s12364_s18 + $0x418] sm:$0xff]  ;;  %v10502_v27 = vpack.c.bf16 %v5701_v11, %v5694_v25  ;;  %v10516_v25 = vpack.c.bf16 %v5758_v58, %v5751_v7  ;;  %v10580_v11 = vpack.c.bf16 %v5759_v28, %v5752_v49  ;;  %v5682_v28 = vld [vmem:[%s12364_s18 + $0x340] sm:$0xff] }
 0xc2e   : > { %v10566_v38 = vpack.c.bf16 %v5591_v23, %v5584_v5  ;;  %v5765_v5 = vld [vmem:[%s12364_s18 + $0x5d8] sm:$0xff]  ;;  %v5772_v23 = vld [vmem:[%s12364_s18 + $0x610] sm:$0xff] }
 0xc30   : > { %10455 = vmatpush1.bf16.msra.mxu0 %v10454_v10  ;;  %10487 = vmatpush1.bf16.msra.mxu1 %v10486_v18  ;;  %v5715_v10 = vld [vmem:[%s12364_s18 + $0x448] sm:$0xff]  ;;  %v10504_v18 = vpack.c.bf16 %v5716_v24, %v5709_v36  ;;  %v5766_v36 = vld [vmem:[%s12364_s18 + $0x5e0] sm:$0xff]  ;;  %v5773_v24 = vld [vmem:[%s12364_s18 + $0x618] sm:$0xff] }
 0xc31   : > { %10457 = vmatprep.subr.bf16.mxu0 %v10456_v6  ;;  %10489 = vmatprep.subr.bf16.mxu1 %v10488_v32  ;;  %v5605_v6 = vld [vmem:[%s12364_s18 + $0xd8] sm:$0xff]  ;;  %v5723_v32 = vld [vmem:[%s12364_s18 + $0x488] sm:$0xff]  ;;  %v10506_v57 = vpack.c.bf16 %v5715_v10, %v5708_v2  ;;  %v10520_v2 = vpack.c.bf16 %v5772_v23, %v5765_v5  ;;  %v10584_v10 = vpack.c.bf16 %v5773_v24, %v5766_v36  ;;  %v5806_v23 = vld [vmem:[%s12364_s18 + $0x720] sm:$0xff] }
 0xc32   : > { %v10570_v44 = vpack.c.bf16 %v5605_v6, %v5598_v30  ;;  %v5779_v30 = vld [vmem:[%s12364_s18 + $0x648] sm:$0xff]  ;;  %v5786_v6 = vld [vmem:[%s12364_s18 + $0x680] sm:$0xff] }
 0xc34   : > { %10459 = vmatpush1.bf16.msra.mxu0 %v10458_v43  ;;  %10491 = vmatpush1.bf16.msra.mxu1 %v10490_v45  ;;  %v5729_v43 = vld [vmem:[%s12364_s18 + $0x4b8] sm:$0xff]  ;;  %v10508_v45 = vpack.c.bf16 %v5730_v59, %v5723_v32  ;;  %v5780_v32 = vld [vmem:[%s12364_s18 + $0x650] sm:$0xff]  ;;  %v5787_v59 = vld [vmem:[%s12364_s18 + $0x688] sm:$0xff] }
 0xc35   : > { %10461 = vmatprep.subr.bf16.mxu0 %v10460_v9  ;;  %10493 = vmatprep.subr.bf16.mxu1 %v10492_v50  ;;  %v5619_v9 = vld [vmem:[%s12364_s18 + $0x148] sm:$0xff]  ;;  %v5737_v50 = vld [vmem:[%s12364_s18 + $0x4f8] sm:$0xff]  ;;  %v10510_v35 = vpack.c.bf16 %v5729_v43, %v5722_v42 }
 0xc36   : > { %v10574_v12 = vpack.c.bf16 %v5619_v9, %v5612_v33  ;;  %v10512_v3 = vpack.c.bf16 %v5744_v34, %v5737_v50  ;;  %v5668_v33 = vld [vmem:[%s12364_s18 + $0x2d0] sm:$0xff]  ;;  %v5675_v9 = vld [vmem:[%s12364_s18 + $0x308] sm:$0xff]  ;;  %v5793_v50 = vld [vmem:[%s12364_s18 + $0x6b8] sm:$0xff] }
 0xc37   : > { %v10528_v58 = vpack.c.bf16 %v5800_v61, %v5793_v50  ;;  %v5834_v50 = vld [vmem:[%s12364_s18 + $0x800] sm:$0xff] }
 0xc38   : > { %10463 = vmatpush1.bf16.msra.mxu0 %v10462_v52  ;;  %10495 = vmatpush1.bf16.msra.mxu1 %v10494_v13  ;;  %v5736_v52 = vld [vmem:[%s12364_s18 + $0x4f0] sm:$0xff]  ;;  %v5743_v13 = vld [vmem:[%s12364_s18 + $0x528] sm:$0xff] }
 0xc39   : > { %10465 = vmatprep.subr.bf16.mxu0 %v10464_v19  ;;  %10497 = vmatprep.subr.bf16.mxu1 %v10496_v31  ;;  %v5626_v19 = vld [vmem:[%s12364_s18 + $0x180] sm:$0xff]  ;;  %v5633_v31 = vld [vmem:[%s12364_s18 + $0x1b8] sm:$0xff]  ;;  %v10514_v29 = vpack.c.bf16 %v5743_v13, %v5736_v52  ;;  %v10590_v13 = vpack.c.bf16 %v5675_v9, %v5668_v33 }
 0xc3a   : > { %v10578_v51 = vpack.c.bf16 %v5633_v31, %v5626_v19 }
 0xc3c   : > { %10467 = vmatpush1.bf16.msra.mxu0 %v10466_v4  ;;  %10499 = vmatpush1.bf16.msra.mxu1 %v10498_v0  ;;  %v5750_v4 = vld [vmem:[%s12364_s18 + $0x560] sm:$0xff]  ;;  %v5757_v0 = vld [vmem:[%s12364_s18 + $0x598] sm:$0xff] }
 0xc3d   : > { %10501 = vmatprep.subr.bf16.mxu1 %v10500_v41  ;;  %10565 = vmatprep.subr.bf16.mxu0 %v10564_v54  ;;  %v5640_v41 = vld [vmem:[%s12364_s18 + $0x1f0] sm:$0xff]  ;;  %v5647_v54 = vld [vmem:[%s12364_s18 + $0x228] sm:$0xff]  ;;  %v10518_v21 = vpack.c.bf16 %v5757_v0, %v5750_v4 }
 0xc3e   : > { %v10582_v63 = vpack.c.bf16 %v5647_v54, %v5640_v41  ;;  %v5807_v0 = vld [vmem:[%s12364_s18 + $0x728] sm:$0xff] }
 0xc3f   : > { %6202 = vmatmul.mubr.f32.vlgmr.msra.gmra.mrb[36].mxu0 %v14440_v1 }
 0xc40   : > { %10503 = vmatpush1.bf16.msra.mxu1 %v10502_v27  ;;  %10567 = vmatpush3.bf16.msra.mxu0 %v10566_v38  ;;  %v5764_v27 = vld [vmem:[%s12364_s18 + $0x5d0] sm:$0xff]  ;;  %v5771_v38 = vld [vmem:[%s12364_s18 + $0x608] sm:$0xff] }
 0xc41   : > { %10505 = vmatprep.subr.bf16.mxu1 %v10504_v18  ;;  %10569 = vmatprep.subr.bf16.mxu0 %v10568_v55  ;;  %v5654_v18 = vld [vmem:[%s12364_s18 + $0x260] sm:$0xff]  ;;  %v5661_v55 = vld [vmem:[%s12364_s18 + $0x298] sm:$0xff]  ;;  %v10522_v8 = vpack.c.bf16 %v5771_v38, %v5764_v27  ;;  %v5808_v27 = vld [vmem:[%s12364_s18 + $0x730] sm:$0xff] }
 0xc42   : > { %6414 = vmatprep.mubr.f32.mxu0 %v11315_v60  ;;  %v10586_v20 = vpack.c.bf16 %v5661_v55, %v5654_v18  ;;  %v5794_v60 = vld [vmem:[%s12364_s18 + $0x6c0] sm:$0xff]  ;;  %v5815_v38 = vld [vmem:[%s12364_s18 + $0x768] sm:$0xff] }
 0xc44   : > { %10507 = vmatpush1.bf16.msra.mxu1 %v10506_v57  ;;  %10571 = vmatpush3.bf16.msra.mxu0 %v10570_v44  ;;  %v5778_v57 = vld [vmem:[%s12364_s18 + $0x640] sm:$0xff]  ;;  %v5785_v44 = vld [vmem:[%s12364_s18 + $0x678] sm:$0xff] }
 0xc45   : > { %10509 = vmatprep.subr.bf16.mxu1 %v10508_v45  ;;  %10573 = vmatprep.subr.bf16.mxu0 %v10572_v62  ;;  %v10524_v45 = vpack.c.bf16 %v5786_v6, %v5779_v30  ;;  %v10588_v62 = vpack.c.bf16 %v5787_v59, %v5780_v32  ;;  %v10526_v52 = vpack.c.bf16 %v5785_v44, %v5778_v57  ;;  %v5820_v6 = vld [vmem:[%s12364_s18 + $0x790] sm:$0xff]  ;;  %v11788_v59 = vmov 0.0|0.0   ;;  %v5822_v57 = vld [vmem:[%s12364_s18 + $0x7a0] sm:$0xff]  ;;  %v5829_v44 = vld [vmem:[%s12364_s18 + $0x7d8] sm:$0xff] }
 0xc46   : > { %v10597_v30 = vpack.c.bf16 %v5815_v38, %v5808_v27  ;;  %v10600_v9 = vpack.c.bf16 %v5829_v44, %v5822_v57  ;;  %v5862_v38 = vld [vmem:[%s12364_s18 + $0x8e0] sm:$0xff]  ;;  %v5877_v57 = vld [vmem:[%s12364_s18 + $0x958] sm:$0xff]  ;;  %v5884_v44 = vld [vmem:[%s12364_s18 + $0x990] sm:$0xff] }
 0xc48   : > { %10511 = vmatpush1.bf16.msra.mxu1 %v10510_v35  ;;  %10575 = vmatpush3.bf16.msra.mxu0 %v10574_v12  ;;  %v5801_v35 = vld [vmem:[%s12364_s18 + $0x6f8] sm:$0xff] }
 0xc49   : > { %10513 = vmatprep.subr.bf16.mxu1 %v10512_v3  ;;  %10577 = vmatprep.subr.bf16.mxu0 %v10576_v22  ;;  %v5792_v3 = vld [vmem:[%s12364_s18 + $0x6b0] sm:$0xff]  ;;  %v5799_v22 = vld [vmem:[%s12364_s18 + $0x6e8] sm:$0xff]  ;;  %v10592_v49 = vpack.c.bf16 %v5801_v35, %v5794_v60  ;;  %v5841_v35 = vld [vmem:[%s12364_s18 + $0x838] sm:$0xff] }
 0xc4a   : > { %v10530_v54 = vpack.c.bf16 %v5799_v22, %v5792_v3  ;;  %v5849_v3 = vld [vmem:[%s12364_s18 + $0x878] sm:$0xff]  ;;  %v5856_v22 = vld [vmem:[%s12364_s18 + $0x8b0] sm:$0xff] }
 0xc4c   : > { %10515 = vmatpush1.bf16.msra.mxu1 %v10514_v29  ;;  %10579 = vmatpush3.bf16.msra.mxu0 %v10578_v51  ;;  %v5689_v29 = vld [vmem:[%s12364_s18 + $0x378] sm:$0xff] }
 0xc4d   : > { %10517 = vmatprep.subr.bf16.mxu1 %v10516_v25  ;;  %10581 = vmatprep.subr.bf16.mxu0 %v10580_v11  ;;  %v5814_v25 = vld [vmem:[%s12364_s18 + $0x760] sm:$0xff]  ;;  %v10594_v5 = vpack.c.bf16 %v5689_v29, %v5682_v28 }
 0xc50   : > { %10519 = vmatpush1.bf16.msra.mxu1 %v10518_v21  ;;  %10583 = vmatpush3.bf16.msra.mxu0 %v10582_v63  ;;  %v10532_v21 = vpack.c.bf16 %v5814_v25, %v5807_v0  ;;  %v5813_v63 = vld [vmem:[%s12364_s18 + $0x758] sm:$0xff]  ;;  %v10544_v25 = vpack.c.bf16 %v5856_v22, %v5849_v3  ;;  %v5891_v22 = vld [vmem:[%s12364_s18 + $0x9c8] sm:$0xff] }
 0xc51   : > { %v14556_v42 = vpop.f32.mrb[28].mxu0  ;;  %v14558_v43 = vpop.f32.mrb[32].mxu1  ;;  %10521 = vmatprep.subr.bf16.mxu1 %v10520_v2  ;;  %10585 = vmatprep.subr.bf16.mxu0 %v10584_v10  ;;  %v5821_v2 = vld [vmem:[%s12364_s18 + $0x798] sm:$0xff]  ;;  %v5828_v10 = vld [vmem:[%s12364_s18 + $0x7d0] sm:$0xff]  ;;  %v10534_v55 = vpack.c.bf16 %v5813_v63, %v5806_v23 }
 0xc52   : > { %v14563_v34 = vpop.f32.mrb[29].mxu0  ;;  %v14565_v37 = vpop.f32.mrb[33].mxu1 }
 0xc53   : > { %v14571_v12 = vmul.f32 0.70710677, %v14565_v37 }
 0xc54   : > { %10523 = vmatpush1.bf16.msra.mxu1 %v10522_v8  ;;  %10587 = vmatpush3.bf16.msra.mxu0 %v10586_v20  ;;  %v10536_v8 = vpack.c.bf16 %v5828_v10, %v5821_v2  ;;  %v5827_v20 = vld [vmem:[%s12364_s18 + $0x7c8] sm:$0xff] }
 0xc55   : > { %v14576_v19 = vand.u32 2147483647, %v14571_v12  ;;  %v14578_v31 = vpop.f32.mrb[30].mxu0  ;;  %v14580_v7 = vpop.f32.mrb[34].mxu1  ;;  %10525 = vmatprep.subr.bf16.mxu1 %v10524_v45  ;;  %10589 = vmatprep.subr.bf16.mxu0 %v10588_v62  ;;  %v5835_v45 = vld [vmem:[%s12364_s18 + $0x808] sm:$0xff]  ;;  %v5842_v62 = vld [vmem:[%s12364_s18 + $0x840] sm:$0xff]  ;;  %v10538_v33 = vpack.c.bf16 %v5827_v20, %v5820_v6 }
 0xc56   : > { %v14584_v51 = vpop.f32.mrb[31].mxu0  ;;  %v14586_v4 = vpop.f32.mrb[35].mxu1  ;;  %v10540_v60 = vpack.c.bf16 %v5842_v62, %v5835_v45  ;;  %v5864_v6 = vld [vmem:[%s12364_s18 + $0x8f0] sm:$0xff]  ;;  %vm5418_vm15 = vcmp.ge.f32.partialorder %v14571_v12, 0.0  ;;  %v5406_v12 = vmul.f32 0.5, %v14565_v37 }
 0xc57   : > { %v5436_v11 = vmul.f32 0.3275911, %v14576_v19  ;;  %v14592_v41 = vmul.f32 0.70710677, %v14586_v4  ;;  %v5514_v61 = vsub.f32 0.0, %v14576_v19  ;;  %v5409_v37 = vmul.f32 0.5, %v14586_v4 }
 0xc58   : > { %10527 = vmatpush1.bf16.msra.mxu1 %v10526_v52  ;;  %10591 = vmatpush3.bf16.msra.mxu0 %v10590_v13  ;;  %v5836_v52 = vld [vmem:[%s12364_s18 + $0x810] sm:$0xff]  ;;  %v5843_v13 = vld [vmem:[%s12364_s18 + $0x848] sm:$0xff] }
 0xc59   : > { %v5442_v36 = vadd.f32 1.0, %v5436_v11  ;;  %v14596_v24 = vand.u32 2147483647, %v14592_v41  ;;  %10529 = vmatprep.subr.bf16.mxu1 %v10528_v58  ;;  %10593 = vmatprep.subr.bf16.mxu0 %v10592_v49  ;;  %v10603_v58 = vpack.c.bf16 %v5843_v13, %v5836_v52  ;;  %v5848_v49 = vld [vmem:[%s12364_s18 + $0x870] sm:$0xff]  ;;  %v5520_v29 = vmul.f32 %v5514_v61, %v14576_v19  ;;  %v5855_v11 = vld [vmem:[%s12364_s18 + $0x8a8] sm:$0xff]  ;;  %v5885_v52 = vld [vmem:[%s12364_s18 + $0x998] sm:$0xff] }
 0xc5a   : > { %v10546_v19 = vpack.c.bf16 %v5855_v11, %v5848_v49  ;;  %v10552_v61 = vpack.c.bf16 %v5884_v44, %v5877_v57  ;;  %v5897_v11 = vld [vmem:[%s12364_s18 + $0x9f8] sm:$0xff]  ;;  %vm5421_vm1 = vcmp.ge.f32.partialorder %v14592_v41, 0.0 }
 0xc5b   : > { %11265 = vrcp.f32 %v5442_v36  ;;  %v5439_v18 = vmul.f32 0.3275911, %v14596_v24  ;;  %v5517_v0 = vsub.f32 0.0, %v14596_v24  ;;  %v5863_v36 = vld [vmem:[%s12364_s18 + $0x8e8] sm:$0xff]  ;;  %v5526_v10 = vmul.f32 1.442695, %v5520_v29 }
 0xc5c   : > { %10531 = vmatpush1.bf16.msra.mxu1 %v10530_v54  ;;  %10595 = vmatpush3.bf16.msra.mxu0 %v10594_v5  ;;  %v5850_v54 = vld [vmem:[%s12364_s18 + $0x880] sm:$0xff]  ;;  %v5857_v5 = vld [vmem:[%s12364_s18 + $0x8b8] sm:$0xff] }
 0xc5d   : > { %v5445_v32 = vadd.f32 1.0, %v5439_v18  ;;  %10533 = vmatprep.subr.bf16.mxu1 %v10532_v21  ;;  %10596 = vmatprep.subr.bf16.mxu0 %v11788_v59  ;;  %v5870_v21 = vld [vmem:[%s12364_s18 + $0x920] sm:$0xff]  ;;  %v10606_v27 = vpack.c.bf16 %v5857_v5, %v5850_v54  ;;  %v5523_v18 = vmul.f32 %v5517_v0, %v14596_v24  ;;  %v5892_v5 = vld [vmem:[%s12364_s18 + $0x9d0] sm:$0xff]  ;;  %v5913_v57 = vld [vmem:[%s12364_s18 + $0xa78] sm:$0xff] }
 0xc5f   : > { %11267 = vrcp.f32 %v5445_v32  ;;  %6273 = vmatmul.mubr.f32.vlgmr.msra.gmra.mrb[44].mxu1 %v14369_v53  ;;  %6415 = vmatmul.mubr.f32.vlgmr.msra.gmra.mrb[38].mxu0 %v14369_v53  ;;  %v10542_v53 = vpack.c.bf16 %v5841_v35, %v5834_v50  ;;  %v5871_v32 = vld [vmem:[%s12364_s18 + $0x928] sm:$0xff]  ;;  %v5532_v50 = vmul.f32 1.442695, %v5523_v18  ;;  %v5878_v35 = vld [vmem:[%s12364_s18 + $0x960] sm:$0xff]  ;;  %v5904_v18 = vld [vmem:[%s12364_s18 + $0xa30] sm:$0xff] }
 0xc60   : > { %10535 = vmatpush1.bf16.msra.mxu1 %v10534_v55  ;;  %10598 = vmatpush3.bf16.msra.mxu0 %v10597_v30  ;;  %v10548_v55 = vpack.c.bf16 %v5870_v21, %v5863_v36  ;;  %v5869_v30 = vld [vmem:[%s12364_s18 + $0x918] sm:$0xff]  ;;  %11269 = vpow2.f32 %v5526_v10  ;;  %v10612_v0 = vpack.c.bf16 %v5885_v52, %v5878_v35 }
 0xc61   : > { %10537 = vmatprep.subr.bf16.mxu1 %v10536_v8  ;;  %10599 = vmatprep.subr.bf16.mxu0 %v11788_v59  ;;  %v10550_v24 = vpack.c.bf16 %v5869_v30, %v5862_v38  ;;  %11271 = vpow2.f32 %v5532_v50 }
 0xc62   : > { %6343 = vmatprep.mubr.f32.mxu1 %v15302_v39  ;;  %8906 = vmatprep.mubr.msk.f32.mxu0 %vm11785_vm0, %v15302_v39 }
 0xc64   : > { %10539 = vmatpush1.bf16.msra.mxu1 %v10538_v33  ;;  %10601 = vmatpush3.bf16.msra.mxu0 %v10600_v9  ;;  %v10609_v33 = vpack.c.bf16 %v5871_v32, %v5864_v6  ;;  %v5876_v9 = vld [vmem:[%s12364_s18 + $0x950] sm:$0xff] }
 0xc65   : > { %v14625_v28 = vpop.eup %11265  ;;  %10541 = vmatprep.subr.bf16.mxu1 %v10540_v60  ;;  %10602 = vmatprep.subr.bf16.mxu0 %v11788_v59  ;;  %v5883_v60 = vld [vmem:[%s12364_s18 + $0x988] sm:$0xff] }
 0xc66   : > { %v5460_v23 = vmul.f32 1.0614054, %v14625_v28  ;;  %v10554_v29 = vpack.c.bf16 %v5883_v60, %v5876_v9 }
 0xc68   : > { %v5466_v63 = vadd.f32 -1.4531521, %v5460_v23  ;;  %10543 = vmatpush1.bf16.msra.mxu1 %v10542_v53  ;;  %10604 = vmatpush3.bf16.msra.mxu0 %v10603_v58  ;;  %v5898_v53 = vld [vmem:[%s12364_s18 + $0xa00] sm:$0xff]  ;;  %v5899_v23 = vld [vmem:[%s12364_s18 + $0xa08] sm:$0xff] }
 0xc69   : > { %v14637_v2 = vpop.eup %11267  ;;  %10545 = vmatprep.subr.bf16.mxu1 %v10544_v25  ;;  %10605 = vmatprep.subr.bf16.mxu0 %v11788_v59  ;;  %v5890_v25 = vld [vmem:[%s12364_s18 + $0x9c0] sm:$0xff]  ;;  %v10556_v54 = vpack.c.bf16 %v5898_v53, %v5891_v22  ;;  %v5424_v22 = vsel %vm5418_vm15, 1.0, %v15301_v17 }
 0xc6a   : > { %v5472_v8 = vmul.f32 %v14625_v28, %v5466_v63  ;;  %v5463_v20 = vmul.f32 1.0614054, %v14637_v2  ;;  %v10558_v10 = vpack.c.bf16 %v5897_v11, %v5890_v25 }
 0xc6c   : > { %v5478_v45 = vadd.f32 1.4214138, %v5472_v8  ;;  %v5469_v62 = vadd.f32 -1.4531521, %v5463_v20  ;;  %10547 = vmatpush1.bf16.msra.mxu1 %v10546_v19  ;;  %10607 = vmatpush3.bf16.msra.mxu0 %v10606_v27  ;;  %v5905_v19 = vld [vmem:[%s12364_s18 + $0xa38] sm:$0xff]  ;;  %v5912_v27 = vld [vmem:[%s12364_s18 + $0xa70] sm:$0xff]  ;;  %v10615_v8 = vpack.c.bf16 %v5899_v23, %v5892_v5 }
 0xc6d   : > { %10549 = vmatprep.subr.bf16.mxu1 %v10548_v55  ;;  %10608 = vmatprep.subr.bf16.mxu0 %v11788_v59  ;;  %v5911_v55 = vld [vmem:[%s12364_s18 + $0xa68] sm:$0xff]  ;;  %v5906_v20 = vld [vmem:[%s12364_s18 + $0xa40] sm:$0xff]  ;;  %v10560_v44 = vpack.c.bf16 %v5912_v27, %v5905_v19  ;;  %s15306_s18 = sld [smem:[#allocation34_spill]] }
 0xc6e   : > { %v5484_v13 = vmul.f32 %v14625_v28, %v5478_v45  ;;  %v5475_v3 = vmul.f32 %v14637_v2, %v5469_v62  ;;  %v10562_v50 = vpack.c.bf16 %v5911_v55, %v5904_v18 }
 0xc70   : > { %v5490_v58 = vadd.f32 -0.28449672, %v5484_v13  ;;  %v5481_v49 = vadd.f32 1.4214138, %v5475_v3  ;;  %10551 = vmatpush1.bf16.msra.mxu1 %v10550_v24  ;;  %10610 = vmatpush3.bf16.msra.mxu0 %v10609_v33  ;;  %v11270_v33 = vpop.eup %11269 }
 0xc71   : > { %10553 = vmatprep.subr.bf16.mxu1 %v10552_v61  ;;  %10611 = vmatprep.subr.bf16.mxu0 %v11788_v59  ;;  %v10618_v61 = vpack.c.bf16 %v5913_v57, %v5906_v20  ;;  %v11272_v3 = vpop.eup %11271 }
 0xc72   : > { %v5496_v36 = vmul.f32 %v14625_v28, %v5490_v58  ;;  %v5487_v21 = vmul.f32 %v14637_v2, %v5481_v49  ;;  %v8565_v63 = vpop.f32.mrb[36].mxu1 }
 0xc73   : > { %v8566_v38 = vpop.f32.mrb[37].mxu1  ;;  %p8406_p4 = scmp.ne.s32.totalorder %s15306_s18, 7 }
 0xc74   : > { %v5502_v30 = vadd.f32 0.2548296, %v5496_v36  ;;  %v5493_v6 = vadd.f32 -0.28449672, %v5487_v21  ;;  %v8567_v32 = vadd.f32 %v8566_v38, %v8565_v63  ;;  %10555 = vmatpush1.bf16.msra.mxu1 %v10554_v29  ;;  %10613 = vmatpush3.bf16.msra.mxu0 %v10612_v0  ;;  %v5427_v29 = vsel %vm5421_vm1, 1.0, %v15301_v17 }
 0xc75   : > { %10557 = vmatprep.subr.bf16.mxu1 %v10556_v54  ;;  %10614 = vmatprep.subr.bf16.mxu0 %v11788_v59 }
 0xc76   : > { %v5508_v45 = vmul.f32 %v14625_v28, %v5502_v30  ;;  %v5499_v62 = vmul.f32 %v14637_v2, %v5493_v6  ;;  %v8568_v24 = vpop.f32.mrb[38].mxu1 }
 0xc77   : > { %v8569_v9 = vpop.f32.mrb[39].mxu1 }
 0xc78   : > { %v5538_v60 = vmul.f32 %v11270_v33, %v5508_v45  ;;  %v5505_v35 = vadd.f32 0.2548296, %v5499_v62  ;;  %v8570_v52 = vadd.f32 %v8569_v9, %v8568_v24  ;;  %10559 = vmatpush1.bf16.msra.mxu1 %v10558_v10  ;;  %10616 = vmatpush3.bf16.msra.mxu0 %v10615_v8 }
 0xc79   : > { %10561 = vmatprep.subr.bf16.mxu1 %v10560_v44  ;;  %10617 = vmatprep.subr.bf16.mxu0 %v11788_v59 }
 0xc7a   : > { %v5544_v13 = vsub.f32 1.0, %v5538_v60  ;;  %v5511_v28 = vmul.f32 %v14637_v2, %v5505_v35 }
 0xc7c   : > { %v5550_v53 = vmul.f32 %v5544_v13, %v5424_v22  ;;  %v5541_v58 = vmul.f32 %v11272_v3, %v5511_v28  ;;  %10563 = vmatpush1.bf16.msra.mxu1 %v10562_v50  ;;  %10619 = vmatpush3.bf16.msra.mxu0 %v10618_v61 }
 0xc7d   : > { %8909 = vmatprep.subr.mxu1 %v15302_v39  ;;  %8919 = vmatprep.subr.mxu0 %v15302_v39 }
 0xc7e   : > { %v5556_v49 = vadd.f32 1.0, %v5550_v53  ;;  %v5547_v59 = vsub.f32 1.0, %v5541_v58 }
 0xc7f   : > { %6344 = vmatmul.mubr.f32.vlgmr.msra.gmra.mrb[44].mxu1 %v14440_v1  ;;  %8907 = vmatmul.mubr.f32.vlgmr.msra.gmra.mrb[40].mxu0 %v14440_v1 }
 0xc80   : > { %v5562_v2 = vmul.f32 %v5556_v49, %v5406_v12  ;;  %v5553_v0 = vmul.f32 %v5547_v59, %v5427_v29  ;;  %8911 = vmatprep.mubr.msk.f32.mxu1 %vm11785_vm0, %v15302_v39  ;;  %8921 = vmatprep.mubr.msk.f32.mxu0 %vm11785_vm0, %v15302_v39 }
 0xc82   : > { %v14689_v41 = vmul.f32 %v5562_v2, %v14556_v42  ;;  %v5559_v25 = vadd.f32 1.0, %v5553_v0 }
 0xc84   : > { %v5565_v11 = vmul.f32 %v5559_v25, %v5409_v37 }
 0xc86   : > { %v14693_v54 = vmul.f32 %v5565_v11, %v14578_v31 }
 0xc92   : > { %v8873_v5 = vpop.f32.mrb[40].mxu1 }
 0xc93   : > { %v14695_v1 = vadd.f32 %v8873_v5, %v8570_v52  ;;  %v5397_v23 = vpop.f32.mrb[41].mxu1 }
 0xc94   : > { %v14697_v36 = vadd.f32 %v8567_v32, %v5397_v23 }
 0xcb2   : > { %v14699_v21 = vpop.f32.mrb[32].mxu0 }
 0xcb3   : > { %v14702_v63 = vmul.f32 0.70710677, %v14699_v21  ;;  %v14704_v42 = vpop.f32.mrb[33].mxu0 }
 0xcb4   : > { %v14707_v4 = vmul.f32 0.70710677, %v14704_v42 }
 0xcb5   : > { %v5431_v19 = vand.u32 2147483647, %v14702_v63  ;;  %vm5419_vm2 = vcmp.ge.f32.partialorder %v14702_v63, 0.0 }
 0xcb6   : > { %v5432_v31 = vand.u32 2147483647, %v14707_v4  ;;  %v14711_v27 = vpop.f32.mrb[34].mxu0  ;;  %vm5420_vm3 = vcmp.ge.f32.partialorder %v14707_v4, 0.0 }
 0xcb7   : > { %v5437_v38 = vmul.f32 0.3275911, %v5431_v19  ;;  %v14713_v10 = vpop.f32.mrb[35].mxu0  ;;  %v14716_v55 = vmul.f32 0.70710677, %v14711_v27  ;;  %v5515_v62 = vsub.f32 0.0, %v5431_v19 }
 0xcb8   : > { %v5438_v18 = vmul.f32 0.3275911, %v5432_v31  ;;  %v14719_v6 = vmul.f32 0.70710677, %v14713_v10  ;;  %v5516_v33 = vsub.f32 0.0, %v5432_v31 }
 0xcb9   : > { %v5443_v30 = vadd.f32 1.0, %v5437_v38  ;;  %v5434_v8 = vand.u32 2147483647, %v14716_v55  ;;  %v5521_v50 = vmul.f32 %v5515_v62, %v5431_v19  ;;  %vm5422_vm4 = vcmp.ge.f32.partialorder %v14716_v55, 0.0 }
 0xcba   : > { %v5444_v32 = vadd.f32 1.0, %v5438_v18  ;;  %v5435_v57 = vand.u32 2147483647, %v14719_v6  ;;  %v5522_v35 = vmul.f32 %v5516_v33, %v5432_v31  ;;  %vm5423_vm5 = vcmp.ge.f32.partialorder %v14719_v6, 0.0 }
 0xcbb   : > { %11273 = vrcp.f32 %v5443_v30  ;;  %v5440_v20 = vmul.f32 0.3275911, %v5434_v8  ;;  %v5518_v52 = vsub.f32 0.0, %v5434_v8  ;;  %v5528_v3 = vmul.f32 1.442695, %v5521_v50 }
 0xcbc   : > { %11275 = vrcp.f32 %v5444_v32  ;;  %v5441_v45 = vmul.f32 0.3275911, %v5435_v57  ;;  %v5519_v53 = vsub.f32 0.0, %v5435_v57  ;;  %v5530_v49 = vmul.f32 1.442695, %v5522_v35 }
 0xcbd   : > { %v5446_v44 = vadd.f32 1.0, %v5440_v20  ;;  %v5524_v59 = vmul.f32 %v5518_v52, %v5434_v8 }
 0xcbe   : > { %v5447_v24 = vadd.f32 1.0, %v5441_v45  ;;  %v5525_v5 = vmul.f32 %v5519_v53, %v5435_v57 }
 0xcbf   : > { %11277 = vrcp.f32 %v5446_v44  ;;  %v5534_v19 = vmul.f32 1.442695, %v5524_v59 }
 0xcc0   : > { %11279 = vrcp.f32 %v5447_v24  ;;  %v5536_v45 = vmul.f32 1.442695, %v5525_v5 }
 0xcc1   : > { %11281 = vpow2.f32 %v5528_v3 }
 0xcc2   : > { %11283 = vpow2.f32 %v5530_v49 }
 0xcc3   : > { %11285 = vpow2.f32 %v5534_v19 }
 0xcc4   : > { %11287 = vpow2.f32 %v5536_v45 }
 0xcc5   : > { %v11274_v9 = vpop.eup %11273 }
 0xcc6   : > { %v11276_v61 = vpop.eup %11275  ;;  %v5461_v60 = vmul.f32 1.0614054, %v11274_v9 }
 0xcc7   : > { %v5462_v13 = vmul.f32 1.0614054, %v11276_v61 }
 0xcc8   : > { %v5467_v28 = vadd.f32 -1.4531521, %v5461_v60 }
 0xcc9   : > { %v5468_v22 = vadd.f32 -1.4531521, %v5462_v13  ;;  %v11278_v58 = vpop.eup %11277 }
 0xcca   : > { %v5473_v12 = vmul.f32 %v11274_v9, %v5467_v28  ;;  %v5464_v2 = vmul.f32 1.0614054, %v11278_v58  ;;  %v11280_v37 = vpop.eup %11279 }
 0xccb   : > { %v5474_v29 = vmul.f32 %v11276_v61, %v5468_v22  ;;  %v5465_v31 = vmul.f32 1.0614054, %v11280_v37  ;;  %v11282_v28 = vpop.eup %11281 }
 0xccc   : > { %v5479_v0 = vadd.f32 1.4214138, %v5473_v12  ;;  %v5470_v11 = vadd.f32 -1.4531521, %v5464_v2  ;;  %v11284_v53 = vpop.eup %11283 }
 0xccd   : > { %v5480_v25 = vadd.f32 1.4214138, %v5474_v29  ;;  %v5471_v32 = vadd.f32 -1.4531521, %v5465_v31 }
 0xcce   : > { %v5485_v23 = vmul.f32 %v11274_v9, %v5479_v0  ;;  %v5476_v18 = vmul.f32 %v11278_v58, %v5470_v11 }
 0xccf   : > { %v5486_v38 = vmul.f32 %v11276_v61, %v5480_v25  ;;  %v5477_v62 = vmul.f32 %v11280_v37, %v5471_v32  ;;  %v5425_v25 = vsel %vm5419_vm2, 1.0, %v15301_v17  ;;  %v5408_v32 = vmul.f32 0.5, %v14704_v42 }
 0xcd0   : > { %v5491_v30 = vadd.f32 -0.28449672, %v5485_v23  ;;  %v5482_v44 = vadd.f32 1.4214138, %v5476_v18 }
 0xcd1   : > { %v5492_v20 = vadd.f32 -0.28449672, %v5486_v38  ;;  %v5483_v60 = vadd.f32 1.4214138, %v5477_v62  ;;  %v5407_v38 = vmul.f32 0.5, %v14699_v21 }
 0xcd2   : > { %v5497_v8 = vmul.f32 %v11274_v9, %v5491_v30  ;;  %v5488_v33 = vmul.f32 %v11278_v58, %v5482_v44 }
 0xcd3   : > { %v5498_v24 = vmul.f32 %v11276_v61, %v5492_v20  ;;  %v5489_v13 = vmul.f32 %v11280_v37, %v5483_v60 }
 0xcd4   : > { %v5503_v50 = vadd.f32 0.2548296, %v5497_v8  ;;  %v5494_v57 = vadd.f32 -0.28449672, %v5488_v33 }
 0xcd5   : > { %v5504_v35 = vadd.f32 0.2548296, %v5498_v24  ;;  %v5495_v49 = vadd.f32 -0.28449672, %v5489_v13 }
 0xcd6   : > { %v5509_v52 = vmul.f32 %v11274_v9, %v5503_v50  ;;  %v5500_v22 = vmul.f32 %v11278_v58, %v5494_v57  ;;  %v11286_v9 = vpop.eup %11285  ;;  %v5429_v50 = vsel %vm5423_vm5, 1.0, %v15301_v17  ;;  %v5411_v57 = vmul.f32 0.5, %v14713_v10 }
 0xcd7   : > { %v5510_v3 = vmul.f32 %v11276_v61, %v5504_v35  ;;  %v5501_v0 = vmul.f32 %v11280_v37, %v5495_v49  ;;  %v5426_v61 = vsel %vm5420_vm3, 1.0, %v15301_v17  ;;  %v11288_v30 = vpop.eup %11287 }
 0xcd8   : > { %v5539_v12 = vmul.f32 %v11282_v28, %v5509_v52  ;;  %v5506_v29 = vadd.f32 0.2548296, %v5500_v22 }
 0xcd9   : > { %v5540_v59 = vmul.f32 %v11284_v53, %v5510_v3  ;;  %v5507_v19 = vadd.f32 0.2548296, %v5501_v0 }
 0xcda   : > { %v5545_v2 = vsub.f32 1.0, %v5539_v12  ;;  %v5512_v5 = vmul.f32 %v11278_v58, %v5506_v29  ;;  %v5428_v58 = vsel %vm5422_vm4, 1.0, %v15301_v17 }
 0xcdb   : > { %v5546_v11 = vsub.f32 1.0, %v5540_v59  ;;  %v5513_v18 = vmul.f32 %v11280_v37, %v5507_v19  ;;  %v5410_v37 = vmul.f32 0.5, %v14711_v27 }
 0xcdc   : > { %v5551_v23 = vmul.f32 %v5545_v2, %v5425_v25  ;;  %v5542_v63 = vmul.f32 %v11286_v9, %v5512_v5 }
 0xcdd   : > { %v5552_v31 = vmul.f32 %v5546_v11, %v5426_v61  ;;  %v5543_v8 = vmul.f32 %v11288_v30, %v5513_v18 }
 0xcde   : > { %v5557_v4 = vadd.f32 1.0, %v5551_v23  ;;  %v5548_v44 = vsub.f32 1.0, %v5542_v63 }
 0xcdf   : > { %v5558_v20 = vadd.f32 1.0, %v5552_v31  ;;  %v5549_v33 = vsub.f32 1.0, %v5543_v8 }
 0xce0   : > { %v5563_v45 = vmul.f32 %v5557_v4, %v5407_v38  ;;  %v5554_v24 = vmul.f32 %v5548_v44, %v5428_v58 }
 0xce1   : > { %v5564_v62 = vmul.f32 %v5558_v20, %v5408_v32  ;;  %v5555_v60 = vmul.f32 %v5549_v33, %v5429_v50 }
 0xce2   : > { %v14733_v55 = vmul.f32 %v5563_v45, %v14563_v34  ;;  %v5560_v42 = vadd.f32 1.0, %v5554_v24 }
 0xce3   : > { %v14736_v21 = vmul.f32 %v5564_v62, %v14558_v43  ;;  %v5561_v6 = vadd.f32 1.0, %v5555_v60 }
 0xce4   : > { %v5566_v35 = vmul.f32 %v5560_v42, %v5410_v37 }
 0xce5   : > { %v5567_v13 = vmul.f32 %v5561_v6, %v5411_v57 }
 0xce6   : > { %v14742_v52 = vmul.f32 %v5566_v35, %v14584_v51 }
 0xce7   : > { %v14745_v34 = vmul.f32 %v5567_v13, %v14580_v7 }
 0xcf2   : > { %v6061_v28 = vpop.f32.mrb[42].mxu1 }
 0xcf3   : > { %v14747_v43 = vpop.f32.mrb[43].mxu1 }
 0xd12   : > { %v14749_v3 = vpop.f32.mrb[36].mxu0 }
 0xd13   : > { %v6205_v27 = vpop.f32.mrb[37].mxu0 }
 0xd14   : > { %v6493_v22 = vmul.f32 0.70710677, %v6205_v27  ;;  %v6490_v20 = vmul.f32 0.5, %v6205_v27 }
 0xd16   : > { %v6502_v53 = vand.u32 2147483647, %v6493_v22  ;;  %vm6496_vm6 = vcmp.ge.f32.partialorder %v6493_v22, 0.0 }
 0xd17   : > { %v6499_v30 = vsel %vm6496_vm6, 1.0, %v15301_v17 }
 0xd18   : > { %v6505_v12 = vmul.f32 0.3275911, %v6502_v53  ;;  %v6544_v10 = vsub.f32 0.0, %v6502_v53 }
 0xd1a   : > { %v6508_v49 = vadd.f32 1.0, %v6505_v12  ;;  %v6547_v29 = vmul.f32 %v6544_v10, %v6502_v53 }
 0xd1c   : > { %11289 = vrcp.f32 %v6508_v49  ;;  %v6550_v0 = vmul.f32 1.442695, %v6547_v29 }
 0xd1e   : > { %11291 = vpow2.f32 %v6550_v0 }
 0xd26   : > { %v11290_v59 = vpop.eup %11289 }
 0xd27   : > { %v6517_v51 = vmul.f32 1.0614054, %v11290_v59 }
 0xd28   : > { %v11292_v38 = vpop.eup %11291 }
 0xd29   : > { %v6520_v2 = vadd.f32 -1.4531521, %v6517_v51 }
 0xd2b   : > { %v6523_v25 = vmul.f32 %v11290_v59, %v6520_v2 }
 0xd2d   : > { %v6526_v7 = vadd.f32 1.4214138, %v6523_v25 }
 0xd2f   : > { %v6529_v11 = vmul.f32 %v11290_v59, %v6526_v7 }
 0xd31   : > { %v6532_v5 = vadd.f32 -0.28449672, %v6529_v11 }
 0xd32   : > { %v8621_v9 = vpop.f32.mrb[38].mxu0 }
 0xd33   : > { %v8622_v23 = vpop.f32.mrb[39].mxu0  ;;  %v6535_v61 = vmul.f32 %v11290_v59, %v6532_v5 }
 0xd34   : > { %v8623_v19 = vadd.f32 %v8622_v23, %v8621_v9 }
 0xd35   : > { %v6538_v31 = vadd.f32 0.2548296, %v6535_v61 }
 0xd37   : > { %v6541_v63 = vmul.f32 %v11290_v59, %v6538_v31 }
 0xd39   : > { %v6556_v4 = vmul.f32 %v11292_v38, %v6541_v63 }
 0xd3b   : > { %v6559_v18 = vsub.f32 1.0, %v6556_v4 }
 0xd3d   : > { %v6562_v32 = vmul.f32 %v6559_v18, %v6499_v30 }
 0xd3f   : > { %v6565_v44 = vadd.f32 1.0, %v6562_v32 }
 0xd41   : > { %v6568_v45 = vmul.f32 %v6565_v44, %v6490_v20 }
 0xd43   : > { %v14752_v58 = vmul.f32 %v6568_v45, %v6061_v28 }
 0xd52   : > { %v6345_v8 = vpop.f32.mrb[44].mxu1  ;;  %v6486_v62 = vpop.f32.mrb[40].mxu0 }
 0xd53   : > { %v6494_v24 = vmul.f32 0.70710677, %v6345_v8  ;;  %v6487_v33 = vadd.f32 %v8623_v19, %v6486_v62  ;;  %v6347_v37 = vpop.f32.mrb[45].mxu1  ;;  %v8908_v42 = vpop.f32.mrb[41].mxu0 }
 0xd54   : > { %v6495_v50 = vmul.f32 0.70710677, %v6347_v37 }
 0xd55   : > { %v6503_v60 = vand.u32 2147483647, %v6494_v24  ;;  %8910 = vmatpush3.xpose.msra.mxu1 %v6487_v33  ;;  %v6581_v6 = vcombine.high %v6487_v33, %v6487_v33  ;;  %vm6497_vm7 = vcmp.ge.f32.partialorder %v6494_v24, 0.0 }
 0xd56   : > { %v6504_v35 = vand.u32 2147483647, %v6495_v50  ;;  %8914 = vmatprep.subr.mxu1 %v15302_v39  ;;  %vm6498_vm8 = vcmp.ge.f32.partialorder %v6495_v50, 0.0  ;;  %v6500_v45 = vsel %vm6497_vm7, 1.0, %v15301_v17 }
 0xd57   : > { %v6506_v57 = vmul.f32 0.3275911, %v6503_v60  ;;  %v6545_v22 = vsub.f32 0.0, %v6503_v60  ;;  %v6501_v42 = vsel %vm6498_vm8, 1.0, %v15301_v17 }
 0xd58   : > { %v6507_v13 = vmul.f32 0.3275911, %v6504_v35  ;;  %8912 = vmatmul.mubr.f32.vlgmr.msra.gmra.mrb[46].mxu1 %v14697_v36  ;;  %v6546_v53 = vsub.f32 0.0, %v6504_v35 }
 0xd59   : > { %v6509_v27 = vadd.f32 1.0, %v6506_v57  ;;  %8915 = vmatpush3.xpose.msra.mxu1 %v6581_v6  ;;  %8916 = vmatprep.mubr.msk.f32.mxu1 %vm11785_vm0, %v15302_v39  ;;  %v6548_v12 = vmul.f32 %v6545_v22, %v6503_v60  ;;  %v6492_v6 = vmul.f32 0.5, %v6347_v37 }
 0xd5a   : > { %v6510_v28 = vadd.f32 1.0, %v6507_v13  ;;  %v6549_v49 = vmul.f32 %v6546_v53, %v6504_v35  ;;  %v6491_v35 = vmul.f32 0.5, %v6345_v8 }
 0xd5b   : > { %11293 = vrcp.f32 %v6509_v27  ;;  %v6552_v36 = vmul.f32 1.442695, %v6548_v12 }
 0xd5c   : > { %11295 = vrcp.f32 %v6510_v28  ;;  %8917 = vmatmul.mubr.f32.vlgmr.msra.gmra.mrb[48].mxu1 %v14695_v1  ;;  %v6554_v0 = vmul.f32 1.442695, %v6549_v49 }
 0xd5d   : > { %6823 = vmatprep.mubr.f32.mxu1 %v15302_v39  ;;  %11297 = vpow2.f32 %v6552_v36 }
 0xd5e   : > { %11299 = vpow2.f32 %v6554_v0 }
 0xd65   : > { %v11294_v10 = vpop.eup %11293 }
 0xd66   : > { %v11296_v59 = vpop.eup %11295  ;;  %v6518_v29 = vmul.f32 1.0614054, %v11294_v10 }
 0xd67   : > { %v6519_v51 = vmul.f32 1.0614054, %v11296_v59  ;;  %v11298_v4 = vpop.eup %11297 }
 0xd68   : > { %v6521_v2 = vadd.f32 -1.4531521, %v6518_v29  ;;  %v11300_v30 = vpop.eup %11299 }
 0xd69   : > { %v6522_v25 = vadd.f32 -1.4531521, %v6519_v51 }
 0xd6a   : > { %v6524_v7 = vmul.f32 %v11294_v10, %v6521_v2 }
 0xd6b   : > { %v6525_v11 = vmul.f32 %v11296_v59, %v6522_v25 }
 0xd6c   : > { %v6527_v5 = vadd.f32 1.4214138, %v6524_v7 }
 0xd6d   : > { %v6528_v1 = vadd.f32 1.4214138, %v6525_v11 }
 0xd6e   : > { %v6530_v9 = vmul.f32 %v11294_v10, %v6527_v5 }
 0xd6f   : > { %v6531_v23 = vmul.f32 %v11296_v59, %v6528_v1 }
 0xd70   : > { %v6533_v61 = vadd.f32 -0.28449672, %v6530_v9 }
 0xd71   : > { %v6534_v19 = vadd.f32 -0.28449672, %v6531_v23 }
 0xd72   : > { %v6536_v31 = vmul.f32 %v11294_v10, %v6533_v61  ;;  %v7101_v61 = vld [vmem:[%s12366_s12 + $0x190] sm:$0xff] }
 0xd73   : > { %v6537_v63 = vmul.f32 %v11296_v59, %v6534_v19  ;;  %v7104_v19 = vld [vmem:[%s12366_s12 + $0x1a8] sm:$0xff] }
 0xd74   : > { %v6539_v38 = vadd.f32 0.2548296, %v6536_v31  ;;  %v10812_v31 = vpack.c.bf16 %v7104_v19, %v7101_v61 }
 0xd75   : > { %v6540_v18 = vadd.f32 0.2548296, %v6537_v63 }
 0xd76   : > { %v6542_v32 = vmul.f32 %v11294_v10, %v6539_v38 }
 0xd77   : > { %v6543_v20 = vmul.f32 %v11296_v59, %v6540_v18  ;;  %v7056_v18 = vld [vmem:[%s12366_s12 + $0x28] sm:$0xff] }
 0xd78   : > { %v6557_v44 = vmul.f32 %v11298_v4, %v6542_v32  ;;  %v7053_v4 = vld [vmem:[%s12366_s12 + $0x10] sm:$0xff]  ;;  %v7110_v32 = vld [vmem:[%s12366_s12 + $0x1d8] sm:$0xff] }
 0xd79   : > { %v6558_v62 = vmul.f32 %v11300_v30, %v6543_v20  ;;  %v7107_v30 = vld [vmem:[%s12366_s12 + $0x1c0] sm:$0xff] }
 0xd7a   : > { %v6560_v33 = vsub.f32 1.0, %v6557_v44  ;;  %v10814_v44 = vpack.c.bf16 %v7056_v18, %v7053_v4  ;;  %v7073_v4 = vld [vmem:[%s12366_s12 + $0xb0] sm:$0xff]  ;;  %v7131_v18 = vld [vmem:[%s12366_s12 + $0x280] sm:$0xff] }
 0xd7b   : > { %v6561_v60 = vsub.f32 1.0, %v6558_v62  ;;  %v7059_v62 = vld [vmem:[%s12366_s12 + $0x40] sm:$0xff] }
 0xd7c   : > { %v6563_v57 = vmul.f32 %v6560_v33, %v6500_v45  ;;  %v7062_v33 = vld [vmem:[%s12366_s12 + $0x58] sm:$0xff] }
 0xd7d   : > { %v6564_v13 = vmul.f32 %v6561_v60, %v6501_v42  ;;  %v10816_v42 = vpack.c.bf16 %v7110_v32, %v7107_v30  ;;  %v7052_v60 = vld [vmem:[%s12366_s12 + $0x8] sm:$0xff]  ;;  %v7134_v30 = vld [vmem:[%s12366_s12 + $0x298] sm:$0xff] }
 0xd7e   : > { %v6566_v27 = vadd.f32 1.0, %v6563_v57  ;;  %v7113_v57 = vld [vmem:[%s12366_s12 + $0x1f0] sm:$0xff] }
 0xd7f   : > { %v6567_v28 = vadd.f32 1.0, %v6564_v13 }
 0xd80   : > { %v6569_v22 = vmul.f32 %v6566_v27, %v6491_v35  ;;  %v7055_v35 = vld [vmem:[%s12366_s12 + $0x20] sm:$0xff]  ;;  %v10818_v27 = vpack.c.bf16 %v7062_v33, %v7059_v62  ;;  %v10832_v62 = vpack.c.bf16 %v7134_v30, %v7131_v18 }
 0xd81   : > { %v6570_v53 = vmul.f32 %v6567_v28, %v6492_v6  ;;  %v7116_v6 = vld [vmem:[%s12366_s12 + $0x208] sm:$0xff]  ;;  %v7051_v28 = vld [vmem:[%s12366_s12] sm:$0xff] }
 0xd82   : > { %v6572_v24 = vmul.f32 %v6569_v22, %v14747_v43  ;;  %v7083_v33 = vld [vmem:[%s12366_s12 + $0x100] sm:$0xff] }
 0xd83   : > { %v14764_v50 = vmul.f32 %v6570_v53, %v14749_v3  ;;  %v10620_v53 = vpack.c.bf16 %v7055_v35, %v7052_v60  ;;  %v7076_v60 = vld [vmem:[%s12366_s12 + $0xc8] sm:$0xff]  ;;  %v7079_v35 = vld [vmem:[%s12366_s12 + $0xe0] sm:$0xff] }
 0xd84   : > { %v8394_v12 = vcombine.low %v6572_v24, %v6572_v24  ;;  %v6577_v49 = vcombine.low %v14752_v58, %v6572_v24  ;;  %v8400_v10 = vcombine.high %v6572_v24, %v6572_v24  ;;  %v6578_v17 = vcombine.high %v14752_v58, %v6572_v24  ;;  %v7054_v24 = vld [vmem:[%s12366_s12 + $0x18] sm:$0xff] }
 0xd85   : > { %8920 = vmatpush3.msk.msra.mxu0 %vm6752_vm9, %v14764_v50 }
 0xd86   : > { %8395 = vmatprep.subr.msk.mxu1 %vm6752_vm9, %v8394_v12  ;;  %8401 = vmatprep.subr.msk.mxu0 %vm6752_vm9, %v8400_v10  ;;  %v7065_v12 = vld [vmem:[%s12366_s12 + $0x70] sm:$0xff]  ;;  %v6579_v10 = vcombine.high %v14764_v50, %v14764_v50  ;;  %v10622_v50 = vpack.c.bf16 %v7054_v24, %v7051_v28  ;;  %v7075_v28 = vld [vmem:[%s12366_s12 + $0xc0] sm:$0xff] }
 0xd87   : > { %8396 = vmatpush1.msk.msra.mxu1 %vm6752_vm9, %v6577_v49  ;;  %v7068_v49 = vld [vmem:[%s12366_s12 + $0x88] sm:$0xff] }
 0xd88   : > { %10813 = vmatprep.subr.bf16.mxu1 %v10812_v31  ;;  %v7077_v31 = vld [vmem:[%s12366_s12 + $0xd0] sm:$0xff] }
 0xe2b   : > { %v6649_v43 = vpop.f32.mrb[46].mxu1 }
 0xe2c   : > { %v6723_v8 = vmul.f32 0.14433756, %v6649_v43  ;;  %v8913_v3 = vpop.f32.mrb[47].mxu1  ;;  %v7058_v43 = vld [vmem:[%s12366_s12 + $0x38] sm:$0xff] }
 0xe2d   : > { %v7119_v3 = vld [vmem:[%s12366_s12 + $0x220] sm:$0xff] }
 0xe2e   : > { %v6726_v37 = vsel %vm6725_vm10, %v6723_v8, -inf }
 0xe2f   : > { %6727 = vmax.xlane.f32.xlu1 %v6726_v37  ;;  %v6719_v59 = vpop.f32.mrb[48].mxu1  ;;  %v7122_v37 = vld [vmem:[%s12366_s12 + $0x238] sm:$0xff] }
 0xe30   : > { %v6724_v29 = vmul.f32 0.14433756, %v6719_v59  ;;  %v8918_v36 = vpop.f32.mrb[49].mxu1  ;;  %v10822_v59 = vpack.c.bf16 %v7068_v49, %v7065_v12  ;;  %v7089_v12 = vld [vmem:[%s12366_s12 + $0x130] sm:$0xff]  ;;  %v7092_v49 = vld [vmem:[%s12366_s12 + $0x148] sm:$0xff] }
 0xe31   : > { %v7060_v36 = vld [vmem:[%s12366_s12 + $0x48] sm:$0xff] }
 0xe32   : > { %v6729_v58 = vsel %vm6725_vm10, %v6724_v29, -inf }
 0xe33   : > { %6730 = vmax.xlane.f32.xlu1 %v6729_v58 }
 0xebc   : > { %v6728_v51 = vpop.xlane.xlu1 %6727 }
 0xebd   : > { %v6732_v2 = vsub.f32 %v6723_v8, %v6728_v51  ;;  %v7061_v8 = vld [vmem:[%s12366_s12 + $0x50] sm:$0xff]  ;;  %v7071_v51 = vld [vmem:[%s12366_s12 + $0xa0] sm:$0xff] }
 0xebe   : > { %v10624_v58 = vpack.c.bf16 %v7061_v8, %v7058_v43  ;;  %v7143_v43 = vld [vmem:[%s12366_s12 + $0x2e0] sm:$0xff]  ;;  %v7146_v8 = vld [vmem:[%s12366_s12 + $0x2f8] sm:$0xff] }
 0xebf   : > { %v6734_v0 = vmul.f32 1.442695, %v6732_v2  ;;  %v7074_v2 = vld [vmem:[%s12366_s12 + $0xb8] sm:$0xff] }
 0xec0   : > { %v6731_v25 = vpop.xlane.xlu1 %6730 }
 0xec1   : > { %11301 = vpow2.f32 %v6734_v0  ;;  %v6733_v7 = vsub.f32 %v6724_v29, %v6731_v25  ;;  %v7057_v29 = vld [vmem:[%s12366_s12 + $0x30] sm:$0xff]  ;;  %v7064_v0 = vld [vmem:[%s12366_s12 + $0x68] sm:$0xff]  ;;  %v10824_v25 = vpack.c.bf16 %v7122_v37, %v7119_v3  ;;  %v10838_v37 = vpack.c.bf16 %v7092_v49, %v7089_v12 }
 0xec2   : > { %v7161_v12 = vld [vmem:[%s12366_s12 + $0x370] sm:$0xff]  ;;  %v7164_v49 = vld [vmem:[%s12366_s12 + $0x388] sm:$0xff] }
 0xec3   : > { %v6736_v11 = vmul.f32 1.442695, %v6733_v7  ;;  %v7067_v7 = vld [vmem:[%s12366_s12 + $0x80] sm:$0xff] }
 0xec4   : > { %v10628_v61 = vpack.c.bf16 %v7067_v7, %v7064_v0  ;;  %v7091_v0 = vld [vmem:[%s12366_s12 + $0x140] sm:$0xff]  ;;  %v7200_v7 = vld [vmem:[%s12366_s12 + $0x4a8] sm:$0xff] }
 0xec5   : > { %11303 = vpow2.f32 %v6736_v11  ;;  %v7125_v11 = vld [vmem:[%s12366_s12 + $0x250] sm:$0xff] }
 0xecb   : > { %v11302_v5 = vpop.eup %11301 }
 0xecc   : > { %v6738_v1 = vsel %vm6725_vm10, %v11302_v5, 0.0 }
 0xecd   : > { %6739 = vadd.xlane.f32.xlu1 %v6738_v1  ;;  %v10826_v1 = vpack.c.bf16 %v7074_v2, %v7071_v51  ;;  %v7098_v51 = vld [vmem:[%s12366_s12 + $0x178] sm:$0xff]  ;;  %v7088_v2 = vld [vmem:[%s12366_s12 + $0x128] sm:$0xff] }
 0xecf   : > { %v11304_v9 = vpop.eup %11303 }
 0xed0   : > { %v6741_v23 = vsel %vm6725_vm10, %v11304_v9, 0.0 }
 0xed1   : > { %6742 = vadd.xlane.f32.xlu0 %v6741_v23  ;;  %v7066_v23 = vld [vmem:[%s12366_s12 + $0x78] sm:$0xff] }
 0xf5a   : > { %v6740_v63 = vpop.xlane.xlu1 %6739 }
 0xf5b   : > { %11305 = vrcp.f32 %v6740_v63  ;;  %v7080_v63 = vld [vmem:[%s12366_s12 + $0xe8] sm:$0xff] }
 0xf5c   : > { %v10830_v32 = vpack.c.bf16 %v7080_v63, %v7077_v31  ;;  %v7149_v31 = vld [vmem:[%s12366_s12 + $0x310] sm:$0xff]  ;;  %v7152_v63 = vld [vmem:[%s12366_s12 + $0x328] sm:$0xff] }
 0xf5e   : > { %v6743_v38 = vpop.xlane.xlu0 %6742 }
 0xf5f   : > { %11307 = vrcp.f32 %v6743_v38  ;;  %v7070_v38 = vld [vmem:[%s12366_s12 + $0x98] sm:$0xff] }
 0xf65   : > { %v11306_v20 = vpop.eup %11305 }
 0xf66   : > { %v6745_v45 = vmul.f32 %v11306_v20, %v11302_v5  ;;  %v7128_v5 = vld [vmem:[%s12366_s12 + $0x268] sm:$0xff]  ;;  %v7069_v20 = vld [vmem:[%s12366_s12 + $0x90] sm:$0xff] }
 0xf67   : > { %v10828_v19 = vpack.c.bf16 %v7128_v5, %v7125_v11 }
 0xf68   : > { %8397 = vmatmul.mubr.msk.f32.vlgmr.msra.gmra.mrb[50].mxu1 %vm6725_vm10, %v6745_v45  ;;  %8922 = vmatmul.mubr.msk.f32.vlgmr.msra.gmra.mrb[42].mxu0 %vm6725_vm10, %v6745_v45  ;;  %v10632_v45 = vpack.c.bf16 %v7073_v4, %v7070_v38  ;;  %v7203_v38 = vld [vmem:[%s12366_s12 + $0x4c0] sm:$0xff]  ;;  %v7206_v4 = vld [vmem:[%s12366_s12 + $0x4d8] sm:$0xff] }
 0xf69   : > { %v11308_v13 = vpop.eup %11307  ;;  %8402 = vmatpush1.msk.msra.mxu0 %vm6752_vm9, %v6578_v17  ;;  %10815 = vmatpush3.bf16.msra.mxu1 %v10814_v44  ;;  %v10820_v17 = vpack.c.bf16 %v7116_v6, %v7113_v57  ;;  %v7072_v44 = vld [vmem:[%s12366_s12 + $0xa8] sm:$0xff]  ;;  %v7137_v57 = vld [vmem:[%s12366_s12 + $0x2b0] sm:$0xff] }
 0xf6a   : > { %v6747_v22 = vmul.f32 %v11308_v13, %v11304_v9  ;;  %7634 = vmatprep.mubr.f32.mxu1 %v14733_v55  ;;  %6974 = vmatprep.mubr.f32.mxu0 %v15302_v39  ;;  %v7063_v9 = vld [vmem:[%s12366_s12 + $0x60] sm:$0xff]  ;;  %v7140_v6 = vld [vmem:[%s12366_s12 + $0x2c8] sm:$0xff]  ;;  %v10634_v13 = vpack.c.bf16 %v7072_v44, %v7069_v20  ;;  %v10846_v44 = vpack.c.bf16 %v7152_v63, %v7149_v31  ;;  %v7230_v63 = vld [vmem:[%s12366_s12 + $0x598] sm:$0xff] }
 0xf6b   : > { %8924 = vmatprep.subr.mxu0 %v15302_v39  ;;  %10817 = vmatprep.subr.bf16.mxu1 %v10816_v42  ;;  %v7086_v42 = vld [vmem:[%s12366_s12 + $0x118] sm:$0xff]  ;;  %v10836_v24 = vpack.c.bf16 %v7140_v6, %v7137_v57  ;;  %v7100_v20 = vld [vmem:[%s12366_s12 + $0x188] sm:$0xff]  ;;  %v7227_v31 = vld [vmem:[%s12366_s12 + $0x580] sm:$0xff] }
 0xf6c   : > { %8403 = vmatmul.mubr.msk.f32.vlgmr.msra.gmra.mrb[44].mxu0 %vm6725_vm10, %v6747_v22 }
 0xf6d   : > { %8925 = vmatpush3.msk.msra.mxu0 %vm6752_vm9, %v6579_v10  ;;  %10819 = vmatpush3.bf16.msra.mxu1 %v10818_v27  ;;  %v10834_v27 = vpack.c.bf16 %v7086_v42, %v7083_v33  ;;  %v7082_v10 = vld [vmem:[%s12366_s12 + $0xf8] sm:$0xff]  ;;  %v7155_v33 = vld [vmem:[%s12366_s12 + $0x340] sm:$0xff] }
 0xf6e   : > { %8926 = vmatprep.mubr.msk.f32.mxu0 %vm11785_vm0, %v15302_v39  ;;  %10621 = vmatprep.subr.bf16.mxu0 %v10620_v53  ;;  %v10626_v39 = vpack.c.bf16 %v7060_v36, %v7057_v29  ;;  %v10636_v53 = vpack.c.bf16 %v7079_v35, %v7076_v60  ;;  %v10840_v36 = vpack.c.bf16 %v7146_v8, %v7143_v43  ;;  %v7158_v42 = vld [vmem:[%s12366_s12 + $0x358] sm:$0xff]  ;;  %v7209_v60 = vld [vmem:[%s12366_s12 + $0x4f0] sm:$0xff]  ;;  %v7212_v35 = vld [vmem:[%s12366_s12 + $0x508] sm:$0xff] }
 0xf6f   : > { %10821 = vmatprep.subr.bf16.mxu1 %v10820_v17  ;;  %v7085_v17 = vld [vmem:[%s12366_s12 + $0x110] sm:$0xff] }
 0xf70   : > { %8927 = vmatmul.mubr.msk.f32.vlgmr.msra.gmra.mrb[46].mxu0 %vm6725_vm10, %v6747_v22  ;;  %v7078_v22 = vld [vmem:[%s12366_s12 + $0xd8] sm:$0xff]  ;;  %v10640_v29 = vpack.c.bf16 %v7085_v17, %v7082_v10  ;;  %v7215_v10 = vld [vmem:[%s12366_s12 + $0x520] sm:$0xff] }
 0xf71   : > { %10623 = vmatpush1.bf16.msra.mxu0 %v10622_v50  ;;  %10823 = vmatpush3.bf16.msra.mxu1 %v10822_v59  ;;  %v10638_v3 = vpack.c.bf16 %v7078_v22, %v7075_v28  ;;  %v7081_v50 = vld [vmem:[%s12366_s12 + $0xf0] sm:$0xff]  ;;  %v7084_v59 = vld [vmem:[%s12366_s12 + $0x108] sm:$0xff]  ;;  %v7106_v28 = vld [vmem:[%s12366_s12 + $0x1b8] sm:$0xff]  ;;  %v10850_v22 = vpack.c.bf16 %v7158_v42, %v7155_v33 }
 0xf72   : > { %7403 = vmatprep.mubr.f32.mxu0 %v14733_v55  ;;  %10625 = vmatprep.subr.bf16.mxu0 %v10624_v58  ;;  %v10630_v55 = vpack.c.bf16 %v7066_v23, %v7063_v9  ;;  %v7095_v58 = vld [vmem:[%s12366_s12 + $0x160] sm:$0xff]  ;;  %v10642_v11 = vpack.c.bf16 %v7084_v59, %v7081_v50  ;;  %v7090_v9 = vld [vmem:[%s12366_s12 + $0x138] sm:$0xff]  ;;  %v7112_v50 = vld [vmem:[%s12366_s12 + $0x1e8] sm:$0xff]  ;;  %v10854_v59 = vpack.c.bf16 %v7164_v49, %v7161_v12 }
 0xf73   : > { %10825 = vmatprep.subr.bf16.mxu1 %v10824_v25  ;;  %v7197_v25 = vld [vmem:[%s12366_s12 + $0x490] sm:$0xff]  ;;  %v10842_v5 = vpack.c.bf16 %v7098_v51, %v7095_v58  ;;  %v7094_v23 = vld [vmem:[%s12366_s12 + $0x158] sm:$0xff]  ;;  %v7167_v58 = vld [vmem:[%s12366_s12 + $0x3a0] sm:$0xff] }
 0xf74   : > { %v7218_v17 = vld [vmem:[%s12366_s12 + $0x538] sm:$0xff]  ;;  %v7233_v33 = vld [vmem:[%s12366_s12 + $0x5b0] sm:$0xff]  ;;  %v7236_v42 = vld [vmem:[%s12366_s12 + $0x5c8] sm:$0xff] }
 0xf75   : > { %10627 = vmatpush1.bf16.msra.mxu0 %v10626_v39  ;;  %10827 = vmatpush3.bf16.msra.mxu1 %v10826_v1  ;;  %v10644_v39 = vpack.c.bf16 %v7091_v0, %v7088_v2  ;;  %v7087_v1 = vld [vmem:[%s12366_s12 + $0x120] sm:$0xff]  ;;  %v7170_v51 = vld [vmem:[%s12366_s12 + $0x3b8] sm:$0xff]  ;;  %v7221_v2 = vld [vmem:[%s12366_s12 + $0x550] sm:$0xff] }
 0xf76   : > { %10629 = vmatprep.subr.bf16.mxu0 %v10628_v61  ;;  %10829 = vmatprep.subr.bf16.mxu1 %v10828_v19  ;;  %v10844_v61 = vpack.c.bf16 %v7200_v7, %v7197_v25  ;;  %v7097_v19 = vld [vmem:[%s12366_s12 + $0x170] sm:$0xff]  ;;  %v10646_v18 = vpack.c.bf16 %v7090_v9, %v7087_v1  ;;  %v7224_v0 = vld [vmem:[%s12366_s12 + $0x568] sm:$0xff]  ;;  %v10858_v1 = vpack.c.bf16 %v7170_v51, %v7167_v58  ;;  %v7239_v12 = vld [vmem:[%s12366_s12 + $0x5e0] sm:$0xff] }
 0xf77   : > { %v10648_v30 = vpack.c.bf16 %v7097_v19, %v7094_v23  ;;  %v7121_v9 = vld [vmem:[%s12366_s12 + $0x230] sm:$0xff]  ;;  %v10860_v23 = vpack.c.bf16 %v7224_v0, %v7221_v2  ;;  %v7176_v19 = vld [vmem:[%s12366_s12 + $0x3e8] sm:$0xff]  ;;  %v7242_v49 = vld [vmem:[%s12366_s12 + $0x5f8] sm:$0xff] }
 0xf78   : > { %v7135_v2 = vld [vmem:[%s12366_s12 + $0x2a0] sm:$0xff]  ;;  %v7138_v0 = vld [vmem:[%s12366_s12 + $0x2b8] sm:$0xff] }
 0xf79   : > { %10631 = vmatpush1.bf16.msra.mxu0 %v10630_v55  ;;  %10831 = vmatpush3.bf16.msra.mxu1 %v10830_v32  ;;  %v7093_v55 = vld [vmem:[%s12366_s12 + $0x150] sm:$0xff]  ;;  %v7096_v32 = vld [vmem:[%s12366_s12 + $0x168] sm:$0xff] }
 0xf7a   : > { %10633 = vmatprep.subr.bf16.mxu0 %v10632_v45  ;;  %10833 = vmatprep.subr.bf16.mxu1 %v10832_v62  ;;  %v7103_v45 = vld [vmem:[%s12366_s12 + $0x1a0] sm:$0xff]  ;;  %v10848_v62 = vpack.c.bf16 %v7206_v4, %v7203_v38  ;;  %v10650_v57 = vpack.c.bf16 %v7096_v32, %v7093_v55  ;;  %v7124_v55 = vld [vmem:[%s12366_s12 + $0x248] sm:$0xff] }
 0xf7b   : > { %v10652_v6 = vpack.c.bf16 %v7103_v45, %v7100_v20  ;;  %v7127_v20 = vld [vmem:[%s12366_s12 + $0x260] sm:$0xff] }
 0xf7c   : > { %v7179_v45 = vld [vmem:[%s12366_s12 + $0x400] sm:$0xff] }
 0xf7d   : > { %10635 = vmatpush1.bf16.msra.mxu0 %v10634_v13  ;;  %10835 = vmatpush3.bf16.msra.mxu1 %v10834_v27  ;;  %v7099_v13 = vld [vmem:[%s12366_s12 + $0x180] sm:$0xff]  ;;  %v7102_v27 = vld [vmem:[%s12366_s12 + $0x198] sm:$0xff] }
 0xf7e   : > { %10637 = vmatprep.subr.bf16.mxu0 %v10636_v53  ;;  %10837 = vmatprep.subr.bf16.mxu1 %v10836_v24  ;;  %v7109_v53 = vld [vmem:[%s12366_s12 + $0x1d0] sm:$0xff]  ;;  %v10852_v24 = vpack.c.bf16 %v7212_v35, %v7209_v60  ;;  %v10654_v43 = vpack.c.bf16 %v7102_v27, %v7099_v13  ;;  %v10668_v35 = vpack.c.bf16 %v7127_v20, %v7124_v55  ;;  %v7130_v13 = vld [vmem:[%s12366_s12 + $0x278] sm:$0xff]  ;;  %v7156_v20 = vld [vmem:[%s12366_s12 + $0x348] sm:$0xff] }
 0xf7f   : > { %v10656_v8 = vpack.c.bf16 %v7109_v53, %v7106_v28  ;;  %v7133_v28 = vld [vmem:[%s12366_s12 + $0x290] sm:$0xff] }
 0xf80   : > { %v7185_v53 = vld [vmem:[%s12366_s12 + $0x430] sm:$0xff] }
 0xf81   : > { %10639 = vmatpush1.bf16.msra.mxu0 %v10638_v3  ;;  %10839 = vmatpush3.bf16.msra.mxu1 %v10838_v37  ;;  %v7105_v3 = vld [vmem:[%s12366_s12 + $0x1b0] sm:$0xff]  ;;  %v7108_v37 = vld [vmem:[%s12366_s12 + $0x1c8] sm:$0xff] }
 0xf82   : > { %10641 = vmatprep.subr.bf16.mxu0 %v10640_v29  ;;  %10841 = vmatprep.subr.bf16.mxu1 %v10840_v36  ;;  %v7115_v29 = vld [vmem:[%s12366_s12 + $0x200] sm:$0xff]  ;;  %v10856_v36 = vpack.c.bf16 %v7218_v17, %v7215_v10  ;;  %v10658_v25 = vpack.c.bf16 %v7108_v37, %v7105_v3  ;;  %v10672_v17 = vpack.c.bf16 %v7133_v28, %v7130_v13  ;;  %v7136_v3 = vld [vmem:[%s12366_s12 + $0x2a8] sm:$0xff] }
 0xf83   : > { %v10660_v7 = vpack.c.bf16 %v7115_v29, %v7112_v50  ;;  %v7139_v50 = vld [vmem:[%s12366_s12 + $0x2c0] sm:$0xff]  ;;  %v7168_v13 = vld [vmem:[%s12366_s12 + $0x3a8] sm:$0xff] }
 0xf84   : > { %v7191_v29 = vld [vmem:[%s12366_s12 + $0x460] sm:$0xff]  ;;  %v10676_v51 = vpack.c.bf16 %v7139_v50, %v7136_v3  ;;  %v7177_v3 = vld [vmem:[%s12366_s12 + $0x3f0] sm:$0xff] }
 0xf85   : > { %10643 = vmatpush1.bf16.msra.mxu0 %v10642_v11  ;;  %10843 = vmatpush3.bf16.msra.mxu1 %v10842_v5  ;;  %v7111_v11 = vld [vmem:[%s12366_s12 + $0x1e0] sm:$0xff]  ;;  %v7114_v5 = vld [vmem:[%s12366_s12 + $0x1f8] sm:$0xff] }
 0xf86   : > { %10645 = vmatprep.subr.bf16.mxu0 %v10644_v39  ;;  %10845 = vmatprep.subr.bf16.mxu1 %v10844_v61  ;;  %v7118_v39 = vld [vmem:[%s12366_s12 + $0x218] sm:$0xff]  ;;  %v7173_v61 = vld [vmem:[%s12366_s12 + $0x3d0] sm:$0xff]  ;;  %v10662_v38 = vpack.c.bf16 %v7114_v5, %v7111_v11  ;;  %v10678_v5 = vpack.c.bf16 %v7138_v0, %v7135_v2  ;;  %v7175_v28 = vld [vmem:[%s12366_s12 + $0x3e0] sm:$0xff] }
 0xf87   : > { %v10664_v4 = vpack.c.bf16 %v7121_v9, %v7118_v39  ;;  %v10862_v32 = vpack.c.bf16 %v7176_v19, %v7173_v61  ;;  %v7145_v11 = vld [vmem:[%s12366_s12 + $0x2f0] sm:$0xff]  ;;  %v7144_v9 = vld [vmem:[%s12366_s12 + $0x2e8] sm:$0xff]  ;;  %v7151_v61 = vld [vmem:[%s12366_s12 + $0x320] sm:$0xff] }
 0xf88   : > { %7635 = vmatmul.mubr.f32.vlgmr.msra.gmra.mrb[52].mxu1 %v14689_v41  ;;  %v7186_v2 = vld [vmem:[%s12366_s12 + $0x438] sm:$0xff] }
 0xf89   : > { %10647 = vmatpush1.bf16.msra.mxu0 %v10646_v18  ;;  %7639 = vmatprep.mubr.f32.mxu1 %v14742_v52  ;;  %v7117_v18 = vld [vmem:[%s12366_s12 + $0x210] sm:$0xff]  ;;  %v7190_v0 = vld [vmem:[%s12366_s12 + $0x458] sm:$0xff] }
 0xf8a   : > { %10649 = vmatprep.subr.bf16.mxu0 %v10648_v30  ;;  %10847 = vmatpush3.bf16.msra.mxu1 %v10846_v44  ;;  %v7120_v30 = vld [vmem:[%s12366_s12 + $0x228] sm:$0xff]  ;;  %v10864_v44 = vpack.c.bf16 %v7230_v63, %v7227_v31  ;;  %v7147_v63 = vld [vmem:[%s12366_s12 + $0x300] sm:$0xff] }
 0xf8b   : > { %10849 = vmatprep.subr.bf16.mxu1 %v10848_v62  ;;  %v7182_v62 = vld [vmem:[%s12366_s12 + $0x418] sm:$0xff]  ;;  %v10666_v60 = vpack.c.bf16 %v7120_v30, %v7117_v18  ;;  %v7157_v18 = vld [vmem:[%s12366_s12 + $0x350] sm:$0xff] }
 0xf8c   : > { %7640 = vmatmul.mubr.f32.gmra.mrb[54].mxu1 %v14693_v54  ;;  %v10866_v27 = vpack.c.bf16 %v7182_v62, %v7179_v45  ;;  %v7163_v45 = vld [vmem:[%s12366_s12 + $0x380] sm:$0xff] }
 0xf8d   : > { %10651 = vmatpush1.bf16.msra.mxu0 %v10650_v57  ;;  %v7123_v57 = vld [vmem:[%s12366_s12 + $0x240] sm:$0xff] }
 0xf8e   : > { %10653 = vmatprep.subr.bf16.mxu0 %v10652_v6  ;;  %10851 = vmatpush3.bf16.msra.mxu1 %v10850_v22  ;;  %v7126_v6 = vld [vmem:[%s12366_s12 + $0x258] sm:$0xff]  ;;  %v10868_v22 = vpack.c.bf16 %v7236_v42, %v7233_v33  ;;  %v7159_v42 = vld [vmem:[%s12366_s12 + $0x360] sm:$0xff] }
 0xf8f   : > { %10853 = vmatprep.subr.bf16.mxu1 %v10852_v24  ;;  %v7188_v24 = vld [vmem:[%s12366_s12 + $0x448] sm:$0xff]  ;;  %v10670_v10 = vpack.c.bf16 %v7126_v6, %v7123_v57  ;;  %v7169_v57 = vld [vmem:[%s12366_s12 + $0x3b0] sm:$0xff] }
 0xf90   : > { %v10870_v37 = vpack.c.bf16 %v7188_v24, %v7185_v53  ;;  %v7165_v6 = vld [vmem:[%s12366_s12 + $0x390] sm:$0xff]  ;;  %v7174_v24 = vld [vmem:[%s12366_s12 + $0x3d8] sm:$0xff] }
 0xf91   : > { %10655 = vmatpush1.bf16.msra.mxu0 %v10654_v43  ;;  %v7129_v43 = vld [vmem:[%s12366_s12 + $0x270] sm:$0xff] }
 0xf92   : > { %10657 = vmatprep.subr.bf16.mxu0 %v10656_v8  ;;  %10855 = vmatpush3.bf16.msra.mxu1 %v10854_v59  ;;  %v7132_v8 = vld [vmem:[%s12366_s12 + $0x288] sm:$0xff]  ;;  %v10872_v59 = vpack.c.bf16 %v7242_v49, %v7239_v12  ;;  %v7178_v12 = vld [vmem:[%s12366_s12 + $0x3f8] sm:$0xff]  ;;  %v7181_v49 = vld [vmem:[%s12366_s12 + $0x410] sm:$0xff] }
 0xf93   : > { %10857 = vmatprep.subr.bf16.mxu1 %v10856_v36  ;;  %v7194_v36 = vld [vmem:[%s12366_s12 + $0x478] sm:$0xff]  ;;  %v10674_v58 = vpack.c.bf16 %v7132_v8, %v7129_v43  ;;  %v7296_v43 = vld [vmem:[%s12366_s12 + $0x7a8] sm:$0xff]  ;;  %v10704_v8 = vpack.c.bf16 %v7181_v49, %v7178_v12 }
 0xf95   : > { %10659 = vmatpush1.bf16.msra.mxu0 %v10658_v25  ;;  %v10874_v25 = vpack.c.bf16 %v7194_v36, %v7191_v29  ;;  %v7187_v29 = vld [vmem:[%s12366_s12 + $0x440] sm:$0xff] }
 0xf96   : > { %10661 = vmatprep.subr.bf16.mxu0 %v10660_v7  ;;  %10859 = vmatpush3.bf16.msra.mxu1 %v10858_v1  ;;  %v7142_v7 = vld [vmem:[%s12366_s12 + $0x2d8] sm:$0xff]  ;;  %v7141_v1 = vld [vmem:[%s12366_s12 + $0x2d0] sm:$0xff] }
 0xf97   : > { %10861 = vmatprep.subr.bf16.mxu1 %v10860_v23  ;;  %v10680_v39 = vpack.c.bf16 %v7145_v11, %v7142_v7  ;;  %v7148_v23 = vld [vmem:[%s12366_s12 + $0x308] sm:$0xff]  ;;  %v10682_v19 = vpack.c.bf16 %v7144_v9, %v7141_v1  ;;  %v7199_v9 = vld [vmem:[%s12366_s12 + $0x4a0] sm:$0xff] }
 0xf98   : > { %v10684_v31 = vpack.c.bf16 %v7151_v61, %v7148_v23  ;;  %v7196_v1 = vld [vmem:[%s12366_s12 + $0x488] sm:$0xff] }
 0xf99   : > { %10663 = vmatpush1.bf16.msra.mxu0 %v10662_v38  ;;  %v7150_v38 = vld [vmem:[%s12366_s12 + $0x318] sm:$0xff]  ;;  %v10716_v61 = vpack.c.bf16 %v7199_v9, %v7196_v1  ;;  %v7245_v9 = vld [vmem:[%s12366_s12 + $0x610] sm:$0xff] }
 0xf9a   : > { %10665 = vmatprep.subr.bf16.mxu0 %v10664_v4  ;;  %10863 = vmatpush3.bf16.msra.mxu1 %v10862_v32  ;;  %v7154_v4 = vld [vmem:[%s12366_s12 + $0x338] sm:$0xff]  ;;  %v10686_v30 = vpack.c.bf16 %v7150_v38, %v7147_v63  ;;  %v7153_v32 = vld [vmem:[%s12366_s12 + $0x330] sm:$0xff] }
 0xf9b   : > { %10865 = vmatprep.subr.bf16.mxu1 %v10864_v44  ;;  %v10688_v55 = vpack.c.bf16 %v7157_v18, %v7154_v4  ;;  %v7160_v44 = vld [vmem:[%s12366_s12 + $0x368] sm:$0xff]  ;;  %v10690_v62 = vpack.c.bf16 %v7156_v20, %v7153_v32  ;;  %v7202_v63 = vld [vmem:[%s12366_s12 + $0x4b8] sm:$0xff]  ;;  %v7205_v38 = vld [vmem:[%s12366_s12 + $0x4d0] sm:$0xff] }
 0xf9c   : > { %v10692_v33 = vpack.c.bf16 %v7163_v45, %v7160_v44  ;;  %v10720_v18 = vpack.c.bf16 %v7205_v38, %v7202_v63  ;;  %v7208_v32 = vld [vmem:[%s12366_s12 + $0x4e8] sm:$0xff]  ;;  %v7211_v20 = vld [vmem:[%s12366_s12 + $0x500] sm:$0xff]  ;;  %v7246_v1 = vld [vmem:[%s12366_s12 + $0x618] sm:$0xff] }
 0xf9d   : > { %10667 = vmatpush1.bf16.msra.mxu0 %v10666_v60  ;;  %v7162_v60 = vld [vmem:[%s12366_s12 + $0x378] sm:$0xff]  ;;  %v10724_v45 = vpack.c.bf16 %v7211_v20, %v7208_v32 }
 0xf9e   : > { %10669 = vmatprep.subr.bf16.mxu0 %v10668_v35  ;;  %10867 = vmatpush3.bf16.msra.mxu1 %v10866_v27  ;;  %v7166_v35 = vld [vmem:[%s12366_s12 + $0x398] sm:$0xff]  ;;  %v7172_v27 = vld [vmem:[%s12366_s12 + $0x3c8] sm:$0xff] }
 0xf9f   : > { %10869 = vmatprep.subr.bf16.mxu1 %v10868_v22  ;;  %v10698_v22 = vpack.c.bf16 %v7168_v13, %v7165_v6  ;;  %v10700_v53 = vpack.c.bf16 %v7175_v28, %v7172_v27  ;;  %v7220_v6 = vld [vmem:[%s12366_s12 + $0x548] sm:$0xff]  ;;  %v7223_v13 = vld [vmem:[%s12366_s12 + $0x560] sm:$0xff]  ;;  %v7302_v63 = vld [vmem:[%s12366_s12 + $0x7d8] sm:$0xff] }
 0xfa0   : > { %v10732_v28 = vpack.c.bf16 %v7223_v13, %v7220_v6  ;;  %v7255_v13 = vld [vmem:[%s12366_s12 + $0x660] sm:$0xff] }
 0xfa1   : > { %10671 = vmatpush1.bf16.msra.mxu0 %v10670_v10  ;;  %v7293_v10 = vld [vmem:[%s12366_s12 + $0x790] sm:$0xff] }
 0xfa2   : > { %10673 = vmatprep.subr.bf16.mxu0 %v10672_v17  ;;  %10871 = vmatpush3.bf16.msra.mxu1 %v10870_v37  ;;  %v7180_v37 = vld [vmem:[%s12366_s12 + $0x408] sm:$0xff]  ;;  %v10876_v50 = vpack.c.bf16 %v7296_v43, %v7293_v10  ;;  %v7225_v10 = vld [vmem:[%s12366_s12 + $0x570] sm:$0xff] }
 0xfa3   : > { %10873 = vmatprep.subr.bf16.mxu1 %v10872_v59  ;;  %v7184_v59 = vld [vmem:[%s12366_s12 + $0x428] sm:$0xff]  ;;  %v10706_v36 = vpack.c.bf16 %v7180_v37, %v7177_v3 }
 0xfa4   : > { %v7232_v43 = vld [vmem:[%s12366_s12 + $0x5a8] sm:$0xff] }
 0xfa5   : > { %10675 = vmatpush1.bf16.msra.mxu0 %v10674_v58  ;;  %v10708_v58 = vpack.c.bf16 %v7187_v29, %v7184_v59  ;;  %v7234_v59 = vld [vmem:[%s12366_s12 + $0x5b8] sm:$0xff] }
 0xfa6   : > { %10677 = vmatprep.subr.bf16.mxu0 %v10676_v51  ;;  %10875 = vmatpush3.bf16.msra.mxu1 %v10874_v25  ;;  %v7183_v51 = vld [vmem:[%s12366_s12 + $0x420] sm:$0xff]  ;;  %v7193_v25 = vld [vmem:[%s12366_s12 + $0x470] sm:$0xff]  ;;  %v7238_v29 = vld [vmem:[%s12366_s12 + $0x5d8] sm:$0xff] }
 0xfa7   : > { %10877 = vmatprep.subr.bf16.mxu1 %v10876_v50  ;;  %v10710_v7 = vpack.c.bf16 %v7186_v2, %v7183_v51  ;;  %v10712_v11 = vpack.c.bf16 %v7193_v25, %v7190_v0  ;;  %v7231_v50 = vld [vmem:[%s12366_s12 + $0x5a0] sm:$0xff]  ;;  %v7237_v2 = vld [vmem:[%s12366_s12 + $0x5d0] sm:$0xff]  ;;  %v7240_v0 = vld [vmem:[%s12366_s12 + $0x5e8] sm:$0xff] }
 0xfa8   : > { %v7244_v25 = vld [vmem:[%s12366_s12 + $0x608] sm:$0xff] }
 0xfa9   : > { %10679 = vmatpush1.bf16.msra.mxu0 %v10678_v5  ;;  %v7189_v5 = vld [vmem:[%s12366_s12 + $0x450] sm:$0xff] }
 0xfaa   : > { %10681 = vmatprep.subr.bf16.mxu0 %v10680_v39  ;;  %v7192_v39 = vld [vmem:[%s12366_s12 + $0x468] sm:$0xff] }
 0xfab   : > { %v10714_v23 = vpack.c.bf16 %v7192_v39, %v7189_v5  ;;  %v7243_v39 = vld [vmem:[%s12366_s12 + $0x600] sm:$0xff] }
 0xfac   : > { %v10750_v38 = vpack.c.bf16 %v7246_v1, %v7243_v39  ;;  %v7270_v39 = vld [vmem:[%s12366_s12 + $0x6d8] sm:$0xff] }
 0xfad   : > { %10683 = vmatpush1.bf16.msra.mxu0 %v10682_v19  ;;  %v7195_v19 = vld [vmem:[%s12366_s12 + $0x480] sm:$0xff] }
 0xfae   : > { %10685 = vmatprep.subr.bf16.mxu0 %v10684_v31  ;;  %v7198_v31 = vld [vmem:[%s12366_s12 + $0x498] sm:$0xff] }
 0xfaf   : > { %v10718_v4 = vpack.c.bf16 %v7198_v31, %v7195_v19  ;;  %v7253_v19 = vld [vmem:[%s12366_s12 + $0x650] sm:$0xff]  ;;  %v7299_v31 = vld [vmem:[%s12366_s12 + $0x7c0] sm:$0xff] }
 0xfb0   : > { %7404 = vmatmul.mubr.f32.vlgmr.msra.gmra.mrb[48].mxu0 %v14689_v41  ;;  %v10694_v41 = vpack.c.bf16 %v7162_v60, %v7159_v42  ;;  %v7214_v42 = vld [vmem:[%s12366_s12 + $0x518] sm:$0xff]  ;;  %v7217_v60 = vld [vmem:[%s12366_s12 + $0x530] sm:$0xff]  ;;  %v10880_v20 = vpack.c.bf16 %v7302_v63, %v7299_v31  ;;  %v7323_v63 = vld [vmem:[%s12366_s12 + $0x880] sm:$0xff] }
 0xfb1   : > { %7409 = vmatprep.mubr.f32.mxu0 %v14742_v52  ;;  %10687 = vmatpush1.bf16.msra.mxu0 %v10686_v30  ;;  %v10696_v52 = vpack.c.bf16 %v7169_v57, %v7166_v35  ;;  %v7201_v30 = vld [vmem:[%s12366_s12 + $0x4b0] sm:$0xff]  ;;  %v10728_v57 = vpack.c.bf16 %v7217_v60, %v7214_v42  ;;  %v7256_v60 = vld [vmem:[%s12366_s12 + $0x668] sm:$0xff] }
 0xfb2   : > { %10689 = vmatprep.subr.bf16.mxu0 %v10688_v55  ;;  %v7204_v55 = vld [vmem:[%s12366_s12 + $0x4c8] sm:$0xff]  ;;  %v7277_v31 = vld [vmem:[%s12366_s12 + $0x710] sm:$0xff] }
 0xfb3   : > { %v10722_v44 = vpack.c.bf16 %v7204_v55, %v7201_v30 }
 0xfb4   : > { %7410 = vmatmul.mubr.f32.gmra.mrb[50].mxu0 %v14693_v54  ;;  %v7171_v54 = vld [vmem:[%s12366_s12 + $0x3c0] sm:$0xff] }
 0xfb5   : > { %10691 = vmatpush1.bf16.msra.mxu0 %v10690_v62  ;;  %v10702_v17 = vpack.c.bf16 %v7174_v24, %v7171_v54  ;;  %v7207_v62 = vld [vmem:[%s12366_s12 + $0x4e0] sm:$0xff]  ;;  %v7226_v54 = vld [vmem:[%s12366_s12 + $0x578] sm:$0xff]  ;;  %v7229_v24 = vld [vmem:[%s12366_s12 + $0x590] sm:$0xff] }
 0xfb6   : > { %10693 = vmatprep.subr.bf16.mxu0 %v10692_v33  ;;  %v7210_v33 = vld [vmem:[%s12366_s12 + $0x4f8] sm:$0xff]  ;;  %v10736_v49 = vpack.c.bf16 %v7229_v24, %v7226_v54 }
 0xfb7   : > { %v10726_v35 = vpack.c.bf16 %v7210_v33, %v7207_v62  ;;  %v7254_v62 = vld [vmem:[%s12366_s12 + $0x658] sm:$0xff] }
 0xfb8   : > { %v7262_v54 = vld [vmem:[%s12366_s12 + $0x698] sm:$0xff] }
 0xfb9   : > { %10695 = vmatpush1.bf16.msra.mxu0 %v10694_v41  ;;  %v7213_v41 = vld [vmem:[%s12366_s12 + $0x510] sm:$0xff] }
 0xfba   : > { %10697 = vmatprep.subr.bf16.mxu0 %v10696_v52  ;;  %v7216_v52 = vld [vmem:[%s12366_s12 + $0x528] sm:$0xff] }
 0xfbb   : > { %v10730_v27 = vpack.c.bf16 %v7216_v52, %v7213_v41  ;;  %v7308_v41 = vld [vmem:[%s12366_s12 + $0x808] sm:$0xff] }
 0xfbd   : > { %10699 = vmatpush1.bf16.msra.mxu0 %v10698_v22  ;;  %v7219_v22 = vld [vmem:[%s12366_s12 + $0x540] sm:$0xff] }
 0xfbe   : > { %10701 = vmatprep.subr.bf16.mxu0 %v10700_v53  ;;  %v7222_v53 = vld [vmem:[%s12366_s12 + $0x558] sm:$0xff] }
 0xfbf   : > { %v10734_v12 = vpack.c.bf16 %v7222_v53, %v7219_v22  ;;  %v7257_v22 = vld [vmem:[%s12366_s12 + $0x670] sm:$0xff]  ;;  %v7260_v53 = vld [vmem:[%s12366_s12 + $0x688] sm:$0xff] }
 0xfc1   : > { %10703 = vmatpush1.bf16.msra.mxu0 %v10702_v17  ;;  %v7228_v17 = vld [vmem:[%s12366_s12 + $0x588] sm:$0xff] }
 0xfc2   : > { %10705 = vmatprep.subr.bf16.mxu0 %v10704_v8  ;;  %v7235_v8 = vld [vmem:[%s12366_s12 + $0x5c0] sm:$0xff]  ;;  %v10738_v3 = vpack.c.bf16 %v7228_v17, %v7225_v10  ;;  %v7314_v17 = vld [vmem:[%s12366_s12 + $0x838] sm:$0xff] }
 0xfc3   : > { %v10740_v37 = vpack.c.bf16 %v7235_v8, %v7232_v43  ;;  %v7311_v10 = vld [vmem:[%s12366_s12 + $0x820] sm:$0xff]  ;;  %v10886_v8 = vpack.c.bf16 %v7260_v53, %v7257_v22  ;;  %v7284_v22 = vld [vmem:[%s12366_s12 + $0x748] sm:$0xff]  ;;  %v7286_v53 = vld [vmem:[%s12366_s12 + $0x758] sm:$0xff] }
 0xfc5   : > { %10707 = vmatpush1.bf16.msra.mxu0 %v10706_v36  ;;  %v7241_v36 = vld [vmem:[%s12366_s12 + $0x5f0] sm:$0xff] }
 0xfc6   : > { %10709 = vmatprep.subr.bf16.mxu0 %v10708_v58  ;;  %v10742_v58 = vpack.c.bf16 %v7234_v59, %v7231_v50  ;;  %v10744_v51 = vpack.c.bf16 %v7241_v36, %v7238_v29  ;;  %v10888_v29 = vpack.c.bf16 %v7314_v17, %v7311_v10  ;;  %v7263_v36 = vld [vmem:[%s12366_s12 + $0x6a0] sm:$0xff]  ;;  %v7285_v17 = vld [vmem:[%s12366_s12 + $0x750] sm:$0xff] }
 0xfc9   : > { %10711 = vmatpush1.bf16.msra.mxu0 %v10710_v7  ;;  %v7247_v7 = vld [vmem:[%s12366_s12 + $0x620] sm:$0xff] }
 0xfca   : > { %10713 = vmatprep.subr.bf16.mxu0 %v10712_v11  ;;  %v10746_v11 = vpack.c.bf16 %v7240_v0, %v7237_v2  ;;  %v10748_v5 = vpack.c.bf16 %v7247_v7, %v7244_v25  ;;  %v7271_v2 = vld [vmem:[%s12366_s12 + $0x6e0] sm:$0xff]  ;;  %v7317_v0 = vld [vmem:[%s12366_s12 + $0x850] sm:$0xff]  ;;  %v7320_v25 = vld [vmem:[%s12366_s12 + $0x868] sm:$0xff] }
 0xfcd   : > { %10715 = vmatpush1.bf16.msra.mxu0 %v10714_v23  ;;  %v7248_v23 = vld [vmem:[%s12366_s12 + $0x628] sm:$0xff] }
 0xfce   : > { %10717 = vmatprep.subr.bf16.mxu0 %v10716_v61  ;;  %v7250_v61 = vld [vmem:[%s12366_s12 + $0x638] sm:$0xff] }
 0xfcf   : > { %v10752_v32 = vpack.c.bf16 %v7253_v19, %v7250_v61  ;;  %v7272_v61 = vld [vmem:[%s12366_s12 + $0x6e8] sm:$0xff]  ;;  %v7274_v19 = vld [vmem:[%s12366_s12 + $0x6f8] sm:$0xff] }
 0xfd1   : > { %10719 = vmatpush1.bf16.msra.mxu0 %v10718_v4  ;;  %v10878_v4 = vpack.c.bf16 %v7248_v23, %v7245_v9  ;;  %v10892_v9 = vpack.c.bf16 %v7320_v25, %v7317_v0  ;;  %v7269_v23 = vld [vmem:[%s12366_s12 + $0x6d0] sm:$0xff]  ;;  %v7294_v0 = vld [vmem:[%s12366_s12 + $0x798] sm:$0xff] }
 0xfd2   : > { %10721 = vmatprep.subr.bf16.mxu0 %v10720_v18  ;;  %v7249_v18 = vld [vmem:[%s12366_s12 + $0x630] sm:$0xff]  ;;  %v7298_v25 = vld [vmem:[%s12366_s12 + $0x7b8] sm:$0xff] }
 0xfd5   : > { %10723 = vmatpush1.bf16.msra.mxu0 %v10722_v44  ;;  %v7252_v44 = vld [vmem:[%s12366_s12 + $0x648] sm:$0xff] }
 0xfd6   : > { %10725 = vmatprep.subr.bf16.mxu0 %v10724_v45  ;;  %v7251_v45 = vld [vmem:[%s12366_s12 + $0x640] sm:$0xff]  ;;  %v10754_v52 = vpack.c.bf16 %v7252_v44, %v7249_v18  ;;  %v10894_v18 = vpack.c.bf16 %v7272_v61, %v7269_v23  ;;  %v7304_v61 = vld [vmem:[%s12366_s12 + $0x7e8] sm:$0xff] }
 0xfd7   : > { %v10882_v6 = vpack.c.bf16 %v7254_v62, %v7251_v45  ;;  %v7275_v44 = vld [vmem:[%s12366_s12 + $0x700] sm:$0xff]  ;;  %v7278_v45 = vld [vmem:[%s12366_s12 + $0x718] sm:$0xff]  ;;  %v7280_v62 = vld [vmem:[%s12366_s12 + $0x728] sm:$0xff] }
 0xfd9   : > { %10727 = vmatpush1.bf16.msra.mxu0 %v10726_v35  ;;  %v7259_v35 = vld [vmem:[%s12366_s12 + $0x680] sm:$0xff] }
 0xfda   : > { %10729 = vmatprep.subr.bf16.mxu0 %v10728_v57  ;;  %v7305_v57 = vld [vmem:[%s12366_s12 + $0x7f0] sm:$0xff]  ;;  %v10756_v24 = vpack.c.bf16 %v7259_v35, %v7256_v60  ;;  %v7332_v35 = vld [vmem:[%s12366_s12 + $0x8c8] sm:$0xff] }
 0xfdb   : > { %v7329_v60 = vld [vmem:[%s12366_s12 + $0x8b0] sm:$0xff] }
 0xfdd   : > { %10731 = vmatpush1.bf16.msra.mxu0 %v10730_v27  ;;  %v7258_v27 = vld [vmem:[%s12366_s12 + $0x678] sm:$0xff] }
 0xfde   : > { %10733 = vmatprep.subr.bf16.mxu0 %v10732_v28  ;;  %v10758_v43 = vpack.c.bf16 %v7258_v27, %v7255_v13  ;;  %v10900_v27 = vpack.c.bf16 %v7332_v35, %v7329_v60  ;;  %v7312_v60 = vld [vmem:[%s12366_s12 + $0x828] sm:$0xff] }
 0xfdf   : > { %v7316_v35 = vld [vmem:[%s12366_s12 + $0x848] sm:$0xff] }
 0xfe1   : > { %10735 = vmatpush1.bf16.msra.mxu0 %v10734_v12  ;;  %v10884_v12 = vpack.c.bf16 %v7308_v41, %v7305_v57  ;;  %v10898_v41 = vpack.c.bf16 %v7278_v45, %v7275_v44 }
 0xfe2   : > { %10737 = vmatprep.subr.bf16.mxu0 %v10736_v49  ;;  %v7265_v49 = vld [vmem:[%s12366_s12 + $0x6b0] sm:$0xff] }
 0xfe3   : > { %v10760_v59 = vpack.c.bf16 %v7265_v49, %v7262_v54  ;;  %v7289_v54 = vld [vmem:[%s12366_s12 + $0x770] sm:$0xff] }
 0xfe5   : > { %10739 = vmatpush1.bf16.msra.mxu0 %v10738_v3  ;;  %v7261_v3 = vld [vmem:[%s12366_s12 + $0x690] sm:$0xff] }
 0xfe6   : > { %10741 = vmatprep.subr.bf16.mxu0 %v10740_v37  ;;  %v7264_v37 = vld [vmem:[%s12366_s12 + $0x6a8] sm:$0xff] }
 0xfe7   : > { %v10762_v7 = vpack.c.bf16 %v7264_v37, %v7261_v3  ;;  %v7288_v3 = vld [vmem:[%s12366_s12 + $0x768] sm:$0xff]  ;;  %v7287_v37 = vld [vmem:[%s12366_s12 + $0x760] sm:$0xff] }
 0xfe9   : > { %10743 = vmatpush1.bf16.msra.mxu0 %v10742_v58  ;;  %v7266_v58 = vld [vmem:[%s12366_s12 + $0x6b8] sm:$0xff] }
 0xfea   : > { %10745 = vmatprep.subr.bf16.mxu0 %v10744_v51 }
 0xfed   : > { %10747 = vmatpush1.bf16.msra.mxu0 %v10746_v11  ;;  %v10890_v11 = vpack.c.bf16 %v7266_v58, %v7263_v36  ;;  %v7295_v36 = vld [vmem:[%s12366_s12 + $0x7a0] sm:$0xff]  ;;  %v10778_v58 = vpack.c.bf16 %v7288_v3, %v7285_v17  ;;  %v7334_v3 = vld [vmem:[%s12366_s12 + $0x8d8] sm:$0xff] }
 0xfee   : > { %10749 = vmatprep.subr.bf16.mxu0 %v10748_v5  ;;  %v7267_v5 = vld [vmem:[%s12366_s12 + $0x6c0] sm:$0xff] }
0x103b   : > { %v6825_v30 = vpop.f32.mrb[50].mxu1  ;;  %v6896_v55 = vpop.f32.mrb[42].mxu0 }
0x103c   : > { %v15005_v33 = vpop.f32.mrb[51].mxu1  ;;  %v8923_v42 = vpop.f32.mrb[43].mxu0  ;;  %7480 = vmatprep.mubr.f32.mxu0 %v6825_v30  ;;  %7709 = vmatprep.mubr.f32.mxu1 %v6825_v30  ;;  %v7273_v30 = vld [vmem:[%s12366_s12 + $0x6f0] sm:$0xff] }
0x103d   : > { %7481 = vmatmul.mubr.f32.vlgmr.msra.gmra.mrb[48].mxu0 %v14736_v21  ;;  %7710 = vmatmul.mubr.f32.vlgmr.msra.gmra.mrb[56].mxu1 %v14736_v21  ;;  %v7283_v42 = vld [vmem:[%s12366_s12 + $0x740] sm:$0xff] }
0x103e   : > { %10751 = vmatpush1.bf16.msra.mxu0 %v10750_v38  ;;  %10879 = vmatpush3.bf16.msra.mxu1 %v10878_v4  ;;  %v7326_v38 = vld [vmem:[%s12366_s12 + $0x898] sm:$0xff]  ;;  %v10766_v4 = vpack.c.bf16 %v7270_v39, %v7267_v5  ;;  %v10772_v13 = vpack.c.bf16 %v7283_v42, %v7280_v62  ;;  %v7309_v42 = vld [vmem:[%s12366_s12 + $0x810] sm:$0xff] }
0x103f   : > { %v6976_v28 = vpop.f32.mrb[44].mxu0  ;;  %10753 = vmatprep.subr.bf16.mxu0 %v10752_v32  ;;  %10881 = vmatprep.subr.bf16.mxu1 %v10880_v20  ;;  %v10768_v32 = vpack.c.bf16 %v7277_v31, %v7274_v19  ;;  %v10896_v20 = vpack.c.bf16 %v7326_v38, %v7323_v63  ;;  %v7307_v19 = vld [vmem:[%s12366_s12 + $0x800] sm:$0xff] }
0x1040   : > { %v15018_v21 = vpop.f32.mrb[45].mxu0  ;;  %7486 = vmatprep.mubr.f32.mxu0 %v6976_v28  ;;  %7714 = vmatprep.mubr.f32.mxu1 %v6976_v28  ;;  %v7281_v28 = vld [vmem:[%s12366_s12 + $0x730] sm:$0xff] }
0x1041   : > { %7487 = vmatmul.mubr.f32.gmra.mrb[50].mxu0 %v14745_v34  ;;  %7715 = vmatmul.mubr.f32.gmra.mrb[58].mxu1 %v14745_v34  ;;  %v7268_v34 = vld [vmem:[%s12366_s12 + $0x6c8] sm:$0xff]  ;;  %v10902_v10 = vpack.c.bf16 %v7284_v22, %v7281_v28  ;;  %v7325_v28 = vld [vmem:[%s12366_s12 + $0x890] sm:$0xff] }
0x1042   : > { %10755 = vmatpush1.bf16.msra.mxu0 %v10754_v52  ;;  %10883 = vmatpush3.bf16.msra.mxu1 %v10882_v6  ;;  %v10764_v1 = vpack.c.bf16 %v7271_v2, %v7268_v34  ;;  %v7279_v52 = vld [vmem:[%s12366_s12 + $0x720] sm:$0xff]  ;;  %v7282_v6 = vld [vmem:[%s12366_s12 + $0x738] sm:$0xff] }
0x1043   : > { %7557 = vmatprep.mubr.f32.mxu0 %v6896_v55  ;;  %7784 = vmatprep.mubr.f32.mxu1 %v6896_v55  ;;  %v15027_v50 = vpop.f32.mrb[46].mxu0  ;;  %v7276_v55 = vld [vmem:[%s12366_s12 + $0x708] sm:$0xff]  ;;  %v10774_v49 = vpack.c.bf16 %v7282_v6, %v7279_v52  ;;  %v7291_v2 = vld [vmem:[%s12366_s12 + $0x780] sm:$0xff] }
0x1044   : > { %v8928_v51 = vpop.f32.mrb[47].mxu0  ;;  %10757 = vmatprep.subr.bf16.mxu0 %v10756_v24  ;;  %10885 = vmatprep.subr.bf16.mxu1 %v10884_v12  ;;  %v10770_v57 = vpack.c.bf16 %v7276_v55, %v7273_v30  ;;  %v7335_v24 = vld [vmem:[%s12366_s12 + $0x8e0] sm:$0xff]  ;;  %v7338_v12 = vld [vmem:[%s12366_s12 + $0x8f8] sm:$0xff] }
0x1045   : > { %v7306_v30 = vld [vmem:[%s12366_s12 + $0x7f8] sm:$0xff]  ;;  %v7315_v6 = vld [vmem:[%s12366_s12 + $0x840] sm:$0xff] }
0x1046   : > { %10759 = vmatpush1.bf16.msra.mxu0 %v10758_v43  ;;  %10887 = vmatpush3.bf16.msra.mxu1 %v10886_v8  ;;  %v10776_v43 = vpack.c.bf16 %v7289_v54, %v7286_v53  ;;  %v10904_v8 = vpack.c.bf16 %v7338_v12, %v7335_v24  ;;  %v7321_v54 = vld [vmem:[%s12366_s12 + $0x870] sm:$0xff]  ;;  %v7324_v24 = vld [vmem:[%s12366_s12 + $0x888] sm:$0xff] }
0x1047   : > { %10761 = vmatprep.subr.bf16.mxu0 %v10760_v59  ;;  %10889 = vmatprep.subr.bf16.mxu1 %v10888_v29  ;;  %v7290_v59 = vld [vmem:[%s12366_s12 + $0x778] sm:$0xff]  ;;  %v7292_v29 = vld [vmem:[%s12366_s12 + $0x788] sm:$0xff] }
0x1048   : > { %v10906_v34 = vpack.c.bf16 %v7290_v59, %v7287_v37  ;;  %v10780_v51 = vpack.c.bf16 %v7295_v36, %v7292_v29  ;;  %v7328_v12 = vld [vmem:[%s12366_s12 + $0x8a8] sm:$0xff]  ;;  %v7337_v37 = vld [vmem:[%s12366_s12 + $0x8f0] sm:$0xff] }
0x1049   : > { %v10808_v29 = vpack.c.bf16 %v7337_v37, %v7334_v3  ;;  %v7333_v36 = vld [vmem:[%s12366_s12 + $0x8d0] sm:$0xff] }
0x104a   : > { %10763 = vmatpush1.bf16.msra.mxu0 %v10762_v7  ;;  %10891 = vmatpush3.bf16.msra.mxu1 %v10890_v11  ;;  %v7301_v7 = vld [vmem:[%s12366_s12 + $0x7d0] sm:$0xff]  ;;  %v10782_v11 = vpack.c.bf16 %v7294_v0, %v7291_v2 }
0x104b   : > { %10765 = vmatprep.subr.bf16.mxu0 %v10764_v1  ;;  %10893 = vmatprep.subr.bf16.mxu1 %v10892_v9  ;;  %v10784_v39 = vpack.c.bf16 %v7301_v7, %v7298_v25  ;;  %v7297_v1 = vld [vmem:[%s12366_s12 + $0x7b0] sm:$0xff]  ;;  %v7300_v9 = vld [vmem:[%s12366_s12 + $0x7c8] sm:$0xff] }
0x104c   : > { %v10786_v63 = vpack.c.bf16 %v7300_v9, %v7297_v1 }
0x104e   : > { %10767 = vmatpush1.bf16.msra.mxu0 %v10766_v4  ;;  %10895 = vmatpush3.bf16.msra.mxu1 %v10894_v18  ;;  %v10788_v4 = vpack.c.bf16 %v7307_v19, %v7304_v61  ;;  %v7303_v18 = vld [vmem:[%s12366_s12 + $0x7e0] sm:$0xff] }
0x104f   : > { %10769 = vmatprep.subr.bf16.mxu0 %v10768_v32  ;;  %10897 = vmatprep.subr.bf16.mxu1 %v10896_v20  ;;  %v7310_v32 = vld [vmem:[%s12366_s12 + $0x818] sm:$0xff]  ;;  %v7313_v20 = vld [vmem:[%s12366_s12 + $0x830] sm:$0xff]  ;;  %v10790_v45 = vpack.c.bf16 %v7306_v30, %v7303_v18 }
0x1050   : > { %v10792_v62 = vpack.c.bf16 %v7313_v20, %v7310_v32 }
0x1052   : > { %10771 = vmatpush1.bf16.msra.mxu0 %v10770_v57  ;;  %10899 = vmatpush3.bf16.msra.mxu1 %v10898_v41  ;;  %v7319_v57 = vld [vmem:[%s12366_s12 + $0x860] sm:$0xff]  ;;  %v10794_v41 = vpack.c.bf16 %v7312_v60, %v7309_v42  ;;  %v7899_v42 = vld [vmem:[#allocation8] sm:$0xff] (!%p8406_p4)  ;;  %v7900_v60 = vld [vmem:[#allocation8 + $0x8] sm:$0xff] (!%p8406_p4) }
0x1053   : > { %10773 = vmatprep.subr.bf16.mxu0 %v10772_v13  ;;  %10901 = vmatprep.subr.bf16.mxu1 %v10900_v27  ;;  %v10796_v52 = vpack.c.bf16 %v7319_v57, %v7316_v35  ;;  %v7318_v13 = vld [vmem:[%s12366_s12 + $0x858] sm:$0xff]  ;;  %v7931_v35 = vld [vmem:[#allocation8 + $0x100] sm:$0xff] (!%p8406_p4)  ;;  %v10910_v57 = vpack.c.bf16 (!%p8406_p4), %v7900_v60, %v7899_v42  ;;  %v7940_v42 = vld [vmem:[#allocation8 + $0x148] sm:$0xff] (!%p8406_p4) }
0x1054   : > { %v7322_v27 = vld [vmem:[%s12366_s12 + $0x878] sm:$0xff]  ;;  %v10798_v22 = vpack.c.bf16 %v7318_v13, %v7315_v6  ;;  %v7918_v6 = vld [vmem:[#allocation8 + $0x98] sm:$0xff] (!%p8406_p4) }
0x1055   : > { %v10800_v53 = vpack.c.bf16 %v7325_v28, %v7322_v27  ;;  %v7901_v13 = vld [vmem:[#allocation8 + $0x10] sm:$0xff] (!%p8406_p4)  ;;  %v7902_v28 = vld [vmem:[#allocation8 + $0x18] sm:$0xff] (!%p8406_p4) }
0x1056   : > { %10775 = vmatpush1.bf16.msra.mxu0 %v10774_v49  ;;  %10903 = vmatpush3.bf16.msra.mxu1 %v10902_v10  ;;  %v7331_v49 = vld [vmem:[%s12366_s12 + $0x8c0] sm:$0xff]  ;;  %v10802_v10 = vpack.c.bf16 %v7324_v24, %v7321_v54  ;;  %v10914_v54 = vpack.c.bf16 (!%p8406_p4), %v7902_v28, %v7901_v13  ;;  %v7925_v60 = vld [vmem:[#allocation8 + $0xd0] sm:$0xff] (!%p8406_p4)  ;;  %v7928_v28 = vld [vmem:[#allocation8 + $0xe8] sm:$0xff] (!%p8406_p4) }
0x1057   : > { %10777 = vmatprep.subr.bf16.mxu0 %v10776_v43  ;;  %10905 = vmatprep.subr.bf16.mxu1 %v10904_v8  ;;  %v10804_v17 = vpack.c.bf16 %v7331_v49, %v7328_v12  ;;  %v7327_v43 = vld [vmem:[%s12366_s12 + $0x8a0] sm:$0xff]  ;;  %v7330_v8 = vld [vmem:[%s12366_s12 + $0x8b8] sm:$0xff]  ;;  %v7919_v12 = vld [vmem:[#allocation8 + $0xa0] sm:$0xff] (!%p8406_p4) }
0x1058   : > { %v10806_v59 = vpack.c.bf16 %v7330_v8, %v7327_v43  ;;  %v7920_v49 = vld [vmem:[#allocation8 + $0xa8] sm:$0xff] (!%p8406_p4)  ;;  %v7942_v13 = vld [vmem:[#allocation8 + $0x158] sm:$0xff] (!%p8406_p4) }
0x1059   : > { %v7904_v43 = vld [vmem:[#allocation8 + $0x28] sm:$0xff] (!%p8406_p4) }
0x105a   : > { %10779 = vmatpush1.bf16.msra.mxu0 %v10778_v58  ;;  %10907 = vmatpush3.bf16.msra.mxu1 %v10906_v34  ;;  %v7336_v58 = vld [vmem:[%s12366_s12 + $0x8e8] sm:$0xff] }
0x105b   : > { %v8681_v5 = vpop.f32.mrb[52].mxu1  ;;  %10781 = vmatprep.subr.bf16.mxu0 %v10780_v51  ;;  %v10810_v34 = vpack.c.bf16 %v7336_v58, %v7333_v36 }
0x105c   : > { %v8682_v23 = vpop.f32.mrb[53].mxu1 }
0x105d   : > { %v15073_v31 = vadd.f32 %v8682_v23, %v8681_v5  ;;  %7785 = vmatmul.mubr.f32.vlgmr.msra.gmra.mrb[60].mxu1 %v15005_v33 }
0x105e   : > { %10783 = vmatpush1.bf16.msra.mxu0 %v10782_v11  ;;  %7789 = vmatprep.mubr.f32.mxu1 %v15027_v50 }
0x105f   : > { %v8684_v38 = vpop.f32.mrb[54].mxu1  ;;  %10785 = vmatprep.subr.bf16.mxu0 %v10784_v39 }
0x1060   : > { %v8685_v55 = vpop.f32.mrb[55].mxu1 }
0x1061   : > { %v8686_v44 = vadd.f32 %v8685_v55, %v8684_v38  ;;  %7790 = vmatmul.mubr.f32.gmra.mrb[62].mxu1 %v15018_v21 }
0x1062   : > { %10787 = vmatpush1.bf16.msra.mxu0 %v10786_v63 }
0x1063   : > { %10789 = vmatprep.subr.bf16.mxu0 %v10788_v4 }
0x1066   : > { %10791 = vmatpush1.bf16.msra.mxu0 %v10790_v45  ;;  %v7915_v45 = vld [vmem:[#allocation8 + $0x80] sm:$0xff] (!%p8406_p4) }
0x1067   : > { %10793 = vmatprep.subr.bf16.mxu0 %v10792_v62  ;;  %v7916_v62 = vld [vmem:[#allocation8 + $0x88] sm:$0xff] (!%p8406_p4) }
0x106a   : > { %10795 = vmatpush1.bf16.msra.mxu0 %v10794_v41 }
0x106b   : > { %10797 = vmatprep.subr.bf16.mxu0 %v10796_v52  ;;  %v7917_v52 = vld [vmem:[#allocation8 + $0x90] sm:$0xff] (!%p8406_p4) }
0x106c   : > { %v10912_v27 = vpack.c.bf16 (!%p8406_p4), %v7918_v6, %v7917_v52  ;;  %v7941_v52 = vld [vmem:[#allocation8 + $0x150] sm:$0xff] (!%p8406_p4) }
0x106e   : > { %10799 = vmatpush1.bf16.msra.mxu0 %v10798_v22  ;;  %v7933_v22 = vld [vmem:[#allocation8 + $0x110] sm:$0xff] (!%p8406_p4) }
0x106f   : > { %10801 = vmatprep.subr.bf16.mxu0 %v10800_v53  ;;  %v7934_v53 = vld [vmem:[#allocation8 + $0x118] sm:$0xff] (!%p8406_p4) }
0x1070   : > { %v10944_v24 = vpack.c.bf16 (!%p8406_p4), %v7934_v53, %v7933_v22  ;;  %v10960_v22 = vpack.c.bf16 (!%p8406_p4), %v7942_v13, %v7941_v52 }
0x1072   : > { %10803 = vmatpush1.bf16.msra.mxu0 %v10802_v10  ;;  %v10916_v10 = vpack.c.bf16 (!%p8406_p4), %v7920_v49, %v7919_v12  ;;  %v7943_v12 = vld [vmem:[#allocation8 + $0x160] sm:$0xff] (!%p8406_p4) }
0x1073   : > { %10805 = vmatprep.subr.bf16.mxu0 %v10804_v17  ;;  %v7903_v17 = vld [vmem:[#allocation8 + $0x20] sm:$0xff] (!%p8406_p4) }
0x1074   : > { %v10918_v8 = vpack.c.bf16 (!%p8406_p4), %v7904_v43, %v7903_v17  ;;  %v7929_v17 = vld [vmem:[#allocation8 + $0xf0] sm:$0xff] (!%p8406_p4)  ;;  %v7930_v43 = vld [vmem:[#allocation8 + $0xf8] sm:$0xff] (!%p8406_p4) }
0x1076   : > { %10807 = vmatpush1.bf16.msra.mxu0 %v10806_v59 }
0x1077   : > { %10809 = vmatprep.subr.bf16.mxu0 %v10808_v29 }
0x107a   : > { %10811 = vmatpush1.bf16.msra.mxu0 %v10810_v34 }
0x107d   : > { %7558 = vmatmul.mubr.f32.vlgmr.msra.gmra.mrb[48].mxu0 %v15005_v33 }
0x107e   : > { %7563 = vmatprep.mubr.f32.mxu0 %v15027_v50 }
0x1081   : > { %7564 = vmatmul.mubr.f32.gmra.mrb[50].mxu0 %v15018_v21 }
0x1110   : > { %v8719_v51 = vpop.f32.mrb[56].mxu1 }
0x1111   : > { %v8720_v2 = vpop.f32.mrb[57].mxu1 }
0x1112   : > { %v8721_v0 = vadd.f32 %v8720_v2, %v8719_v51 }
0x1114   : > { %v7712_v25 = vadd.f32 %v8721_v0, %v15073_v31  ;;  %v8722_v7 = vpop.f32.mrb[58].mxu1 }
0x1115   : > { %v8723_v11 = vpop.f32.mrb[59].mxu1 }
0x1116   : > { %v8724_v5 = vadd.f32 %v8723_v11, %v8722_v7 }
0x1118   : > { %v7717_v39 = vadd.f32 %v8724_v5, %v8686_v44 }
0x1130   : > { %v8757_v1 = vpop.f32.mrb[60].mxu1 }
0x1131   : > { %v8758_v9 = vpop.f32.mrb[61].mxu1 }
0x1132   : > { %v8759_v23 = vadd.f32 %v8758_v9, %v8757_v1 }
0x1134   : > { %v7787_v61 = vadd.f32 %v8759_v23, %v7712_v25  ;;  %v8760_v19 = vpop.f32.mrb[62].mxu1 }
0x1135   : > { %v8761_v63 = vpop.f32.mrb[63].mxu1 }
0x1136   : > { %v15105_v33 = vadd.f32 %v7787_v61, %v13793_v56  ;;  %v8762_v50 = vadd.f32 %v8761_v63, %v8760_v19  ;;  %v7935_v63 = vld [vmem:[#allocation8 + $0x120] sm:$0xff] (!%p8406_p4) }
0x1138   : > { %7803 = vst [vmem:[#allocation2 + $0x10] sm:$0xff] %v15105_v33  ;;  %v7792_v21 = vadd.f32 %v8762_v50, %v7717_v39 }
0x113a   : > { %v15109_v38 = vadd.f32 %v7792_v21, %v13802_v48  ;;  %v7921_v21 = vld [vmem:[#allocation8 + $0xb0] sm:$0xff] (!%p8406_p4) }
0x113c   : > { %7806 = vst [vmem:[#allocation2 + $0x28] sm:$0xff] %v15109_v38 }
0x1150   : > { %v7559_v31 = vpop.f32.mrb[48].mxu0 }
0x1151   : > { %v7795_v4 = vadd.f32 %v7559_v31, %v13789_v26  ;;  %v7561_v18 = vpop.f32.mrb[49].mxu0 }
0x1152   : > { %v7796_v30 = vadd.f32 %v7561_v18, %v13791_v47  ;;  %7810 = sbr.rel (%p8406_p4) target bundleno = 4978 (0x1372), region = 136  ;;  %v7906_v18 = vld [vmem:[#allocation8 + $0x38] sm:$0xff] (!%p8406_p4) }
0x1153   : > { %7801 = vst [vmem:[#allocation2] sm:$0xff] %v7795_v4 }
0x1154   : > { %7802 = vst [vmem:[#allocation2 + $0x8] sm:$0xff] %v7796_v30  ;;  %v7565_v55 = vpop.f32.mrb[50].mxu0  ;;  %v7813_v48 = vadd.f32 (!%p8406_p4), %v7796_v30, %v7795_v4 }
0x1155   : > { %v7798_v56 = vadd.f32 %v7565_v55, %v13797_v46  ;;  %v7567_v32 = vpop.f32.mrb[51].mxu0  ;;  %v10908_v46 = vpack.c.bf16 (!%p8406_p4), %v7916_v62, %v7915_v45  ;;  %v7937_v55 = vld [vmem:[#allocation8 + $0x130] sm:$0xff] (!%p8406_p4)  ;;  %v7939_v62 = vld [vmem:[#allocation8 + $0x140] sm:$0xff] (!%p8406_p4) }
0x1156   : > { %v7799_v20 = vadd.f32 %v7567_v32, %v13799_v40  ;;  %v7814_v26 = vadd.f32 (!%p8406_p4), %v7813_v48, %v15105_v33  ;;  %v7932_v40 = vld [vmem:[#allocation8 + $0x108] sm:$0xff] (!%p8406_p4) }
0x1157   : > { %7804 = vst [vmem:[#allocation2 + $0x18] sm:$0xff] %v7798_v56  ;;  %v10940_v41 = vpack.c.bf16 (!%p8406_p4), %v7932_v40, %v7931_v35  ;;  %10909 = vmatprep.subr.bf16.mxu0 (!%p8406_p4), %v10908_v46  ;;  %v7924_v48 = vld [vmem:[#allocation8 + $0xc8] sm:$0xff] (!%p8406_p4)  ;;  %v10956_v46 = vpack.c.bf16 (!%p8406_p4), %v7940_v42, %v7939_v62  ;;  %v7926_v35 = vld [vmem:[#allocation8 + $0xd8] sm:$0xff] (!%p8406_p4) }
0x1158   : > { %7805 = vst [vmem:[#allocation2 + $0x20] sm:$0xff] %v7799_v20  ;;  %v7817_v44 = vadd.f32 (!%p8406_p4), %v7799_v20, %v7798_v56  ;;  %7815 = vadd.xlane.f32.xlu0 (!%p8406_p4), %v7814_v26  ;;  %10911 = vmatpush3.bf16.msra.mxu0 (!%p8406_p4), %v10910_v57  ;;  %v7907_v26 = vld [vmem:[#allocation8 + $0x40] sm:$0xff] (!%p8406_p4)  ;;  %v10928_v40 = vpack.c.bf16 (!%p8406_p4), %v7926_v35, %v7925_v60  ;;  %v7909_v57 = vld [vmem:[#allocation8 + $0x50] sm:$0xff] (!%p8406_p4) }
0x1159   : > { %10941 = vmatprep.subr.bf16.mxu1 %v10940_v41  ;;  %10913 = vmatprep.subr.bf16.mxu0 %v10912_v27  ;;  %v7927_v27 = vld [vmem:[#allocation8 + $0xe0] sm:$0xff] }
0x115a   : > { %v7818_v47 = vadd.f32 %v7817_v44, %v15109_v38  ;;  %10943 = vmatpush3.bf16.msra.mxu1 %v10940_v41  ;;  %v7910_v41 = vld [vmem:[#allocation8 + $0x58] sm:$0xff]  ;;  %v10932_v53 = vpack.c.bf16 %v7928_v28, %v7927_v27 }
0x115b   : > { %10945 = vmatprep.subr.bf16.mxu1 %v10944_v24  ;;  %v10930_v6 = vpack.c.bf16 %v7910_v41, %v7909_v57 }
0x115c   : > { %7819 = vadd.xlane.f32.xlu0 %v7818_v47  ;;  %10915 = vmatpush3.bf16.msra.mxu0 %v10914_v54  ;;  %v7908_v47 = vld [vmem:[#allocation8 + $0x48] sm:$0xff]  ;;  %v7911_v54 = vld [vmem:[#allocation8 + $0x60] sm:$0xff] }
0x115d   : > { %10917 = vmatprep.subr.bf16.mxu0 %v10916_v10  ;;  %v10926_v45 = vpack.c.bf16 %v7908_v47, %v7907_v26  ;;  %v7944_v10 = vld [vmem:[#allocation8 + $0x168] sm:$0xff] }
0x115e   : > { %10947 = vmatpush3.bf16.msra.mxu1 %v10944_v24  ;;  %v7912_v24 = vld [vmem:[#allocation8 + $0x68] sm:$0xff] }
0x115f   : > { %v10934_v49 = vpack.c.bf16 %v7912_v24, %v7911_v54 }
0x1160   : > { %10919 = vmatpush3.bf16.msra.mxu0 %v10918_v8  ;;  %v10964_v8 = vpack.c.bf16 %v7944_v10, %v7943_v12 }
0x11e5   : > { %v7816_v3 = vpop.xlane.xlu0 %7815 }
0x11e6   : > { %v7821_v37 = vmul.f32 0.0026041667, %v7816_v3  ;;  %v10936_v3 = vpack.c.bf16 %v7930_v43, %v7929_v17 }
0x11e8   : > { %v15119_v59 = vsub.f32 %v7795_v4, %v7821_v37  ;;  %v15121_v29 = vsub.f32 %v7796_v30, %v7821_v37  ;;  %v15124_v36 = vsub.f32 %v15105_v33, %v7821_v37  ;;  %v7936_v33 = vld [vmem:[#allocation8 + $0x128] sm:$0xff]  ;;  %v7905_v4 = vld [vmem:[#allocation8 + $0x30] sm:$0xff] }
0x11e9   : > { %v7820_v58 = vpop.xlane.xlu0 %7819  ;;  %v10948_v50 = vpack.c.bf16 %v7936_v33, %v7935_v63  ;;  %v10922_v30 = vpack.c.bf16 %v7906_v18, %v7905_v4  ;;  %v7913_v37 = vld [vmem:[#allocation8 + $0x70] sm:$0xff]  ;;  %v7812_v63 = vld [vmem:[#allocation6] sm:$0x7] }
0x11ea   : > { %v7822_v34 = vmul.f32 0.0026041667, %v7820_v58  ;;  %v7829_v51 = vmul.f32 %v15119_v59, %v15119_v59  ;;  %v7830_v2 = vmul.f32 %v15121_v29, %v15121_v29  ;;  %v7831_v0 = vmul.f32 %v15124_v36, %v15124_v36  ;;  %v7914_v58 = vld [vmem:[#allocation8 + $0x78] sm:$0xff] }
0x11eb   : > { %10949 = vmatprep.subr.bf16.mxu1 %v10948_v50  ;;  %v7889_v4 = vrot.slane %v7812_v63, %v12556_v15 }
0x11ec   : > { %v15132_v25 = vsub.f32 %v7798_v56, %v7822_v34  ;;  %v15134_v7 = vsub.f32 %v7799_v20, %v7822_v34  ;;  %v15137_v11 = vsub.f32 %v15109_v38, %v7822_v34  ;;  %v7835_v5 = vadd.f32 %v7830_v2, %v7829_v51  ;;  %v7922_v38 = vld [vmem:[#allocation8 + $0xb8] sm:$0xff]  ;;  %10951 = vmatpush3.bf16.msra.mxu1 %v10948_v50  ;;  %v7923_v20 = vld [vmem:[#allocation8 + $0xc0] sm:$0xff]  ;;  %v7945_v51 = vld [vmem:[#allocation8 + $0x170] sm:$0xff] }
0x11ed   : > { %v10920_v31 = vpack.c.bf16 %v7922_v38, %v7921_v21  ;;  %v7938_v56 = vld [vmem:[#allocation8 + $0x138] sm:$0xff]  ;;  %v10924_v44 = vpack.c.bf16 %v7924_v48, %v7923_v20  ;;  %v10938_v34 = vpack.c.bf16 %v7914_v58, %v7913_v37 }
0x11ee   : > { %v7836_v39 = vadd.f32 %v7835_v5, %v7831_v0  ;;  %v7832_v1 = vmul.f32 %v15132_v25, %v15132_v25  ;;  %v7833_v9 = vmul.f32 %v15134_v7, %v15134_v7  ;;  %v7834_v23 = vmul.f32 %v15137_v11, %v15137_v11  ;;  %v7946_v2 = vld [vmem:[#allocation8 + $0x178] sm:$0xff] }
0x11ef   : > { %10921 = vmatprep.subr.bf16.mxu0 %v10920_v31  ;;  %v10952_v32 = vpack.c.bf16 %v7938_v56, %v7937_v55  ;;  %v10968_v0 = vpack.c.bf16 %v7946_v2, %v7945_v51  ;;  %v7885_v31 = vrot.slane %v7812_v63, %v12553_v14  ;;  %v7881_v56 = vrot.slane %v7812_v63, %v12559_v16 }
0x11f0   : > { %7837 = vadd.xlane.f32.xlu1 %v7836_v39  ;;  %v7839_v61 = vadd.f32 %v7833_v9, %v7832_v1  ;;  %10923 = vmatpush3.bf16.msra.mxu0 %v10922_v30 }
0x11f1   : > { %10953 = vmatprep.subr.bf16.mxu1 %v10952_v32  ;;  %10925 = vmatprep.subr.bf16.mxu0 %v10924_v44 }
0x11f2   : > { %v7840_v19 = vadd.f32 %v7839_v61, %v7834_v23  ;;  %10955 = vmatpush3.bf16.msra.mxu1 %v10952_v32 }
0x11f3   : > { %10957 = vmatprep.subr.bf16.mxu1 %v10956_v46 }
0x11f4   : > { %7841 = vadd.xlane.f32.xlu1 %v7840_v19  ;;  %10927 = vmatpush3.bf16.msra.mxu0 %v10926_v45  ;;  %v7811_v19 = vld [vmem:[#allocation3] sm:$0x7] }
0x11f5   : > { %10929 = vmatprep.subr.bf16.mxu0 %v10928_v40  ;;  %v7863_v33 = vrot.slane %v7811_v19, %v12553_v14  ;;  %v7867_v50 = vrot.slane %v7811_v19, %v12556_v15  ;;  %v7859_v21 = vrot.slane %v7811_v19, %v12559_v16 }
0x11f6   : > { %10959 = vmatpush3.bf16.msra.mxu1 %v10956_v46 }
0x11f7   : > { %10961 = vmatprep.subr.bf16.mxu1 %v10960_v22 }
0x11f8   : > { %10931 = vmatpush3.bf16.msra.mxu0 %v10930_v6 }
0x11f9   : > { %10933 = vmatprep.subr.bf16.mxu0 %v10932_v53 }
0x11fa   : > { %10963 = vmatpush3.bf16.msra.mxu1 %v10960_v22 }
0x11fb   : > { %10965 = vmatprep.subr.bf16.mxu1 %v10964_v8 }
0x11fc   : > { %10935 = vmatpush3.bf16.msra.mxu0 %v10934_v49 }
0x11fd   : > { %10937 = vmatprep.subr.bf16.mxu0 %v10936_v3 }
0x11fe   : > { %10967 = vmatpush3.bf16.msra.mxu1 %v10964_v8 }
0x11ff   : > { %10969 = vmatprep.subr.bf16.mxu1 %v10968_v0 }
0x1200   : > { %10939 = vmatpush3.bf16.msra.mxu0 %v10938_v34 }
0x1202   : > { %10971 = vmatpush3.bf16.msra.mxu1 %v10968_v0 }
0x127d   : > { %v7838_v5 = vpop.xlane.xlu1 %7837 }
0x127e   : > { %v7843_v39 = vmul.f32 0.0026041667, %v7838_v5 }
0x1280   : > { %v7845_v1 = vadd.f32 1e-05, %v7843_v39 }
0x1281   : > { %v7842_v9 = vpop.xlane.xlu1 %7841 }
0x1282   : > { %11316 = vrsqrt.f32 %v7845_v1  ;;  %v7844_v23 = vmul.f32 0.0026041667, %v7842_v9 }
0x1284   : > { %v7846_v61 = vadd.f32 1e-05, %v7844_v23 }
0x1286   : > { %11318 = vrsqrt.f32 %v7846_v61 }
0x128c   : > { %v11317_v38 = vpop.eup %11316 }
0x128d   : > { %v7850_v18 = vmul.f32 %v11317_v38, %v15121_v29  ;;  %v7851_v30 = vmul.f32 %v11317_v38, %v15124_v36  ;;  %v7849_v55 = vmul.f32 %v11317_v38, %v15119_v59 }
0x128f   : > { %v7872_v32 = vmul.f32 %v7863_v33, %v7850_v18  ;;  %v7873_v20 = vmul.f32 %v7867_v50, %v7851_v30  ;;  %v7871_v48 = vmul.f32 %v7859_v21, %v7849_v55 }
0x1290   : > { %v11319_v44 = vpop.eup %11318 }
0x1291   : > { %v7894_v26 = vadd.f32 %v7885_v31, %v7872_v32  ;;  %v7895_v47 = vadd.f32 %v7889_v4, %v7873_v20  ;;  %v7893_v45 = vadd.f32 %v7881_v56, %v7871_v48  ;;  %v7853_v62 = vmul.f32 %v11319_v44, %v15134_v7 }
0x1292   : > { %v7854_v14 = vmul.f32 %v11319_v44, %v15137_v11  ;;  %v7852_v15 = vmul.f32 %v11319_v44, %v15132_v25 }
0x1293   : > { %8011 = vmatprep.mubr.f32.mxu0 %v7894_v26  ;;  %8961 = vmatprep.mubr.f32.mxu1 %v7895_v47  ;;  %v7875_v29 = vmul.f32 %v7863_v33, %v7853_v62 }
0x1294   : > { %8012 = vmatmul.mubr.f32.vlgmr.msra.gmra.mrb[0].mxu0 %v7893_v45  ;;  %v7876_v59 = vmul.f32 %v7867_v50, %v7854_v14  ;;  %v7874_v36 = vmul.f32 %v7859_v21, %v7852_v15 }
0x1295   : > { %v7897_v16 = vadd.f32 %v7885_v31, %v7875_v29 }
0x1296   : > { %v7898_v42 = vadd.f32 %v7889_v4, %v7876_v59  ;;  %v7896_v46 = vadd.f32 %v7881_v56, %v7874_v36 }
0x1297   : > { %8016 = vmatprep.mubr.f32.mxu0 %v7897_v16 }
0x1298   : > { %8962 = vmatmul.mubr.f32.vlgmr.msra.gmra.mrb[0].mxu1 %v7898_v42  ;;  %8017 = vmatmul.mubr.f32.gmra.mrb[2].mxu0 %v7896_v46 }
0x1367   : > { %v8795_v60 = vpop.f32.mrb[0].mxu0 }
0x1368   : > { %v8796_v35 = vpop.f32.mrb[1].mxu0 }
0x1369   : > { %v8797_v40 = vadd.f32 %v8796_v35, %v8795_v60 }
0x136b   : > { %v8963_v7 = vpop.f32.mrb[0].mxu1  ;;  %v8798_v57 = vpop.f32.mrb[2].mxu0 }
0x136c   : > { %v8088_v11 = vpop.f32.mrb[1].mxu1  ;;  %v8799_v41 = vpop.f32.mrb[3].mxu0 }
0x136d   : > { %v8089_v25 = vadd.f32 %v8797_v40, %v8088_v11  ;;  %v8800_v52 = vadd.f32 %v8799_v41, %v8798_v57 }
0x136f   : > { %8097 = vst [vmem:[#allocation23] sm:$0xff] %v8089_v25  ;;  %v8094_v6 = vadd.f32 %v8963_v7, %v8800_v52 }
0x1371   : > { %8098 = vst [vmem:[#allocation23 + $0x8] sm:$0xff] %v8094_v6 }
0x1372 PF: > { %s15307_s12 = sld [smem:[#allocation34_spill]]  ;;  %s11789_s25 = smov [#allocation23]  }
0x1373   : > { %s8105_s3 = sshll.u32 %s11789_s25, 4  ;;  %s8106_s3 = int_to_ptr.vmem [resolvable:$true] %s8105_s3 }
0x1374   : > { %s11674_s26 = scalar_lea.vmem %s8106_s3, 256  ;;  %p11681_p5 = scmp.lt.s32.totalorder %s8106_s3, %s8106_s3 }
0x1375   : > { %p11675_p9 = scmp.ne.s32.totalorder %s8106_s3, %s11674_s26  ;;  %p11682_p2 = scmp.lt.s32.totalorder %s11674_s26, %s11674_s26 }
0x1377   : > { %p11683_p8 = por %p11682_p2, %p11681_p5 }
0x1378   : > { %p11135_p0 = scmp.eq.s32.totalorder %s15307_s12, 7 }
0x137a   : > { %p11676_p6 = pnand %p11675_p9, %p11135_p0 }
0x137c   : > { %p11677_p12 = pneg %p11676_p6 }
0x137e   : > { %p11684_p7 = pnand %p11683_p8, %p11677_p12 }
0x1380   : > { %11687 = shalt.err (!%p11684_p7)
}
0x1381   : > { %s15308_s23 = sld [smem:[#allocation48_spill]] }
0x1387   : > { %s11688_s28 = scalar_lea.hbm %s15308_s23, 256 }
0x1388   : > { %p11689_p11 = scmp.ne.s32.totalorder %s15308_s23, %s11688_s28  ;;  %p11694_p1 = scmp.lt.u32.totalorder %s11688_s28, %s15308_s23 }
0x138a   : > { %p11690_p3 = pnand %p11689_p11, %p11135_p0 }
0x138c   : > { %p11691_p13 = pneg %p11690_p3 }
0x138e   : > { %p11696_p10 = pnand %p11694_p1, %p11691_p13 }
0x1390   : > { %11699 = shalt.err (!%p11696_p10)
}
0x1391   : > { %s11790_s10 = smov 128   ;;  %s11791_s19 = smov 8  }
0x1392   : > { %11087 = dma.vmem_to_hbm [thread:$0]  (%p11135_p0), %s8106_s3, 256, %s15308_s23, [#allocation5], %s11790_s10, %s11790_s10, %s11791_s19  }
0x1393   : > { %11745 = dma.done.wait (%p11135_p0), [#allocation5], 256  }
0x1394   : > { %11747 = vsyncadd (%p11135_p0), [#allocation5], 4294967040 }
0x1395 PF: > { %s15309_s21 = sld [smem:[#allocation35_spill]]  ;;  %s15310_s18 = sld [smem:[#allocation32_spill]] }
0x1396   : > { %s15311_s19 = sld [smem:[#allocation33_spill]]  ;;  %s15312_s20 = sld [smem:[#allocation36_spill]] }
0x139b   : > { %p40_p4 = scmp.ge.s32.totalorder %s15309_s21, 10  }
0x139d   :  { %42 = sbr.rel (!%p40_p4) target bundleno = 25 (0x19), region = 237 }
0x13a4   :  { %8121 = vsyncpa [#allocation4], 1 }
0x13a5   :  { %8123 = vsyncpa [#allocation4 + $0x1], 1 }
0x13a6   :  { %8124 = vsyncpa [#allocation7], 1 }
0x13a7   :  { %8125 = vsyncpa [#allocation10], 1 }
0x13a8   :  { %8127 = vsyncpa [#allocation10 + $0x1], 1 }
0x13a9   :  { %8128 = vsyncpa [#allocation13], 1 }
0x13aa   :  { %8130 = vsyncpa [#allocation13 + $0x1], 1 }
0x13ab   :  { %8131 = vsyncpa [#allocation16], 1 }
0x13ac   :  { %8133 = vsyncpa [#allocation16 + $0x1], 1 }
0x13ad   :  { %8134 = vsyncpa [#allocation19], 1 }
0x13ae   :  { %8136 = vsyncpa [#allocation19 + $0x1], 1 }
0x13af   :  { %8137 = vsyncpa [#allocation22], 1 }
0x13b0   :  { %8139 = vsyncpa [#allocation22 + $0x1], 1 }
0x13b1   :  { %8140 = vsyncpa [#allocation5], 1 }
0x13b2   :  { %8142 = vsyncpa [#allocation5 + $0x1], 1 }

</bundles_post_ra>
